<compile_context>
chip_gen: v7x
topology: tpu7x:2x2x1
jax: 0.10.0
libtpu: 0.0.40
codegen_flags: <defaults>
</compile_context>

<pallas_src>
import numpy as np
import jax
import jax.numpy as jnp
from jax.experimental import pallas as pl
from jax.experimental.pallas import tpu as pltpu

HID = 128   # gcn1 output channels (hard-coded in the PyTorch module)
IMG = 35    # module hard-codes reshape to (outChannels, 35, 35)


def _make_kernel(rows: int, w_pad: int):
    """Kernel factory. rows = items_per_step * h_pad * w_pad stacked node rows."""

    def kernel(x_ref, dinv_ref, w1_ref, b1_ref, w2_ref, b2_ref, o_ref):
        # x_ref    : (rows, Cin)   stacked node features (items_per_step items)
        # dinv_ref : (rows, 1)     D^-1/2 per node (exactly 0 on every pad node)
        # w1, b1   : (Cin, 128), (1, 128)
        # w2, b2   : (128, CP), (1, CP)   output channels zero-padded to CP lanes
        # o_ref    : (rows, CP)
        x = x_ref[...]
        dinv = dinv_ref[...]

        # Hoist the lane-broadcast once; reused by all four dinv multiplies.
        dinv_b = jnp.broadcast_to(dinv, (rows, HID))

        def a_hat_apply(h):
            # h: (rows, 128) -> D^-1/2 (A+I) D^-1/2 @ h via the 5-point stencil.
            # All shifts are XLU rolls (shift sign is irrelevant: the stencil is
            # symmetric, and wrapped rows are dinv==0 pad nodes so they add 0).
            s = dinv_b * h
            acc = s                                               # self loop
            acc = acc + pltpu.roll(s, shift=1, axis=0)            # horiz neighbor
            acc = acc + pltpu.roll(s, shift=rows - 1, axis=0)     # horiz neighbor
            acc = acc + pltpu.roll(s, shift=w_pad, axis=0)        # vert neighbor
            acc = acc + pltpu.roll(s, shift=rows - w_pad, axis=0) # vert neighbor
            return dinv_b * acc

        # GCNConv 1: A_hat @ (X @ W1) + b1
        z = jnp.dot(x, w1_ref[...], preferred_element_type=jnp.float32)
        h1 = a_hat_apply(z) + b1_ref[...]
        # (h1 at pad nodes equals b1; harmless — layer 2's inner dinv* zeroes it
        #  and pad rows are sliced off in the wrapper.)

        # GCNConv 2: A_hat @ (H1 @ W2) + b2 == (A_hat @ H1) @ W2 + b2
        h2 = a_hat_apply(h1)
        o_ref[...] = (jnp.dot(h2, w2_ref[...], preferred_element_type=jnp.float32)
                      + b2_ref[...])

    return kernel


def build_dinv_padded(h_img, w_img, h_pad, w_pad):
    """Per-node D^-1/2 (degree incl. self-loop) on the zero-padded (h_pad, w_pad) grid."""
    d = np.zeros((h_pad, w_pad), dtype=np.float32)
    for r in range(h_img):
        for c in range(w_img):
            deg = 1.0  # self loop
            for dr, dc in ((1, 0), (-1, 0), (0, 1), (0, -1)):
                rr, cc = r + dr, c + dc
                if 0 <= rr < h_img and 0 <= cc < w_img:
                    deg += 1.0
            d[r, c] = 1.0 / np.sqrt(deg)
    return jnp.asarray(d.reshape(h_pad * w_pad, 1))


def build_dense_a_hat(h_img, w_img):
    """Dense normalized adjacency — used only by the plain-JAX reference check."""
    n = h_img * w_img
    a = np.zeros((n, n), dtype=np.float32)

    def idx(r, c):
        return r * w_img + c

    for r in range(h_img):
        for c in range(w_img):
            i = idx(r, c)
            a[i, i] = 1.0
            for dr, dc in ((1, 0), (-1, 0), (0, 1), (0, -1)):
                rr, cc = r + dr, c + dc
                if 0 <= rr < h_img and 0 <= cc < w_img:
                    a[i, idx(rr, cc)] = 1.0
    dinv = 1.0 / np.sqrt(a.sum(axis=1))
    return jnp.asarray(a * dinv[:, None] * dinv[None, :])


def gcnet_forward(x_nchw, params, *, grid_steps=None):
    B, Cin, h_img, w_img = x_nchw.shape
    n = h_img * w_img
    w1, b1, w2, b2 = params
    Cout = w2.shape[1]

    # Padded grid: one extra (all-pad) row; width rounded up past W+1 to a
    # multiple of 8 so the +/-w_pad rolls are sublane-aligned.
    h_pad = h_img + 1
    w_pad = ((w_img + 1 + 7) // 8) * 8          # 35 -> 40
    rows_pad = h_pad * w_pad                    # 36*40 = 1440 (multiple of 8)
    cp = max(128, ((Cout + 127) // 128) * 128)  # lane-dense output width

    # The roll-based stencil (and cross-item isolation) REQUIRES at least one
    # zero-dinv pad row and pad column per item. Do not remove the padding.
    assert h_pad > h_img and w_pad > w_img, "need dinv==0 pad row/col for roll wrap safety"

    # Batch folding: stack bt items per grid step. grid_steps=2 keeps both v7x
    # TensorCores busy ("parallel" axis) while amortizing per-step overhead and
    # MXU weight pushes on single-TC v5e/v6e.
    if grid_steps is None:
        grid_steps = min(B, 2)
    bt = -(-B // grid_steps)                    # items per step
    b_padded = grid_steps * bt
    rows = bt * rows_pad                        # stacked node rows per grid step

    # NCHW -> (B_pad, h_pad, w_pad, Cin) zero-padded node grid -> flat (N, Cin)
    xn = jnp.transpose(x_nchw, (0, 2, 3, 1))
    xn = jnp.pad(xn, ((0, b_padded - B), (0, h_pad - h_img),
                      (0, w_pad - w_img), (0, 0)))
    xn = xn.reshape(b_padded * rows_pad, Cin)

    dinv = build_dinv_padded(h_img, w_img, h_pad, w_pad)     # (rows_pad, 1)
    dinv = jnp.tile(dinv, (bt, 1))                           # (rows, 1)

    # Zero-pad the output projection to a full 128-lane width (unmasked stores).
    w2p = jnp.zeros((HID, cp), jnp.float32).at[:, :Cout].set(w2)
    b2p = jnp.zeros((1, cp), jnp.float32).at[:, :Cout].set(b2)

    kernel = _make_kernel(rows, w_pad)

    out = pl.pallas_call(
        kernel,
        out_shape=jax.ShapeDtypeStruct((b_padded * rows_pad, cp), jnp.float32),
        grid_spec=pltpu.PrefetchScalarGridSpec(
            num_scalar_prefetch=0,
            grid=(grid_steps,),
            in_specs=[
                pl.BlockSpec((rows, Cin), lambda g: (g, 0)),   # X (bt items / step)
                pl.BlockSpec((rows, 1), lambda g: (0, 0)),     # dinv (shared)
                pl.BlockSpec((Cin, HID), lambda g: (0, 0)),    # W1
                pl.BlockSpec((1, HID), lambda g: (0, 0)),      # b1
                pl.BlockSpec((HID, cp), lambda g: (0, 0)),     # W2 (lane-padded)
                pl.BlockSpec((1, cp), lambda g: (0, 0)),       # b2 (lane-padded)
            ],
            out_specs=pl.BlockSpec((rows, cp), lambda g: (g, 0)),
        ),
        compiler_params=pltpu.CompilerParams(
            # Grid steps are independent batch slices -> v7x shards across both
            # TensorCores; harmless on single-TC v5e/v6e.
            dimension_semantics=("parallel",),
        ),
    )(xn, dinv, w1, b1, w2p, b2p)

    # Drop pad rows/cols/channels/items, then apply the module's flat reshape:
    # per item, torch.reshape of the (N, Cout) node matrix to (Cout, 35, 35).
    out = out.reshape(b_padded, h_pad, w_pad, cp)[:B, :h_img, :w_img, :Cout]
    out = out.reshape(B, n, Cout).reshape(B, Cout, h_img, w_img)
    return out


if __name__ == "__main__":
    key = jax.random.PRNGKey(0)
    B, Cin, Cout = 2, 4, 8
    h_img = w_img = IMG
    n = h_img * w_img

    k1, k2, k3, k4, k5 = jax.random.split(key, 5)
    x = jax.random.normal(k1, (B, Cin, h_img, w_img), dtype=jnp.float32)

    # Deterministic GCNConv parameters, stored transposed: (in, out); glorot-ish.
    w1 = (jax.random.uniform(k2, (Cin, HID), minval=-1.0, maxval=1.0)
          * np.sqrt(6.0 / (Cin + HID))).astype(jnp.float32)
    b1 = jax.random.uniform(k3, (1, HID), minval=-0.1, maxval=0.1).astype(jnp.float32)
    w2 = (jax.random.uniform(k4, (HID, Cout), minval=-1.0, maxval=1.0)
          * np.sqrt(6.0 / (HID + Cout))).astype(jnp.float32)
    b2 = jax.random.uniform(k5, (1, Cout), minval=-0.1, maxval=0.1).astype(jnp.float32)

    out = gcnet_forward(x, (w1, b1, w2, b2))
    out = jax.block_until_ready(out)
    assert out.shape == (B, Cout, h_img, w_img)

    # Independent plain-JAX reference using the dense normalized adjacency.
    a_hat = build_dense_a_hat(h_img, w_img)
    xn_ref = jnp.transpose(x, (0, 2, 3, 1)).reshape(B, n, Cin)
    hp = jax.lax.Precision.HIGHEST
    z1 = jnp.einsum("bnc,ch->bnh", xn_ref, w1, precision=hp)
    h1 = jnp.einsum("ij,bjh->bih", a_hat, z1, precision=hp) + b1
    z2 = jnp.einsum("bnh,ho->bno", h1, w2, precision=hp)
    ref = jnp.einsum("ij,bjo->bio", a_hat, z2, precision=hp) + b2
    ref = ref.reshape(B, Cout, h_img, w_img)

    np.testing.assert_allclose(np.asarray(out), np.asarray(ref), rtol=1e-4, atol=1e-4)
    print("KERNEL_OK")
</pallas_src>

<mosaic_0001>
module attributes {stable_mosaic.version = 11 : i64} {
  func.func @kernel(%arg0: i32, %arg1: memref<1440x4xf32, #tpu.memory_space<vmem>>, %arg2: memref<1440x1xf32, #tpu.memory_space<vmem>>, %arg3: memref<4x128xf32, #tpu.memory_space<vmem>>, %arg4: memref<1x128xf32, #tpu.memory_space<vmem>>, %arg5: memref<128x128xf32, #tpu.memory_space<vmem>>, %arg6: memref<1x128xf32, #tpu.memory_space<vmem>>, %arg7: memref<1440x128xf32, #tpu.memory_space<vmem>>) attributes {dimension_semantics = [#tpu.dimension_semantics<parallel>], iteration_bounds = array<i64: 2>, scalar_prefetch = 0 : i64, scratch_operands = 0 : i64, tpu.core_type = #tpu.core_type<tc>, window_params = [{transform_indices = @transform_0, window_bounds = array<i64: 1440, 4>}, {pipeline_mode = #tpu.pipeline_mode<synchronous>, transform_indices = @transform_1, window_bounds = array<i64: 1440, 1>}, {pipeline_mode = #tpu.pipeline_mode<synchronous>, transform_indices = @transform_2, window_bounds = array<i64: 4, 128>}, {pipeline_mode = #tpu.pipeline_mode<synchronous>, transform_indices = @transform_3, window_bounds = array<i64: 1, 128>}, {pipeline_mode = #tpu.pipeline_mode<synchronous>, transform_indices = @transform_4, window_bounds = array<i64: 128, 128>}, {pipeline_mode = #tpu.pipeline_mode<synchronous>, transform_indices = @transform_5, window_bounds = array<i64: 1, 128>}, {transform_indices = @transform_6, window_bounds = array<i64: 1440, 128>}]} {
    %c0 = arith.constant 0 : index
    %c0_0 = arith.constant 0 : index
    %0 = vector.load %arg1[%c0, %c0_0] : memref<1440x4xf32, #tpu.memory_space<vmem>>, vector<1440x4xf32>
    %c0_1 = arith.constant 0 : index
    %c0_2 = arith.constant 0 : index
    %1 = vector.load %arg2[%c0_1, %c0_2] : memref<1440x1xf32, #tpu.memory_space<vmem>>, vector<1440x1xf32>
    %2 = vector.shape_cast %1 : vector<1440x1xf32> to vector<1440x1xf32>
    %3 = vector.broadcast %2 : vector<1440x1xf32> to vector<1440x128xf32>
    %c0_3 = arith.constant 0 : index
    %c0_4 = arith.constant 0 : index
    %4 = vector.load %arg3[%c0_3, %c0_4] : memref<4x128xf32, #tpu.memory_space<vmem>>, vector<4x128xf32>
    %cst = arith.constant dense<0.000000e+00> : vector<1440x128xf32>
    %5 = tpu.matmul %0, %4, %cst {dimension_numbers = #tpu.dot_dimension_numbers<[1], [0], [0], [1], [0, 0, 1, 1], [], []>} : vector<1440x4xf32>, vector<4x128xf32>, vector<1440x128xf32> -> vector<1440x128xf32>
    %6 = arith.mulf %3, %5 : vector<1440x128xf32>
    %c1_i32 = arith.constant 1 : i32
    %7 = tpu.dynamic_rotate %6 by %c1_i32 dim 0 : vector<1440x128xf32>, i32 -> vector<1440x128xf32>
    %8 = arith.addf %6, %7 : vector<1440x128xf32>
    %c1439_i32 = arith.constant 1439 : i32
    %9 = tpu.dynamic_rotate %6 by %c1439_i32 dim 0 : vector<1440x128xf32>, i32 -> vector<1440x128xf32>
    %10 = arith.addf %8, %9 : vector<1440x128xf32>
    %c40_i32 = arith.constant 40 : i32
    %11 = tpu.dynamic_rotate %6 by %c40_i32 dim 0 : vector<1440x128xf32>, i32 -> vector<1440x128xf32>
    %12 = arith.addf %10, %11 : vector<1440x128xf32>
    %c1400_i32 = arith.constant 1400 : i32
    %13 = tpu.dynamic_rotate %6 by %c1400_i32 dim 0 : vector<1440x128xf32>, i32 -> vector<1440x128xf32>
    %14 = arith.addf %12, %13 : vector<1440x128xf32>
    %15 = arith.mulf %3, %14 : vector<1440x128xf32>
    %c0_5 = arith.constant 0 : index
    %c0_6 = arith.constant 0 : index
    %16 = vector.load %arg4[%c0_5, %c0_6] : memref<1x128xf32, #tpu.memory_space<vmem>>, vector<1x128xf32>
    %17 = vector.broadcast %16 : vector<1x128xf32> to vector<1440x128xf32>
    %18 = arith.addf %15, %17 : vector<1440x128xf32>
    %19 = arith.mulf %3, %18 : vector<1440x128xf32>
    %c1_i32_7 = arith.constant 1 : i32
    %20 = tpu.dynamic_rotate %19 by %c1_i32_7 dim 0 : vector<1440x128xf32>, i32 -> vector<1440x128xf32>
    %21 = arith.addf %19, %20 : vector<1440x128xf32>
    %c1439_i32_8 = arith.constant 1439 : i32
    %22 = tpu.dynamic_rotate %19 by %c1439_i32_8 dim 0 : vector<1440x128xf32>, i32 -> vector<1440x128xf32>
    %23 = arith.addf %21, %22 : vector<1440x128xf32>
    %c40_i32_9 = arith.constant 40 : i32
    %24 = tpu.dynamic_rotate %19 by %c40_i32_9 dim 0 : vector<1440x128xf32>, i32 -> vector<1440x128xf32>
    %25 = arith.addf %23, %24 : vector<1440x128xf32>
    %c1400_i32_10 = arith.constant 1400 : i32
    %26 = tpu.dynamic_rotate %19 by %c1400_i32_10 dim 0 : vector<1440x128xf32>, i32 -> vector<1440x128xf32>
    %27 = arith.addf %25, %26 : vector<1440x128xf32>
    %28 = arith.mulf %3, %27 : vector<1440x128xf32>
    %c0_11 = arith.constant 0 : index
    %c0_12 = arith.constant 0 : index
    %29 = vector.load %arg5[%c0_11, %c0_12] : memref<128x128xf32, #tpu.memory_space<vmem>>, vector<128x128xf32>
    %cst_13 = arith.constant dense<0.000000e+00> : vector<1440x128xf32>
    %30 = tpu.matmul %28, %29, %cst_13 {dimension_numbers = #tpu.dot_dimension_numbers<[1], [0], [0], [1], [0, 0, 1, 1], [], []>} : vector<1440x128xf32>, vector<128x128xf32>, vector<1440x128xf32> -> vector<1440x128xf32>
    %c0_14 = arith.constant 0 : index
    %c0_15 = arith.constant 0 : index
    %31 = vector.load %arg6[%c0_14, %c0_15] : memref<1x128xf32, #tpu.memory_space<vmem>>, vector<1x128xf32>
    %32 = vector.broadcast %31 : vector<1x128xf32> to vector<1440x128xf32>
    %33 = arith.addf %30, %32 : vector<1440x128xf32>
    %c0_16 = arith.constant 0 : index
    %c0_17 = arith.constant 0 : index
    %34 = vector.load %arg7[%c0_16, %c0_17] : memref<1440x128xf32, #tpu.memory_space<vmem>>, vector<1440x128xf32>
    tpu.vector_store %arg7[%c0_16, %c0_17], %33 {strides = array<i32>} : memref<1440x128xf32, #tpu.memory_space<vmem>>, vector<1440x128xf32>,
    return
  }
  func.func @transform_0(%arg0: i32) -> (i32, i32) {
    %c0_i32 = arith.constant 0 : i32
    %c0_i32_0 = arith.constant 0 : i32
    return %arg0, %c0_i32 : i32, i32
  }
  func.func @transform_1(%arg0: i32) -> (i32, i32) {
    %c0_i32 = arith.constant 0 : i32
    %c0_i32_0 = arith.constant 0 : i32
    %c0_i32_1 = arith.constant 0 : i32
    return %c0_i32, %c0_i32_0 : i32, i32
  }
  func.func @transform_2(%arg0: i32) -> (i32, i32) {
    %c0_i32 = arith.constant 0 : i32
    %c0_i32_0 = arith.constant 0 : i32
    %c0_i32_1 = arith.constant 0 : i32
    return %c0_i32, %c0_i32_0 : i32, i32
  }
  func.func @transform_3(%arg0: i32) -> (i32, i32) {
    %c0_i32 = arith.constant 0 : i32
    %c0_i32_0 = arith.constant 0 : i32
    %c0_i32_1 = arith.constant 0 : i32
    return %c0_i32, %c0_i32_0 : i32, i32
  }
  func.func @transform_4(%arg0: i32) -> (i32, i32) {
    %c0_i32 = arith.constant 0 : i32
    %c0_i32_0 = arith.constant 0 : i32
    %c0_i32_1 = arith.constant 0 : i32
    return %c0_i32, %c0_i32_0 : i32, i32
  }
  func.func @transform_5(%arg0: i32) -> (i32, i32) {
    %c0_i32 = arith.constant 0 : i32
    %c0_i32_0 = arith.constant 0 : i32
    %c0_i32_1 = arith.constant 0 : i32
    return %c0_i32, %c0_i32_0 : i32, i32
  }
  func.func @transform_6(%arg0: i32) -> (i32, i32) {
    %c0_i32 = arith.constant 0 : i32
    %c0_i32_0 = arith.constant 0 : i32
    return %arg0, %c0_i32 : i32, i32
  }
}

</mosaic_0001>

<bundles_post_ra>
// kernel: tpu_custom_call.1
= control target key start
LH: loop header
LB: loop body
LE: loop exit
PB: predicated region body
PF: predicated region fallthrough
CT: control target
= control target key end

     0   :  { %11 = vsyncpa [#allocation3], 0  ;;  %s17724_s0 = inlined_call_operand.vmem [shape: f32[2880,4], index: 0, kind: input, shape index: {}]   ;;  %s17725_s1 = inlined_call_operand.vmem [shape: f32[1440,1], index: 1, kind: input, shape index: {}]   ;;  %s17726_s2 = inlined_call_operand.vmem [shape: f32[4,128], index: 2, kind: input, shape index: {}]   ;;  %s17727_s3 = inlined_call_operand.vmem [shape: f32[1,128], index: 3, kind: input, shape index: {}]   ;;  %s17728_s4 = inlined_call_operand.vmem [shape: f32[128,128], index: 4, kind: input, shape index: {}]   ;;  %s17729_s5 = inlined_call_operand.vmem [shape: f32[1,128], index: 5, kind: input, shape index: {}]   ;;  %s17730_s6 = inlined_call_operand.hbm [shape: f32[2880,128], index: 6, kind: output, shape index: {}]  }
   0x1   :  { %13 = vsyncpa [#allocation3 + $0x1], 0  ;;  %s9405_s21 = smov 0   ;;  %s9407_s22 = smov 0  }
   0x2   :  { %s9409_s23 = smov 0   ;;  %s9411_s24 = smov 0  }
   0x3 LB: > { %s9426_s25 = sadd.s32 4294967295, %s9364_s24   ;;  %s8059_s26 = sadd.s32 4294967294, %s9364_s24   ;;  %s9364_s24 = sphi %s9411_s24, %s19182_s24   ;;  %s9360_s23 = sphi %s9409_s23, %s19181_s23   ;;  %s9356_s22 = sphi %s9407_s22, %s19180_s22   ;;  %s9352_s21 = sphi %s9405_s21, %s19179_s21  }
   0x4   : > { %s9430_s27 = sadd.s32 1, %s9364_s24   ;;  %s157_s28 = sadd.s32 1, %s9360_s23 }
   0x5   : > { %s154_s29 = ssub.s32 %s9364_s24, %s9430_s27  ;;  %p167_p0 = scmp.ne.s32.totalorder %s9360_s23, %s9356_s22 }
   0x6   : > { %p155_p1 = scmp.eq.s32.totalorder %s154_s29, 0  ;;  %p168_p2 = scmp.eq.s32.totalorder %s9426_s25, 1 }
   0x7   : > { %p173_p3 = scmp.ne.s32.totalorder %s9356_s22, %s9352_s21  ;;  %p174_p4 = scmp.eq.s32.totalorder %s8059_s26, 1 }
   0x8   : > { %s9441_s30 = scalar_select %p155_p1, %s9360_s23, %s157_s28  }
   0x9   : > { %p9443_p5 = por %p168_p2, %p167_p0  ;;  %p9447_p6 = por %p174_p4, %p173_p3 }
   0xa   : > { %p8062_p7 = scmp.ge.s32.totalorder %s9364_s24, 1  ;;  %p216_p8 = scmp.lt.s32.totalorder %s9364_s24, 3 }
   0xc   : > { %p217_p9 = pnand %p8062_p7, %p216_p8 }
   0xe   : > { %220 = sbr.rel (%p217_p9) target bundleno = 1478 (0x5c6), region = 44 }
  0x15   : > { %v1513_v0 = vld [vmem:[%s17726_s2] sm:$0xf]  ;;  %vm2055_vm0 = vcmask 1043456   ;;  %s246_s11 = smul.u32 180, %s9426_s25  ;;  %v9366_v1 = vmov 0   ;;  %v435_v3 = vld [vmem:[%s17725_s1 + $0x10] sm:$0xff] }
  0x16   : > { %8628 = vmatprep.subr.msk.mxu0 %vm2055_vm0, %v1513_v0  ;;  %9293 = vset.pattern.permute.xlu0 %v9366_v1  ;;  %v433_v2 = vld [vmem:[%s17725_s1] sm:$0xff]  ;;  %v434_v4 = vld [vmem:[%s17725_s1 + $0x8] sm:$0xff]  ;;  %v436_v5 = vld [vmem:[%s17725_s1 + $0x18] sm:$0xff]  ;;  %vm1514_vm1 = vcmask 31744   ;;  %s243_s10 = sand.u32 1, %s9356_s22   ;;  %s8250_s18 = smul.u32 23040, %s9426_s25 }
  0x17   : > { %8629 = vmatpush3.msk.msra.mxu0 %vm2055_vm0, %v1513_v0  ;;  %p247_p10 = scmp.lt.s32.totalorder %s246_s11, 359  ;;  %615 = vperm.xlu0 %9293, %v433_v2   ;;  %v437_v6 = vld [vmem:[%s17725_s1 + $0x20] sm:$0xff]  ;;  %v438_v10 = vld [vmem:[%s17725_s1 + $0x28] sm:$0xff]  ;;  %v439_v12 = vld [vmem:[%s17725_s1 + $0x30] sm:$0xff]  ;;  %s17683_s25 = scalar_lea.sflag [#allocation3], %s243_s10 }
  0x18   : > { %9294 = vset.pattern.permute.xlu1 %v9366_v1  ;;  %v440_v14 = vld [vmem:[%s17725_s1 + $0x38] sm:$0xff]  ;;  %v441_v16 = vld [vmem:[%s17725_s1 + $0x40] sm:$0xff]  ;;  %v442_v18 = vld [vmem:[%s17725_s1 + $0x48] sm:$0xff]  ;;  %s17674_s28 = scalar_lea.hbm %s17730_s6, %s8250_s18 }
  0x19   : > { %s19184_s11 = smov (!%p247_p10, %s246_s11), 359  ;;  %625 = vperm.xlu1 %9294, %v435_v3   ;;  %v443_v20 = vld [vmem:[%s17725_s1 + $0x50] sm:$0xff]  ;;  %v444_v22 = vld [vmem:[%s17725_s1 + $0x58] sm:$0xff]  ;;  %v445_v24 = vld [vmem:[%s17725_s1 + $0x60] sm:$0xff] }
  0x1a   : > { %s8063_s20 = sshll.u32 %s19184_s11, 3  ;;  %v446_v26 = vld [vmem:[%s17725_s1 + $0x68] sm:$0xff]  ;;  %v447_v28 = vld [vmem:[%s17725_s1 + $0x70] sm:$0xff]  ;;  %v448_v30 = vld [vmem:[%s17725_s1 + $0x78] sm:$0xff]  ;;  %s16101_s11 = smul.u32 1440, %s243_s10 }
  0x1b   : > { %620 = vperm.xlu0 %9293, %v434_v4   ;;  %s9472_s29 = scalar_lea.vmem %s17724_s0, %s8063_s20  ;;  %v449_v32 = vld [vmem:[%s17725_s1 + $0x80] sm:$0xff]  ;;  %v450_v34 = vld [vmem:[%s17725_s1 + $0x88] sm:$0xff]  ;;  %v451_v36 = vld [vmem:[%s17725_s1 + $0x90] sm:$0xff] }
  0x1c   : > { %v253_v7 = vld [vmem:[%s9472_s29] sm:$0xff]  ;;  %v254_v8 = vld [vmem:[%s9472_s29 + $0x8] sm:$0xff]  ;;  %v255_v9 = vld [vmem:[%s9472_s29 + $0x10] sm:$0xff]  ;;  %s16153_s14 = scalar_lea.vmem [#allocation2], %s16101_s11  ;;  %s9367_s11 = smov [#allocation2]  }
  0x1d   : > { %630 = vperm.xlu1 %9294, %v436_v5   ;;  %8630 = vmatprep.mubr.msk.f32.mxu0 %vm1514_vm1, %v253_v7  ;;  %v256_v11 = vld [vmem:[%s9472_s29 + $0x18] sm:$0xff]  ;;  %v257_v13 = vld [vmem:[%s9472_s29 + $0x20] sm:$0xff]  ;;  %v258_v15 = vld [vmem:[%s9472_s29 + $0x28] sm:$0xff]  ;;  %s7997_s19 = sshll.u32 %s16153_s14, 4  ;;  %s9306_s12 = sshll.u32 %s9367_s11, 4  ;;  %s17677_s19 = int_to_ptr.vmem [resolvable:$true] %s7997_s19  ;;  %s9307_s12 = int_to_ptr.vmem [resolvable:$false] %s9306_s12 }
  0x1e   : > { %8631 = vmatmul.mubr.msk.f32.vlgmr.msra.gmra.mrb[0].mxu0 %vm1514_vm1, %v254_v8  ;;  %v259_v17 = vld [vmem:[%s9472_s29 + $0x30] sm:$0xff]  ;;  %v260_v19 = vld [vmem:[%s9472_s29 + $0x38] sm:$0xff]  ;;  %v261_v21 = vld [vmem:[%s9472_s29 + $0x40] sm:$0xff]  ;;  %s9302_s9 = scalar_lea.vmem %s17677_s19, 23040  ;;  %s9308_s13 = scalar_lea.vmem %s9307_s12, 46080 }
  0x1f   : > { %635 = vperm.xlu0 %9293, %v437_v6   ;;  %8633 = vmatprep.mubr.msk.f32.mxu0 %vm1514_vm1, %v255_v9  ;;  %v262_v23 = vld [vmem:[%s9472_s29 + $0x48] sm:$0xff]  ;;  %v263_v25 = vld [vmem:[%s9472_s29 + $0x50] sm:$0xff]  ;;  %v264_v27 = vld [vmem:[%s9472_s29 + $0x58] sm:$0xff]  ;;  %p9303_p11 = scmp.ne.s32.totalorder %s17677_s19, %s9302_s9  ;;  %p9309_p0 = scmp.lt.s32.totalorder %s17677_s19, %s9307_s12 }
  0x20   : > { %v265_v29 = vld [vmem:[%s9472_s29 + $0x60] sm:$0xff]  ;;  %v266_v31 = vld [vmem:[%s9472_s29 + $0x68] sm:$0xff]  ;;  %v267_v33 = vld [vmem:[%s9472_s29 + $0x70] sm:$0xff]  ;;  %p9310_p1 = scmp.lt.s32.totalorder %s9308_s13, %s9302_s9 }
  0x21   : > { %640 = vperm.xlu1 %9294, %v438_v10   ;;  %v268_v35 = vld [vmem:[%s9472_s29 + $0x78] sm:$0xff]  ;;  %v269_v37 = vld [vmem:[%s9472_s29 + $0x80] sm:$0xff]  ;;  %v270_v39 = vld [vmem:[%s9472_s29 + $0x88] sm:$0xff]  ;;  %p9304_p12 = pnand %p9303_p11, %p9443_p5 }
  0x22   : > { %8634 = vmatmul.mubr.msk.f32.gmra.mrb[2].mxu0 %vm1514_vm1, %v256_v11  ;;  %v609_v38 = vld [vmem:[%s17725_s1 + $0x580] sm:$0xff]  ;;  %v610_v40 = vld [vmem:[%s17725_s1 + $0x588] sm:$0xff]  ;;  %v271_v41 = vld [vmem:[%s9472_s29 + $0x90] sm:$0xff]  ;;  %p9311_p2 = por %p9310_p1, %p9309_p0 }
  0x23   : > { %645 = vperm.xlu0 %9293, %v439_v12   ;;  %8636 = vmatprep.mubr.msk.f32.mxu0 %vm1514_vm1, %v257_v13  ;;  %v611_v42 = vld [vmem:[%s17725_s1 + $0x590] sm:$0xff]  ;;  %v272_v43 = vld [vmem:[%s9472_s29 + $0x98] sm:$0xff]  ;;  %v273_v45 = vld [vmem:[%s9472_s29 + $0xa0] sm:$0xff]  ;;  %p9305_p13 = pneg %p9304_p12 }
  0x24   : > { %v612_v44 = vld [vmem:[%s17725_s1 + $0x598] sm:$0xff]  ;;  %v274_v47 = vld [vmem:[%s9472_s29 + $0xa8] sm:$0xff]  ;;  %v453_v48 = vld [vmem:[%s17725_s1 + $0xa0] sm:$0xff] }
  0x25   : > { %650 = vperm.xlu1 %9294, %v440_v14   ;;  %v452_v46 = vld [vmem:[%s17725_s1 + $0x98] sm:$0xff]  ;;  %v275_v49 = vld [vmem:[%s9472_s29 + $0xb0] sm:$0xff]  ;;  %v454_v50 = vld [vmem:[%s17725_s1 + $0xa8] sm:$0xff]  ;;  %p9312_p3 = pnand %p9311_p2, %p9305_p13 }
  0x26   : > { %8637 = vmatmul.mubr.msk.f32.gmra.mrb[4].mxu0 %vm1514_vm1, %v258_v15  ;;  %v276_v51 = vld [vmem:[%s9472_s29 + $0xb8] sm:$0xff]  ;;  %v455_v52 = vld [vmem:[%s17725_s1 + $0xb0] sm:$0xff]  ;;  %v277_v53 = vld [vmem:[%s9472_s29 + $0xc0] sm:$0xff] }
  0x27   : > { %655 = vperm.xlu0 %9293, %v441_v16   ;;  %8639 = vmatprep.mubr.msk.f32.mxu0 %vm1514_vm1, %v259_v17  ;;  %v456_v54 = vld [vmem:[%s17725_s1 + $0xb8] sm:$0xff]  ;;  %v278_v55 = vld [vmem:[%s9472_s29 + $0xc8] sm:$0xff]  ;;  %v457_v56 = vld [vmem:[%s17725_s1 + $0xc0] sm:$0xff] }
  0x28   : > { %v279_v57 = vld [vmem:[%s9472_s29 + $0xd0] sm:$0xff]  ;;  %v458_v58 = vld [vmem:[%s17725_s1 + $0xc8] sm:$0xff]  ;;  %v280_v59 = vld [vmem:[%s9472_s29 + $0xd8] sm:$0xff] }
  0x29   : > { %660 = vperm.xlu1 %9294, %v442_v18   ;;  %v459_v60 = vld [vmem:[%s17725_s1 + $0xd0] sm:$0xff]  ;;  %v281_v61 = vld [vmem:[%s9472_s29 + $0xe0] sm:$0xff]  ;;  %v460_v62 = vld [vmem:[%s17725_s1 + $0xd8] sm:$0xff] }
  0x2a   : > { %8640 = vmatmul.mubr.msk.f32.gmra.mrb[6].mxu0 %vm1514_vm1, %v260_v19  ;;  %v282_v63 = vld [vmem:[%s9472_s29 + $0xe8] sm:$0xff]  ;;  %v461_v0 = vld [vmem:[%s17725_s1 + $0xe0] sm:$0xff]  ;;  %v283_v1 = vld [vmem:[%s9472_s29 + $0xf0] sm:$0xff] }
  0x2b   : > { %665 = vperm.xlu0 %9293, %v443_v20   ;;  %8642 = vmatprep.mubr.msk.f32.mxu0 %vm1514_vm1, %v261_v21  ;;  %v462_v2 = vld [vmem:[%s17725_s1 + $0xe8] sm:$0xff]  ;;  %v284_v3 = vld [vmem:[%s9472_s29 + $0xf8] sm:$0xff]  ;;  %v463_v4 = vld [vmem:[%s17725_s1 + $0xf0] sm:$0xff] }
  0x2c   : > { %v285_v5 = vld [vmem:[%s9472_s29 + $0x100] sm:$0xff]  ;;  %v464_v6 = vld [vmem:[%s17725_s1 + $0xf8] sm:$0xff]  ;;  %v286_v7 = vld [vmem:[%s9472_s29 + $0x108] sm:$0xff] }
  0x2d   : > { %670 = vperm.xlu1 %9294, %v444_v22   ;;  %v465_v8 = vld [vmem:[%s17725_s1 + $0x100] sm:$0xff]  ;;  %v287_v9 = vld [vmem:[%s9472_s29 + $0x110] sm:$0xff]  ;;  %v466_v10 = vld [vmem:[%s17725_s1 + $0x108] sm:$0xff] }
  0x2e   : > { %8643 = vmatmul.mubr.msk.f32.gmra.mrb[8].mxu0 %vm1514_vm1, %v262_v23  ;;  %v288_v11 = vld [vmem:[%s9472_s29 + $0x118] sm:$0xff]  ;;  %v467_v12 = vld [vmem:[%s17725_s1 + $0x110] sm:$0xff]  ;;  %v289_v13 = vld [vmem:[%s9472_s29 + $0x120] sm:$0xff] }
  0x2f   : > { %675 = vperm.xlu0 %9293, %v445_v24   ;;  %8645 = vmatprep.mubr.msk.f32.mxu0 %vm1514_vm1, %v263_v25  ;;  %v468_v14 = vld [vmem:[%s17725_s1 + $0x118] sm:$0xff]  ;;  %v290_v15 = vld [vmem:[%s9472_s29 + $0x128] sm:$0xff]  ;;  %v469_v16 = vld [vmem:[%s17725_s1 + $0x120] sm:$0xff] }
  0x30   : > { %v291_v17 = vld [vmem:[%s9472_s29 + $0x130] sm:$0xff]  ;;  %v470_v18 = vld [vmem:[%s17725_s1 + $0x128] sm:$0xff]  ;;  %v292_v19 = vld [vmem:[%s9472_s29 + $0x138] sm:$0xff] }
  0x31   : > { %680 = vperm.xlu1 %9294, %v446_v26   ;;  %v471_v20 = vld [vmem:[%s17725_s1 + $0x130] sm:$0xff]  ;;  %v293_v21 = vld [vmem:[%s9472_s29 + $0x140] sm:$0xff]  ;;  %v472_v22 = vld [vmem:[%s17725_s1 + $0x138] sm:$0xff] }
  0x32   : > { %8646 = vmatmul.mubr.msk.f32.gmra.mrb[10].mxu0 %vm1514_vm1, %v264_v27  ;;  %v294_v23 = vld [vmem:[%s9472_s29 + $0x148] sm:$0xff]  ;;  %v473_v24 = vld [vmem:[%s17725_s1 + $0x140] sm:$0xff]  ;;  %v295_v25 = vld [vmem:[%s9472_s29 + $0x150] sm:$0xff] }
  0x33   : > { %685 = vperm.xlu0 %9293, %v447_v28   ;;  %8648 = vmatprep.mubr.msk.f32.mxu0 %vm1514_vm1, %v265_v29  ;;  %v474_v26 = vld [vmem:[%s17725_s1 + $0x148] sm:$0xff]  ;;  %v296_v27 = vld [vmem:[%s9472_s29 + $0x158] sm:$0xff]  ;;  %v475_v28 = vld [vmem:[%s17725_s1 + $0x150] sm:$0xff] }
  0x34   : > { %v297_v29 = vld [vmem:[%s9472_s29 + $0x160] sm:$0xff] }
  0x35   : > { %690 = vperm.xlu1 %9294, %v448_v30   ;;  %v476_v30 = vld [vmem:[%s17725_s1 + $0x158] sm:$0xff] }
  0x36   : > { %8649 = vmatmul.mubr.msk.f32.gmra.mrb[12].mxu0 %vm1514_vm1, %v266_v31  ;;  %v298_v31 = vld [vmem:[%s9472_s29 + $0x168] sm:$0xff] }
  0x37   : > { %695 = vperm.xlu0 %9293, %v449_v32   ;;  %8651 = vmatprep.mubr.msk.f32.mxu0 %vm1514_vm1, %v267_v33  ;;  %v477_v32 = vld [vmem:[%s17725_s1 + $0x160] sm:$0xff]  ;;  %v299_v33 = vld [vmem:[%s9472_s29 + $0x170] sm:$0xff] }
  0x39   : > { %700 = vperm.xlu1 %9294, %v450_v34   ;;  %v478_v34 = vld [vmem:[%s17725_s1 + $0x168] sm:$0xff] }
  0x3a   : > { %8652 = vmatmul.mubr.msk.f32.gmra.mrb[14].mxu0 %vm1514_vm1, %v268_v35  ;;  %v300_v35 = vld [vmem:[%s9472_s29 + $0x178] sm:$0xff] }
  0x3b   : > { %705 = vperm.xlu0 %9293, %v451_v36   ;;  %8654 = vmatprep.mubr.msk.f32.mxu0 %vm1514_vm1, %v269_v37  ;;  %v479_v36 = vld [vmem:[%s17725_s1 + $0x170] sm:$0xff]  ;;  %v301_v37 = vld [vmem:[%s9472_s29 + $0x180] sm:$0xff] }
  0x3d   : > { %1495 = vperm.xlu1 %9294, %v609_v38   ;;  %v480_v38 = vld [vmem:[%s17725_s1 + $0x178] sm:$0xff] }
  0x3e   : > { %8655 = vmatmul.mubr.msk.f32.gmra.mrb[16].mxu0 %vm1514_vm1, %v270_v39  ;;  %v302_v39 = vld [vmem:[%s9472_s29 + $0x188] sm:$0xff] }
  0x3f   : > { %1500 = vperm.xlu0 %9293, %v610_v40   ;;  %8657 = vmatprep.mubr.msk.f32.mxu0 %vm1514_vm1, %v271_v41  ;;  %v481_v40 = vld [vmem:[%s17725_s1 + $0x180] sm:$0xff]  ;;  %v303_v41 = vld [vmem:[%s9472_s29 + $0x190] sm:$0xff] }
  0x41   : > { %1505 = vperm.xlu1 %9294, %v611_v42   ;;  %v482_v42 = vld [vmem:[%s17725_s1 + $0x188] sm:$0xff] }
  0x42   : > { %8658 = vmatmul.mubr.msk.f32.gmra.mrb[18].mxu0 %vm1514_vm1, %v272_v43  ;;  %v304_v43 = vld [vmem:[%s9472_s29 + $0x198] sm:$0xff] }
  0x43   : > { %1510 = vperm.xlu0 %9293, %v612_v44   ;;  %8660 = vmatprep.mubr.msk.f32.mxu0 %vm1514_vm1, %v273_v45  ;;  %v483_v44 = vld [vmem:[%s17725_s1 + $0x190] sm:$0xff]  ;;  %v305_v45 = vld [vmem:[%s9472_s29 + $0x1a0] sm:$0xff] }
  0x45   : > { %710 = vperm.xlu1 %9294, %v452_v46   ;;  %v484_v46 = vld [vmem:[%s17725_s1 + $0x198] sm:$0xff] }
  0x46   : > { %8661 = vmatmul.mubr.msk.f32.gmra.mrb[20].mxu0 %vm1514_vm1, %v274_v47  ;;  %v306_v47 = vld [vmem:[%s9472_s29 + $0x1a8] sm:$0xff] }
  0x47   : > { %715 = vperm.xlu0 %9293, %v453_v48   ;;  %8663 = vmatprep.mubr.msk.f32.mxu0 %vm1514_vm1, %v275_v49  ;;  %v485_v48 = vld [vmem:[%s17725_s1 + $0x1a0] sm:$0xff]  ;;  %v307_v49 = vld [vmem:[%s9472_s29 + $0x1b0] sm:$0xff] }
  0x49   : > { %720 = vperm.xlu1 %9294, %v454_v50   ;;  %v486_v50 = vld [vmem:[%s17725_s1 + $0x1a8] sm:$0xff] }
  0x4a   : > { %8664 = vmatmul.mubr.msk.f32.gmra.mrb[22].mxu0 %vm1514_vm1, %v276_v51  ;;  %v308_v51 = vld [vmem:[%s9472_s29 + $0x1b8] sm:$0xff] }
  0x4b   : > { %725 = vperm.xlu0 %9293, %v455_v52   ;;  %8666 = vmatprep.mubr.msk.f32.mxu0 %vm1514_vm1, %v277_v53  ;;  %v487_v52 = vld [vmem:[%s17725_s1 + $0x1b0] sm:$0xff]  ;;  %v309_v53 = vld [vmem:[%s9472_s29 + $0x1c0] sm:$0xff] }
  0x4d   : > { %730 = vperm.xlu1 %9294, %v456_v54   ;;  %v488_v54 = vld [vmem:[%s17725_s1 + $0x1b8] sm:$0xff] }
  0x4e   : > { %8667 = vmatmul.mubr.msk.f32.gmra.mrb[24].mxu0 %vm1514_vm1, %v278_v55  ;;  %v310_v55 = vld [vmem:[%s9472_s29 + $0x1c8] sm:$0xff] }
  0x4f   : > { %735 = vperm.xlu0 %9293, %v457_v56   ;;  %8669 = vmatprep.mubr.msk.f32.mxu0 %vm1514_vm1, %v279_v57  ;;  %v489_v56 = vld [vmem:[%s17725_s1 + $0x1c0] sm:$0xff]  ;;  %v311_v57 = vld [vmem:[%s9472_s29 + $0x1d0] sm:$0xff] }
  0x51   : > { %740 = vperm.xlu1 %9294, %v458_v58   ;;  %v490_v58 = vld [vmem:[%s17725_s1 + $0x1c8] sm:$0xff] }
  0x52   : > { %8670 = vmatmul.mubr.msk.f32.gmra.mrb[26].mxu0 %vm1514_vm1, %v280_v59  ;;  %v312_v59 = vld [vmem:[%s9472_s29 + $0x1d8] sm:$0xff] }
  0x53   : > { %745 = vperm.xlu0 %9293, %v459_v60   ;;  %8672 = vmatprep.mubr.msk.f32.mxu0 %vm1514_vm1, %v281_v61  ;;  %v491_v60 = vld [vmem:[%s17725_s1 + $0x1d0] sm:$0xff]  ;;  %v313_v61 = vld [vmem:[%s9472_s29 + $0x1e0] sm:$0xff] }
  0x55   : > { %750 = vperm.xlu1 %9294, %v460_v62   ;;  %v492_v62 = vld [vmem:[%s17725_s1 + $0x1d8] sm:$0xff] }
  0x56   : > { %8673 = vmatmul.mubr.msk.f32.gmra.mrb[28].mxu0 %vm1514_vm1, %v282_v63  ;;  %v314_v63 = vld [vmem:[%s9472_s29 + $0x1e8] sm:$0xff] }
  0x57   : > { %755 = vperm.xlu0 %9293, %v461_v0   ;;  %8675 = vmatprep.mubr.msk.f32.mxu0 %vm1514_vm1, %v283_v1  ;;  %v493_v0 = vld [vmem:[%s17725_s1 + $0x1e0] sm:$0xff]  ;;  %v315_v1 = vld [vmem:[%s9472_s29 + $0x1f0] sm:$0xff] }
  0x59   : > { %760 = vperm.xlu1 %9294, %v462_v2  }
  0x5a   : > { %8676 = vmatmul.mubr.msk.f32.gmra.mrb[30].mxu0 %vm1514_vm1, %v284_v3  ;;  %v494_v3 = vld [vmem:[%s17725_s1 + $0x1e8] sm:$0xff] }
  0x5b   : > { %765 = vperm.xlu0 %9293, %v463_v4   ;;  %8678 = vmatprep.mubr.msk.f32.mxu0 %vm1514_vm1, %v285_v5  ;;  %v316_v4 = vld [vmem:[%s9472_s29 + $0x1f8] sm:$0xff] }
  0x5d   : > { %770 = vperm.xlu1 %9294, %v464_v6   ;;  %v495_v6 = vld [vmem:[%s17725_s1 + $0x1f0] sm:$0xff] }
  0x5e   : > { %8679 = vmatmul.mubr.msk.f32.gmra.mrb[32].mxu0 %vm1514_vm1, %v286_v7  ;;  %v317_v7 = vld [vmem:[%s9472_s29 + $0x200] sm:$0xff] }
  0x5f   : > { %775 = vperm.xlu0 %9293, %v465_v8   ;;  %8681 = vmatprep.mubr.msk.f32.mxu0 %vm1514_vm1, %v287_v9  ;;  %v496_v9 = vld [vmem:[%s17725_s1 + $0x1f8] sm:$0xff] }
  0x61   : > { %780 = vperm.xlu1 %9294, %v466_v10   ;;  %v318_v10 = vld [vmem:[%s9472_s29 + $0x208] sm:$0xff] }
  0x62   : > { %8682 = vmatmul.mubr.msk.f32.gmra.mrb[34].mxu0 %vm1514_vm1, %v288_v11 }
  0x63   : > { %785 = vperm.xlu0 %9293, %v467_v12   ;;  %8684 = vmatprep.mubr.msk.f32.mxu0 %vm1514_vm1, %v289_v13  ;;  %v497_v12 = vld [vmem:[%s17725_s1 + $0x200] sm:$0xff]  ;;  %v319_v13 = vld [vmem:[%s9472_s29 + $0x210] sm:$0xff] }
  0x65   : > { %790 = vperm.xlu1 %9294, %v468_v14  }
  0x66   : > { %8685 = vmatmul.mubr.msk.f32.gmra.mrb[36].mxu0 %vm1514_vm1, %v290_v15  ;;  %v498_v15 = vld [vmem:[%s17725_s1 + $0x208] sm:$0xff] }
  0x67   : > { %795 = vperm.xlu0 %9293, %v469_v16   ;;  %8687 = vmatprep.mubr.msk.f32.mxu0 %vm1514_vm1, %v291_v17  ;;  %v320_v16 = vld [vmem:[%s9472_s29 + $0x218] sm:$0xff] }
  0x69   : > { %800 = vperm.xlu1 %9294, %v470_v18   ;;  %v499_v18 = vld [vmem:[%s17725_s1 + $0x210] sm:$0xff] }
  0x6a   : > { %8688 = vmatmul.mubr.msk.f32.gmra.mrb[38].mxu0 %vm1514_vm1, %v292_v19  ;;  %v321_v19 = vld [vmem:[%s9472_s29 + $0x220] sm:$0xff] }
  0x6b   : > { %805 = vperm.xlu0 %9293, %v471_v20   ;;  %8690 = vmatprep.mubr.msk.f32.mxu0 %vm1514_vm1, %v293_v21  ;;  %v500_v21 = vld [vmem:[%s17725_s1 + $0x218] sm:$0xff] }
  0x6d   : > { %810 = vperm.xlu1 %9294, %v472_v22   ;;  %v322_v22 = vld [vmem:[%s9472_s29 + $0x228] sm:$0xff] }
  0x6e   : > { %8691 = vmatmul.mubr.msk.f32.gmra.mrb[40].mxu0 %vm1514_vm1, %v294_v23 }
  0x6f   : > { %815 = vperm.xlu0 %9293, %v473_v24   ;;  %8693 = vmatprep.mubr.msk.f32.mxu0 %vm1514_vm1, %v295_v25  ;;  %v501_v24 = vld [vmem:[%s17725_s1 + $0x220] sm:$0xff]  ;;  %v323_v25 = vld [vmem:[%s9472_s29 + $0x230] sm:$0xff] }
  0x71   : > { %820 = vperm.xlu1 %9294, %v474_v26  }
  0x72   : > { %8694 = vmatmul.mubr.msk.f32.gmra.mrb[42].mxu0 %vm1514_vm1, %v296_v27  ;;  %v502_v27 = vld [vmem:[%s17725_s1 + $0x228] sm:$0xff] }
  0x73   : > { %825 = vperm.xlu0 %9293, %v475_v28   ;;  %8696 = vmatprep.mubr.msk.f32.mxu0 %vm1514_vm1, %v297_v29  ;;  %v324_v28 = vld [vmem:[%s9472_s29 + $0x238] sm:$0xff] }
  0x75   : > { %830 = vperm.xlu1 %9294, %v476_v30   ;;  %v503_v30 = vld [vmem:[%s17725_s1 + $0x230] sm:$0xff] }
  0x76   : > { %8697 = vmatmul.mubr.msk.f32.gmra.mrb[44].mxu0 %vm1514_vm1, %v298_v31  ;;  %v325_v31 = vld [vmem:[%s9472_s29 + $0x240] sm:$0xff] }
  0x77   : > { %835 = vperm.xlu0 %9293, %v477_v32   ;;  %8699 = vmatprep.mubr.msk.f32.mxu0 %vm1514_vm1, %v299_v33  ;;  %v504_v32 = vld [vmem:[%s17725_s1 + $0x238] sm:$0xff] }
  0x79   : > { %840 = vperm.xlu1 %9294, %v478_v34   ;;  %v326_v34 = vld [vmem:[%s9472_s29 + $0x248] sm:$0xff] }
  0x7a   : > { %8700 = vmatmul.mubr.msk.f32.gmra.mrb[46].mxu0 %vm1514_vm1, %v300_v35 }
  0x7b   : > { %845 = vperm.xlu0 %9293, %v479_v36   ;;  %8702 = vmatprep.mubr.msk.f32.mxu0 %vm1514_vm1, %v301_v37  ;;  %v505_v36 = vld [vmem:[%s17725_s1 + $0x240] sm:$0xff]  ;;  %v327_v37 = vld [vmem:[%s9472_s29 + $0x250] sm:$0xff] }
  0x7d   : > { %850 = vperm.xlu1 %9294, %v480_v38   ;;  %v506_v38 = vld [vmem:[%s17725_s1 + $0x248] sm:$0xff] }
  0x7e   : > { %8703 = vmatmul.mubr.msk.f32.gmra.mrb[48].mxu0 %vm1514_vm1, %v302_v39  ;;  %v328_v39 = vld [vmem:[%s9472_s29 + $0x258] sm:$0xff] }
  0x7f   : > { %855 = vperm.xlu0 %9293, %v481_v40   ;;  %8705 = vmatprep.mubr.msk.f32.mxu0 %vm1514_vm1, %v303_v41  ;;  %v507_v40 = vld [vmem:[%s17725_s1 + $0x250] sm:$0xff]  ;;  %v329_v41 = vld [vmem:[%s9472_s29 + $0x260] sm:$0xff] }
  0x81   : > { %860 = vperm.xlu1 %9294, %v482_v42  }
  0x82   : > { %8706 = vmatmul.mubr.msk.f32.gmra.mrb[50].mxu0 %vm1514_vm1, %v304_v43 }
  0x83   : > { %865 = vperm.xlu0 %9293, %v483_v44   ;;  %8708 = vmatprep.mubr.msk.f32.mxu0 %vm1514_vm1, %v305_v45  ;;  %v508_v44 = vld [vmem:[%s17725_s1 + $0x258] sm:$0xff]  ;;  %v330_v45 = vld [vmem:[%s9472_s29 + $0x268] sm:$0xff] }
  0x85   : > { %870 = vperm.xlu1 %9294, %v484_v46   ;;  %v509_v46 = vld [vmem:[%s17725_s1 + $0x260] sm:$0xff] }
  0x86   : > { %8709 = vmatmul.mubr.msk.f32.gmra.mrb[52].mxu0 %vm1514_vm1, %v306_v47  ;;  %v331_v47 = vld [vmem:[%s9472_s29 + $0x270] sm:$0xff] }
  0x87   : > { %875 = vperm.xlu0 %9293, %v485_v48   ;;  %8711 = vmatprep.mubr.msk.f32.mxu0 %vm1514_vm1, %v307_v49  ;;  %v510_v48 = vld [vmem:[%s17725_s1 + $0x268] sm:$0xff] }
  0x89   : > { %880 = vperm.xlu1 %9294, %v486_v50   ;;  %v332_v50 = vld [vmem:[%s9472_s29 + $0x278] sm:$0xff] }
  0x8a   : > { %8712 = vmatmul.mubr.msk.f32.gmra.mrb[54].mxu0 %vm1514_vm1, %v308_v51 }
  0x8b   : > { %885 = vperm.xlu0 %9293, %v487_v52   ;;  %8714 = vmatprep.mubr.msk.f32.mxu0 %vm1514_vm1, %v309_v53  ;;  %v511_v52 = vld [vmem:[%s17725_s1 + $0x270] sm:$0xff]  ;;  %v333_v53 = vld [vmem:[%s9472_s29 + $0x280] sm:$0xff] }
  0x8d   : > { %890 = vperm.xlu1 %9294, %v488_v54   ;;  %v512_v54 = vld [vmem:[%s17725_s1 + $0x278] sm:$0xff] }
  0x8e   : > { %8715 = vmatmul.mubr.msk.f32.gmra.mrb[56].mxu0 %vm1514_vm1, %v310_v55  ;;  %v334_v55 = vld [vmem:[%s9472_s29 + $0x288] sm:$0xff] }
  0x8f   : > { %895 = vperm.xlu0 %9293, %v489_v56   ;;  %8717 = vmatprep.mubr.msk.f32.mxu0 %vm1514_vm1, %v311_v57  ;;  %v513_v56 = vld [vmem:[%s17725_s1 + $0x280] sm:$0xff]  ;;  %v335_v57 = vld [vmem:[%s9472_s29 + $0x290] sm:$0xff] }
  0x91   : > { %900 = vperm.xlu1 %9294, %v490_v58  }
  0x92   : > { %8718 = vmatmul.mubr.msk.f32.gmra.mrb[58].mxu0 %vm1514_vm1, %v312_v59 }
  0x93   : > { %905 = vperm.xlu0 %9293, %v491_v60   ;;  %8720 = vmatprep.mubr.msk.f32.mxu0 %vm1514_vm1, %v313_v61  ;;  %v514_v60 = vld [vmem:[%s17725_s1 + $0x288] sm:$0xff]  ;;  %v336_v61 = vld [vmem:[%s9472_s29 + $0x298] sm:$0xff] }
  0x95   : > { %910 = vperm.xlu1 %9294, %v492_v62   ;;  %v515_v62 = vld [vmem:[%s17725_s1 + $0x290] sm:$0xff] }
  0x96   : > { %v9781_v2 = vpop.permute.xlu0 %615  ;;  %8721 = vmatmul.mubr.msk.f32.gmra.mrb[60].mxu0 %vm1514_vm1, %v314_v63  ;;  %v337_v63 = vld [vmem:[%s9472_s29 + $0x2a0] sm:$0xff] }
  0x97   : > { %18130 = vst [vmem:[#allocation5_spill] sm:$0xff] %v9781_v2  ;;  %915 = vperm.xlu0 %9293, %v493_v0   ;;  %8723 = vmatprep.mubr.msk.f32.mxu0 %vm1514_vm1, %v315_v1  ;;  %v516_v0 = vld [vmem:[%s17725_s1 + $0x298] sm:$0xff] }
  0x98   : > { %v9789_v5 = vpop.permute.xlu1 %625 }
  0x99   : > { %18131 = vst [vmem:[#allocation6_spill] sm:$0xff] %v9789_v5  ;;  %920 = vperm.xlu1 %9294, %v494_v3   ;;  %v338_v3 = vld [vmem:[%s9472_s29 + $0x2a8] sm:$0xff] }
  0x9a   : > { %v9795_v8 = vpop.permute.xlu0 %620  ;;  %8724 = vmatmul.mubr.msk.f32.gmra.mrb[62].mxu0 %vm1514_vm1, %v316_v4 }
  0x9b   : > { %18132 = vst [vmem:[#allocation7_spill] sm:$0xff] %v9795_v8  ;;  %925 = vperm.xlu0 %9293, %v495_v6   ;;  %8726 = vmatprep.mubr.msk.f32.mxu0 %vm1514_vm1, %v317_v7  ;;  %v517_v6 = vld [vmem:[%s17725_s1 + $0x2a0] sm:$0xff]  ;;  %v339_v7 = vld [vmem:[%s9472_s29 + $0x2b0] sm:$0xff] }
  0x9c   : > { %v9803_v11 = vpop.permute.xlu1 %630 }
  0x9d   : > { %18133 = vst [vmem:[#allocation8_spill] sm:$0xff] %v9803_v11  ;;  %930 = vperm.xlu1 %9294, %v496_v9   ;;  %v518_v9 = vld [vmem:[%s17725_s1 + $0x2a8] sm:$0xff] }
  0x9e   : > { %v9809_v14 = vpop.permute.xlu0 %635  ;;  %8727 = vmatmul.mubr.msk.f32.gmra.mrb[64].mxu0 %vm1514_vm1, %v318_v10  ;;  %v340_v10 = vld [vmem:[%s9472_s29 + $0x2b8] sm:$0xff] }
  0x9f   : > { %18134 = vst [vmem:[#allocation9_spill] sm:$0xff] %v9809_v14  ;;  %935 = vperm.xlu0 %9293, %v497_v12   ;;  %8729 = vmatprep.mubr.msk.f32.mxu0 %vm1514_vm1, %v319_v13  ;;  %v519_v12 = vld [vmem:[%s17725_s1 + $0x2b0] sm:$0xff]  ;;  %v341_v13 = vld [vmem:[%s9472_s29 + $0x2c0] sm:$0xff] }
  0xa0   : > { %v9817_v17 = vpop.permute.xlu1 %640 }
  0xa1   : > { %18135 = vst [vmem:[#allocation10_spill] sm:$0xff] %v9817_v17  ;;  %940 = vperm.xlu1 %9294, %v498_v15  }
  0xa2   : > { %v9823_v20 = vpop.permute.xlu0 %645  ;;  %8730 = vmatmul.mubr.msk.f32.gmra.mrb[66].mxu0 %vm1514_vm1, %v320_v16 }
  0xa3   : > { %18136 = vst [vmem:[#allocation11_spill] sm:$0xff] %v9823_v20  ;;  %945 = vperm.xlu0 %9293, %v499_v18   ;;  %8732 = vmatprep.mubr.msk.f32.mxu0 %vm1514_vm1, %v321_v19  ;;  %v520_v18 = vld [vmem:[%s17725_s1 + $0x2b8] sm:$0xff]  ;;  %v342_v19 = vld [vmem:[%s9472_s29 + $0x2c8] sm:$0xff] }
  0xa4   : > { %v9831_v23 = vpop.permute.xlu1 %650 }
  0xa5   : > { %18137 = vst [vmem:[#allocation12_spill] sm:$0xff] %v9831_v23  ;;  %950 = vperm.xlu1 %9294, %v500_v21   ;;  %v521_v21 = vld [vmem:[%s17725_s1 + $0x2c0] sm:$0xff] }
  0xa6   : > { %v9837_v26 = vpop.permute.xlu0 %655  ;;  %8733 = vmatmul.mubr.msk.f32.gmra.mrb[68].mxu0 %vm1514_vm1, %v322_v22  ;;  %v343_v22 = vld [vmem:[%s9472_s29 + $0x2d0] sm:$0xff] }
  0xa7   : > { %18138 = vst [vmem:[#allocation13_spill] sm:$0xff] %v9837_v26  ;;  %955 = vperm.xlu0 %9293, %v501_v24   ;;  %8735 = vmatprep.mubr.msk.f32.mxu0 %vm1514_vm1, %v323_v25  ;;  %v522_v24 = vld [vmem:[%s17725_s1 + $0x2c8] sm:$0xff] }
  0xa8   : > { %v9845_v29 = vpop.permute.xlu1 %660 }
  0xa9   : > { %18139 = vst [vmem:[#allocation14_spill] sm:$0xff] %v9845_v29  ;;  %960 = vperm.xlu1 %9294, %v502_v27   ;;  %v344_v27 = vld [vmem:[%s9472_s29 + $0x2d8] sm:$0xff] }
  0xaa   : > { %8736 = vmatmul.mubr.msk.f32.gmra.mrb[70].mxu0 %vm1514_vm1, %v324_v28  ;;  %v9855_v33 = vpop.permute.xlu0 %665 }
  0xab   : > { %18140 = vst [vmem:[#allocation15_spill] sm:$0xff] %v9855_v33  ;;  %965 = vperm.xlu0 %9293, %v503_v30   ;;  %8738 = vmatprep.mubr.msk.f32.mxu0 %vm1514_vm1, %v325_v31  ;;  %v523_v30 = vld [vmem:[%s17725_s1 + $0x2d0] sm:$0xff]  ;;  %v345_v31 = vld [vmem:[%s9472_s29 + $0x2e0] sm:$0xff] }
  0xac   : > { %v9859_v35 = vpop.permute.xlu1 %670 }
  0xad   : > { %18141 = vst [vmem:[#allocation16_spill] sm:$0xff] %v9859_v35  ;;  %970 = vperm.xlu1 %9294, %v504_v32   ;;  %v524_v32 = vld [vmem:[%s17725_s1 + $0x2d8] sm:$0xff] }
  0xae   : > { %8739 = vmatmul.mubr.msk.f32.gmra.mrb[72].mxu0 %vm1514_vm1, %v326_v34  ;;  %v9875_v42 = vpop.permute.xlu0 %675  ;;  %v346_v34 = vld [vmem:[%s9472_s29 + $0x2e8] sm:$0xff] }
  0xaf   : > { %975 = vperm.xlu0 %9293, %v505_v36   ;;  %8741 = vmatprep.mubr.msk.f32.mxu0 %vm1514_vm1, %v327_v37  ;;  %18142 = vst [vmem:[#allocation17_spill] sm:$0xff] %v9875_v42  ;;  %v525_v36 = vld [vmem:[%s17725_s1 + $0x2e0] sm:$0xff]  ;;  %v347_v37 = vld [vmem:[%s9472_s29 + $0x2f0] sm:$0xff] }
  0xb0   : > { %v9877_v43 = vpop.permute.xlu1 %680 }
  0xb1   : > { %980 = vperm.xlu1 %9294, %v506_v38   ;;  %18143 = vst [vmem:[#allocation18_spill] sm:$0xff] %v9877_v43 }
  0xb2   : > { %8742 = vmatmul.mubr.msk.f32.gmra.mrb[74].mxu0 %vm1514_vm1, %v328_v39  ;;  %v9893_v49 = vpop.permute.xlu0 %685 }
  0xb3   : > { %985 = vperm.xlu0 %9293, %v507_v40   ;;  %8744 = vmatprep.mubr.msk.f32.mxu0 %vm1514_vm1, %v329_v41  ;;  %18144 = vst [vmem:[#allocation19_spill] sm:$0xff] %v9893_v49  ;;  %v526_v40 = vld [vmem:[%s17725_s1 + $0x2e8] sm:$0xff]  ;;  %v348_v41 = vld [vmem:[%s9472_s29 + $0x2f8] sm:$0xff] }
  0xb4   : > { %v9897_v51 = vpop.permute.xlu1 %690 }
  0xb5   : > { %990 = vperm.xlu1 %9294, %v508_v44   ;;  %18145 = vst [vmem:[#allocation20_spill] sm:$0xff] %v9897_v51  ;;  %v527_v44 = vld [vmem:[%s17725_s1 + $0x2f0] sm:$0xff] }
  0xb6   : > { %8745 = vmatmul.mubr.msk.f32.gmra.mrb[76].mxu0 %vm1514_vm1, %v330_v45  ;;  %v9913_v58 = vpop.permute.xlu0 %695  ;;  %v349_v45 = vld [vmem:[%s9472_s29 + $0x300] sm:$0xff] }
  0xb7   : > { %995 = vperm.xlu0 %9293, %v509_v46   ;;  %8747 = vmatprep.mubr.msk.f32.mxu0 %vm1514_vm1, %v331_v47  ;;  %18146 = vst [vmem:[#allocation21_spill] sm:$0xff] %v9913_v58  ;;  %v528_v46 = vld [vmem:[%s17725_s1 + $0x2f8] sm:$0xff] }
  0xb8   : > { %v9915_v59 = vpop.permute.xlu1 %700 }
  0xb9   : > { %1000 = vperm.xlu1 %9294, %v510_v48   ;;  %18147 = vst [vmem:[#allocation22_spill] sm:$0xff] %v9915_v59  ;;  %v350_v48 = vld [vmem:[%s9472_s29 + $0x308] sm:$0xff] }
  0xba   : > { %8748 = vmatmul.mubr.msk.f32.gmra.mrb[78].mxu0 %vm1514_vm1, %v332_v50  ;;  %v9931_v1 = vpop.permute.xlu0 %705 }
  0xbb   : > { %1005 = vperm.xlu0 %9293, %v511_v52   ;;  %8750 = vmatprep.mubr.msk.f32.mxu0 %vm1514_vm1, %v333_v53  ;;  %18148 = vst [vmem:[#allocation23_spill] sm:$0xff] %v9931_v1  ;;  %v529_v52 = vld [vmem:[%s17725_s1 + $0x300] sm:$0xff]  ;;  %v351_v53 = vld [vmem:[%s9472_s29 + $0x310] sm:$0xff] }
  0xbc   : > { %v9935_v4 = vpop.permute.xlu1 %1495 }
  0xbd   : > { %1010 = vperm.xlu1 %9294, %v512_v54   ;;  %18149 = vst [vmem:[#allocation24_spill] sm:$0xff] %v9935_v4  ;;  %v530_v54 = vld [vmem:[%s17725_s1 + $0x308] sm:$0xff] }
  0xbe   : > { %8751 = vmatmul.mubr.msk.f32.gmra.mrb[80].mxu0 %vm1514_vm1, %v334_v55  ;;  %v9951_v15 = vpop.permute.xlu0 %1500  ;;  %v352_v55 = vld [vmem:[%s9472_s29 + $0x318] sm:$0xff] }
  0xbf   : > { %1015 = vperm.xlu0 %9293, %v513_v56   ;;  %8753 = vmatprep.mubr.msk.f32.mxu0 %vm1514_vm1, %v335_v57  ;;  %18150 = vst [vmem:[#allocation25_spill] sm:$0xff] %v9951_v15  ;;  %v531_v56 = vld [vmem:[%s17725_s1 + $0x310] sm:$0xff]  ;;  %v353_v57 = vld [vmem:[%s9472_s29 + $0x320] sm:$0xff] }
  0xc0   : > { %v9953_v16 = vpop.permute.xlu1 %1505 }
  0xc1   : > { %1020 = vperm.xlu1 %9294, %v514_v60   ;;  %18151 = vst [vmem:[#allocation26_spill] sm:$0xff] %v9953_v16 }
  0xc2   : > { %8754 = vmatmul.mubr.msk.f32.gmra.mrb[82].mxu0 %vm1514_vm1, %v336_v61  ;;  %v9969_v25 = vpop.permute.xlu0 %1510 }
  0xc3   : > { %1025 = vperm.xlu0 %9293, %v515_v62   ;;  %8756 = vmatprep.mubr.msk.f32.mxu0 %vm1514_vm1, %v337_v63  ;;  %18152 = vst [vmem:[#allocation27_spill] sm:$0xff] %v9969_v25  ;;  %v532_v62 = vld [vmem:[%s17725_s1 + $0x318] sm:$0xff]  ;;  %v354_v63 = vld [vmem:[%s9472_s29 + $0x328] sm:$0xff] }
  0xc4   : > { %v9973_v28 = vpop.permute.xlu1 %710 }
  0xc5   : > { %1030 = vperm.xlu1 %9294, %v516_v0   ;;  %18153 = vst [vmem:[#allocation28_spill] sm:$0xff] %v9973_v28  ;;  %v533_v0 = vld [vmem:[%s17725_s1 + $0x320] sm:$0xff] }
  0xc6   : > { %8757 = vmatmul.mubr.msk.f32.gmra.mrb[84].mxu0 %vm1514_vm1, %v338_v3  ;;  %v9989_v38 = vpop.permute.xlu0 %715  ;;  %v355_v3 = vld [vmem:[%s9472_s29 + $0x330] sm:$0xff] }
  0xc7   : > { %1035 = vperm.xlu0 %9293, %v517_v6   ;;  %8759 = vmatprep.mubr.msk.f32.mxu0 %vm1514_vm1, %v339_v7  ;;  %18154 = vst [vmem:[#allocation29_spill] sm:$0xff] %v9989_v38  ;;  %v534_v6 = vld [vmem:[%s17725_s1 + $0x328] sm:$0xff] }
  0xc8   : > { %v9991_v39 = vpop.permute.xlu1 %720 }
  0xc9   : > { %1040 = vperm.xlu1 %9294, %v518_v9   ;;  %18155 = vst [vmem:[#allocation30_spill] sm:$0xff] %v9991_v39  ;;  %v356_v9 = vld [vmem:[%s9472_s29 + $0x338] sm:$0xff] }
  0xca   : > { %8760 = vmatmul.mubr.msk.f32.gmra.mrb[86].mxu0 %vm1514_vm1, %v340_v10  ;;  %v10007_v47 = vpop.permute.xlu0 %725 }
  0xcb   : > { %1045 = vperm.xlu0 %9293, %v519_v12   ;;  %8762 = vmatprep.mubr.msk.f32.mxu0 %vm1514_vm1, %v341_v13  ;;  %18156 = vst [vmem:[#allocation31_spill] sm:$0xff] %v10007_v47  ;;  %v535_v12 = vld [vmem:[%s17725_s1 + $0x330] sm:$0xff]  ;;  %v357_v13 = vld [vmem:[%s9472_s29 + $0x340] sm:$0xff] }
  0xcc   : > { %v10011_v50 = vpop.permute.xlu1 %730 }
  0xcd   : > { %1050 = vperm.xlu1 %9294, %v520_v18   ;;  %18157 = vst [vmem:[#allocation32_spill] sm:$0xff] %v10011_v50  ;;  %v536_v18 = vld [vmem:[%s17725_s1 + $0x338] sm:$0xff] }
  0xce   : > { %8763 = vmatmul.mubr.msk.f32.gmra.mrb[88].mxu0 %vm1514_vm1, %v342_v19  ;;  %v10027_v60 = vpop.permute.xlu0 %735  ;;  %v358_v19 = vld [vmem:[%s9472_s29 + $0x348] sm:$0xff] }
  0xcf   : > { %1055 = vperm.xlu0 %9293, %v521_v21   ;;  %8765 = vmatprep.mubr.msk.f32.mxu0 %vm1514_vm1, %v343_v22  ;;  %18158 = vst [vmem:[#allocation33_spill] sm:$0xff] %v10027_v60  ;;  %v537_v21 = vld [vmem:[%s17725_s1 + $0x340] sm:$0xff]  ;;  %v359_v22 = vld [vmem:[%s9472_s29 + $0x350] sm:$0xff] }
  0xd0   : > { %v10029_v61 = vpop.permute.xlu1 %740 }
  0xd1   : > { %1060 = vperm.xlu1 %9294, %v522_v24   ;;  %18159 = vst [vmem:[#allocation34_spill] sm:$0xff] %v10029_v61  ;;  %v3384_v24 = vlaneseq }
  0xd2   : > { %8766 = vmatmul.mubr.msk.f32.gmra.mrb[90].mxu0 %vm1514_vm1, %v344_v27  ;;  %v10045_v7 = vpop.permute.xlu0 %745 }
  0xd3   : > { %1065 = vperm.xlu0 %9293, %v523_v30   ;;  %8768 = vmatprep.mubr.msk.f32.mxu0 %vm1514_vm1, %v345_v31  ;;  %18160 = vst [vmem:[#allocation35_spill] sm:$0xff] %v10045_v7  ;;  %v538_v31 = vld [vmem:[%s17725_s1 + $0x348] sm:$0xff] }
  0xd4   : > { %v10049_v10 = vpop.permute.xlu1 %750 }
  0xd5   : > { %1070 = vperm.xlu1 %9294, %v524_v32   ;;  %18161 = vst [vmem:[#allocation36_spill] sm:$0xff] %v10049_v10  ;;  %v360_v32 = vld [vmem:[%s9472_s29 + $0x358] sm:$0xff] }
  0xd6   : > { %8769 = vmatmul.mubr.msk.f32.gmra.mrb[92].mxu0 %vm1514_vm1, %v346_v34  ;;  %v10065_v27 = vpop.permute.xlu0 %755  ;;  %v539_v34 = vld [vmem:[%s17725_s1 + $0x350] sm:$0xff] }
  0xd7   : > { %1075 = vperm.xlu0 %9293, %v525_v36   ;;  %8771 = vmatprep.mubr.msk.f32.mxu0 %vm1514_vm1, %v347_v37  ;;  %18162 = vst [vmem:[#allocation37_spill] sm:$0xff] %v10065_v27  ;;  %v10078_v36 = vshrl.u32 %v3384_v24, 7  ;;  %v361_v37 = vld [vmem:[%s9472_s29 + $0x360] sm:$0xff] }
  0xd8   : > { %v10067_v30 = vpop.permute.xlu1 %760  ;;  %v365_v24 = vld [vmem:[%s9472_s29 + $0x380] sm:$0xff] }
  0xd9   : > { %1080 = vperm.xlu1 %9294, %v526_v40   ;;  %18163 = vst [vmem:[#allocation38_spill] sm:$0xff] %v10067_v30  ;;  %vm3386_vm2 = vcmp.lt.s32.totalorder %v10078_v36, 1  ;;  %vm3927_vm3 = vcmp.lt.s32.totalorder %v10078_v36, 7 }
  0xda   : > { %8772 = vmatmul.mubr.msk.f32.gmra.mrb[94].mxu0 %vm1514_vm1, %v348_v41  ;;  %v540_v41 = vld [vmem:[%s17725_s1 + $0x358] sm:$0xff] }
  0xdb   : > { %1085 = vperm.xlu0 %9293, %v527_v44   ;;  %8774 = vmatprep.mubr.msk.f32.mxu0 %vm1514_vm1, %v349_v45 }
  0xdd   : > { %1090 = vperm.xlu1 %9294, %v528_v46   ;;  %v10088_v46 = vpop.permute.xlu0 %765 }
  0xde   : > { %8775 = vmatmul.mubr.msk.f32.gmra.mrb[96].mxu0 %vm1514_vm1, %v350_v48  ;;  %18165 = vst [vmem:[#allocation40_spill] sm:$0xff] %v10088_v46 }
  0xdf   : > { %1095 = vperm.xlu0 %9293, %v529_v52   ;;  %8777 = vmatprep.mubr.msk.f32.mxu0 %vm1514_vm1, %v351_v53  ;;  %v362_v52 = vld [vmem:[%s9472_s29 + $0x368] sm:$0xff]  ;;  %v10095_v53 = vpop.permute.xlu1 %770 }
  0xe0   : > { %18167 = vst [vmem:[#allocation42_spill] sm:$0xff] %v10095_v53 }
  0xe1   : > { %1100 = vperm.xlu1 %9294, %v530_v54   ;;  %v541_v54 = vld [vmem:[%s17725_s1 + $0x360] sm:$0xff] }
  0xe2   : > { %8778 = vmatmul.mubr.msk.f32.gmra.mrb[98].mxu0 %vm1514_vm1, %v352_v55 }
  0xe3   : > { %1105 = vperm.xlu0 %9293, %v531_v56   ;;  %8780 = vmatprep.mubr.msk.f32.mxu0 %vm1514_vm1, %v353_v57  ;;  %v363_v57 = vld [vmem:[%s9472_s29 + $0x370] sm:$0xff] }
  0xe5   : > { %1110 = vperm.xlu1 %9294, %v532_v62  }
  0xe6   : > { %8781 = vmatmul.mubr.msk.f32.gmra.mrb[100].mxu0 %vm1514_vm1, %v354_v63 }
  0xe7   : > { %1115 = vperm.xlu0 %9293, %v533_v0   ;;  %8783 = vmatprep.mubr.msk.f32.mxu0 %vm1514_vm1, %v355_v3  ;;  %v542_v3 = vld [vmem:[%s17725_s1 + $0x368] sm:$0xff] }
  0xe9   : > { %1120 = vperm.xlu1 %9294, %v534_v6  }
  0xea   : > { %8784 = vmatmul.mubr.msk.f32.gmra.mrb[102].mxu0 %vm1514_vm1, %v356_v9 }
  0xeb   : > { %1125 = vperm.xlu0 %9293, %v535_v12   ;;  %8786 = vmatprep.mubr.msk.f32.mxu0 %vm1514_vm1, %v357_v13 }
  0xed   : > { %1130 = vperm.xlu1 %9294, %v536_v18  }
  0xee   : > { %8787 = vmatmul.mubr.msk.f32.gmra.mrb[104].mxu0 %vm1514_vm1, %v358_v19  ;;  %v364_v19 = vld [vmem:[%s9472_s29 + $0x378] sm:$0xff] }
  0xef   : > { %1135 = vperm.xlu0 %9293, %v537_v21   ;;  %8789 = vmatprep.mubr.msk.f32.mxu0 %vm1514_vm1, %v359_v22  ;;  %v543_v21 = vld [vmem:[%s17725_s1 + $0x370] sm:$0xff] }
  0xf1   : > { %1140 = vperm.xlu1 %9294, %v538_v31   ;;  %v8632_v40 = vpop.f32.mrb[0].mxu0  ;;  %v10134_v31 = vpop.permute.xlu0 %775 }
  0xf2   : > { %v10085_v44 = vmul.f32 %v8632_v40, %v9795_v8  ;;  %v2125_v45 = vpop.f32.mrb[1].mxu0  ;;  %8790 = vmatmul.mubr.msk.f32.gmra.mrb[106].mxu0 %vm1514_vm1, %v360_v32  ;;  %18171 = vst [vmem:[#allocation46_spill] sm:$0xff] %v10134_v31  ;;  %v544_v40 = vld [vmem:[%s17725_s1 + $0x378] sm:$0xff]  ;;  %v375_v31 = vld [vmem:[%s9472_s29 + $0x3d0] sm:$0xff] }
  0xf3   : > { %1145 = vperm.xlu0 %9293, %v539_v34   ;;  %v10091_v48 = vmul.f32 %v2125_v45, %v9781_v2  ;;  %8792 = vmatprep.mubr.msk.f32.mxu0 %vm1514_vm1, %v361_v37  ;;  %v10137_v37 = vpop.permute.xlu1 %780 }
  0xf4   : > { %18164 = vst [vmem:[#allocation39_spill] sm:$0xff] %v10085_v44  ;;  %v3205_v55 = vrot.slane %v10085_v44, 7  ;;  %v3748_v56 = vrot.slane %v10085_v44, 1  ;;  %18172 = vst [vmem:[#allocation47_spill] sm:$0xff] %v10137_v37 }
  0xf5   : > { %18166 = vst [vmem:[#allocation41_spill] sm:$0xff] %v10091_v48  ;;  %1150 = vperm.xlu1 %9294, %v540_v41   ;;  %v17732_v62 = vrot.slane %v10091_v48, 7  ;;  %v17731_v63 = vrot.slane %v10091_v48, 1  ;;  %v8635_v0 = vpop.f32.mrb[2].mxu0 }
  0xf6   : > { %v10111_v6 = vmul.f32 %v8635_v0, %v9803_v11  ;;  %v2135_v9 = vpop.f32.mrb[3].mxu0  ;;  %8793 = vmatmul.mubr.msk.f32.gmra.mrb[108].mxu0 %vm1514_vm1, %v362_v52 }
  0xf7   : > { %1155 = vperm.xlu0 %9293, %v541_v54   ;;  %v3565_v12 = vsel %vm3386_vm2, %v17732_v62, %v3205_v55  ;;  %v10122_v13 = vsel %vm3927_vm3, %v17731_v63, %v3748_v56  ;;  %v10125_v18 = vmul.f32 %v2135_v9, %v9789_v5  ;;  %8795 = vmatprep.mubr.msk.f32.mxu0 %vm1514_vm1, %v363_v57  ;;  %v366_v9 = vld [vmem:[%s9472_s29 + $0x388] sm:$0xff]  ;;  %v367_v62 = vld [vmem:[%s9472_s29 + $0x390] sm:$0xff] }
  0xf8   : > { %18168 = vst [vmem:[#allocation43_spill] sm:$0xff] %v10111_v6  ;;  %18169 = vst [vmem:[#allocation44_spill] sm:$0xff] %v10122_v13  ;;  %v3207_v22 = vrot.slane %v10111_v6, 7  ;;  %v10191_v13 = vpop.permute.xlu1 %790 }
  0xf9   : > { %18170 = vst [vmem:[#allocation45_spill] sm:$0xff] %v10125_v18  ;;  %1160 = vperm.xlu1 %9294, %v542_v3   ;;  %v3206_v32 = vrot.slane %v10125_v18, 7  ;;  %v8638_v34 = vpop.f32.mrb[4].mxu0  ;;  %v3749_v45 = vrot.slane %v10125_v18, 1  ;;  %18180 = vst [vmem:[#allocation54_spill] sm:$0xff] %v10191_v13 }
  0xfa   : > { %v10145_v52 = vmul.f32 %v8638_v34, %v9817_v17  ;;  %v2145_v54 = vpop.f32.mrb[5].mxu0  ;;  %8796 = vmatmul.mubr.msk.f32.gmra.mrb[110].mxu0 %vm1514_vm1, %v364_v19  ;;  %v545_v34 = vld [vmem:[%s17725_s1 + $0x380] sm:$0xff]  ;;  %v3568_v19 = vadd.f32 %v3565_v12, %v10085_v44  ;;  %v10174_v12 = vpop.permute.xlu0 %785 }
  0xfb   : > { %1165 = vperm.xlu0 %9293, %v543_v21   ;;  %v10150_v57 = vsel %vm3386_vm2, %v3206_v32, %v3207_v22  ;;  %v3564_v0 = vsel %vm3386_vm2, %v3205_v55, %v3206_v32  ;;  %v10155_v3 = vmul.f32 %v2145_v54, %v9809_v14  ;;  %8798 = vmatprep.mubr.msk.f32.mxu0 %vm1514_vm1, %v365_v24  ;;  %v546_v24 = vld [vmem:[%s17725_s1 + $0x388] sm:$0xff] }
  0xfc   : > { %18173 = vst [vmem:[#allocation48_spill] sm:$0xff] %v10145_v52  ;;  %18174 = vst [vmem:[#allocation49_spill] sm:$0xff] %v10150_v57  ;;  %v3569_v21 = vadd.f32 %v3564_v0, %v10125_v18  ;;  %v3209_v63 = vrot.slane %v10145_v52, 7  ;;  %v18178_v0 = vrot.slane %v10111_v6, 1  ;;  %v4105_v11 = vsel %vm3927_vm3, %v3748_v56, %v3749_v45 }
  0xfd   : > { %18175 = vst [vmem:[#allocation50_spill] sm:$0xff] %v10155_v3  ;;  %1170 = vperm.xlu1 %9294, %v544_v40   ;;  %v3208_v55 = vrot.slane %v10155_v3, 7  ;;  %v8641_v32 = vpop.f32.mrb[6].mxu0  ;;  %18177 = vst [vmem:[#allocation52_spill] sm:$0xff] %v10174_v12  ;;  %v10196_v57 = vadd.f32 %v4105_v11, %v3568_v19  ;;  %v548_v19 = vld [vmem:[%s17725_s1 + $0x398] sm:$0xff] }
  0xfe   : > { %v10171_v54 = vmul.f32 %v8641_v32, %v9831_v23  ;;  %v2155_v41 = vpop.f32.mrb[7].mxu0  ;;  %8799 = vmatmul.mubr.msk.f32.gmra.mrb[112].mxu0 %vm1514_vm1, %v366_v9  ;;  %v4104_v40 = vsel %vm3927_vm3, %v3749_v45, %v18178_v0  ;;  %v547_v0 = vld [vmem:[%s17725_s1 + $0x390] sm:$0xff] }
  0xff   : > { %1175 = vperm.xlu0 %9293, %v545_v34   ;;  %v3561_v2 = vsel %vm3386_vm2, %v3208_v55, %v3209_v63  ;;  %v3562_v32 = vsel %vm3386_vm2, %v3207_v22, %v3208_v55  ;;  %v10187_v9 = vmul.f32 %v2155_v41, %v9823_v20  ;;  %8801 = vmatprep.mubr.msk.f32.mxu0 %vm1514_vm1, %v367_v62  ;;  %v368_v34 = vld [vmem:[%s9472_s29 + $0x398] sm:$0xff]  ;;  %v369_v55 = vld [vmem:[%s9472_s29 + $0x3a0] sm:$0xff]  ;;  %v3752_v62 = vrot.slane %v10145_v52, 1 }
 0x100   : > { %18176 = vst [vmem:[#allocation51_spill] sm:$0xff] %v10171_v54  ;;  %18181 = vst [vmem:[#allocation55_spill] sm:$0xff] %v10196_v57  ;;  %v10199_v56 = vadd.f32 %v3562_v32, %v10155_v3  ;;  %v3572_v45 = vadd.f32 %v3561_v2, %v10145_v52  ;;  %v3211_v22 = vrot.slane %v10171_v54, 7  ;;  %v3754_v41 = vrot.slane %v10171_v54, 1 }
 0x101   : > { %18179 = vst [vmem:[#allocation53_spill] sm:$0xff] %v10187_v9  ;;  %1180 = vperm.xlu1 %9294, %v546_v24   ;;  %v3210_v14 = vrot.slane %v10187_v9, 7  ;;  %v3753_v16 = vrot.slane %v10187_v9, 1  ;;  %v8644_v11 = vpop.f32.mrb[8].mxu0  ;;  %v10211_v2 = vadd.f32 %v4104_v40, %v3569_v21  ;;  %v370_v40 = vld [vmem:[%s9472_s29 + $0x3a8] sm:$0xff] }
 0x102   : > { %18182 = vst [vmem:[#allocation56_spill] sm:$0xff] %v10199_v56  ;;  %v10214_v32 = vmul.f32 %v8644_v11, %v9845_v29  ;;  %v2165_v8 = vpop.f32.mrb[9].mxu0  ;;  %8802 = vmatmul.mubr.msk.f32.gmra.mrb[114].mxu0 %vm1514_vm1, %v368_v34  ;;  %v549_v34 = vld [vmem:[%s17725_s1 + $0x3a0] sm:$0xff] }
 0x103   : > { %18183 = vst [vmem:[#allocation57_spill] sm:$0xff] %v10211_v2  ;;  %1185 = vperm.xlu0 %9293, %v547_v0   ;;  %v3559_v24 = vsel %vm3386_vm2, %v3210_v14, %v3211_v22  ;;  %v3560_v56 = vsel %vm3386_vm2, %v3209_v63, %v3210_v14  ;;  %v4100_v25 = vsel %vm3927_vm3, %v3753_v16, %v3754_v41  ;;  %v371_v14 = vld [vmem:[%s9472_s29 + $0x3b0] sm:$0xff]  ;;  %v10236_v63 = vpop.permute.xlu0 %795  ;;  %v10243_v0 = vpop.permute.xlu1 %800 }
 0x104   : > { %18184 = vst [vmem:[#allocation58_spill] sm:$0xff] %v10214_v32  ;;  %v4101_v21 = vsel %vm3927_vm3, %v3752_v62, %v3753_v16  ;;  %8804 = vmatprep.mubr.msk.f32.mxu0 %vm1514_vm1, %v369_v55  ;;  %v3573_v11 = vadd.f32 %v3560_v56, %v10187_v9  ;;  %v10233_v5 = vadd.f32 %v3559_v24, %v10171_v54  ;;  %18185 = vst [vmem:[#allocation59_spill] sm:$0xff] %v10236_v63  ;;  %v550_v56 = vld [vmem:[%s17725_s1 + $0x3a8] sm:$0xff] }
 0x105   : > { %1190 = vperm.xlu1 %9294, %v548_v19   ;;  %v3213_v16 = vrot.slane %v10214_v32, 7  ;;  %v3756_v55 = vrot.slane %v10214_v32, 1  ;;  %v10241_v57 = vmul.f32 %v2165_v8, %v9837_v26  ;;  %v8647_v2 = vpop.f32.mrb[10].mxu0  ;;  %v4113_v4 = vadd.f32 %v4101_v21, %v3572_v45  ;;  %18187 = vst [vmem:[#allocation61_spill] sm:$0xff] %v10243_v0  ;;  %v372_v0 = vld [vmem:[%s9472_s29 + $0x3b8] sm:$0xff] }
 0x106   : > { %v4114_v24 = vadd.f32 %v4100_v25, %v3573_v11  ;;  %v10249_v19 = vmul.f32 %v8647_v2, %v9859_v35  ;;  %v2175_v15 = vpop.f32.mrb[11].mxu0  ;;  %8805 = vmatmul.mubr.msk.f32.gmra.mrb[116].mxu0 %vm1514_vm1, %v370_v40  ;;  %v551_v25 = vld [vmem:[%s17725_s1 + $0x3b0] sm:$0xff]  ;;  %v373_v11 = vld [vmem:[%s9472_s29 + $0x3c0] sm:$0xff] }
 0x107   : > { %18186 = vst [vmem:[#allocation60_spill] sm:$0xff] %v10241_v57  ;;  %1195 = vperm.xlu0 %9293, %v549_v34   ;;  %v3212_v8 = vrot.slane %v10241_v57, 7  ;;  %v3755_v63 = vrot.slane %v10241_v57, 1  ;;  %v10255_v45 = vmul.f32 %v2175_v15, %v9855_v33  ;;  %v4293_v21 = vadd.f32 %v4113_v4, %v10091_v48  ;;  %8807 = vmatprep.mubr.msk.f32.mxu0 %vm1514_vm1, %v371_v14 }
 0x108   : > { %v4294_v34 = vadd.f32 %v4114_v24, %v10085_v44  ;;  %v18188_v15 = vrot.slane %v10155_v3, 1  ;;  %v18193_v37 = vrot.slane %v10249_v19, 1 }
 0x109   : > { %1200 = vperm.xlu1 %9294, %v550_v56   ;;  %v3557_v14 = vsel %vm3386_vm2, %v3212_v8, %v3213_v16  ;;  %v3558_v48 = vsel %vm3386_vm2, %v3211_v22, %v3212_v8  ;;  %v4098_v2 = vsel %vm3927_vm3, %v3755_v63, %v3756_v55  ;;  %v4099_v24 = vsel %vm3927_vm3, %v3754_v41, %v3755_v63  ;;  %v8650_v40 = vpop.f32.mrb[12].mxu0  ;;  %v552_v56 = vld [vmem:[%s17725_s1 + $0x3b8] sm:$0xff]  ;;  %v10291_v41 = vpop.permute.xlu0 %805  ;;  %v10296_v63 = vld [vmem:[%s17727_s3] ss:$0 sm:$0xff] }
 0x10a   : > { %v10271_v4 = vsel %vm3927_vm3, %v18188_v15, %v3752_v62  ;;  %v3575_v62 = vadd.f32 %v3558_v48, %v10241_v57  ;;  %v10286_v15 = vadd.f32 %v3557_v14, %v10214_v32  ;;  %v4474_v44 = vadd.f32 %v4294_v34, %v10249_v19  ;;  %v2185_v8 = vpop.f32.mrb[13].mxu0  ;;  %8808 = vmatmul.mubr.msk.f32.gmra.mrb[118].mxu0 %vm1514_vm1, %v372_v0  ;;  %v374_v0 = vld [vmem:[%s9472_s29 + $0x3c8] sm:$0xff] }
 0x10b   : > { %18189 = vst [vmem:[#allocation62_spill] sm:$0xff] %v10271_v4  ;;  %v3214_v22 = vrot.slane %v10255_v45, 7  ;;  %18190 = vst [vmem:[#allocation63_spill] sm:$0xff] %v10291_v41  ;;  %1205 = vperm.xlu0 %9293, %v551_v25   ;;  %v3757_v48 = vrot.slane %v10255_v45, 1  ;;  %v4473_v14 = vadd.f32 %v4293_v21, %v10255_v45  ;;  %v10301_v34 = vmul.f32 %v8650_v40, %v9877_v43  ;;  %v10308_v41 = vpop.permute.xlu1 %810  ;;  %v553_v25 = vld [vmem:[%s17725_s1 + $0x3c0] sm:$0xff] }
 0x10c   : > { %v10304_v4 = vmul.f32 %v2185_v8, %v9875_v42  ;;  %8810 = vmatprep.mubr.msk.f32.mxu0 %vm1514_vm1, %v373_v11  ;;  %18191 = vst [vmem:[#allocation64_spill] sm:$0xff] %v10308_v41  ;;  %v4116_v12 = vadd.f32 %v4098_v2, %v3575_v62  ;;  %v4654_v13 = vmul.f32 %v4474_v44, %v9823_v20  ;;  %v18192_v21 = vrot.slane %v10249_v19, 7 }
 0x10d   : > { %v3556_v8 = vsel %vm3386_vm2, %v3213_v16, %v3214_v22  ;;  %1210 = vperm.xlu1 %9294, %v552_v56   ;;  %v4096_v44 = vsel %vm3927_vm3, %v3757_v48, %v18193_v37  ;;  %v4097_v2 = vsel %vm3927_vm3, %v3756_v55, %v3757_v48  ;;  %v8653_v62 = vpop.f32.mrb[14].mxu0  ;;  %v554_v16 = vld [vmem:[%s17725_s1 + $0x3c8] sm:$0xff] }
 0x10e   : > { %v3555_v40 = vsel %vm3386_vm2, %v3214_v22, %v18192_v21  ;;  %v3577_v11 = vadd.f32 %v3556_v8, %v10255_v45  ;;  %v4841_v56 = vadd.f32 %v10296_v63, %v4654_v13  ;;  %v4653_v22 = vmul.f32 %v4473_v14, %v9817_v17  ;;  %v2195_v8 = vpop.f32.mrb[15].mxu0  ;;  %8811 = vmatmul.mubr.msk.f32.gmra.mrb[120].mxu0 %vm1514_vm1, %v374_v0  ;;  %v376_v13 = vld [vmem:[%s9472_s29 + $0x3d8] sm:$0xff] }
 0x10f   : > { %v10323_v41 = vadd.f32 %v3555_v40, %v10249_v19  ;;  %1215 = vperm.xlu0 %9293, %v553_v25   ;;  %v4296_v55 = vadd.f32 %v4116_v12, %v10111_v6  ;;  %v3216_v48 = vrot.slane %v10304_v4, 7  ;;  %v3759_v46 = vrot.slane %v10304_v4, 1  ;;  %8813 = vmatprep.mubr.msk.f32.mxu0 %vm1514_vm1, %v375_v31  ;;  %v377_v25 = vld [vmem:[%s9472_s29 + $0x3e0] sm:$0xff]  ;;  %v555_v12 = vld [vmem:[%s17725_s1 + $0x3d0] sm:$0xff] }
 0x110   : > { %v4118_v37 = vadd.f32 %v4096_v44, %v3577_v11  ;;  %v10345_v14 = vmul.f32 %v4841_v56, %v9823_v20  ;;  %v4840_v21 = vadd.f32 %v10296_v63, %v4653_v22  ;;  %v4115_v40 = vadd.f32 %v4099_v24, %v10233_v5  ;;  %v10353_v11 = vpop.permute.xlu0 %815  ;;  %v10371_v20 = vpop.permute.xlu1 %820 }
 0x111   : > { %v10350_v0 = vmul.f32 %v8653_v62, %v9897_v51  ;;  %18195 = vst [vmem:[#allocation66_spill] sm:$0xff] %v10353_v11  ;;  %1220 = vperm.xlu1 %9294, %v554_v16   ;;  %v4476_v31 = vadd.f32 %v4296_v55, %v10301_v34  ;;  %v18196_v44 = vrot.slane %v10301_v34, 7  ;;  %v18197_v5 = vrot.slane %v10249_v19, 7  ;;  %v8656_v22 = vpop.f32.mrb[16].mxu0  ;;  %18199 = vst [vmem:[#allocation67_spill] sm:$0xff] %v10371_v20  ;;  %v556_v55 = vld [vmem:[%s17725_s1 + $0x3d8] sm:$0xff] }
 0x112   : > { %18194 = vst [vmem:[#allocation65_spill] sm:$0xff] %v10345_v14  ;;  %v18198_v62 = vrot.slane %v10301_v34, 1  ;;  %v2205_v6 = vpop.f32.mrb[17].mxu0  ;;  %8814 = vmatmul.mubr.msk.f32.gmra.mrb[122].mxu0 %vm1514_vm1, %v376_v13  ;;  %v4295_v20 = vadd.f32 %v4115_v40, %v10125_v18  ;;  %v4117_v13 = vadd.f32 %v4097_v2, %v10286_v15  ;;  %v557_v40 = vld [vmem:[%s17725_s1 + $0x3e0] sm:$0xff]  ;;  %v558_v15 = vld [vmem:[%s17725_s1 + $0x3e8] sm:$0xff] }
 0x113   : > { %v3553_v56 = vsel %vm3386_vm2, %v3216_v48, %v18196_v44  ;;  %v3554_v24 = vsel %vm3386_vm2, %v18197_v5, %v3216_v48  ;;  %v10377_v44 = vmul.f32 %v4840_v21, %v9817_v17  ;;  %v18201_v5 = vrot.slane %v10249_v19, 1  ;;  %8816 = vmatprep.mubr.msk.f32.mxu0 %vm1514_vm1, %v377_v25  ;;  %1225 = vperm.xlu0 %9293, %v555_v12   ;;  %v380_v21 = vld [vmem:[%s9472_s29 + $0x3f8] sm:$0xff] }
 0x114   : > { %v4094_v16 = vsel %vm3927_vm3, %v3759_v46, %v18198_v62  ;;  %v3579_v14 = vadd.f32 %v3554_v24, %v10304_v4  ;;  %v10381_v48 = vadd.f32 %v3553_v56, %v10301_v34  ;;  %v4656_v11 = vmul.f32 %v4476_v31, %v9837_v26  ;;  %v378_v56 = vld [vmem:[%s9472_s29 + $0x3e8] sm:$0xff]  ;;  %v10431_v18 = vpop.permute.xlu1 %830  ;;  %v381_v24 = vld [vmem:[%s9472_s29 + $0x400] sm:$0xff] }
 0x115   : > { %18200 = vst [vmem:[#allocation68_spill] sm:$0xff] %v10377_v44  ;;  %v4095_v62 = vsel %vm3927_vm3, %v18201_v5, %v3759_v46  ;;  %v4298_v44 = vadd.f32 %v4118_v37, %v10145_v52  ;;  %v10396_v46 = vmul.f32 %v2195_v8, %v9893_v49  ;;  %v379_v5 = vld [vmem:[%s9472_s29 + $0x3f0] sm:$0xff]  ;;  %1230 = vperm.xlu1 %9294, %v556_v55   ;;  %v10411_v8 = vpop.f32.mrb[18].mxu0  ;;  %18204 = vst [vmem:[#allocation71_spill] sm:$0xff] %v10431_v18 }
 0x116   : > { %v4120_v17 = vadd.f32 %v4094_v16, %v3579_v14  ;;  %v4843_v31 = vadd.f32 %v10296_v63, %v4656_v11  ;;  %v4475_v25 = vadd.f32 %v4295_v20, %v10304_v4  ;;  %v10406_v12 = vmul.f32 %v8656_v22, %v9915_v59  ;;  %v2215_v16 = vpop.f32.mrb[19].mxu0  ;;  %8817 = vmatmul.mubr.msk.f32.gmra.mrb[124].mxu0 %vm1514_vm1, %v378_v56 }
 0x117   : > { %v10409_v37 = vmul.f32 %v2205_v6, %v9913_v58  ;;  %v4478_v2 = vadd.f32 %v4298_v44, %v10350_v0  ;;  %v3218_v14 = vrot.slane %v10396_v46, 7  ;;  %v3761_v11 = vrot.slane %v10396_v46, 1  ;;  %v10421_v6 = vpop.permute.xlu0 %825  ;;  %8819 = vmatprep.mubr.msk.f32.mxu0 %vm1514_vm1, %v379_v5  ;;  %1235 = vperm.xlu0 %9293, %v557_v40   ;;  %v559_v40 = vld [vmem:[%s17725_s1 + $0x3f0] sm:$0xff] }
 0x118   : > { %v4297_v20 = vadd.f32 %v4117_v13, %v10155_v3  ;;  %18202 = vst [vmem:[#allocation69_spill] sm:$0xff] %v10421_v6  ;;  %v10424_v22 = vmul.f32 %v4843_v31, %v9837_v26  ;;  %v4655_v55 = vmul.f32 %v4475_v25, %v9831_v23  ;;  %v18205_v56 = vrot.slane %v10350_v0, 7 }
 0x119   : > { %v4658_v13 = vmul.f32 %v4478_v2, %v9855_v33  ;;  %v18206_v26 = vrot.slane %v10301_v34, 7  ;;  %v18207_v44 = vrot.slane %v10350_v0, 1  ;;  %1240 = vperm.xlu1 %9294, %v558_v15   ;;  %v560_v15 = vld [vmem:[%s17725_s1 + $0x3f8] sm:$0xff]  ;;  %v3763_v6 = vrot.slane %v10409_v37, 1 }
 0x11a   : > { %18203 = vst [vmem:[#allocation70_spill] sm:$0xff] %v10424_v22  ;;  %v3551_v31 = vsel %vm3386_vm2, %v3218_v14, %v18205_v56  ;;  %v4842_v2 = vadd.f32 %v10296_v63, %v4655_v55  ;;  %v4477_v55 = vadd.f32 %v4297_v20, %v10396_v46  ;;  %8820 = vmatmul.mubr.msk.f32.gmra.mrb[126].mxu0 %vm1514_vm1, %v380_v21  ;;  %v382_v20 = vld [vmem:[%s9472_s29 + $0x408] sm:$0xff]  ;;  %v18211_v21 = vrot.slane %v10406_v12, 7 }
 0x11b   : > { %v3552_v25 = vsel %vm3386_vm2, %v18206_v26, %v3218_v14  ;;  %v4092_v5 = vsel %vm3927_vm3, %v3761_v11, %v18207_v44  ;;  %v10453_v22 = vadd.f32 %v3551_v31, %v10350_v0  ;;  %v18208_v26 = vrot.slane %v10301_v34, 1  ;;  %v8662_v44 = vpop.f32.mrb[20].mxu0  ;;  %8822 = vmatprep.mubr.msk.f32.mxu0 %vm1514_vm1, %v381_v24  ;;  %1245 = vperm.xlu0 %9293, %v559_v40  }
 0x11c   : > { %v3581_v56 = vadd.f32 %v3552_v25, %v10396_v46  ;;  %v4845_v52 = vadd.f32 %v10296_v63, %v4658_v13  ;;  %v4300_v25 = vadd.f32 %v4120_v17, %v10171_v54  ;;  %v3220_v31 = vrot.slane %v10409_v37, 7  ;;  %v10466_v3 = vpop.f32.mrb[21].mxu0 }
 0x11d   : > { %v4093_v14 = vsel %vm3927_vm3, %v18208_v26, %v3761_v11  ;;  %v10470_v11 = vmul.f32 %v4842_v2, %v9831_v23  ;;  %v4119_v18 = vadd.f32 %v4095_v62, %v10323_v41  ;;  %v4657_v13 = vmul.f32 %v4477_v55, %v9845_v29  ;;  %v383_v2 = vld [vmem:[%s9472_s29 + $0x410] sm:$0xff]  ;;  %1250 = vperm.xlu1 %9294, %v560_v15   ;;  %v10503_v15 = vpop.f32.mrb[22].mxu0 }
 0x11e   : > { %v4122_v26 = vadd.f32 %v4092_v5, %v3581_v56  ;;  %v10477_v17 = vmul.f32 %v4845_v52, %v9855_v33  ;;  %v4480_v54 = vadd.f32 %v4300_v25, %v10406_v12  ;;  %v3549_v5 = vsel %vm3386_vm2, %v3220_v31, %v18211_v21  ;;  %v10486_v56 = vpop.permute.xlu0 %835  ;;  %v10505_v21 = vpop.permute.xlu1 %840  ;;  %8823 = vmatmul.mubr.msk.f32.gmra.mrb[128].mxu0 %vm1514_vm1, %v382_v20 }
 0x11f   : > { %18209 = vst [vmem:[#allocation72_spill] sm:$0xff] %v10470_v11  ;;  %18212 = vst [vmem:[#allocation74_spill] sm:$0xff] %v10486_v56  ;;  %v18213_v41 = vrot.slane %v10350_v0, 7  ;;  %v10493_v52 = vadd.f32 %v3549_v5, %v10406_v12  ;;  %v18214_v24 = vrot.slane %v10406_v12, 1  ;;  %v18215_v55 = vrot.slane %v10350_v0, 1  ;;  %v2235_v23 = vpop.f32.mrb[23].mxu0  ;;  %8825 = vmatprep.mubr.msk.f32.mxu0 %vm1514_vm1, %v383_v2 }
 0x120   : > { %18210 = vst [vmem:[#allocation73_spill] sm:$0xff] %v10477_v17  ;;  %18216 = vst [vmem:[#allocation75_spill] sm:$0xff] %v10505_v21  ;;  %v4844_v5 = vadd.f32 %v10296_v63, %v4657_v13  ;;  %v4299_v33 = vadd.f32 %v4119_v18, %v10187_v9  ;;  %v4302_v13 = vadd.f32 %v4122_v26, %v10214_v32  ;;  %v384_v18 = vld [vmem:[%s9472_s29 + $0x418] sm:$0xff]  ;;  %v385_v11 = vld [vmem:[%s9472_s29 + $0x420] sm:$0xff] }
 0x121   : > { %v3550_v62 = vsel %vm3386_vm2, %v18213_v41, %v3220_v31  ;;  %v4090_v40 = vsel %vm3927_vm3, %v3763_v6, %v18214_v24  ;;  %v4091_v25 = vsel %vm3927_vm3, %v18215_v55, %v3763_v6  ;;  %v561_v31 = vld [vmem:[%s17725_s1 + $0x400] sm:$0xff]  ;;  %v4660_v41 = vmul.f32 %v4480_v54, %v9875_v42  ;;  %v562_v6 = vld [vmem:[%s17725_s1 + $0x408] sm:$0xff]  ;;  %v10541_v2 = vpop.f32.mrb[24].mxu0 }
 0x122   : > { %v3583_v24 = vadd.f32 %v3550_v62, %v10409_v37  ;;  %v10520_v55 = vmul.f32 %v10411_v8, %v9973_v28  ;;  %v10524_v54 = vmul.f32 %v2215_v16, %v9931_v1  ;;  %v4121_v62 = vadd.f32 %v4093_v14, %v10381_v48  ;;  %1255 = vperm.xlu0 %9293, %v561_v31  }
 0x123   : > { %v10530_v20 = vmul.f32 %v4844_v5, %v9845_v29  ;;  %v10533_v17 = vadd.f32 %v10296_v63, %v4660_v41  ;;  %v4479_v8 = vadd.f32 %v4299_v33, %v10409_v37  ;;  %1260 = vperm.xlu1 %9294, %v562_v6   ;;  %v10552_v41 = vmul.f32 %v8662_v44, %v9991_v39  ;;  %v10557_v6 = vpop.permute.xlu0 %845  ;;  %v386_v29 = vld [vmem:[%s9472_s29 + $0x428] sm:$0xff] }
 0x124   : > { %v4124_v42 = vadd.f32 %v4090_v40, %v3583_v24  ;;  %v17786_v26 = vrot.slane %v10520_v55, 7  ;;  %v4482_v48 = vadd.f32 %v4302_v13, %v10520_v55  ;;  %v3222_v14 = vrot.slane %v10524_v54, 7  ;;  %v563_v40 = vld [vmem:[%s17725_s1 + $0x410] sm:$0xff]  ;;  %v10554_v24 = vpop.f32.mrb[25].mxu0  ;;  %8826 = vmatmul.mubr.msk.f32.gmra.mrb[130].mxu0 %vm1514_vm1, %v384_v18  ;;  %18220 = vst [vmem:[#allocation79_spill] sm:$0xff] %v10557_v6  ;;  %v564_v13 = vld [vmem:[%s17725_s1 + $0x418] sm:$0xff] }
 0x125   : > { %18217 = vst [vmem:[#allocation76_spill] sm:$0xff] %v10530_v20  ;;  %18218 = vst [vmem:[#allocation77_spill] sm:$0xff] %v10533_v17  ;;  %v10547_v33 = vmul.f32 %v4479_v8, %v9859_v35  ;;  %v3765_v31 = vrot.slane %v10524_v54, 1  ;;  %v4301_v5 = vadd.f32 %v4121_v62, %v10241_v57  ;;  %v18221_v44 = vrot.slane %v10406_v12, 7  ;;  %8828 = vmatprep.mubr.msk.f32.mxu0 %vm1514_vm1, %v385_v11  ;;  %v10574_v20 = vpop.permute.xlu1 %850 }
 0x126   : > { %v4662_v8 = vmul.f32 %v4482_v48, %v9893_v49  ;;  %v3547_v62 = vsel %vm3386_vm2, %v3222_v14, %v17786_v26  ;;  %v4304_v18 = vadd.f32 %v4124_v42, %v10249_v19  ;;  %18222 = vst [vmem:[#allocation80_spill] sm:$0xff] %v10574_v20  ;;  %v18223_v49 = vrot.slane %v10520_v55, 1  ;;  %v387_v19 = vld [vmem:[%s9472_s29 + $0x430] sm:$0xff]  ;;  %1265 = vperm.xlu0 %9293, %v563_v40  }
 0x127   : > { %18219 = vst [vmem:[#allocation78_spill] sm:$0xff] %v10547_v33  ;;  %v3548_v16 = vsel %vm3386_vm2, %v18221_v44, %v3222_v14  ;;  %v10578_v48 = vadd.f32 %v3547_v62, %v10520_v55  ;;  %v18224_v35 = vrot.slane %v10406_v12, 1  ;;  %v3225_v14 = vrot.slane %v10552_v41, 7  ;;  %v10595_v44 = vpop.f32.mrb[26].mxu0  ;;  %1270 = vperm.xlu1 %9294, %v564_v13   ;;  %v566_v13 = vld [vmem:[%s17725_s1 + $0x428] sm:$0xff] }
 0x128   : > { %v3585_v17 = vadd.f32 %v3548_v16, %v10524_v54  ;;  %v4088_v26 = vsel %vm3927_vm3, %v3765_v31, %v18223_v49  ;;  %v10590_v11 = vadd.f32 %v10296_v63, %v4662_v8  ;;  %v4481_v16 = vadd.f32 %v4301_v5, %v10524_v54  ;;  %v565_v49 = vld [vmem:[%s17725_s1 + $0x420] sm:$0xff]  ;;  %v10606_v8 = vpop.f32.mrb[27].mxu0  ;;  %8829 = vmatmul.mubr.msk.f32.gmra.mrb[132].mxu0 %vm1514_vm1, %v386_v29 }
 0x129   : > { %v4089_v42 = vsel %vm3927_vm3, %v18224_v35, %v3765_v31  ;;  %v4484_v40 = vadd.f32 %v4304_v18, %v10552_v41  ;;  %v10603_v31 = vmul.f32 %v10466_v3, %v9989_v38  ;;  %v4123_v5 = vadd.f32 %v4091_v25, %v10453_v22  ;;  %8831 = vmatprep.mubr.msk.f32.mxu0 %vm1514_vm1, %v387_v19  ;;  %v388_v22 = vld [vmem:[%s9472_s29 + $0x438] sm:$0xff]  ;;  %v10636_v19 = vpop.f32.mrb[28].mxu0 }
 0x12a   : > { %18225 = vst [vmem:[#allocation81_spill] sm:$0xff] %v10590_v11  ;;  %v4126_v35 = vadd.f32 %v4088_v26, %v3585_v17  ;;  %v4661_v62 = vmul.f32 %v4481_v16, %v9877_v43  ;;  %v10615_v17 = vmul.f32 %v10503_v15, %v10011_v50  ;;  %v10618_v26 = vmul.f32 %v2235_v23, %v10007_v47  ;;  %v389_v11 = vld [vmem:[%s9472_s29 + $0x440] sm:$0xff]  ;;  %v10628_v43 = vpop.permute.xlu0 %855  ;;  %v10656_v15 = vpop.f32.mrb[29].mxu0 }
 0x12b   : > { %v4125_v3 = vadd.f32 %v4089_v42, %v10493_v52  ;;  %v4664_v29 = vmul.f32 %v4484_v40, %v9913_v58  ;;  %v3224_v25 = vrot.slane %v10603_v31, 7  ;;  %v3767_v18 = vrot.slane %v10603_v31, 1  ;;  %18226 = vst [vmem:[#allocation82_spill] sm:$0xff] %v10628_v43  ;;  %1275 = vperm.xlu0 %9293, %v565_v49   ;;  %v10638_v40 = vpop.permute.xlu1 %860  ;;  %1280 = vperm.xlu1 %9294, %v566_v13   ;;  %v390_v58 = vld [vmem:[%s9472_s29 + $0x448] sm:$0xff] }
 0x12c   : > { %v4303_v16 = vadd.f32 %v4123_v5, %v10255_v45  ;;  %v10631_v23 = vadd.f32 %v10296_v63, %v4661_v62  ;;  %v4306_v42 = vadd.f32 %v4126_v35, %v10301_v34  ;;  %18228 = vst [vmem:[#allocation84_spill] sm:$0xff] %v10638_v40  ;;  %v567_v45 = vld [vmem:[%s17725_s1 + $0x430] sm:$0xff]  ;;  %v18230_v5 = vrot.slane %v10520_v55, 7  ;;  %8832 = vmatmul.mubr.msk.f32.gmra.mrb[134].mxu0 %vm1514_vm1, %v388_v22 }
 0x12d   : > { %v10644_v49 = vadd.f32 %v10296_v63, %v4664_v29  ;;  %v3545_v62 = vsel %vm3386_vm2, %v3224_v25, %v3225_v14  ;;  %v18231_v35 = vrot.slane %v10552_v41, 1  ;;  %v568_v29 = vld [vmem:[%s17725_s1 + $0x438] sm:$0xff]  ;;  %8834 = vmatprep.mubr.msk.f32.mxu0 %vm1514_vm1, %v389_v11  ;;  %v3769_v33 = vrot.slane %v10618_v26, 1 }
 0x12e   : > { %18227 = vst [vmem:[#allocation83_spill] sm:$0xff] %v10631_v23  ;;  %v3546_v34 = vsel %vm3386_vm2, %v18230_v5, %v3224_v25  ;;  %v18232_v25 = vrot.slane %v10520_v55, 1  ;;  %v4486_v22 = vadd.f32 %v4306_v42, %v10615_v17  ;;  %v3226_v23 = vrot.slane %v10618_v26, 7 }
 0x12f   : > { %18229 = vst [vmem:[#allocation85_spill] sm:$0xff] %v10644_v49  ;;  %v4086_v13 = vsel %vm3927_vm3, %v3767_v18, %v18231_v35  ;;  %v3587_v52 = vadd.f32 %v3546_v34, %v10603_v31  ;;  %v10664_v49 = vadd.f32 %v3545_v62, %v10552_v41  ;;  %v4483_v35 = vadd.f32 %v4303_v16, %v10603_v31  ;;  %v391_v62 = vld [vmem:[%s9472_s29 + $0x450] sm:$0xff]  ;;  %v10687_v16 = vpop.f32.mrb[30].mxu0 }
 0x130   : > { %v4087_v5 = vsel %vm3927_vm3, %v18232_v25, %v3767_v18  ;;  %v4305_v34 = vadd.f32 %v4125_v3, %v10304_v4  ;;  %1285 = vperm.xlu0 %9293, %v567_v45   ;;  %v10681_v18 = vmul.f32 %v10541_v2, %v10029_v61  ;;  %v10685_v11 = vmul.f32 %v10554_v24, %v10027_v60  ;;  %v569_v4 = vld [vmem:[%s17725_s1 + $0x440] sm:$0xff]  ;;  %v570_v25 = vld [vmem:[%s17725_s1 + $0x448] sm:$0xff] }
 0x131   : > { %v4128_v57 = vadd.f32 %v4086_v13, %v3587_v52  ;;  %v4663_v32 = vmul.f32 %v4483_v35, %v9897_v51  ;;  %1290 = vperm.xlu1 %9294, %v568_v29   ;;  %v4666_v3 = vmul.f32 %v4486_v22, %v9931_v1  ;;  %v18233_v52 = vrot.slane %v10615_v17, 7  ;;  %v10703_v13 = vpop.f32.mrb[31].mxu0  ;;  %8835 = vmatmul.mubr.msk.f32.gmra.mrb[136].mxu0 %vm1514_vm1, %v390_v58  ;;  %v10706_v29 = vpop.permute.xlu0 %865  ;;  %v392_v58 = vld [vmem:[%s9472_s29 + $0x458] sm:$0xff] }
 0x132   : > { %v3544_v42 = vsel %vm3386_vm2, %v3225_v14, %v3226_v23  ;;  %v18234_v24 = vrot.slane %v10615_v17, 1  ;;  %18235 = vst [vmem:[#allocation86_spill] sm:$0xff] %v10706_v29  ;;  %v18237_v22 = vrot.slane %v10552_v41, 1  ;;  %8837 = vmatprep.mubr.msk.f32.mxu0 %vm1514_vm1, %v391_v62  ;;  %v3771_v62 = vrot.slane %v10685_v11, 1 }
 0x133   : > { %v3543_v2 = vsel %vm3386_vm2, %v3226_v23, %v18233_v52  ;;  %v10712_v35 = vadd.f32 %v10296_v63, %v4663_v32  ;;  %v3589_v14 = vadd.f32 %v3544_v42, %v10618_v26  ;;  %v10727_v1 = vadd.f32 %v10296_v63, %v4666_v3 }
 0x134   : > { %v4084_v45 = vsel %vm3927_vm3, %v3769_v33, %v18234_v24  ;;  %v10716_v23 = vadd.f32 %v3543_v2, %v10615_v17  ;;  %v4085_v52 = vsel %vm3927_vm3, %v18237_v22, %v3769_v33  ;;  %v10724_v24 = vpop.permute.xlu1 %870  ;;  %v4485_v32 = vadd.f32 %v4305_v34, %v10618_v26  ;;  %1295 = vperm.xlu0 %9293, %v569_v4   ;;  %v10736_v22 = vpop.f32.mrb[32].mxu0  ;;  %v571_v34 = vld [vmem:[%s17725_s1 + $0x450] sm:$0xff] }
 0x135   : > { %18236 = vst [vmem:[#allocation87_spill] sm:$0xff] %v10712_v35  ;;  %18238 = vst [vmem:[#allocation88_spill] sm:$0xff] %v10724_v24  ;;  %v3229_v42 = vrot.slane %v10681_v18, 7  ;;  %v3772_v2 = vrot.slane %v10681_v18, 1  ;;  %v393_v35 = vld [vmem:[%s9472_s29 + $0x460] sm:$0xff]  ;;  %v4130_v51 = vadd.f32 %v4084_v45, %v3589_v14  ;;  %v4308_v9 = vadd.f32 %v4128_v57, %v10350_v0  ;;  %1300 = vperm.xlu1 %9294, %v570_v25   ;;  %v10751_v0 = vpop.f32.mrb[33].mxu0 }
 0x136   : > { %18239 = vst [vmem:[#allocation89_spill] sm:$0xff] %v10727_v1  ;;  %v3228_v33 = vrot.slane %v10685_v11, 7  ;;  %v4665_v3 = vmul.f32 %v4485_v32, %v9915_v59  ;;  %v4127_v1 = vadd.f32 %v4087_v5, %v10578_v48  ;;  %v10745_v4 = vmul.f32 %v10595_v44, %v10049_v10  ;;  %8838 = vmatmul.mubr.msk.f32.gmra.mrb[138].mxu0 %vm1514_vm1, %v392_v58  ;;  %v572_v45 = vld [vmem:[%s17725_s1 + $0x458] sm:$0xff]  ;;  %v394_v14 = vld [vmem:[%s9472_s29 + $0x468] sm:$0xff] }
 0x137   : > { %v10749_v57 = vmul.f32 %v10606_v8, %v10045_v7  ;;  %v4488_v25 = vadd.f32 %v4308_v9, %v10681_v18  ;;  %v18240_v44 = vrot.slane %v10615_v17, 7  ;;  %v4082_v8 = vsel %vm3927_vm3, %v3771_v62, %v3772_v2  ;;  %8840 = vmatprep.mubr.msk.f32.mxu0 %vm1514_vm1, %v393_v35 }
 0x138   : > { %v3541_v48 = vsel %vm3386_vm2, %v3228_v33, %v3229_v42  ;;  %v10769_v58 = vadd.f32 %v10296_v63, %v4665_v3  ;;  %v18242_v59 = vrot.slane %v10615_v17, 1  ;;  %1305 = vperm.xlu0 %9293, %v571_v34   ;;  %v4307_v24 = vadd.f32 %v4127_v1, %v10396_v46 }
 0x139   : > { %v3542_v5 = vsel %vm3386_vm2, %v18240_v44, %v3228_v33  ;;  %v10773_v9 = vadd.f32 %v3541_v48, %v10681_v18  ;;  %v10779_v33 = vpop.permute.xlu0 %875  ;;  %v395_v44 = vld [vmem:[%s9472_s29 + $0x470] sm:$0xff]  ;;  %v4668_v35 = vmul.f32 %v4488_v25, %v9989_v38  ;;  %v17806_v3 = vrot.slane %v10745_v4, 7  ;;  %v10788_v48 = vpop.permute.xlu1 %880  ;;  %1310 = vperm.xlu1 %9294, %v572_v45   ;;  %v574_v45 = vld [vmem:[%s17725_s1 + $0x468] sm:$0xff] }
 0x13a   : > { %18241 = vst [vmem:[#allocation90_spill] sm:$0xff] %v10769_v58  ;;  %v3591_v32 = vadd.f32 %v3542_v5, %v10685_v11  ;;  %v4083_v29 = vsel %vm3927_vm3, %v18242_v59, %v3771_v62  ;;  %18243 = vst [vmem:[#allocation91_spill] sm:$0xff] %v10779_v33  ;;  %v10786_v58 = vpop.f32.mrb[34].mxu0  ;;  %v573_v59 = vld [vmem:[%s17725_s1 + $0x460] sm:$0xff]  ;;  %v4310_v34 = vadd.f32 %v4130_v51, %v10406_v12  ;;  %v3230_v1 = vrot.slane %v10749_v57, 7 }
 0x13b   : > { %18244 = vst [vmem:[#allocation92_spill] sm:$0xff] %v10788_v48  ;;  %v3773_v46 = vrot.slane %v10749_v57, 1  ;;  %v10796_v25 = vpop.f32.mrb[35].mxu0  ;;  %8841 = vmatmul.mubr.msk.f32.gmra.mrb[140].mxu0 %vm1514_vm1, %v394_v14  ;;  %v10803_v5 = vadd.f32 %v10296_v63, %v4668_v35  ;;  %v4129_v51 = vadd.f32 %v4085_v52, %v10664_v49  ;;  %v10809_v12 = vmul.f32 %v10636_v19, %v10067_v30  ;;  %v397_v19 = vld [vmem:[%s9472_s29 + $0x480] sm:$0xff] }
 0x13c   : > { %v4132_v62 = vadd.f32 %v4082_v8, %v3591_v32  ;;  %v4487_v8 = vadd.f32 %v4307_v24, %v10685_v11  ;;  %8843 = vmatprep.mubr.msk.f32.mxu0 %vm1514_vm1, %v395_v44  ;;  %v396_v32 = vld [vmem:[%s9472_s29 + $0x478] sm:$0xff]  ;;  %v4490_v14 = vadd.f32 %v4310_v34, %v10745_v4  ;;  %v3539_v38 = vsel %vm3386_vm2, %v3230_v1, %v17806_v3 }
 0x13d   : > { %18245 = vst [vmem:[#allocation93_spill] sm:$0xff] %v10803_v5  ;;  %v3540_v35 = vsel %vm3386_vm2, %v3229_v42, %v3230_v1  ;;  %v18246_v24 = vrot.slane %v10745_v4, 1  ;;  %1315 = vperm.xlu0 %9293, %v573_v59   ;;  %v10828_v34 = vadd.f32 %v3539_v38, %v10745_v4  ;;  %v4081_v3 = vsel %vm3927_vm3, %v3772_v2, %v3773_v46  ;;  %v10832_v5 = vpop.f32.mrb[36].mxu0  ;;  %v575_v42 = vld [vmem:[%s17725_s1 + $0x470] sm:$0xff]  ;;  %v10844_v2 = vpop.permute.xlu0 %885 }
 0x13e   : > { %v4667_v52 = vmul.f32 %v4487_v8, %v9973_v28  ;;  %v3593_v44 = vadd.f32 %v3540_v35, %v10749_v57  ;;  %1320 = vperm.xlu1 %9294, %v574_v45   ;;  %v4670_v59 = vmul.f32 %v4490_v14, %v10007_v47  ;;  %v4309_v1 = vadd.f32 %v4129_v51, %v10409_v37  ;;  %v10841_v35 = vpop.f32.mrb[37].mxu0  ;;  %v401_v47 = vld [vmem:[%s9472_s29 + $0x4a0] sm:$0xff] }
 0x13f   : > { %v4080_v49 = vsel %vm3927_vm3, %v3773_v46, %v18246_v24  ;;  %8844 = vmatmul.mubr.msk.f32.gmra.mrb[142].mxu0 %vm1514_vm1, %v396_v32  ;;  %18247 = vst [vmem:[#allocation94_spill] sm:$0xff] %v10844_v2  ;;  %v576_v46 = vld [vmem:[%s17725_s1 + $0x478] sm:$0xff]  ;;  %v4312_v37 = vadd.f32 %v4132_v62, %v10520_v55  ;;  %v10855_v51 = vmul.f32 %v10656_v15, %v10065_v27  ;;  %v10858_v24 = vpop.permute.xlu1 %890  ;;  %v398_v32 = vld [vmem:[%s9472_s29 + $0x488] sm:$0xff]  ;;  %v399_v55 = vld [vmem:[%s9472_s29 + $0x490] sm:$0xff] }
 0x140   : > { %v10850_v45 = vadd.f32 %v10296_v63, %v4667_v52  ;;  %v4134_v14 = vadd.f32 %v4080_v49, %v3593_v44  ;;  %8846 = vmatprep.mubr.msk.f32.mxu0 %vm1514_vm1, %v397_v19  ;;  %18249 = vst [vmem:[#allocation96_spill] sm:$0xff] %v10858_v24  ;;  %v10862_v38 = vadd.f32 %v10296_v63, %v4670_v59  ;;  %v10875_v59 = vpop.f32.mrb[38].mxu0 }
 0x141   : > { %v4489_v8 = vadd.f32 %v4309_v1, %v10749_v57  ;;  %v4131_v52 = vadd.f32 %v4083_v29, %v10716_v23  ;;  %v10868_v49 = vmul.f32 %v10687_v16, %v10095_v53  ;;  %1325 = vperm.xlu0 %9293, %v575_v42   ;;  %v4492_v15 = vadd.f32 %v4312_v37, %v10809_v12  ;;  %v577_v29 = vld [vmem:[%s17725_s1 + $0x480] sm:$0xff]  ;;  %v10884_v37 = vpop.f32.mrb[39].mxu0  ;;  %v400_v42 = vld [vmem:[%s9472_s29 + $0x498] sm:$0xff] }
 0x142   : > { %18248 = vst [vmem:[#allocation95_spill] sm:$0xff] %v10850_v45  ;;  %18250 = vst [vmem:[#allocation97_spill] sm:$0xff] %v10862_v38  ;;  %v3232_v62 = vrot.slane %v10855_v51, 7  ;;  %v3775_v19 = vrot.slane %v10855_v51, 1  ;;  %v4314_v44 = vadd.f32 %v4134_v14, %v10552_v41  ;;  %1330 = vperm.xlu1 %9294, %v576_v46   ;;  %v578_v41 = vld [vmem:[%s17725_s1 + $0x488] sm:$0xff]  ;;  %v18251_v14 = vrot.slane %v10809_v12, 7 }
 0x143   : > { %v4669_v16 = vmul.f32 %v4489_v8, %v9991_v39  ;;  %v4311_v23 = vadd.f32 %v4131_v52, %v10524_v54  ;;  %8847 = vmatmul.mubr.msk.f32.gmra.mrb[144].mxu0 %vm1514_vm1, %v398_v32  ;;  %v4672_v46 = vmul.f32 %v4492_v15, %v10027_v60  ;;  %v18252_v8 = vrot.slane %v10745_v4, 7  ;;  %v10930_v39 = vpop.permute.xlu1 %900 }
 0x144   : > { %v3537_v54 = vsel %vm3386_vm2, %v3232_v62, %v18251_v14  ;;  %v18253_v1 = vrot.slane %v10809_v12, 1  ;;  %8849 = vmatprep.mubr.msk.f32.mxu0 %vm1514_vm1, %v399_v55  ;;  %v18255_v38 = vrot.slane %v10745_v4, 1  ;;  %18259 = vst [vmem:[#allocation101_spill] sm:$0xff] %v10930_v39  ;;  %v18271_v39 = vld [vmem:[#allocation52_spill] sm:$0xff] }
 0x145   : > { %v3538_v52 = vsel %vm3386_vm2, %v18252_v8, %v3232_v62  ;;  %v10906_v15 = vadd.f32 %v10296_v63, %v4669_v16  ;;  %v10910_v14 = vadd.f32 %v3537_v54, %v10809_v12  ;;  %v10916_v8 = vpop.permute.xlu0 %895  ;;  %1335 = vperm.xlu0 %9293, %v577_v29   ;;  %v10920_v55 = vadd.f32 %v10296_v63, %v4672_v46 }
 0x146   : > { %v4078_v32 = vsel %vm3927_vm3, %v3775_v19, %v18253_v1  ;;  %v3595_v60 = vadd.f32 %v3538_v52, %v10855_v51  ;;  %v4079_v62 = vsel %vm3927_vm3, %v18255_v38, %v3775_v19  ;;  %18256 = vst [vmem:[#allocation99_spill] sm:$0xff] %v10916_v8  ;;  %v4491_v16 = vadd.f32 %v4311_v23, %v10855_v51  ;;  %v18258_v52 = vld [vmem:[#allocation40_spill] sm:$0xff]  ;;  %v579_v38 = vld [vmem:[%s17725_s1 + $0x490] sm:$0xff] }
 0x147   : > { %18254 = vst [vmem:[#allocation98_spill] sm:$0xff] %v10906_v15  ;;  %18257 = vst [vmem:[#allocation100_spill] sm:$0xff] %v10920_v55  ;;  %v4494_v1 = vadd.f32 %v4314_v44, %v10868_v49  ;;  %v10926_v54 = vmul.f32 %v10703_v13, %v18258_v52  ;;  %v10928_v15 = vpop.f32.mrb[40].mxu0  ;;  %1340 = vperm.xlu1 %9294, %v578_v41   ;;  %v4133_v29 = vadd.f32 %v4081_v3, %v10773_v9  ;;  %v18260_v23 = vld [vmem:[#allocation47_spill] sm:$0xff]  ;;  %v18261_v13 = vld [vmem:[#allocation46_spill] sm:$0xff] }
 0x148   : > { %v4136_v19 = vadd.f32 %v4078_v32, %v3595_v60  ;;  %v10938_v44 = vmul.f32 %v10736_v22, %v18260_v23  ;;  %v10942_v46 = vmul.f32 %v10751_v0, %v18261_v13  ;;  %v10944_v55 = vpop.f32.mrb[41].mxu0  ;;  %8850 = vmatmul.mubr.msk.f32.gmra.mrb[146].mxu0 %vm1514_vm1, %v400_v42  ;;  %v580_v41 = vld [vmem:[%s17725_s1 + $0x498] sm:$0xff]  ;;  %v4671_v60 = vmul.f32 %v4491_v16, %v10011_v50  ;;  %v402_v0 = vld [vmem:[%s9472_s29 + $0x4a8] sm:$0xff]  ;;  %v403_v8 = vld [vmem:[%s9472_s29 + $0x4b0] sm:$0xff] }
 0x149   : > { %v4674_v9 = vmul.f32 %v4494_v1, %v10045_v7  ;;  %v3234_v3 = vrot.slane %v10926_v54, 7  ;;  %v3777_v22 = vrot.slane %v10926_v54, 1  ;;  %8852 = vmatprep.mubr.msk.f32.mxu0 %vm1514_vm1, %v401_v47  ;;  %v4313_v32 = vadd.f32 %v4133_v29, %v10603_v31  ;;  %1345 = vperm.xlu0 %9293, %v579_v38   ;;  %v10975_v42 = vpop.f32.mrb[42].mxu0  ;;  %v18270_v50 = vld [vmem:[#allocation54_spill] sm:$0xff] }
 0x14a   : > { %v4316_v28 = vadd.f32 %v4136_v19, %v10615_v17  ;;  %v10962_v16 = vadd.f32 %v10296_v63, %v4671_v60  ;;  %v18264_v7 = vrot.slane %v10868_v49, 7  ;;  %v18265_v31 = vrot.slane %v10809_v12, 7  ;;  %v581_v17 = vld [vmem:[%s17725_s1 + $0x4a0] sm:$0xff] }
 0x14b   : > { %v10965_v1 = vadd.f32 %v10296_v63, %v4674_v9  ;;  %1350 = vperm.xlu1 %9294, %v580_v41   ;;  %v18267_v9 = vrot.slane %v10809_v12, 1  ;;  %v3236_v45 = vrot.slane %v10942_v46, 7 }
 0x14c   : > { %18262 = vst [vmem:[#allocation102_spill] sm:$0xff] %v10962_v16  ;;  %v3535_v47 = vsel %vm3386_vm2, %v3234_v3, %v18264_v7  ;;  %v3536_v29 = vsel %vm3386_vm2, %v18265_v31, %v3234_v3  ;;  %v18266_v7 = vrot.slane %v10868_v49, 1  ;;  %v10992_v3 = vpop.permute.xlu0 %905  ;;  %v10994_v31 = vpop.f32.mrb[43].mxu0  ;;  %8853 = vmatmul.mubr.msk.f32.gmra.mrb[148].mxu0 %vm1514_vm1, %v402_v0  ;;  %v4135_v0 = vadd.f32 %v4079_v62, %v10828_v34 }
 0x14d   : > { %18263 = vst [vmem:[#allocation103_spill] sm:$0xff] %v10965_v1  ;;  %v3597_v38 = vadd.f32 %v3536_v29, %v10926_v54  ;;  %v10982_v19 = vadd.f32 %v3535_v47, %v10868_v49  ;;  %v4077_v41 = vsel %vm3927_vm3, %v18267_v9, %v3777_v22  ;;  %18268 = vst [vmem:[#allocation104_spill] sm:$0xff] %v10992_v3  ;;  %v582_v47 = vld [vmem:[%s17725_s1 + $0x4a8] sm:$0xff]  ;;  %v3779_v1 = vrot.slane %v10942_v46, 1  ;;  %v404_v9 = vld [vmem:[%s9472_s29 + $0x4b8] sm:$0xff]  ;;  %v11028_v62 = vpop.f32.mrb[44].mxu0 }
 0x14e   : > { %v4076_v60 = vsel %vm3927_vm3, %v3777_v22, %v18266_v7  ;;  %v4493_v29 = vadd.f32 %v4313_v32, %v10926_v54  ;;  %v4496_v7 = vadd.f32 %v4316_v28, %v10938_v44  ;;  %v11004_v22 = vpop.permute.xlu1 %910  ;;  %8855 = vmatprep.mubr.msk.f32.mxu0 %vm1514_vm1, %v403_v8  ;;  %v11011_v3 = vmul.f32 %v10786_v58, %v18270_v50  ;;  %v405_v28 = vld [vmem:[%s9472_s29 + $0x4c0] sm:$0xff] }
 0x14f   : > { %18269 = vst [vmem:[#allocation105_spill] sm:$0xff] %v11004_v22  ;;  %v4138_v16 = vadd.f32 %v4076_v60, %v3597_v38  ;;  %v11015_v32 = vmul.f32 %v10796_v25, %v18271_v39  ;;  %1355 = vperm.xlu0 %9293, %v581_v17   ;;  %v18272_v8 = vrot.slane %v10938_v44, 7  ;;  %v18273_v34 = vrot.slane %v10868_v49, 7  ;;  %1360 = vperm.xlu1 %9294, %v582_v47   ;;  %v583_v25 = vld [vmem:[%s17725_s1 + $0x4b0] sm:$0xff] }
 0x150   : > { %v4673_v2 = vmul.f32 %v4493_v29, %v10029_v61  ;;  %v4676_v22 = vmul.f32 %v4496_v7, %v10065_v27  ;;  %v18274_v29 = vrot.slane %v10938_v44, 1  ;;  %8856 = vmatmul.mubr.msk.f32.gmra.mrb[150].mxu0 %vm1514_vm1, %v404_v9  ;;  %v11064_v33 = vpop.permute.xlu0 %915  ;;  %v18279_v27 = vld [vmem:[#allocation61_spill] sm:$0xff] }
 0x151   : > { %v3533_v38 = vsel %vm3386_vm2, %v3236_v45, %v18272_v8  ;;  %v3534_v58 = vsel %vm3386_vm2, %v18273_v34, %v3236_v45  ;;  %v18275_v45 = vrot.slane %v10868_v49, 1  ;;  %v11045_v8 = vpop.f32.mrb[45].mxu0  ;;  %8858 = vmatprep.mubr.msk.f32.mxu0 %vm1514_vm1, %v405_v28  ;;  %v4318_v61 = vadd.f32 %v4138_v16, %v10681_v18  ;;  %18278 = vst [vmem:[#allocation108_spill] sm:$0xff] %v11064_v33  ;;  %v585_v16 = vld [vmem:[%s17725_s1 + $0x4c0] sm:$0xff] }
 0x152   : > { %v3599_v17 = vadd.f32 %v3534_v58, %v10942_v46  ;;  %v11035_v60 = vadd.f32 %v3533_v38, %v10938_v44  ;;  %v4074_v7 = vsel %vm3927_vm3, %v3779_v1, %v18274_v29  ;;  %v584_v38 = vld [vmem:[%s17725_s1 + $0x4b8] sm:$0xff]  ;;  %v11052_v34 = vadd.f32 %v10296_v63, %v4673_v2  ;;  %v407_v2 = vld [vmem:[%s9472_s29 + $0x4d0] sm:$0xff]  ;;  %v11076_v18 = vpop.f32.mrb[46].mxu0 }
 0x153   : > { %v4075_v47 = vsel %vm3927_vm3, %v18275_v45, %v3779_v1  ;;  %v11055_v58 = vadd.f32 %v10296_v63, %v4676_v22  ;;  %v4315_v29 = vadd.f32 %v4135_v0, %v10618_v26  ;;  %v406_v1 = vld [vmem:[%s9472_s29 + $0x4c8] sm:$0xff]  ;;  %v3238_v24 = vrot.slane %v11015_v32, 7  ;;  %1365 = vperm.xlu0 %9293, %v583_v25   ;;  %1370 = vperm.xlu1 %9294, %v584_v38   ;;  %v11091_v38 = vpop.f32.mrb[47].mxu0 }
 0x154   : > { %18276 = vst [vmem:[#allocation106_spill] sm:$0xff] %v11052_v34  ;;  %v4140_v45 = vadd.f32 %v4074_v7, %v3599_v17  ;;  %v3781_v26 = vrot.slane %v11015_v32, 1  ;;  %v4137_v0 = vadd.f32 %v4077_v41, %v10910_v14  ;;  %v11072_v28 = vmul.f32 %v10832_v5, %v18279_v27  ;;  %v11074_v17 = vpop.permute.xlu1 %920  ;;  %8859 = vmatmul.mubr.msk.f32.gmra.mrb[152].mxu0 %vm1514_vm1, %v406_v1 }
 0x155   : > { %18277 = vst [vmem:[#allocation107_spill] sm:$0xff] %v11055_v58  ;;  %v4495_v22 = vadd.f32 %v4315_v29, %v10942_v46  ;;  %18280 = vst [vmem:[#allocation109_spill] sm:$0xff] %v11074_v17  ;;  %v4498_v25 = vadd.f32 %v4318_v61, %v11011_v3  ;;  %v18281_v7 = vrot.slane %v11011_v3, 7  ;;  %v18282_v5 = vrot.slane %v10938_v44, 7  ;;  %v586_v61 = vld [vmem:[%s17725_s1 + $0x4c8] sm:$0xff]  ;;  %8861 = vmatprep.mubr.msk.f32.mxu0 %vm1514_vm1, %v407_v2 }
 0x156   : > { %v4320_v29 = vadd.f32 %v4140_v45, %v10745_v4  ;;  %v18283_v34 = vrot.slane %v11011_v3, 1  ;;  %v18284_v45 = vrot.slane %v10938_v44, 1 }
 0x157   : > { %v3531_v14 = vsel %vm3386_vm2, %v3238_v24, %v18281_v7  ;;  %v3532_v41 = vsel %vm3386_vm2, %v18282_v5, %v3238_v24  ;;  %v4675_v9 = vmul.f32 %v4495_v22, %v10049_v10  ;;  %v408_v24 = vld [vmem:[%s9472_s29 + $0x4d8] sm:$0xff]  ;;  %v4678_v1 = vmul.f32 %v4498_v25, %v18258_v52  ;;  %1375 = vperm.xlu0 %9293, %v585_v16   ;;  %v11121_v25 = vpop.f32.mrb[48].mxu0 }
 0x158   : > { %v3601_v7 = vadd.f32 %v3532_v41, %v11015_v32  ;;  %v11100_v58 = vadd.f32 %v3531_v14, %v11011_v3  ;;  %v4072_v4 = vsel %vm3927_vm3, %v3781_v26, %v18283_v34  ;;  %v4073_v22 = vsel %vm3927_vm3, %v18284_v45, %v3781_v26  ;;  %v409_v41 = vld [vmem:[%s9472_s29 + $0x4e0] sm:$0xff]  ;;  %1380 = vperm.xlu1 %9294, %v586_v61   ;;  %v11137_v61 = vpop.f32.mrb[49].mxu0  ;;  %v18289_v45 = vld [vmem:[#allocation64_spill] sm:$0xff]  ;;  %v11153_v2 = vpop.permute.xlu1 %930 }
 0x159   : > { %v4317_v5 = vadd.f32 %v4137_v0, %v10685_v11  ;;  %v11117_v10 = vadd.f32 %v10296_v63, %v4675_v9  ;;  %v4500_v33 = vadd.f32 %v4320_v29, %v11072_v28  ;;  %v587_v11 = vld [vmem:[%s17725_s1 + $0x4d0] sm:$0xff]  ;;  %v11127_v26 = vadd.f32 %v10296_v63, %v4678_v1  ;;  %v11135_v29 = vpop.permute.xlu0 %925  ;;  %8862 = vmatmul.mubr.msk.f32.gmra.mrb[154].mxu0 %vm1514_vm1, %v408_v24  ;;  %v410_v24 = vld [vmem:[%s9472_s29 + $0x4e8] sm:$0xff]  ;;  %v11168_v52 = vpop.f32.mrb[50].mxu0 }
 0x15a   : > { %v4142_v34 = vadd.f32 %v4072_v4, %v3601_v7  ;;  %v18287_v9 = vld [vmem:[#allocation59_spill] sm:$0xff]  ;;  %v4139_v7 = vadd.f32 %v4075_v47, %v10982_v19  ;;  %18288 = vst [vmem:[#allocation112_spill] sm:$0xff] %v11135_v29  ;;  %v588_v4 = vld [vmem:[%s17725_s1 + $0x4d8] sm:$0xff]  ;;  %18291 = vst [vmem:[#allocation113_spill] sm:$0xff] %v11153_v2  ;;  %8864 = vmatprep.mubr.msk.f32.mxu0 %vm1514_vm1, %v409_v41 }
 0x15b   : > { %18285 = vst [vmem:[#allocation110_spill] sm:$0xff] %v11117_v10  ;;  %18286 = vst [vmem:[#allocation111_spill] sm:$0xff] %v11127_v26  ;;  %v4497_v0 = vadd.f32 %v4317_v5, %v11015_v32  ;;  %v11132_v16 = vmul.f32 %v10841_v35, %v18287_v9  ;;  %v4680_v1 = vmul.f32 %v4500_v33, %v18261_v13  ;;  %v18290_v19 = vld [vmem:[#allocation63_spill] sm:$0xff]  ;;  %1385 = vperm.xlu0 %9293, %v587_v11   ;;  %v413_v29 = vld [vmem:[%s9472_s29 + $0x500] sm:$0xff] }
 0x15c   : > { %v11146_v5 = vmul.f32 %v10875_v59, %v18289_v45  ;;  %v4322_v35 = vadd.f32 %v4142_v34, %v10809_v12  ;;  %v11151_v47 = vmul.f32 %v10884_v37, %v18290_v19  ;;  %v4319_v59 = vadd.f32 %v4139_v7, %v10749_v57  ;;  %v411_v13 = vld [vmem:[%s9472_s29 + $0x4f0] sm:$0xff]  ;;  %1390 = vperm.xlu1 %9294, %v588_v4   ;;  %v11176_v57 = vld [vmem:[%s17727_s3] ss:$0 sm:$0xff]  ;;  %v11193_v37 = vpop.f32.mrb[51].mxu0 }
 0x15d   : > { %v4677_v14 = vmul.f32 %v4497_v0, %v10067_v30  ;;  %v3240_v26 = vrot.slane %v11132_v16, 7  ;;  %v3783_v33 = vrot.slane %v11132_v16, 1  ;;  %v11163_v12 = vadd.f32 %v10296_v63, %v4680_v1  ;;  %v589_v0 = vld [vmem:[%s17725_s1 + $0x4e0] sm:$0xff]  ;;  %8865 = vmatmul.mubr.msk.f32.gmra.mrb[156].mxu0 %vm1514_vm1, %v410_v24  ;;  %v11228_v17 = vpop.f32.mrb[52].mxu0 }
 0x15e   : > { %v4502_v41 = vadd.f32 %v4322_v35, %v11146_v5  ;;  %v18294_v11 = vrot.slane %v11072_v28, 7  ;;  %v18295_v1 = vrot.slane %v11011_v3, 7  ;;  %v18296_v35 = vrot.slane %v11072_v28, 1  ;;  %8867 = vmatprep.mubr.msk.f32.mxu0 %vm1514_vm1, %v411_v13  ;;  %v18300_v13 = vld [vmem:[#allocation66_spill] sm:$0xff]  ;;  %18302 = vst [vmem:[#allocation118_spill] sm:$0xff] %v11228_v17  ;;  %v417_v17 = vld [vmem:[%s9472_s29 + $0x520] sm:$0xff] }
 0x15f   : > { %18292 = vst [vmem:[#allocation114_spill] sm:$0xff] %v11163_v12  ;;  %v11179_v63 = vadd.f32 %v11176_v57, %v4677_v14  ;;  %v590_v14 = vld [vmem:[%s17725_s1 + $0x4e8] sm:$0xff]  ;;  %v3242_v30 = vrot.slane %v11151_v47, 7  ;;  %v3785_v10 = vrot.slane %v11151_v47, 1  ;;  %1395 = vperm.xlu0 %9293, %v589_v0  }
 0x160   : > { %v3529_v7 = vsel %vm3386_vm2, %v3240_v26, %v18294_v11  ;;  %v3530_v4 = vsel %vm3386_vm2, %v18295_v1, %v3240_v26  ;;  %v4070_v34 = vsel %vm3927_vm3, %v3783_v33, %v18296_v35  ;;  %v18297_v26 = vrot.slane %v11011_v3, 1  ;;  %1400 = vperm.xlu1 %9294, %v590_v14  }
 0x161   : > { %18293 = vst [vmem:[#allocation115_spill] sm:$0xff] %v11179_v63  ;;  %v3603_v11 = vadd.f32 %v3530_v4, %v11132_v16  ;;  %v11201_v12 = vadd.f32 %v3529_v7, %v11072_v28  ;;  %v4499_v35 = vadd.f32 %v4319_v59, %v11132_v16  ;;  %v412_v63 = vld [vmem:[%s9472_s29 + $0x4f8] sm:$0xff]  ;;  %v4682_v24 = vmul.f32 %v4502_v41, %v18271_v39  ;;  %v11214_v7 = vpop.permute.xlu0 %935  ;;  %v11226_v39 = vpop.permute.xlu1 %940 }
 0x162   : > { %v4071_v1 = vsel %vm3927_vm3, %v18297_v26, %v3783_v33  ;;  %v4141_v4 = vadd.f32 %v4073_v22, %v11035_v60  ;;  %18298 = vst [vmem:[#allocation116_spill] sm:$0xff] %v11214_v7  ;;  %v18299_v26 = vld [vmem:[#allocation67_spill] sm:$0xff]  ;;  %v11224_v41 = vmul.f32 %v10944_v55, %v18300_v13  ;;  %18301 = vst [vmem:[#allocation117_spill] sm:$0xff] %v11226_v39  ;;  %v18305_v55 = vrot.slane %v11072_v28, 7 }
 0x163   : > { %v4144_v2 = vadd.f32 %v4070_v34, %v3603_v11  ;;  %v4679_v33 = vmul.f32 %v4499_v35, %v10095_v53  ;;  %v11220_v59 = vmul.f32 %v10928_v15, %v18299_v26  ;;  %v591_v60 = vld [vmem:[%s17725_s1 + $0x4f0] sm:$0xff]  ;;  %v11234_v22 = vadd.f32 %v11176_v57, %v4682_v24  ;;  %v11248_v35 = vpop.f32.mrb[53].mxu0  ;;  %8868 = vmatmul.mubr.msk.f32.gmra.mrb[158].mxu0 %vm1514_vm1, %v412_v63  ;;  %v592_v24 = vld [vmem:[%s17725_s1 + $0x4f8] sm:$0xff]  ;;  %v414_v63 = vld [vmem:[%s9472_s29 + $0x508] sm:$0xff] }
 0x164   : > { %v18304_v15 = vrot.slane %v11146_v5, 7  ;;  %v3528_v0 = vsel %vm3386_vm2, %v18305_v55, %v3242_v30  ;;  %v18306_v14 = vrot.slane %v11146_v5, 1  ;;  %18307 = vst [vmem:[#allocation120_spill] sm:$0xff] %v11248_v35  ;;  %v18309_v55 = vrot.slane %v11072_v28, 1  ;;  %8870 = vmatprep.mubr.msk.f32.mxu0 %vm1514_vm1, %v413_v29  ;;  %1405 = vperm.xlu0 %9293, %v591_v60   ;;  %v18312_v60 = vld [vmem:[#allocation69_spill] sm:$0xff] }
 0x165   : > { %18303 = vst [vmem:[#allocation119_spill] sm:$0xff] %v11234_v22  ;;  %v3605_v22 = vadd.f32 %v3528_v0, %v11151_v47  ;;  %v4321_v53 = vadd.f32 %v4141_v4, %v10855_v51  ;;  %v3245_v7 = vrot.slane %v11220_v59, 7  ;;  %v415_v0 = vld [vmem:[%s9472_s29 + $0x510] sm:$0xff]  ;;  %v3244_v39 = vrot.slane %v11224_v41, 7  ;;  %1410 = vperm.xlu1 %9294, %v592_v24   ;;  %v593_v51 = vld [vmem:[%s17725_s1 + $0x500] sm:$0xff] }
 0x166   : > { %v3527_v34 = vsel %vm3386_vm2, %v3242_v30, %v18304_v15  ;;  %v4068_v11 = vsel %vm3927_vm3, %v3785_v10, %v18306_v14  ;;  %v11255_v15 = vadd.f32 %v11176_v57, %v4679_v33  ;;  %v4069_v14 = vsel %vm3927_vm3, %v18309_v55, %v3785_v10  ;;  %v11275_v55 = vpop.f32.mrb[54].mxu0 }
 0x167   : > { %v11259_v30 = vadd.f32 %v3527_v34, %v11146_v5  ;;  %v17846_v33 = vrot.slane %v11220_v59, 1  ;;  %v4146_v34 = vadd.f32 %v4068_v11, %v3605_v22  ;;  %v3787_v35 = vrot.slane %v11224_v41, 1  ;;  %18310 = vst [vmem:[#allocation122_spill] sm:$0xff] %v11275_v55  ;;  %8871 = vmatmul.mubr.msk.f32.gmra.mrb[160].mxu0 %vm1514_vm1, %v414_v63 }
 0x168   : > { %18308 = vst [vmem:[#allocation121_spill] sm:$0xff] %v11255_v15  ;;  %v4324_v15 = vadd.f32 %v4144_v2, %v10868_v49  ;;  %v4143_v10 = vadd.f32 %v4071_v1, %v11100_v58  ;;  %v4501_v29 = vadd.f32 %v4321_v53, %v11151_v47  ;;  %v18311_v2 = vld [vmem:[#allocation71_spill] sm:$0xff]  ;;  %v11288_v22 = vmul.f32 %v10994_v31, %v18312_v60  ;;  %v11290_v58 = vpop.permute.xlu0 %945  ;;  %v11292_v1 = vpop.f32.mrb[55].mxu0  ;;  %v594_v53 = vld [vmem:[%s17725_s1 + $0x508] sm:$0xff] }
 0x169   : > { %v11284_v4 = vmul.f32 %v10975_v42, %v18311_v2  ;;  %18313 = vst [vmem:[#allocation123_spill] sm:$0xff] %v11290_v58  ;;  %18314 = vst [vmem:[#allocation124_spill] sm:$0xff] %v11292_v1  ;;  %v3525_v11 = vsel %vm3386_vm2, %v3244_v39, %v3245_v7  ;;  %v18315_v42 = vrot.slane %v11146_v5, 7  ;;  %v4066_v24 = vsel %vm3927_vm3, %v3787_v35, %v17846_v33  ;;  %v11312_v58 = vpop.permute.xlu1 %950  ;;  %v416_v1 = vld [vmem:[%s9472_s29 + $0x518] sm:$0xff] }
 0x16a   : > { %v4504_v49 = vadd.f32 %v4324_v15, %v11220_v59  ;;  %v18316_v15 = vrot.slane %v11146_v5, 1  ;;  %18317 = vst [vmem:[#allocation125_spill] sm:$0xff] %v11312_v58  ;;  %8873 = vmatprep.mubr.msk.f32.mxu0 %vm1514_vm1, %v415_v0  ;;  %v4681_v55 = vmul.f32 %v4501_v29, %v18260_v23  ;;  %1415 = vperm.xlu0 %9293, %v593_v51   ;;  %v11325_v0 = vpop.f32.mrb[56].mxu0  ;;  %v595_v29 = vld [vmem:[%s17725_s1 + $0x510] sm:$0xff]  ;;  %v18343_v23 = vld [vmem:[#allocation86_spill] sm:$0xff] }
 0x16b   : > { %v3526_v31 = vsel %vm3386_vm2, %v18315_v42, %v3244_v39  ;;  %v3608_v42 = vadd.f32 %v3525_v11, %v11220_v59  ;;  %v4323_v33 = vadd.f32 %v4143_v10, %v10926_v54  ;;  %v17848_v48 = vrot.slane %v11284_v4, 7  ;;  %1420 = vperm.xlu1 %9294, %v594_v53   ;;  %v11337_v11 = vpop.f32.mrb[57].mxu0  ;;  %8874 = vmatmul.mubr.msk.f32.gmra.mrb[162].mxu0 %vm1514_vm1, %v416_v1 }
 0x16c   : > { %v4067_v63 = vsel %vm3927_vm3, %v18316_v15, %v3787_v35  ;;  %v4684_v2 = vmul.f32 %v4504_v49, %v18287_v9  ;;  %v3607_v39 = vadd.f32 %v3526_v31, %v11224_v41  ;;  %v4326_v15 = vadd.f32 %v4146_v34, %v10938_v44  ;;  %v596_v44 = vld [vmem:[%s17725_s1 + $0x518] sm:$0xff]  ;;  %8876 = vmatprep.mubr.msk.f32.mxu0 %vm1514_vm1, %v417_v17  ;;  %v418_v31 = vld [vmem:[%s9472_s29 + $0x528] sm:$0xff] }
 0x16d   : > { %v11331_v49 = vadd.f32 %v11176_v57, %v4681_v55  ;;  %v3246_v10 = vrot.slane %v11288_v22, 7  ;;  %v4503_v34 = vadd.f32 %v4323_v33, %v11224_v41  ;;  %v3789_v53 = vrot.slane %v11288_v22, 1 }
 0x16e   : > { %v11334_v51 = vadd.f32 %v11176_v57, %v4684_v2  ;;  %v4148_v54 = vadd.f32 %v4066_v24, %v3607_v39  ;;  %v4506_v55 = vadd.f32 %v4326_v15, %v11284_v4  ;;  %v4145_v2 = vadd.f32 %v4069_v14, %v11201_v12  ;;  %v11360_v15 = vpop.permute.xlu0 %955  ;;  %v419_v12 = vld [vmem:[%s9472_s29 + $0x530] sm:$0xff]  ;;  %1425 = vperm.xlu0 %9293, %v595_v29  }
 0x16f   : > { %18318 = vst [vmem:[#allocation126_spill] sm:$0xff] %v11331_v49  ;;  %v3523_v1 = vsel %vm3386_vm2, %v3246_v10, %v17848_v48  ;;  %v3524_v24 = vsel %vm3386_vm2, %v3245_v7, %v3246_v10  ;;  %v11357_v33 = vmul.f32 %v11028_v62, %v10505_v21  ;;  %18320 = vst [vmem:[#allocation128_spill] sm:$0xff] %v11360_v15  ;;  %v11369_v7 = vpop.permute.xlu1 %960  ;;  %v11371_v62 = vpop.f32.mrb[58].mxu0  ;;  %1430 = vperm.xlu1 %9294, %v596_v44   ;;  %v18342_v49 = vld [vmem:[#allocation88_spill] sm:$0xff] }
 0x170   : > { %18319 = vst [vmem:[#allocation127_spill] sm:$0xff] %v11334_v51  ;;  %v4328_v39 = vadd.f32 %v4148_v54, %v11011_v3  ;;  %v4683_v17 = vmul.f32 %v4503_v34, %v18270_v50  ;;  %v4686_v14 = vmul.f32 %v4506_v55, %v18290_v19  ;;  %v3609_v35 = vadd.f32 %v3524_v24, %v11288_v22  ;;  %v597_v3 = vld [vmem:[%s17725_s1 + $0x520] sm:$0xff]  ;;  %v11386_v44 = vpop.f32.mrb[59].mxu0  ;;  %v598_v24 = vld [vmem:[%s17725_s1 + $0x528] sm:$0xff] }
 0x171   : > { %v11367_v48 = vadd.f32 %v3523_v1, %v11284_v4  ;;  %18321 = vst [vmem:[#allocation129_spill] sm:$0xff] %v11369_v7  ;;  %v18322_v29 = vrot.slane %v11284_v4, 1  ;;  %v18323_v10 = vrot.slane %v11220_v59, 1  ;;  %v4325_v55 = vadd.f32 %v4145_v2, %v10942_v46  ;;  %8877 = vmatmul.mubr.msk.f32.gmra.mrb[164].mxu0 %vm1514_vm1, %v418_v31  ;;  %v420_v46 = vld [vmem:[%s9472_s29 + $0x538] sm:$0xff]  ;;  %v421_v51 = vld [vmem:[%s9472_s29 + $0x540] sm:$0xff] }
 0x172   : > { %v11396_v19 = vadd.f32 %v11176_v57, %v4686_v14  ;;  %8879 = vmatprep.mubr.msk.f32.mxu0 %vm1514_vm1, %v419_v12  ;;  %v4508_v31 = vadd.f32 %v4328_v39, %v11357_v33  ;;  %v11405_v1 = vmul.f32 %v11045_v8, %v10486_v56  ;;  %1435 = vperm.xlu0 %9293, %v597_v3   ;;  %v11418_v39 = vpop.f32.mrb[60].mxu0  ;;  %v599_v8 = vld [vmem:[%s17725_s1 + $0x530] sm:$0xff]  ;;  %v600_v3 = vld [vmem:[%s17725_s1 + $0x538] sm:$0xff] }
 0x173   : > { %v4064_v54 = vsel %vm3927_vm3, %v3789_v53, %v18322_v29  ;;  %v4065_v34 = vsel %vm3927_vm3, %v18323_v10, %v3789_v53  ;;  %v11393_v29 = vadd.f32 %v11176_v57, %v4683_v17  ;;  %v4505_v2 = vadd.f32 %v4325_v55, %v11288_v22  ;;  %1440 = vperm.xlu1 %9294, %v598_v24   ;;  %v423_v24 = vld [vmem:[%s9472_s29 + $0x550] sm:$0xff] }
 0x174   : > { %18325 = vst [vmem:[#allocation131_spill] sm:$0xff] %v11396_v19  ;;  %v4150_v53 = vadd.f32 %v4064_v54, %v3609_v35  ;;  %v4147_v17 = vadd.f32 %v4067_v63, %v11259_v30  ;;  %v11411_v35 = vmul.f32 %v11076_v18, %v10574_v20  ;;  %v11416_v12 = vmul.f32 %v11091_v38, %v10557_v6  ;;  %v11427_v38 = vpop.permute.xlu0 %965 }
 0x175   : > { %18324 = vst [vmem:[#allocation130_spill] sm:$0xff] %v11393_v29  ;;  %v4149_v54 = vadd.f32 %v4065_v34, %v3608_v42  ;;  %v4685_v30 = vmul.f32 %v4505_v2, %v18279_v27  ;;  %v4688_v18 = vmul.f32 %v4508_v31, %v18300_v13  ;;  %v3248_v63 = vrot.slane %v11405_v1, 7  ;;  %18326 = vst [vmem:[#allocation132_spill] sm:$0xff] %v11427_v38  ;;  %v11429_v42 = vpop.f32.mrb[61].mxu0  ;;  %v11439_v2 = vpop.permute.xlu1 %970  ;;  %v422_v31 = vld [vmem:[%s9472_s29 + $0x548] sm:$0xff] }
 0x176   : > { %v4330_v14 = vadd.f32 %v4150_v53, %v11072_v28  ;;  %v3791_v28 = vrot.slane %v11405_v1, 1  ;;  %8880 = vmatmul.mubr.msk.f32.gmra.mrb[166].mxu0 %vm1514_vm1, %v420_v46  ;;  %v4327_v34 = vadd.f32 %v4147_v17, %v11015_v32  ;;  %18327 = vst [vmem:[#allocation133_spill] sm:$0xff] %v11439_v2  ;;  %v18330_v13 = vrot.slane %v11357_v33, 7  ;;  %1445 = vperm.xlu0 %9293, %v599_v8   ;;  %v11470_v19 = vpop.f32.mrb[62].mxu0  ;;  %v601_v8 = vld [vmem:[%s17725_s1 + $0x540] sm:$0xff] }
 0x177   : > { %8882 = vmatprep.mubr.msk.f32.mxu0 %vm1514_vm1, %v421_v51  ;;  %v11444_v10 = vadd.f32 %v11176_v57, %v4685_v30  ;;  %v11447_v46 = vadd.f32 %v11176_v57, %v4688_v18  ;;  %v18331_v17 = vrot.slane %v11284_v4, 7  ;;  %v18332_v18 = vrot.slane %v11357_v33, 1  ;;  %1450 = vperm.xlu1 %9294, %v600_v3   ;;  %v429_v2 = vld [vmem:[%s9472_s29 + $0x580] sm:$0xff] }
 0x178   : > { %v4510_v53 = vadd.f32 %v4330_v14, %v11411_v35  ;;  %v3521_v32 = vsel %vm3386_vm2, %v3248_v63, %v18330_v13 }
 0x179   : > { %18328 = vst [vmem:[#allocation134_spill] sm:$0xff] %v11444_v10  ;;  %18329 = vst [vmem:[#allocation135_spill] sm:$0xff] %v11447_v46  ;;  %v3522_v14 = vsel %vm3386_vm2, %v18331_v17, %v3248_v63  ;;  %v11460_v30 = vadd.f32 %v3521_v32, %v11357_v33  ;;  %v4062_v55 = vsel %vm3927_vm3, %v3791_v28, %v18332_v18  ;;  %v18333_v46 = vrot.slane %v11284_v4, 1  ;;  %v11479_v18 = vpop.f32.mrb[63].mxu0 }
 0x17a   : > { %v3611_v51 = vadd.f32 %v3522_v14, %v11405_v1  ;;  %v4507_v63 = vadd.f32 %v4327_v34, %v11405_v1  ;;  %v4690_v32 = vmul.f32 %v4510_v53, %v18312_v60  ;;  %v3250_v17 = vrot.slane %v11416_v12, 7  ;;  %8883 = vmatmul.mubr.msk.f32.gmra.mrb[168].mxu0 %vm1514_vm1, %v422_v31  ;;  %v424_v60 = vld [vmem:[%s9472_s29 + $0x558] sm:$0xff]  ;;  %1455 = vperm.xlu0 %9293, %v601_v8   ;;  %v603_v8 = vld [vmem:[%s17725_s1 + $0x550] sm:$0xff] }
 0x17b   : > { %v4063_v13 = vsel %vm3927_vm3, %v18333_v46, %v3791_v28  ;;  %v3793_v14 = vrot.slane %v11416_v12, 1  ;;  %v602_v28 = vld [vmem:[%s17725_s1 + $0x548] sm:$0xff]  ;;  %v4329_v46 = vadd.f32 %v4149_v54, %v11132_v16  ;;  %v11488_v34 = vmul.f32 %v11121_v25, %v10638_v40  ;;  %8885 = vmatprep.mubr.msk.f32.mxu0 %vm1514_vm1, %v423_v24 }
 0x17c   : > { %v4152_v3 = vadd.f32 %v4062_v55, %v3611_v51  ;;  %v11492_v53 = vmul.f32 %v11137_v61, %v10628_v43  ;;  %v4687_v31 = vmul.f32 %v4507_v63, %v18289_v45  ;;  %v11498_v10 = vadd.f32 %v11176_v57, %v4690_v32  ;;  %v11508_v61 = vpop.permute.xlu0 %975  ;;  %v425_v51 = vld [vmem:[%s9472_s29 + $0x560] sm:$0xff]  ;;  %1460 = vperm.xlu1 %9294, %v602_v28   ;;  %v604_v28 = vld [vmem:[%s17725_s1 + $0x558] sm:$0xff] }
 0x17d   : > { %v18335_v55 = vrot.slane %v11411_v35, 7  ;;  %v18336_v25 = vrot.slane %v11357_v33, 7  ;;  %18337 = vst [vmem:[#allocation137_spill] sm:$0xff] %v11508_v61  ;;  %v18338_v32 = vrot.slane %v11411_v35, 1  ;;  %v4151_v50 = vadd.f32 %v4063_v13, %v11367_v48  ;;  %v18350_v61 = vld [vmem:[#allocation92_spill] sm:$0xff] }
 0x17e   : > { %18334 = vst [vmem:[#allocation136_spill] sm:$0xff] %v11498_v10  ;;  %8886 = vmatmul.mubr.msk.f32.gmra.mrb[170].mxu0 %vm1514_vm1, %v424_v60  ;;  %v4332_v9 = vadd.f32 %v4152_v3, %v11146_v5  ;;  %v11551_v60 = vmul.f32 %v11168_v52, %v18342_v49  ;;  %v427_v5 = vld [vmem:[%s9472_s29 + $0x570] sm:$0xff]  ;;  %1465 = vperm.xlu0 %9293, %v603_v8  }
 0x17f   : > { %v3519_v16 = vsel %vm3386_vm2, %v3250_v17, %v18335_v55  ;;  %v3520_v54 = vsel %vm3386_vm2, %v18336_v25, %v3250_v17  ;;  %v4060_v10 = vsel %vm3927_vm3, %v3793_v14, %v18338_v32  ;;  %v18339_v55 = vrot.slane %v11357_v33, 1  ;;  %v11523_v17 = vpop.permute.xlu1 %980  ;;  %v11525_v25 = vpop.f32.mrb[64].mxu0  ;;  %8888 = vmatprep.mubr.msk.f32.mxu0 %vm1514_vm1, %v425_v51 }
 0x180   : > { %v3613_v24 = vadd.f32 %v3520_v54, %v11416_v12  ;;  %v11513_v63 = vadd.f32 %v3519_v16, %v11411_v35  ;;  %18340 = vst [vmem:[#allocation138_spill] sm:$0xff] %v11523_v17  ;;  %v11531_v16 = vadd.f32 %v11176_v57, %v4687_v31  ;;  %v4509_v54 = vadd.f32 %v4329_v46, %v11416_v12 }
 0x181   : > { %v4061_v45 = vsel %vm3927_vm3, %v18339_v55, %v3793_v14  ;;  %v3253_v32 = vrot.slane %v11488_v34, 7  ;;  %v3796_v14 = vrot.slane %v11488_v34, 1  ;;  %v11536_v55 = vpop.f32.mrb[65].mxu0  ;;  %v3252_v31 = vrot.slane %v11492_v53, 7  ;;  %1470 = vperm.xlu1 %9294, %v604_v28   ;;  %v11583_v28 = vpop.permute.xlu0 %985 }
 0x182   : > { %18341 = vst [vmem:[#allocation139_spill] sm:$0xff] %v11531_v16  ;;  %v4154_v27 = vadd.f32 %v4060_v10, %v3613_v24  ;;  %v3795_v46 = vrot.slane %v11492_v53, 1  ;;  %v426_v16 = vld [vmem:[%s9472_s29 + $0x568] sm:$0xff]  ;;  %v4689_v29 = vmul.f32 %v4509_v54, %v18299_v26  ;;  %v11555_v10 = vmul.f32 %v11193_v37, %v18343_v23  ;;  %v11567_v13 = vpop.f32.mrb[66].mxu0  ;;  %v605_v37 = vld [vmem:[%s17725_s1 + $0x560] sm:$0xff]  ;;  %18347 = vst [vmem:[#allocation141_spill] sm:$0xff] %v11583_v28 }
 0x183   : > { %v4512_v3 = vadd.f32 %v4332_v9, %v11488_v34  ;;  %v3517_v51 = vsel %vm3386_vm2, %v3252_v31, %v3253_v32  ;;  %v18344_v24 = vrot.slane %v11411_v35, 7  ;;  %v11585_v26 = vpop.f32.mrb[67].mxu0  ;;  %8889 = vmatmul.mubr.msk.f32.gmra.mrb[172].mxu0 %vm1514_vm1, %v426_v16  ;;  %1475 = vperm.xlu0 %9293, %v605_v37   ;;  %v18352_v37 = vrot.slane %v11551_v60, 7 }
 0x184   : > { %v4058_v52 = vsel %vm3927_vm3, %v3795_v46, %v3796_v14  ;;  %v11573_v9 = vadd.f32 %v11176_v57, %v4689_v29  ;;  %v11577_v54 = vadd.f32 %v3517_v51, %v11488_v34  ;;  %v606_v29 = vld [vmem:[%s17725_s1 + $0x568] sm:$0xff]  ;;  %v4331_v51 = vadd.f32 %v4151_v50, %v11151_v47  ;;  %8891 = vmatprep.mubr.msk.f32.mxu0 %vm1514_vm1, %v427_v5 }
 0x185   : > { %v3518_v48 = vsel %vm3386_vm2, %v18344_v24, %v3252_v31  ;;  %v18346_v31 = vrot.slane %v11411_v35, 1  ;;  %v4334_v16 = vadd.f32 %v4154_v27, %v11220_v59  ;;  %v3254_v17 = vrot.slane %v11555_v10, 7  ;;  %v607_v27 = vld [vmem:[%s17725_s1 + $0x570] sm:$0xff] }
 0x186   : > { %18345 = vst [vmem:[#allocation140_spill] sm:$0xff] %v11573_v9  ;;  %v3615_v8 = vadd.f32 %v3518_v48, %v11492_v53  ;;  %v4692_v48 = vmul.f32 %v4512_v3, %v10486_v56  ;;  %v3797_v38 = vrot.slane %v11555_v10, 1  ;;  %v4511_v47 = vadd.f32 %v4331_v51, %v11492_v53  ;;  %v18351_v9 = vld [vmem:[#allocation118_spill] sm:$0xff]  ;;  %v18354_v51 = vld [vmem:[#allocation71_spill] sm:$0xff] }
 0x187   : > { %v4059_v24 = vsel %vm3927_vm3, %v18346_v31, %v3795_v46  ;;  %v11595_v46 = vpop.permute.xlu1 %990  ;;  %v428_v31 = vld [vmem:[%s9472_s29 + $0x578] sm:$0xff]  ;;  %v4153_v3 = vadd.f32 %v4061_v45, %v11460_v30  ;;  %v11610_v5 = vmul.f32 %v18351_v9, %v18350_v61  ;;  %1480 = vperm.xlu1 %9294, %v606_v29   ;;  %v4514_v59 = vadd.f32 %v4334_v16, %v11551_v60 }
 0x188   : > { %18348 = vst [vmem:[#allocation142_spill] sm:$0xff] %v11595_v46  ;;  %v4156_v28 = vadd.f32 %v4058_v52, %v3615_v8  ;;  %v11604_v50 = vadd.f32 %v11176_v57, %v4692_v48  ;;  %v11612_v52 = vpop.f32.mrb[68].mxu0  ;;  %v3515_v8 = vsel %vm3386_vm2, %v3254_v17, %v18352_v37  ;;  %v3516_v45 = vsel %vm3386_vm2, %v3253_v32, %v3254_v17  ;;  %v608_v48 = vld [vmem:[%s17725_s1 + $0x578] sm:$0xff] }
 0x189   : > { %v18353_v30 = vrot.slane %v11551_v60, 1  ;;  %v11628_v29 = vpop.f32.mrb[69].mxu0  ;;  %8892 = vmatmul.mubr.msk.f32.gmra.mrb[174].mxu0 %vm1514_vm1, %v428_v31  ;;  %v4691_v16 = vmul.f32 %v4511_v47, %v18354_v51  ;;  %v3617_v37 = vadd.f32 %v3516_v45, %v11555_v10  ;;  %v11637_v17 = vadd.f32 %v3515_v8, %v11551_v60  ;;  %v11647_v47 = vpop.permute.xlu0 %995  ;;  %v431_v45 = vld [vmem:[%s9472_s29 + $0x590] sm:$0xff]  ;;  %1485 = vperm.xlu0 %9293, %v607_v27  }
 0x18a   : > { %18349 = vst [vmem:[#allocation143_spill] sm:$0xff] %v11604_v50  ;;  %v4057_v32 = vsel %vm3927_vm3, %v3796_v14, %v3797_v38  ;;  %8894 = vmatprep.mubr.msk.f32.mxu0 %vm1514_vm1, %v429_v2  ;;  %v4694_v50 = vmul.f32 %v4514_v59, %v10557_v6  ;;  %v4333_v31 = vadd.f32 %v4153_v3, %v11224_v41  ;;  %v3257_v56 = vrot.slane %v11610_v5, 7  ;;  %v18357_v2 = vld [vmem:[#allocation91_spill] sm:$0xff]  ;;  %v18358_v14 = vld [vmem:[#allocation120_spill] sm:$0xff]  ;;  %v11660_v3 = vpop.f32.mrb[70].mxu0 }
 0x18b   : > { %v4056_v9 = vsel %vm3927_vm3, %v3797_v38, %v18353_v30  ;;  %v430_v30 = vld [vmem:[%s9472_s29 + $0x588] sm:$0xff]  ;;  %18355 = vst [vmem:[#allocation118_spill] sm:$0xff] %v11647_v47  ;;  %v11651_v8 = vadd.f32 %v11176_v57, %v4691_v16  ;;  %v4336_v38 = vadd.f32 %v4156_v28, %v11284_v4  ;;  %v11656_v59 = vmul.f32 %v18358_v14, %v18357_v2  ;;  %v11658_v41 = vpop.permute.xlu1 %1000  ;;  %v11671_v28 = vpop.f32.mrb[71].mxu0 }
 0x18c   : > { %v4158_v51 = vadd.f32 %v4056_v9, %v3617_v37  ;;  %18359 = vst [vmem:[#allocation120_spill] sm:$0xff] %v11658_v41  ;;  %1490 = vperm.xlu1 %9294, %v608_v48   ;;  %v11663_v46 = vadd.f32 %v11176_v57, %v4694_v50  ;;  %v4513_v27 = vadd.f32 %v4333_v31, %v11555_v10  ;;  %v18361_v9 = vld [vmem:[#allocation96_spill] sm:$0xff]  ;;  %v18362_v37 = vld [vmem:[#allocation122_spill] sm:$0xff] }
 0x18d   : > { %18356 = vst [vmem:[#allocation144_spill] sm:$0xff] %v11651_v8  ;;  %v4155_v16 = vadd.f32 %v4059_v24, %v11513_v63  ;;  %v11669_v4 = vmul.f32 %v18362_v37, %v18361_v9  ;;  %8895 = vmatmul.mubr.msk.f32.gmra.mrb[176].mxu0 %vm1514_vm1, %v430_v30  ;;  %v4516_v14 = vadd.f32 %v4336_v38, %v11610_v5  ;;  %v3256_v6 = vrot.slane %v11656_v59, 7  ;;  %v432_v31 = vld [vmem:[%s9472_s29 + $0x598] sm:$0xff] }
 0x18e   : > { %18360 = vst [vmem:[#allocation145_spill] sm:$0xff] %v11663_v46  ;;  %v3799_v48 = vrot.slane %v11656_v59, 1  ;;  %v4338_v50 = vadd.f32 %v4158_v51, %v11357_v33  ;;  %8897 = vmatprep.mubr.msk.f32.mxu0 %vm1514_vm1, %v431_v45  ;;  %v4693_v63 = vmul.f32 %v4513_v27, %v10505_v21  ;;  %v18363_v8 = vrot.slane %v11551_v60, 7 }
 0x18f   : > { %v4335_v24 = vadd.f32 %v4155_v16, %v11288_v22  ;;  %v3259_v37 = vrot.slane %v11669_v4, 7  ;;  %v3802_v46 = vrot.slane %v11669_v4, 1  ;;  %v4696_v30 = vmul.f32 %v4516_v14, %v10628_v43  ;;  %v11695_v22 = vpop.f32.mrb[72].mxu0 }
 0x190   : > { %v3513_v38 = vsel %vm3386_vm2, %v3256_v6, %v3257_v56  ;;  %v3514_v33 = vsel %vm3386_vm2, %v18363_v8, %v3256_v6  ;;  %v18364_v51 = vrot.slane %v11610_v5, 1  ;;  %18365 = vst [vmem:[#allocation122_spill] sm:$0xff] %v11695_v22  ;;  %v11698_v27 = vadd.f32 %v11176_v57, %v4693_v63  ;;  %v11706_v6 = vpop.f32.mrb[73].mxu0  ;;  %v18371_v22 = vld [vmem:[#allocation101_spill] sm:$0xff] }
 0x191   : > { %v3619_v16 = vadd.f32 %v3514_v33, %v11656_v59  ;;  %v3620_v14 = vadd.f32 %v3513_v38, %v11610_v5  ;;  %v18367_v43 = vrot.slane %v11551_v60, 1  ;;  %8898 = vmatmul.mubr.msk.f32.gmra.mrb[178].mxu0 %vm1514_vm1, %v432_v31  ;;  %v11710_v8 = vadd.f32 %v11176_v57, %v4696_v30  ;;  %v18370_v33 = vld [vmem:[#allocation124_spill] sm:$0xff] }
 0x192   : > { %v4054_v45 = vsel %vm3927_vm3, %v3799_v48, %v18364_v51  ;;  %18366 = vst [vmem:[#allocation146_spill] sm:$0xff] %v11698_v27  ;;  %v4515_v51 = vadd.f32 %v4335_v24, %v11656_v59  ;;  %v4518_v63 = vadd.f32 %v4338_v50, %v11669_v4  ;;  %v18369_v27 = vld [vmem:[#allocation94_spill] sm:$0xff]  ;;  %v4157_v41 = vadd.f32 %v4057_v32, %v11577_v54 }
 0x193   : > { %v4055_v21 = vsel %vm3927_vm3, %v18367_v43, %v3799_v48  ;;  %18368 = vst [vmem:[#allocation147_spill] sm:$0xff] %v11710_v8  ;;  %v11716_v47 = vmul.f32 %v18370_v33, %v18369_v27  ;;  %v4160_v38 = vadd.f32 %v4054_v45, %v3619_v16  ;;  %v11721_v43 = vmul.f32 %v11325_v0, %v18371_v22  ;;  %v18372_v48 = vld [vmem:[#allocation99_spill] sm:$0xff]  ;;  %v11731_v8 = vpop.f32.mrb[74].mxu0 }
 0x194   : > { %v11725_v31 = vmul.f32 %v11337_v11, %v18372_v48  ;;  %v4695_v30 = vmul.f32 %v4515_v51, %v10574_v20  ;;  %v4698_v24 = vmul.f32 %v4518_v63, %v18343_v23  ;;  %18373 = vst [vmem:[#allocation124_spill] sm:$0xff] %v11731_v8  ;;  %v4337_v54 = vadd.f32 %v4157_v41, %v11405_v1  ;;  %v11737_v11 = vpop.f32.mrb[75].mxu0  ;;  %v18379_v20 = vld [vmem:[#allocation105_spill] sm:$0xff]  ;;  %v18380_v8 = vld [vmem:[#allocation104_spill] sm:$0xff] }
 0x195   : > { %v3258_v50 = vrot.slane %v11716_v47, 7  ;;  %v3801_v33 = vrot.slane %v11716_v47, 1  ;;  %v3261_v32 = vrot.slane %v11721_v43, 7  ;;  %v3804_v0 = vrot.slane %v11721_v43, 1  ;;  %18374 = vst [vmem:[#allocation148_spill] sm:$0xff] %v11737_v11 }
 0x196   : > { %v4340_v45 = vadd.f32 %v4160_v38, %v11411_v35  ;;  %v11740_v16 = vadd.f32 %v11176_v57, %v4695_v30  ;;  %v11743_v51 = vadd.f32 %v11176_v57, %v4698_v24  ;;  %v18377_v38 = vrot.slane %v11610_v5, 1 }
 0x197   : > { %v3511_v63 = vsel %vm3386_vm2, %v3258_v50, %v3259_v37  ;;  %v3512_v1 = vsel %vm3386_vm2, %v3257_v56, %v3258_v50  ;;  %v4052_v35 = vsel %vm3927_vm3, %v3801_v33, %v3802_v46  ;;  %v4517_v24 = vadd.f32 %v4337_v54, %v11716_v47  ;;  %v11761_v50 = vpop.f32.mrb[76].mxu0 }
 0x198   : > { %18375 = vst [vmem:[#allocation149_spill] sm:$0xff] %v11740_v16  ;;  %18376 = vst [vmem:[#allocation150_spill] sm:$0xff] %v11743_v51  ;;  %v3621_v41 = vadd.f32 %v3512_v1, %v11716_v47  ;;  %v3622_v23 = vadd.f32 %v3511_v63, %v11669_v4  ;;  %v4053_v30 = vsel %vm3927_vm3, %v18377_v38, %v3801_v33  ;;  %v3260_v16 = vrot.slane %v11725_v31, 7  ;;  %v11772_v54 = vpop.f32.mrb[77].mxu0 }
 0x199   : > { %v4520_v51 = vadd.f32 %v4340_v45, %v11721_v43  ;;  %v3803_v56 = vrot.slane %v11725_v31, 1  ;;  %18378 = vst [vmem:[#allocation151_spill] sm:$0xff] %v11761_v50  ;;  %v4159_v63 = vadd.f32 %v4055_v21, %v11637_v17  ;;  %v11766_v11 = vmul.f32 %v11371_v62, %v18379_v20 }
 0x19a   : > { %v4162_v1 = vadd.f32 %v4052_v35, %v3621_v41  ;;  %v11770_v33 = vmul.f32 %v11386_v44, %v18380_v8  ;;  %v4697_v45 = vmul.f32 %v4517_v24, %v10638_v40  ;;  %v3509_v50 = vsel %vm3386_vm2, %v3260_v16, %v3261_v32 }
 0x19b   : > { %v4700_v38 = vmul.f32 %v4520_v51, %v18357_v2  ;;  %v3510_v21 = vsel %vm3386_vm2, %v3259_v37, %v3260_v16  ;;  %v11782_v62 = vadd.f32 %v3509_v50, %v11721_v43  ;;  %v4050_v44 = vsel %vm3927_vm3, %v3803_v56, %v3804_v0  ;;  %v11796_v16 = vpop.f32.mrb[78].mxu0 }
 0x19c   : > { %v3623_v17 = vadd.f32 %v3510_v21, %v11725_v31  ;;  %v4051_v41 = vsel %vm3927_vm3, %v3802_v46, %v3803_v56  ;;  %v11789_v35 = vadd.f32 %v11176_v57, %v4697_v45  ;;  %v4339_v24 = vadd.f32 %v4159_v63, %v11416_v12  ;;  %v11801_v46 = vpop.f32.mrb[79].mxu0 }
 0x19d   : > { %v11792_v51 = vadd.f32 %v11176_v57, %v4700_v38  ;;  %v3263_v37 = vrot.slane %v11766_v11, 7  ;;  %v3806_v21 = vrot.slane %v11766_v11, 1  ;;  %v4342_v2 = vadd.f32 %v4162_v1, %v11488_v34 }
 0x19e   : > { %18381 = vst [vmem:[#allocation152_spill] sm:$0xff] %v11789_v35  ;;  %v4164_v50 = vadd.f32 %v4050_v44, %v3623_v17  ;;  %v3262_v40 = vrot.slane %v11770_v33, 7  ;;  %v4519_v56 = vadd.f32 %v4339_v24, %v11725_v31  ;;  %v3805_v45 = vrot.slane %v11770_v33, 1 }
 0x19f   : > { %18382 = vst [vmem:[#allocation153_spill] sm:$0xff] %v11792_v51  ;;  %v4161_v38 = vadd.f32 %v4053_v30, %v3620_v14  ;;  %v18383_v51 = vld [vmem:[#allocation109_spill] sm:$0xff]  ;;  %v4522_v63 = vadd.f32 %v4342_v2, %v11766_v11  ;;  %v11822_v30 = vpop.f32.mrb[80].mxu0 }
 0x1a0   : > { %v11807_v12 = vmul.f32 %v11418_v39, %v18383_v51  ;;  %v3507_v17 = vsel %vm3386_vm2, %v3262_v40, %v3263_v37  ;;  %v3508_v34 = vsel %vm3386_vm2, %v3261_v32, %v3262_v40  ;;  %v4344_v1 = vadd.f32 %v4164_v50, %v11551_v60  ;;  %v11829_v32 = vpop.f32.mrb[81].mxu0 }
 0x1a1   : > { %v4699_v44 = vmul.f32 %v4519_v56, %v18342_v49  ;;  %v3625_v24 = vadd.f32 %v3508_v34, %v11770_v33  ;;  %v11818_v14 = vadd.f32 %v3507_v17, %v11766_v11  ;;  %v4048_v39 = vsel %vm3927_vm3, %v3805_v45, %v3806_v21 }
 0x1a2   : > { %v4702_v2 = vmul.f32 %v4522_v63, %v18369_v27  ;;  %v4049_v35 = vsel %vm3927_vm3, %v3804_v0, %v3805_v45  ;;  %v4341_v40 = vadd.f32 %v4161_v38, %v11492_v53  ;;  %v3265_v60 = vrot.slane %v11807_v12, 7  ;;  %v18386_v0 = vld [vmem:[#allocation108_spill] sm:$0xff]  ;;  %v18387_v27 = vld [vmem:[#allocation113_spill] sm:$0xff] }
 0x1a3   : > { %v11832_v50 = vadd.f32 %v11176_v57, %v4699_v44  ;;  %v4166_v56 = vadd.f32 %v4048_v39, %v3625_v24  ;;  %v3808_v17 = vrot.slane %v11807_v12, 1  ;;  %v4524_v34 = vadd.f32 %v4344_v1, %v11807_v12  ;;  %v18388_v39 = vld [vmem:[#allocation112_spill] sm:$0xff] }
 0x1a4   : > { %v11837_v49 = vadd.f32 %v11176_v57, %v4702_v2  ;;  %v4521_v63 = vadd.f32 %v4341_v40, %v11770_v33  ;;  %v11842_v53 = vmul.f32 %v11429_v42, %v18386_v0  ;;  %v4163_v45 = vadd.f32 %v4051_v41, %v3622_v23  ;;  %v11854_v2 = vpop.f32.mrb[82].mxu0 }
 0x1a5   : > { %18384 = vst [vmem:[#allocation154_spill] sm:$0xff] %v11832_v50  ;;  %v4704_v38 = vmul.f32 %v4524_v34, %v18372_v48  ;;  %v11847_v44 = vmul.f32 %v11470_v19, %v18387_v27  ;;  %v4346_v24 = vadd.f32 %v4166_v56, %v11610_v5  ;;  %v11852_v1 = vmul.f32 %v11479_v18, %v18388_v39  ;;  %v11860_v34 = vpop.f32.mrb[83].mxu0 }
 0x1a6   : > { %18385 = vst [vmem:[#allocation155_spill] sm:$0xff] %v11837_v49  ;;  %v4701_v40 = vmul.f32 %v4521_v63, %v18350_v61  ;;  %v3264_v42 = vrot.slane %v11842_v53, 7  ;;  %v3807_v23 = vrot.slane %v11842_v53, 1  ;;  %v4343_v41 = vadd.f32 %v4163_v45, %v11555_v10  ;;  %18389 = vst [vmem:[#allocation156_spill] sm:$0xff] %v11860_v34  ;;  %v18392_v34 = vld [vmem:[#allocation117_spill] sm:$0xff] }
 0x1a7   : > { %v11863_v19 = vadd.f32 %v11176_v57, %v4704_v38  ;;  %v3267_v5 = vrot.slane %v11847_v44, 7  ;;  %v3810_v18 = vrot.slane %v11847_v44, 1  ;;  %v4526_v56 = vadd.f32 %v4346_v24, %v11847_v44 }
 0x1a8   : > { %v11869_v48 = vadd.f32 %v11176_v57, %v4701_v40  ;;  %v3505_v63 = vsel %vm3386_vm2, %v3264_v42, %v3265_v60  ;;  %v3506_v10 = vsel %vm3386_vm2, %v3263_v37, %v3264_v42  ;;  %v4046_v45 = vsel %vm3927_vm3, %v3807_v23, %v3808_v17  ;;  %v11882_v40 = vpop.f32.mrb[84].mxu0 }
 0x1a9   : > { %18390 = vst [vmem:[#allocation157_spill] sm:$0xff] %v11863_v19  ;;  %v3627_v38 = vadd.f32 %v3506_v10, %v11842_v53  ;;  %v3628_v19 = vadd.f32 %v3505_v63, %v11807_v12  ;;  %v4047_v49 = vsel %vm3927_vm3, %v3806_v21, %v3807_v23  ;;  %v4523_v24 = vadd.f32 %v4343_v41, %v11842_v53  ;;  %v11888_v50 = vpop.f32.mrb[85].mxu0  ;;  %v18393_v23 = vld [vmem:[#allocation116_spill] sm:$0xff] }
 0x1aa   : > { %18391 = vst [vmem:[#allocation158_spill] sm:$0xff] %v11869_v48  ;;  %v4706_v48 = vmul.f32 %v4526_v56, %v18380_v8  ;;  %v3266_v61 = vrot.slane %v11852_v1, 7  ;;  %v3809_v37 = vrot.slane %v11852_v1, 1  ;;  %v4165_v42 = vadd.f32 %v4049_v35, %v11782_v62 }
 0x1ab   : > { %v4168_v10 = vadd.f32 %v4046_v45, %v3627_v38  ;;  %v4703_v63 = vmul.f32 %v4523_v24, %v18361_v9  ;;  %v11893_v21 = vmul.f32 %v11525_v25, %v18392_v34  ;;  %v11897_v41 = vmul.f32 %v11536_v55, %v18393_v23  ;;  %v11915_v38 = vpop.f32.mrb[86].mxu0 }
 0x1ac   : > { %v11900_v56 = vadd.f32 %v11176_v57, %v4706_v48  ;;  %v3503_v8 = vsel %vm3386_vm2, %v3266_v61, %v3267_v5  ;;  %v3504_v62 = vsel %vm3386_vm2, %v3265_v60, %v3266_v61  ;;  %v4044_v35 = vsel %vm3927_vm3, %v3809_v37, %v3810_v18  ;;  %18396 = vst [vmem:[#allocation161_spill] sm:$0xff] %v11915_v38  ;;  %v11921_v9 = vpop.f32.mrb[87].mxu0 }
 0x1ad   : > { %v11909_v45 = vadd.f32 %v11176_v57, %v4703_v63  ;;  %v3629_v25 = vadd.f32 %v3504_v62, %v11852_v1  ;;  %v3630_v55 = vadd.f32 %v3503_v8, %v11847_v44  ;;  %v4045_v48 = vsel %vm3927_vm3, %v3808_v17, %v3809_v37  ;;  %18397 = vst [vmem:[#allocation162_spill] sm:$0xff] %v11921_v9 }
 0x1ae   : > { %18394 = vst [vmem:[#allocation159_spill] sm:$0xff] %v11900_v56  ;;  %v4345_v24 = vadd.f32 %v4165_v42, %v11656_v59  ;;  %v3269_v56 = vrot.slane %v11893_v21, 7  ;;  %v3812_v61 = vrot.slane %v11893_v21, 1  ;;  %v4348_v60 = vadd.f32 %v4168_v10, %v11669_v4  ;;  %v18398_v42 = vld [vmem:[#allocation123_spill] sm:$0xff] }
 0x1af   : > { %18395 = vst [vmem:[#allocation160_spill] sm:$0xff] %v11909_v45  ;;  %v4170_v63 = vadd.f32 %v4044_v35, %v3629_v25  ;;  %v3268_v62 = vrot.slane %v11897_v41, 7  ;;  %v3811_v8 = vrot.slane %v11897_v41, 1  ;;  %v4167_v45 = vadd.f32 %v4047_v49, %v11818_v14  ;;  %v11944_v25 = vpop.f32.mrb[88].mxu0 }
 0x1b0   : > { %v4525_v17 = vadd.f32 %v4345_v24, %v11852_v1  ;;  %v4528_v37 = vadd.f32 %v4348_v60, %v11893_v21  ;;  %v11930_v59 = vmul.f32 %v11567_v13, %v11312_v58  ;;  %v11934_v4 = vmul.f32 %v11585_v26, %v18398_v42  ;;  %v11950_v9 = vpop.f32.mrb[89].mxu0 }
 0x1b1   : > { %v3501_v10 = vsel %vm3386_vm2, %v3268_v62, %v3269_v56  ;;  %v3502_v35 = vsel %vm3386_vm2, %v3267_v5, %v3268_v62  ;;  %v4042_v49 = vsel %vm3927_vm3, %v3811_v8, %v3812_v61  ;;  %v4043_v14 = vsel %vm3927_vm3, %v3810_v18, %v3811_v8  ;;  %18399 = vst [vmem:[#allocation163_spill] sm:$0xff] %v11950_v9 }
 0x1b2   : > { %v4705_v13 = vmul.f32 %v4525_v17, %v18371_v22  ;;  %v4708_v24 = vmul.f32 %v4528_v37, %v18386_v0  ;;  %v3631_v26 = vadd.f32 %v3502_v35, %v11897_v41  ;;  %v3632_v60 = vadd.f32 %v3501_v10, %v11893_v21  ;;  %v11966_v22 = vpop.f32.mrb[90].mxu0 }
 0x1b3   : > { %v4347_v5 = vadd.f32 %v4167_v45, %v11716_v47  ;;  %v3271_v62 = vrot.slane %v11930_v59, 7  ;;  %v3814_v38 = vrot.slane %v11930_v59, 1  ;;  %v4350_v18 = vadd.f32 %v4170_v63, %v11721_v43  ;;  %18402 = vst [vmem:[#allocation166_spill] sm:$0xff] %v11966_v22 }
 0x1b4   : > { %v11957_v8 = vadd.f32 %v11176_v57, %v4705_v13  ;;  %v11960_v17 = vadd.f32 %v11176_v57, %v4708_v24  ;;  %v4172_v37 = vadd.f32 %v4042_v49, %v3631_v26  ;;  %v3270_v35 = vrot.slane %v11934_v4, 7  ;;  %v11977_v24 = vpop.f32.mrb[91].mxu0 }
 0x1b5   : > { %v4527_v10 = vadd.f32 %v4347_v5, %v11897_v41  ;;  %v4530_v0 = vadd.f32 %v4350_v18, %v11930_v59  ;;  %v3813_v47 = vrot.slane %v11934_v4, 1  ;;  %v4169_v45 = vadd.f32 %v4045_v48, %v3628_v19  ;;  %18403 = vst [vmem:[#allocation167_spill] sm:$0xff] %v11977_v24  ;;  %v11985_v18 = vpop.permute.xlu0 %1005  ;;  %v18431_v24 = vld [vmem:[#allocation148_spill] sm:$0xff] }
 0x1b6   : > { %18400 = vst [vmem:[#allocation164_spill] sm:$0xff] %v11957_v8  ;;  %18401 = vst [vmem:[#allocation165_spill] sm:$0xff] %v11960_v17  ;;  %v3499_v43 = vsel %vm3386_vm2, %v3270_v35, %v3271_v62  ;;  %v3500_v63 = vsel %vm3386_vm2, %v3269_v56, %v3270_v35  ;;  %v11974_v49 = vmul.f32 %v11612_v52, %v11369_v7  ;;  %v11993_v35 = vpop.permute.xlu1 %1010  ;;  %v18419_v8 = vld [vmem:[#allocation122_spill] sm:$0xff] }
 0x1b7   : > { %v4352_v13 = vadd.f32 %v4172_v37, %v11766_v11  ;;  %v4707_v26 = vmul.f32 %v4527_v10, %v18379_v20  ;;  %v4710_v19 = vmul.f32 %v4530_v0, %v18388_v39  ;;  %v3633_v48 = vadd.f32 %v3500_v63, %v11934_v4  ;;  %18404 = vst [vmem:[#allocation168_spill] sm:$0xff] %v11985_v18  ;;  %v12002_v39 = vpop.f32.mrb[92].mxu0 }
 0x1b8   : > { %v11983_v5 = vadd.f32 %v3499_v43, %v11930_v59  ;;  %v4040_v56 = vsel %vm3927_vm3, %v3813_v47, %v3814_v38  ;;  %v4041_v52 = vsel %vm3927_vm3, %v3812_v61, %v3813_v47  ;;  %v4349_v11 = vadd.f32 %v4169_v45, %v11725_v31  ;;  %18405 = vst [vmem:[#allocation169_spill] sm:$0xff] %v11993_v35  ;;  %v12010_v45 = vpop.f32.mrb[93].mxu0 }
 0x1b9   : > { %v3273_v37 = vrot.slane %v11974_v49, 7  ;;  %v11996_v0 = vadd.f32 %v11176_v57, %v4707_v26  ;;  %v11999_v10 = vadd.f32 %v11176_v57, %v4710_v19  ;;  %v4174_v43 = vadd.f32 %v4040_v56, %v3633_v48  ;;  %18408 = vst [vmem:[#allocation172_spill] sm:$0xff] %v12002_v39  ;;  %18409 = vst [vmem:[#allocation173_spill] sm:$0xff] %v12010_v45  ;;  %v18410_v26 = vld [vmem:[#allocation133_spill] sm:$0xff]  ;;  %v18411_v56 = vld [vmem:[#allocation132_spill] sm:$0xff] }
 0x1ba   : > { %v3816_v63 = vrot.slane %v11974_v49, 1  ;;  %v4529_v17 = vadd.f32 %v4349_v11, %v11934_v4  ;;  %v4532_v61 = vadd.f32 %v4352_v13, %v11974_v49  ;;  %v12008_v31 = vmul.f32 %v11628_v29, %v11360_v15  ;;  %v18430_v39 = vld [vmem:[#allocation141_spill] sm:$0xff] }
 0x1bb   : > { %18406 = vst [vmem:[#allocation170_spill] sm:$0xff] %v11996_v0  ;;  %18407 = vst [vmem:[#allocation171_spill] sm:$0xff] %v11999_v10  ;;  %v4171_v47 = vadd.f32 %v4043_v14, %v3630_v55  ;;  %v12014_v19 = vmul.f32 %v11660_v3, %v18410_v26  ;;  %v4354_v48 = vadd.f32 %v4174_v43, %v11807_v12  ;;  %v12029_v43 = vpop.f32.mrb[94].mxu0 }
 0x1bc   : > { %v12019_v10 = vmul.f32 %v11671_v28, %v18411_v56  ;;  %v4173_v11 = vadd.f32 %v4041_v52, %v3632_v60  ;;  %v4709_v13 = vmul.f32 %v4529_v17, %v18383_v51  ;;  %v4712_v0 = vmul.f32 %v4532_v61, %v18393_v23  ;;  %18412 = vst [vmem:[#allocation174_spill] sm:$0xff] %v12029_v43  ;;  %v12031_v28 = vpop.permute.xlu0 %1015  ;;  %v12043_v61 = vpop.f32.mrb[95].mxu0 }
 0x1bd   : > { %v3272_v29 = vrot.slane %v12008_v31, 7  ;;  %v3815_v55 = vrot.slane %v12008_v31, 1  ;;  %v4351_v14 = vadd.f32 %v4171_v47, %v11770_v33  ;;  %v3275_v3 = vrot.slane %v12014_v19, 7  ;;  %18413 = vst [vmem:[#allocation175_spill] sm:$0xff] %v12031_v28  ;;  %18416 = vst [vmem:[#allocation178_spill] sm:$0xff] %v12043_v61  ;;  %v12045_v47 = vpop.permute.xlu1 %1020  ;;  %v18420_v61 = vld [vmem:[#allocation137_spill] sm:$0xff] }
 0x1be   : > { %v3818_v20 = vrot.slane %v12014_v19, 1  ;;  %v4534_v12 = vadd.f32 %v4354_v48, %v12014_v19  ;;  %v12034_v60 = vadd.f32 %v11176_v57, %v4709_v13  ;;  %v12037_v17 = vadd.f32 %v11176_v57, %v4712_v0  ;;  %18417 = vst [vmem:[#allocation179_spill] sm:$0xff] %v12045_v47 }
 0x1bf   : > { %v3497_v52 = vsel %vm3386_vm2, %v3272_v29, %v3273_v37  ;;  %v3498_v33 = vsel %vm3386_vm2, %v3271_v62, %v3272_v29  ;;  %v4038_v13 = vsel %vm3927_vm3, %v3815_v55, %v3816_v63  ;;  %v4039_v57 = vsel %vm3927_vm3, %v3814_v38, %v3815_v55  ;;  %v12066_v38 = vpop.f32.mrb[96].mxu0 }
 0x1c0   : > { %18414 = vst [vmem:[#allocation176_spill] sm:$0xff] %v12034_v60  ;;  %18415 = vst [vmem:[#allocation177_spill] sm:$0xff] %v12037_v17  ;;  %v3635_v48 = vadd.f32 %v3498_v33, %v12008_v31  ;;  %v3636_v23 = vadd.f32 %v3497_v52, %v11974_v49  ;;  %v4531_v0 = vadd.f32 %v4351_v14, %v12008_v31  ;;  %v3274_v62 = vrot.slane %v12019_v10, 7  ;;  %v18418_v33 = vld [vmem:[#allocation138_spill] sm:$0xff]  ;;  %v12072_v14 = vld [vmem:[%s17727_s3] ss:$0 sm:$0xff] }
 0x1c1   : > { %v4714_v17 = vmul.f32 %v4534_v12, %v18398_v42  ;;  %v3817_v29 = vrot.slane %v12019_v10, 1  ;;  %v4353_v51 = vadd.f32 %v4173_v11, %v11842_v53  ;;  %v12060_v52 = vmul.f32 %v18419_v8, %v18418_v33  ;;  %18421 = vst [vmem:[#allocation122_spill] sm:$0xff] %v12066_v38  ;;  %v12099_v42 = vpop.permute.xlu1 %1030  ;;  %v18429_v38 = vld [vmem:[#allocation124_spill] sm:$0xff] }
 0x1c2   : > { %v4176_v60 = vadd.f32 %v4038_v13, %v3635_v48  ;;  %v12064_v43 = vmul.f32 %v11706_v6, %v18420_v61  ;;  %v4711_v55 = vmul.f32 %v4531_v0, %v18387_v27  ;;  %v3495_v53 = vsel %vm3386_vm2, %v3274_v62, %v3275_v3  ;;  %v12081_v6 = vpop.f32.mrb[97].mxu0  ;;  %v12091_v0 = vpop.permute.xlu0 %1025  ;;  %18426 = vst [vmem:[#allocation184_spill] sm:$0xff] %v12099_v42 }
 0x1c3   : > { %v12075_v12 = vadd.f32 %v12072_v14, %v4714_v17  ;;  %v3496_v8 = vsel %vm3386_vm2, %v3273_v37, %v3274_v62  ;;  %18423 = vst [vmem:[#allocation181_spill] sm:$0xff] %v12081_v6  ;;  %v12085_v48 = vadd.f32 %v3495_v53, %v12014_v19  ;;  %v4036_v13 = vsel %vm3927_vm3, %v3817_v29, %v3818_v20 }
 0x1c4   : > { %v3637_v11 = vadd.f32 %v3496_v8, %v12019_v10  ;;  %v4037_v17 = vsel %vm3927_vm3, %v3816_v63, %v3817_v29  ;;  %18424 = vst [vmem:[#allocation182_spill] sm:$0xff] %v12091_v0  ;;  %v4533_v37 = vadd.f32 %v4353_v51, %v12019_v10  ;;  %v3277_v62 = vrot.slane %v12060_v52, 7  ;;  %v12104_v29 = vpop.f32.mrb[98].mxu0  ;;  %v18428_v51 = vld [vmem:[#allocation142_spill] sm:$0xff] }
 0x1c5   : > { %18422 = vst [vmem:[#allocation180_spill] sm:$0xff] %v12075_v12  ;;  %v12094_v12 = vadd.f32 %v12072_v14, %v4711_v55  ;;  %v3820_v8 = vrot.slane %v12060_v52, 1  ;;  %v4356_v27 = vadd.f32 %v4176_v60, %v11847_v44  ;;  %v3276_v6 = vrot.slane %v12064_v43, 7  ;;  %18427 = vst [vmem:[#allocation185_spill] sm:$0xff] %v12104_v29 }
 0x1c6   : > { %v4178_v53 = vadd.f32 %v4036_v13, %v3637_v11  ;;  %v3819_v63 = vrot.slane %v12064_v43, 1  ;;  %v4713_v55 = vmul.f32 %v4533_v37, %v18392_v34  ;;  %v12110_v45 = vmul.f32 %v18429_v38, %v18428_v51  ;;  %v12116_v11 = vpop.f32.mrb[99].mxu0 }
 0x1c7   : > { %18425 = vst [vmem:[#allocation183_spill] sm:$0xff] %v12094_v12  ;;  %v4175_v12 = vadd.f32 %v4039_v57, %v11983_v5  ;;  %v12114_v22 = vmul.f32 %v18431_v24, %v18430_v39  ;;  %18432 = vst [vmem:[#allocation124_spill] sm:$0xff] %v12116_v11  ;;  %v4536_v44 = vadd.f32 %v4356_v27, %v12060_v52  ;;  %v12138_v11 = vpop.f32.mrb[100].mxu0 }
 0x1c8   : > { %v3493_v60 = vsel %vm3386_vm2, %v3276_v6, %v3277_v62  ;;  %v3494_v13 = vsel %vm3386_vm2, %v3275_v3, %v3276_v6  ;;  %v4034_v5 = vsel %vm3927_vm3, %v3819_v63, %v3820_v8  ;;  %v12126_v57 = vadd.f32 %v12072_v14, %v4713_v55  ;;  %18434 = vst [vmem:[#allocation186_spill] sm:$0xff] %v12138_v11  ;;  %v12140_v55 = vpop.permute.xlu0 %1035  ;;  %v18440_v11 = vld [vmem:[#allocation151_spill] sm:$0xff] }
 0x1c9   : > { %v3639_v38 = vadd.f32 %v3494_v13, %v12064_v43  ;;  %v12130_v24 = vadd.f32 %v3493_v60, %v12060_v52  ;;  %v4035_v27 = vsel %vm3927_vm3, %v3818_v20, %v3819_v63  ;;  %v4716_v37 = vmul.f32 %v4536_v44, %v11360_v15  ;;  %18435 = vst [vmem:[#allocation187_spill] sm:$0xff] %v12140_v55  ;;  %v12145_v20 = vpop.f32.mrb[101].mxu0  ;;  %v12147_v63 = vpop.permute.xlu1 %1040  ;;  %v18439_v15 = vld [vmem:[#allocation120_spill] sm:$0xff] }
 0x1ca   : > { %18433 = vst [vmem:[#allocation148_spill] sm:$0xff] %v12126_v57  ;;  %v4355_v34 = vadd.f32 %v4175_v12, %v11852_v1  ;;  %v3279_v3 = vrot.slane %v12110_v45, 7  ;;  %v3822_v6 = vrot.slane %v12110_v45, 1  ;;  %v4358_v13 = vadd.f32 %v4178_v53, %v11893_v21  ;;  %18436 = vst [vmem:[#allocation188_spill] sm:$0xff] %v12145_v20 }
 0x1cb   : > { %v4180_v57 = vadd.f32 %v4034_v5, %v3639_v38  ;;  %v3278_v60 = vrot.slane %v12114_v22, 7  ;;  %v3821_v29 = vrot.slane %v12114_v22, 1  ;;  %18437 = vst [vmem:[#allocation189_spill] sm:$0xff] %v12147_v63  ;;  %v12150_v1 = vadd.f32 %v12072_v14, %v4716_v37 }
 0x1cc   : > { %v4535_v12 = vadd.f32 %v4355_v34, %v12064_v43  ;;  %v4177_v44 = vadd.f32 %v4037_v17, %v3636_v23  ;;  %v12155_v9 = vmul.f32 %v18440_v11, %v18439_v15  ;;  %v4538_v21 = vadd.f32 %v4358_v13, %v12110_v45  ;;  %v12171_v11 = vpop.f32.mrb[102].mxu0 }
 0x1cd   : > { %18438 = vst [vmem:[#allocation190_spill] sm:$0xff] %v12150_v1  ;;  %v3491_v53 = vsel %vm3386_vm2, %v3278_v60, %v3279_v3  ;;  %v3492_v5 = vsel %vm3386_vm2, %v3277_v62, %v3278_v60  ;;  %v4032_v38 = vsel %vm3927_vm3, %v3821_v29, %v3822_v6  ;;  %v4033_v17 = vsel %vm3927_vm3, %v3820_v8, %v3821_v29  ;;  %v12177_v20 = vpop.f32.mrb[103].mxu0  ;;  %v12187_v29 = vpop.permute.xlu0 %1045 }
 0x1ce   : > { %v4715_v37 = vmul.f32 %v4535_v12, %v11312_v58  ;;  %v3641_v34 = vadd.f32 %v3492_v5, %v12114_v22  ;;  %v12167_v23 = vadd.f32 %v3491_v53, %v12110_v45  ;;  %v4718_v13 = vmul.f32 %v4538_v21, %v18411_v56  ;;  %v18442_v58 = vld [vmem:[#allocation118_spill] sm:$0xff]  ;;  %18443 = vst [vmem:[#allocation191_spill] sm:$0xff] %v12187_v29 }
 0x1cf   : > { %v4357_v1 = vadd.f32 %v4177_v44, %v11897_v41  ;;  %v3281_v62 = vrot.slane %v12155_v9, 7  ;;  %v3824_v60 = vrot.slane %v12155_v9, 1  ;;  %v4360_v5 = vadd.f32 %v4180_v57, %v11930_v59 }
 0x1d0   : > { %v12180_v12 = vadd.f32 %v12072_v14, %v4715_v37  ;;  %v4182_v53 = vadd.f32 %v4032_v38, %v3641_v34  ;;  %v12185_v8 = vmul.f32 %v11772_v54, %v18442_v58  ;;  %v12190_v41 = vadd.f32 %v12072_v14, %v4718_v13  ;;  %v12198_v38 = vpop.permute.xlu1 %1050  ;;  %v12204_v13 = vpop.f32.mrb[104].mxu0 }
 0x1d1   : > { %v4537_v44 = vadd.f32 %v4357_v1, %v12114_v22  ;;  %v4179_v21 = vadd.f32 %v4035_v27, %v12085_v48  ;;  %v12196_v37 = vmul.f32 %v11796_v16, %v11993_v35  ;;  %18445 = vst [vmem:[#allocation193_spill] sm:$0xff] %v12198_v38  ;;  %v4540_v59 = vadd.f32 %v4360_v5, %v12155_v9 }
 0x1d2   : > { %18441 = vst [vmem:[#allocation151_spill] sm:$0xff] %v12180_v12  ;;  %18444 = vst [vmem:[#allocation192_spill] sm:$0xff] %v12190_v41  ;;  %v3280_v54 = vrot.slane %v12185_v8, 7  ;;  %v3823_v57 = vrot.slane %v12185_v8, 1  ;;  %v4362_v34 = vadd.f32 %v4182_v53, %v11974_v49  ;;  %v12210_v41 = vpop.f32.mrb[105].mxu0 }
 0x1d3   : > { %v4717_v1 = vmul.f32 %v4537_v44, %v11369_v7  ;;  %v4359_v48 = vadd.f32 %v4179_v21, %v11934_v4  ;;  %v3283_v27 = vrot.slane %v12196_v37, 7  ;;  %v3826_v16 = vrot.slane %v12196_v37, 1 }
 0x1d4   : > { %v4720_v5 = vmul.f32 %v4540_v59, %v18420_v61  ;;  %v3489_v56 = vsel %vm3386_vm2, %v3280_v54, %v3281_v62  ;;  %v3490_v49 = vsel %vm3386_vm2, %v3279_v3, %v3280_v54  ;;  %v4030_v53 = vsel %vm3927_vm3, %v3823_v57, %v3824_v60 }
 0x1d5   : > { %v12220_v44 = vadd.f32 %v12072_v14, %v4717_v1  ;;  %v3643_v4 = vadd.f32 %v3490_v49, %v12185_v8  ;;  %v3644_v21 = vadd.f32 %v3489_v56, %v12155_v9  ;;  %v4031_v7 = vsel %vm3927_vm3, %v3822_v6, %v3823_v57  ;;  %v12235_v1 = vpop.f32.mrb[106].mxu0 }
 0x1d6   : > { %v12227_v59 = vadd.f32 %v12072_v14, %v4720_v5  ;;  %v4539_v61 = vadd.f32 %v4359_v48, %v12185_v8  ;;  %v4542_v3 = vadd.f32 %v4362_v34, %v12196_v37  ;;  %v12233_v54 = vmul.f32 %v11801_v46, %v11985_v18  ;;  %v12248_v34 = vpop.f32.mrb[107].mxu0  ;;  %v12250_v48 = vpop.permute.xlu1 %1060 }
 0x1d7   : > { %18446 = vst [vmem:[#allocation194_spill] sm:$0xff] %v12220_v44  ;;  %v12237_v44 = vpop.permute.xlu0 %1055  ;;  %v4184_v49 = vadd.f32 %v4030_v53, %v3643_v4  ;;  %v4181_v56 = vadd.f32 %v4033_v17, %v12130_v24  ;;  %v12242_v6 = vmul.f32 %v11822_v30, %v12045_v47  ;;  %v12246_v57 = vmul.f32 %v11829_v32, %v12031_v28 }
 0x1d8   : > { %18447 = vst [vmem:[#allocation195_spill] sm:$0xff] %v12227_v59  ;;  %18448 = vst [vmem:[#allocation196_spill] sm:$0xff] %v12237_v44  ;;  %v4719_v46 = vmul.f32 %v4539_v61, %v18410_v26  ;;  %v4722_v5 = vmul.f32 %v4542_v3, %v18430_v39  ;;  %v3282_v53 = vrot.slane %v12233_v54, 7  ;;  %v3825_v24 = vrot.slane %v12233_v54, 1  ;;  %v12270_v39 = vpop.f32.mrb[108].mxu0 }
 0x1d9   : > { %18449 = vst [vmem:[#allocation197_spill] sm:$0xff] %v12250_v48  ;;  %v4361_v17 = vadd.f32 %v4181_v56, %v12008_v31  ;;  %v3285_v30 = vrot.slane %v12242_v6, 7  ;;  %v3828_v4 = vrot.slane %v12242_v6, 1  ;;  %v4364_v32 = vadd.f32 %v4184_v49, %v12014_v19  ;;  %18452 = vst [vmem:[#allocation200_spill] sm:$0xff] %v12270_v39 }
 0x1da   : > { %v12261_v59 = vadd.f32 %v12072_v14, %v4719_v46  ;;  %v12264_v12 = vadd.f32 %v12072_v14, %v4722_v5  ;;  %v3487_v61 = vsel %vm3386_vm2, %v3282_v53, %v3283_v27  ;;  %v3488_v3 = vsel %vm3386_vm2, %v3281_v62, %v3282_v53  ;;  %v12278_v46 = vpop.f32.mrb[109].mxu0 }
 0x1db   : > { %v3645_v31 = vadd.f32 %v3488_v3, %v12233_v54  ;;  %v3646_v56 = vadd.f32 %v3487_v61, %v12196_v37  ;;  %v4028_v19 = vsel %vm3927_vm3, %v3825_v24, %v3826_v16  ;;  %v4029_v49 = vsel %vm3927_vm3, %v3824_v60, %v3825_v24  ;;  %18453 = vst [vmem:[#allocation201_spill] sm:$0xff] %v12278_v46  ;;  %v18455_v60 = vld [vmem:[#allocation156_spill] sm:$0xff] }
 0x1dc   : > { %18450 = vst [vmem:[#allocation198_spill] sm:$0xff] %v12261_v59  ;;  %18451 = vst [vmem:[#allocation199_spill] sm:$0xff] %v12264_v12  ;;  %v4541_v5 = vadd.f32 %v4361_v17, %v12233_v54  ;;  %v4544_v12 = vadd.f32 %v4364_v32, %v12242_v6  ;;  %v3284_v62 = vrot.slane %v12246_v57, 7  ;;  %v3827_v53 = vrot.slane %v12246_v57, 1  ;;  %v12284_v59 = vpop.permute.xlu0 %1065  ;;  %v12295_v17 = vpop.permute.xlu1 %1070 }
 0x1dd   : > { %18454 = vst [vmem:[#allocation202_spill] sm:$0xff] %v12284_v59  ;;  %v4186_v3 = vadd.f32 %v4028_v19, %v3645_v31  ;;  %v4183_v61 = vadd.f32 %v4031_v7, %v12167_v23  ;;  %v12289_v26 = vmul.f32 %v11854_v2, %v12099_v42  ;;  %v12293_v24 = vmul.f32 %v18455_v60, %v12091_v0  ;;  %v12303_v23 = vpop.f32.mrb[110].mxu0 }
 0x1de   : > { %18456 = vst [vmem:[#allocation156_spill] sm:$0xff] %v12295_v17  ;;  %v4721_v32 = vmul.f32 %v4541_v5, %v18418_v33  ;;  %v4724_v46 = vmul.f32 %v4544_v12, %v18442_v58  ;;  %v3485_v39 = vsel %vm3386_vm2, %v3284_v62, %v3285_v30  ;;  %v3486_v7 = vsel %vm3386_vm2, %v3283_v27, %v3284_v62  ;;  %v12313_v12 = vpop.f32.mrb[111].mxu0 }
 0x1df   : > { %18457 = vst [vmem:[#allocation203_spill] sm:$0xff] %v12303_v23  ;;  %v3647_v2 = vadd.f32 %v3486_v7, %v12246_v57  ;;  %v12307_v31 = vadd.f32 %v3485_v39, %v12242_v6  ;;  %v4026_v19 = vsel %vm3927_vm3, %v3827_v53, %v3828_v4  ;;  %v4027_v5 = vsel %vm3927_vm3, %v3826_v16, %v3827_v53 }
 0x1e0   : > { %v12316_v60 = vadd.f32 %v12072_v14, %v4721_v32  ;;  %v12319_v27 = vadd.f32 %v12072_v14, %v4724_v46  ;;  %v4363_v62 = vadd.f32 %v4183_v61, %v12019_v10  ;;  %v3287_v7 = vrot.slane %v12289_v26, 7  ;;  %v12334_v10 = vpop.permute.xlu0 %1075 }
 0x1e1   : > { %v4188_v39 = vadd.f32 %v4026_v19, %v3647_v2  ;;  %v3830_v58 = vrot.slane %v12289_v26, 1  ;;  %v4366_v33 = vadd.f32 %v4186_v3, %v12060_v52  ;;  %v3286_v23 = vrot.slane %v12293_v24, 7  ;;  %18460 = vst [vmem:[#allocation206_spill] sm:$0xff] %v12334_v10 }
 0x1e2   : > { %18458 = vst [vmem:[#allocation204_spill] sm:$0xff] %v12316_v60  ;;  %18459 = vst [vmem:[#allocation205_spill] sm:$0xff] %v12319_v27  ;;  %v4543_v16 = vadd.f32 %v4363_v62, %v12246_v57  ;;  %v3829_v53 = vrot.slane %v12293_v24, 1  ;;  %v4185_v32 = vadd.f32 %v4029_v49, %v3644_v21  ;;  %v12330_v46 = vmul.f32 %v11882_v40, %v12147_v63  ;;  %v12332_v27 = vpop.f32.mrb[112].mxu0  ;;  %v12344_v21 = vpop.permute.xlu1 %1080 }
 0x1e3   : > { %v4546_v61 = vadd.f32 %v4366_v33, %v12289_v26  ;;  %v3483_v52 = vsel %vm3386_vm2, %v3286_v23, %v3287_v7  ;;  %v3484_v3 = vsel %vm3386_vm2, %v3285_v30, %v3286_v23  ;;  %v4368_v2 = vadd.f32 %v4188_v39, %v12110_v45  ;;  %v12342_v19 = vpop.f32.mrb[113].mxu0  ;;  %18462 = vst [vmem:[#allocation208_spill] sm:$0xff] %v12344_v21 }
 0x1e4   : > { %18461 = vst [vmem:[#allocation207_spill] sm:$0xff] %v12342_v19  ;;  %v4723_v40 = vmul.f32 %v4543_v16, %v18428_v51  ;;  %v3649_v49 = vadd.f32 %v3484_v3, %v12293_v24  ;;  %v12349_v62 = vadd.f32 %v3483_v52, %v12289_v26  ;;  %v4024_v33 = vsel %vm3927_vm3, %v3829_v53, %v3830_v58  ;;  %v12363_v51 = vpop.f32.mrb[114].mxu0 }
 0x1e5   : > { %v4726_v60 = vmul.f32 %v4546_v61, %v11985_v18  ;;  %v4025_v30 = vsel %vm3927_vm3, %v3828_v4, %v3829_v53  ;;  %v4365_v45 = vadd.f32 %v4185_v32, %v12064_v43  ;;  %v3289_v23 = vrot.slane %v12330_v46, 7  ;;  %v12373_v53 = vpop.f32.mrb[115].mxu0 }
 0x1e6   : > { %v12359_v39 = vadd.f32 %v12072_v14, %v4723_v40  ;;  %v4190_v16 = vadd.f32 %v4024_v33, %v3649_v49  ;;  %v3832_v3 = vrot.slane %v12330_v46, 1  ;;  %v4548_v52 = vadd.f32 %v4368_v2, %v12330_v46  ;;  %18465 = vst [vmem:[#allocation211_spill] sm:$0xff] %v12373_v53  ;;  %v18466_v40 = vld [vmem:[#allocation161_spill] sm:$0xff] }
 0x1e7   : > { %v12366_v19 = vadd.f32 %v12072_v14, %v4726_v60  ;;  %v4545_v61 = vadd.f32 %v4365_v45, %v12293_v24  ;;  %v12371_v43 = vmul.f32 %v11888_v50, %v12140_v55  ;;  %v4187_v4 = vadd.f32 %v4027_v5, %v3646_v56  ;;  %v18467_v60 = vld [vmem:[#allocation162_spill] sm:$0xff]  ;;  %v12385_v45 = vpop.permute.xlu0 %1085 }
 0x1e8   : > { %18463 = vst [vmem:[#allocation209_spill] sm:$0xff] %v12359_v39  ;;  %v4728_v32 = vmul.f32 %v4548_v52, %v12031_v28  ;;  %v12378_v49 = vmul.f32 %v18466_v40, %v12198_v38  ;;  %v4370_v2 = vadd.f32 %v4190_v16, %v12155_v9  ;;  %v12383_v33 = vmul.f32 %v18467_v60, %v12187_v29  ;;  %v12391_v28 = vpop.permute.xlu1 %1090 }
 0x1e9   : > { %18464 = vst [vmem:[#allocation210_spill] sm:$0xff] %v12366_v19  ;;  %18468 = vst [vmem:[#allocation161_spill] sm:$0xff] %v12385_v45  ;;  %v4725_v50 = vmul.f32 %v4545_v61, %v18439_v15  ;;  %v3288_v56 = vrot.slane %v12371_v43, 7  ;;  %v3831_v5 = vrot.slane %v12371_v43, 1  ;;  %v4367_v52 = vadd.f32 %v4187_v4, %v12114_v22  ;;  %v12399_v19 = vpop.f32.mrb[116].mxu0 }
 0x1ea   : > { %18469 = vst [vmem:[#allocation162_spill] sm:$0xff] %v12391_v28  ;;  %v12394_v40 = vadd.f32 %v12072_v14, %v4728_v32  ;;  %v3291_v9 = vrot.slane %v12378_v49, 7  ;;  %v3834_v16 = vrot.slane %v12378_v49, 1  ;;  %v4550_v60 = vadd.f32 %v4370_v2, %v12378_v49  ;;  %18471 = vst [vmem:[#allocation213_spill] sm:$0xff] %v12399_v19  ;;  %v12410_v32 = vpop.f32.mrb[117].mxu0 }
 0x1eb   : > { %v12402_v61 = vadd.f32 %v12072_v14, %v4725_v50  ;;  %v3481_v18 = vsel %vm3386_vm2, %v3288_v56, %v3289_v23  ;;  %v3482_v22 = vsel %vm3386_vm2, %v3287_v7, %v3288_v56  ;;  %v4022_v4 = vsel %vm3927_vm3, %v3831_v5, %v3832_v3  ;;  %18473 = vst [vmem:[#allocation215_spill] sm:$0xff] %v12410_v32 }
 0x1ec   : > { %18470 = vst [vmem:[#allocation212_spill] sm:$0xff] %v12394_v40  ;;  %v3651_v40 = vadd.f32 %v3482_v22, %v12371_v43  ;;  %v3652_v2 = vadd.f32 %v3481_v18, %v12330_v46  ;;  %v4023_v15 = vsel %vm3927_vm3, %v3830_v58, %v3831_v5  ;;  %v4547_v50 = vadd.f32 %v4367_v52, %v12371_v43  ;;  %v18474_v18 = vld [vmem:[#allocation163_spill] sm:$0xff]  ;;  %v12430_v5 = vpop.f32.mrb[118].mxu0  ;;  %v12432_v52 = vpop.permute.xlu0 %1095 }
 0x1ed   : > { %18472 = vst [vmem:[#allocation214_spill] sm:$0xff] %v12402_v61  ;;  %v4730_v61 = vmul.f32 %v4550_v60, %v12091_v0  ;;  %v3290_v39 = vrot.slane %v12383_v33, 7  ;;  %v3833_v7 = vrot.slane %v12383_v33, 1  ;;  %v4189_v56 = vadd.f32 %v4025_v30, %v12307_v31  ;;  %18475 = vst [vmem:[#allocation163_spill] sm:$0xff] %v12430_v5 }
 0x1ee   : > { %v4192_v19 = vadd.f32 %v4022_v4, %v3651_v40  ;;  %v4727_v32 = vmul.f32 %v4547_v50, %v11993_v35  ;;  %v12424_v22 = vmul.f32 %v11944_v25, %v12250_v48  ;;  %v12428_v58 = vmul.f32 %v18474_v18, %v12237_v44  ;;  %18476 = vst [vmem:[#allocation216_spill] sm:$0xff] %v12432_v52  ;;  %v12443_v40 = vpop.f32.mrb[119].mxu0  ;;  %v12445_v4 = vpop.permute.xlu1 %1100 }
 0x1ef   : > { %v12435_v60 = vadd.f32 %v12072_v14, %v4730_v61  ;;  %v3479_v31 = vsel %vm3386_vm2, %v3290_v39, %v3291_v9  ;;  %v3480_v30 = vsel %vm3386_vm2, %v3289_v23, %v3290_v39  ;;  %v4020_v25 = vsel %vm3927_vm3, %v3833_v7, %v3834_v16  ;;  %18478 = vst [vmem:[#allocation218_spill] sm:$0xff] %v12443_v40 }
 0x1f0   : > { %18479 = vst [vmem:[#allocation219_spill] sm:$0xff] %v12445_v4  ;;  %v12448_v50 = vadd.f32 %v12072_v14, %v4727_v32  ;;  %v3653_v18 = vadd.f32 %v3480_v30, %v12383_v33  ;;  %v12452_v61 = vadd.f32 %v3479_v31, %v12378_v49  ;;  %v4369_v23 = vadd.f32 %v4189_v56, %v12185_v8  ;;  %v12463_v31 = vpop.f32.mrb[120].mxu0  ;;  %v18482_v8 = vld [vmem:[#allocation166_spill] sm:$0xff]  ;;  %v18483_v56 = vld [vmem:[#allocation167_spill] sm:$0xff] }
 0x1f1   : > { %18477 = vst [vmem:[#allocation217_spill] sm:$0xff] %v12435_v60  ;;  %v4021_v60 = vsel %vm3927_vm3, %v3832_v3, %v3833_v7  ;;  %v3293_v39 = vrot.slane %v12424_v22, 7  ;;  %v3836_v0 = vrot.slane %v12424_v22, 1  ;;  %v4372_v35 = vadd.f32 %v4192_v19, %v12196_v37  ;;  %18481 = vst [vmem:[#allocation221_spill] sm:$0xff] %v12463_v31  ;;  %v12475_v19 = vpop.f32.mrb[121].mxu0 }
 0x1f2   : > { %18480 = vst [vmem:[#allocation220_spill] sm:$0xff] %v12448_v50  ;;  %v4194_v40 = vadd.f32 %v4020_v25, %v3653_v18  ;;  %v3292_v32 = vrot.slane %v12428_v58, 7  ;;  %v3835_v50 = vrot.slane %v12428_v58, 1  ;;  %v4191_v30 = vadd.f32 %v4023_v15, %v12349_v62  ;;  %18484 = vst [vmem:[#allocation166_spill] sm:$0xff] %v12475_v19  ;;  %v12485_v18 = vpop.permute.xlu0 %1105  ;;  %v12491_v31 = vpop.permute.xlu1 %1110 }
 0x1f3   : > { %v4549_v5 = vadd.f32 %v4369_v23, %v12383_v33  ;;  %v4552_v3 = vadd.f32 %v4372_v35, %v12424_v22  ;;  %v12469_v7 = vmul.f32 %v18482_v8, %v12295_v17  ;;  %v12473_v37 = vmul.f32 %v18483_v56, %v12284_v59  ;;  %18485 = vst [vmem:[#allocation167_spill] sm:$0xff] %v12485_v18 }
 0x1f4   : > { %v3477_v25 = vsel %vm3386_vm2, %v3292_v32, %v3293_v39  ;;  %v3478_v15 = vsel %vm3386_vm2, %v3291_v9, %v3292_v32  ;;  %v4018_v62 = vsel %vm3927_vm3, %v3835_v50, %v3836_v0  ;;  %v4019_v35 = vsel %vm3927_vm3, %v3834_v16, %v3835_v50  ;;  %18486 = vst [vmem:[#allocation222_spill] sm:$0xff] %v12491_v31  ;;  %v12497_v50 = vpop.f32.mrb[122].mxu0 }
 0x1f5   : > { %v4729_v23 = vmul.f32 %v4549_v5, %v12045_v47  ;;  %v4732_v8 = vmul.f32 %v4552_v3, %v12140_v55  ;;  %v3655_v56 = vadd.f32 %v3478_v15, %v12428_v58  ;;  %v3656_v19 = vadd.f32 %v3477_v25, %v12424_v22  ;;  %v12506_v55 = vpop.f32.mrb[123].mxu0 }
 0x1f6   : > { %v4371_v9 = vadd.f32 %v4191_v30, %v12233_v54  ;;  %v3295_v32 = vrot.slane %v12469_v7, 7  ;;  %v3838_v53 = vrot.slane %v12469_v7, 1  ;;  %v4374_v16 = vadd.f32 %v4194_v40, %v12242_v6  ;;  %18489 = vst [vmem:[#allocation225_spill] sm:$0xff] %v12506_v55 }
 0x1f7   : > { %v12500_v5 = vadd.f32 %v12072_v14, %v4729_v23  ;;  %v12503_v3 = vadd.f32 %v12072_v14, %v4732_v8  ;;  %v4196_v15 = vadd.f32 %v4018_v62, %v3655_v56  ;;  %v3294_v25 = vrot.slane %v12473_v37, 7  ;;  %v18490_v8 = vld [vmem:[#allocation172_spill] sm:$0xff] }
 0x1f8   : > { %v4551_v54 = vadd.f32 %v4371_v9, %v12428_v58  ;;  %v4554_v30 = vadd.f32 %v4374_v16, %v12469_v7  ;;  %v3837_v47 = vrot.slane %v12473_v37, 1  ;;  %v4193_v6 = vadd.f32 %v4021_v60, %v3652_v2  ;;  %v12526_v60 = vpop.f32.mrb[124].mxu0 }
 0x1f9   : > { %18487 = vst [vmem:[#allocation223_spill] sm:$0xff] %v12500_v5  ;;  %18488 = vst [vmem:[#allocation224_spill] sm:$0xff] %v12503_v3  ;;  %v3475_v40 = vsel %vm3386_vm2, %v3294_v25, %v3295_v32  ;;  %v3476_v23 = vsel %vm3386_vm2, %v3293_v39, %v3294_v25  ;;  %v12517_v62 = vmul.f32 %v18490_v8, %v12344_v21  ;;  %v12528_v5 = vpop.permute.xlu0 %1115 }
 0x1fa   : > { %v4376_v56 = vadd.f32 %v4196_v15, %v12289_v26  ;;  %v4731_v3 = vmul.f32 %v4551_v54, %v12099_v42  ;;  %v4734_v9 = vmul.f32 %v4554_v30, %v12187_v29  ;;  %v3657_v16 = vadd.f32 %v3476_v23, %v12473_v37  ;;  %18491 = vst [vmem:[#allocation172_spill] sm:$0xff] %v12526_v60  ;;  %v12536_v54 = vpop.f32.mrb[125].mxu0  ;;  %v12538_v30 = vpop.permute.xlu1 %1120 }
 0x1fb   : > { %v12524_v2 = vadd.f32 %v3475_v40, %v12469_v7  ;;  %18492 = vst [vmem:[#allocation226_spill] sm:$0xff] %v12528_v5  ;;  %v4016_v39 = vsel %vm3927_vm3, %v3837_v47, %v3838_v53  ;;  %v4017_v25 = vsel %vm3927_vm3, %v3836_v0, %v3837_v47  ;;  %v4373_v26 = vadd.f32 %v4193_v6, %v12246_v57  ;;  %v18497_v0 = vld [vmem:[#allocation173_spill] sm:$0xff] }
 0x1fc   : > { %v3297_v15 = vrot.slane %v12517_v62, 7  ;;  %18493 = vst [vmem:[#allocation227_spill] sm:$0xff] %v12536_v54  ;;  %18494 = vst [vmem:[#allocation228_spill] sm:$0xff] %v12538_v30  ;;  %v12541_v40 = vadd.f32 %v12072_v14, %v4731_v3  ;;  %v12544_v23 = vadd.f32 %v12072_v14, %v4734_v9  ;;  %v4198_v8 = vadd.f32 %v4016_v39, %v3657_v16  ;;  %v18498_v54 = vld [vmem:[#allocation174_spill] sm:$0xff] }
 0x1fd   : > { %v3840_v29 = vrot.slane %v12517_v62, 1  ;;  %v4553_v42 = vadd.f32 %v4373_v26, %v12473_v37  ;;  %v4556_v47 = vadd.f32 %v4376_v56, %v12517_v62  ;;  %v12551_v57 = vmul.f32 %v18497_v0, %v12334_v10  ;;  %v18499_v16 = vld [vmem:[#allocation178_spill] sm:$0xff]  ;;  %v12563_v26 = vpop.f32.mrb[126].mxu0 }
 0x1fe   : > { %18495 = vst [vmem:[#allocation229_spill] sm:$0xff] %v12541_v40  ;;  %18496 = vst [vmem:[#allocation230_spill] sm:$0xff] %v12544_v23  ;;  %v4195_v6 = vadd.f32 %v4019_v35, %v12452_v61  ;;  %v12556_v3 = vmul.f32 %v18498_v54, %v12391_v28  ;;  %v4378_v9 = vadd.f32 %v4198_v8, %v12330_v46  ;;  %v12569_v35 = vpop.f32.mrb[127].mxu0 }
 0x1ff   : > { %v12561_v39 = vmul.f32 %v18499_v16, %v12385_v45  ;;  %v4197_v23 = vadd.f32 %v4017_v25, %v3656_v19  ;;  %18500 = vst [vmem:[#allocation173_spill] sm:$0xff] %v12563_v26  ;;  %v4733_v56 = vmul.f32 %v4553_v42, %v12147_v63  ;;  %v4736_v0 = vmul.f32 %v4556_v47, %v12237_v44  ;;  %v12575_v25 = vpop.permute.xlu0 %1125  ;;  %v18508_v26 = vld [vmem:[#allocation122_spill] sm:$0xff] }
 0x200   : > { %v3296_v40 = vrot.slane %v12551_v57, 7  ;;  %v3839_v61 = vrot.slane %v12551_v57, 1  ;;  %18501 = vst [vmem:[#allocation174_spill] sm:$0xff] %v12569_v35  ;;  %v4375_v54 = vadd.f32 %v4195_v6, %v12293_v24  ;;  %v3299_v46 = vrot.slane %v12556_v3, 7  ;;  %18502 = vst [vmem:[#allocation178_spill] sm:$0xff] %v12575_v25  ;;  %v12587_v6 = vpop.permute.xlu1 %1130 }
 0x201   : > { %v3842_v8 = vrot.slane %v12556_v3, 1  ;;  %v4558_v19 = vadd.f32 %v4378_v9, %v12556_v3  ;;  %v12578_v42 = vadd.f32 %v12072_v14, %v4733_v56  ;;  %v12581_v47 = vadd.f32 %v12072_v14, %v4736_v0  ;;  %18505 = vst [vmem:[#allocation233_spill] sm:$0xff] %v12587_v6  ;;  %v12595_v0 = vpop.f32.mrb[128].mxu0 }
 0x202   : > { %v3473_v16 = vsel %vm3386_vm2, %v3296_v40, %v3297_v15  ;;  %v3474_v24 = vsel %vm3386_vm2, %v3295_v32, %v3296_v40  ;;  %v4014_v63 = vsel %vm3927_vm3, %v3839_v61, %v3840_v29  ;;  %v4015_v56 = vsel %vm3927_vm3, %v3838_v53, %v3839_v61  ;;  %18506 = vst [vmem:[#allocation234_spill] sm:$0xff] %v12595_v0  ;;  %v12601_v35 = vpop.f32.mrb[129].mxu0  ;;  %v18509_v53 = vld [vmem:[#allocation181_spill] sm:$0xff]  ;;  %v18517_v0 = vld [vmem:[#allocation124_spill] sm:$0xff] }
 0x203   : > { %18503 = vst [vmem:[#allocation231_spill] sm:$0xff] %v12578_v42  ;;  %18504 = vst [vmem:[#allocation232_spill] sm:$0xff] %v12581_v47  ;;  %v3659_v44 = vadd.f32 %v3474_v24, %v12551_v57  ;;  %v3660_v9 = vadd.f32 %v3473_v16, %v12517_v62  ;;  %v4555_v47 = vadd.f32 %v4375_v54, %v12551_v57  ;;  %v3298_v32 = vrot.slane %v12561_v39, 7 }
 0x204   : > { %v4738_v42 = vmul.f32 %v4558_v19, %v12284_v59  ;;  %v3841_v40 = vrot.slane %v12561_v39, 1  ;;  %18507 = vst [vmem:[#allocation235_spill] sm:$0xff] %v12601_v35  ;;  %v4377_v16 = vadd.f32 %v4197_v23, %v12371_v43  ;;  %v12606_v60 = vmul.f32 %v18508_v26, %v12445_v4 }
 0x205   : > { %v4200_v24 = vadd.f32 %v4014_v63, %v3659_v44  ;;  %v12610_v61 = vmul.f32 %v18509_v53, %v12432_v52  ;;  %v4735_v54 = vmul.f32 %v4555_v47, %v12198_v38  ;;  %v3471_v59 = vsel %vm3386_vm2, %v3298_v32, %v3299_v46  ;;  %v12628_v47 = vpop.f32.mrb[130].mxu0 }
 0x206   : > { %v12614_v19 = vadd.f32 %v12072_v14, %v4738_v42  ;;  %v3472_v63 = vsel %vm3386_vm2, %v3297_v15, %v3298_v32  ;;  %v12622_v43 = vadd.f32 %v3471_v59, %v12556_v3  ;;  %v4012_v23 = vsel %vm3927_vm3, %v3841_v40, %v3842_v8  ;;  %18511 = vst [vmem:[#allocation181_spill] sm:$0xff] %v12628_v47  ;;  %v12630_v42 = vpop.permute.xlu0 %1135 }
 0x207   : > { %v3661_v44 = vadd.f32 %v3472_v63, %v12561_v39  ;;  %v4013_v26 = vsel %vm3927_vm3, %v3840_v29, %v3841_v40  ;;  %18512 = vst [vmem:[#allocation236_spill] sm:$0xff] %v12630_v42  ;;  %v12633_v53 = vadd.f32 %v12072_v14, %v4735_v54  ;;  %v4557_v15 = vadd.f32 %v4377_v16, %v12561_v39  ;;  %v12638_v63 = vpop.f32.mrb[131].mxu0  ;;  %v18516_v16 = vld [vmem:[#allocation185_spill] sm:$0xff] }
 0x208   : > { %18510 = vst [vmem:[#allocation122_spill] sm:$0xff] %v12614_v19  ;;  %v3301_v32 = vrot.slane %v12606_v60, 7  ;;  %v3844_v59 = vrot.slane %v12606_v60, 1  ;;  %18514 = vst [vmem:[#allocation238_spill] sm:$0xff] %v12638_v63  ;;  %v12640_v19 = vpop.permute.xlu1 %1140  ;;  %v4380_v29 = vadd.f32 %v4200_v24, %v12378_v49  ;;  %v3300_v40 = vrot.slane %v12610_v61, 7 }
 0x209   : > { %18513 = vst [vmem:[#allocation237_spill] sm:$0xff] %v12633_v53  ;;  %18515 = vst [vmem:[#allocation239_spill] sm:$0xff] %v12640_v19  ;;  %v4202_v38 = vadd.f32 %v4012_v23, %v3661_v44  ;;  %v3843_v47 = vrot.slane %v12610_v61, 1  ;;  %v4737_v54 = vmul.f32 %v4557_v15, %v12250_v48  ;;  %v4199_v53 = vadd.f32 %v4015_v56, %v12524_v2  ;;  %v12662_v2 = vpop.f32.mrb[132].mxu0 }
 0x20a   : > { %v12649_v35 = vmul.f32 %v18516_v16, %v12491_v31  ;;  %v12653_v63 = vmul.f32 %v18517_v0, %v12485_v18  ;;  %v4560_v44 = vadd.f32 %v4380_v29, %v12606_v60  ;;  %v3469_v49 = vsel %vm3386_vm2, %v3300_v40, %v3301_v32  ;;  %18518 = vst [vmem:[#allocation185_spill] sm:$0xff] %v12662_v2  ;;  %v12673_v16 = vpop.f32.mrb[133].mxu0 }
 0x20b   : > { %v3470_v24 = vsel %vm3386_vm2, %v3299_v46, %v3300_v40  ;;  %v4010_v23 = vsel %vm3927_vm3, %v3843_v47, %v3844_v59  ;;  %v12665_v56 = vadd.f32 %v12072_v14, %v4737_v54  ;;  %v12669_v0 = vadd.f32 %v3469_v49, %v12606_v60  ;;  %18520 = vst [vmem:[#allocation240_spill] sm:$0xff] %v12673_v16  ;;  %v12679_v54 = vpop.permute.xlu0 %1145  ;;  %v12694_v16 = vpop.f32.mrb[134].mxu0 }
 0x20c   : > { %v3663_v15 = vadd.f32 %v3470_v24, %v12610_v61  ;;  %v4011_v29 = vsel %vm3927_vm3, %v3842_v8, %v3843_v47  ;;  %v4740_v46 = vmul.f32 %v4560_v44, %v12334_v10  ;;  %v4379_v40 = vadd.f32 %v4199_v53, %v12383_v33  ;;  %18521 = vst [vmem:[#allocation241_spill] sm:$0xff] %v12679_v54  ;;  %v12684_v8 = vpop.permute.xlu1 %1150  ;;  %v18524_v44 = vld [vmem:[#allocation186_spill] sm:$0xff] }
 0x20d   : > { %18519 = vst [vmem:[#allocation124_spill] sm:$0xff] %v12665_v56  ;;  %v3303_v48 = vrot.slane %v12649_v35, 7  ;;  %v3846_v2 = vrot.slane %v12649_v35, 1  ;;  %v4382_v24 = vadd.f32 %v4202_v38, %v12424_v22  ;;  %v3302_v49 = vrot.slane %v12653_v63, 7  ;;  %18522 = vst [vmem:[#allocation242_spill] sm:$0xff] %v12684_v8 }
 0x20e   : > { %v4204_v56 = vadd.f32 %v4010_v23, %v3663_v15  ;;  %v3845_v55 = vrot.slane %v12653_v63, 1  ;;  %v12687_v47 = vadd.f32 %v12072_v14, %v4740_v46  ;;  %v4559_v33 = vadd.f32 %v4379_v40, %v12610_v61  ;;  %18525 = vst [vmem:[#allocation186_spill] sm:$0xff] %v12694_v16  ;;  %v12703_v46 = vpop.f32.mrb[135].mxu0 }
 0x20f   : > { %v4201_v53 = vadd.f32 %v4013_v26, %v3660_v9  ;;  %v12692_v10 = vmul.f32 %v18524_v44, %v12538_v30  ;;  %v4562_v38 = vadd.f32 %v4382_v24, %v12649_v35  ;;  %v3467_v22 = vsel %vm3386_vm2, %v3302_v49, %v3303_v48  ;;  %18526 = vst [vmem:[#allocation244_spill] sm:$0xff] %v12703_v46  ;;  %v12724_v16 = vpop.f32.mrb[136].mxu0 }
 0x210   : > { %18523 = vst [vmem:[#allocation243_spill] sm:$0xff] %v12687_v47  ;;  %v3468_v23 = vsel %vm3386_vm2, %v3301_v32, %v3302_v49  ;;  %v4008_v15 = vsel %vm3927_vm3, %v3845_v55, %v3846_v2  ;;  %v4739_v9 = vmul.f32 %v4559_v33, %v12295_v17  ;;  %v12708_v40 = vadd.f32 %v3467_v22, %v12649_v35  ;;  %v18528_v22 = vld [vmem:[#allocation188_spill] sm:$0xff] }
 0x211   : > { %v3665_v26 = vadd.f32 %v3468_v23, %v12653_v63  ;;  %v4009_v24 = vsel %vm3927_vm3, %v3844_v59, %v3845_v55  ;;  %v4742_v44 = vmul.f32 %v4562_v38, %v12385_v45  ;;  %v4381_v47 = vadd.f32 %v4201_v53, %v12428_v58  ;;  %v12726_v55 = vpop.permute.xlu0 %1155 }
 0x212   : > { %v3305_v32 = vrot.slane %v12692_v10, 7  ;;  %v3848_v49 = vrot.slane %v12692_v10, 1  ;;  %v12717_v46 = vadd.f32 %v12072_v14, %v4739_v9  ;;  %v4384_v23 = vadd.f32 %v4204_v56, %v12469_v7  ;;  %18529 = vst [vmem:[#allocation188_spill] sm:$0xff] %v12726_v55  ;;  %v12737_v7 = vpop.f32.mrb[137].mxu0  ;;  %v12739_v56 = vpop.permute.xlu1 %1160 }
 0x213   : > { %v4206_v33 = vadd.f32 %v4008_v15, %v3665_v26  ;;  %v12722_v17 = vmul.f32 %v18528_v22, %v12528_v5  ;;  %v12729_v58 = vadd.f32 %v12072_v14, %v4742_v44  ;;  %v4561_v59 = vadd.f32 %v4381_v47, %v12653_v63  ;;  %18531 = vst [vmem:[#allocation247_spill] sm:$0xff] %v12739_v56 }
 0x214   : > { %18527 = vst [vmem:[#allocation245_spill] sm:$0xff] %v12717_v46  ;;  %v4203_v53 = vadd.f32 %v4011_v29, %v12622_v43  ;;  %v12735_v38 = vmul.f32 %v12171_v11, %v12587_v6  ;;  %v4564_v15 = vadd.f32 %v4384_v23, %v12692_v10 }
 0x215   : > { %18530 = vst [vmem:[#allocation246_spill] sm:$0xff] %v12729_v58  ;;  %v3304_v9 = vrot.slane %v12722_v17, 7  ;;  %v3847_v26 = vrot.slane %v12722_v17, 1  ;;  %v4386_v44 = vadd.f32 %v4206_v33, %v12517_v62  ;;  %v4741_v47 = vmul.f32 %v4561_v59, %v12344_v21  ;;  %v12756_v62 = vpop.f32.mrb[138].mxu0 }
 0x216   : > { %v4383_v43 = vadd.f32 %v4203_v53, %v12473_v37  ;;  %v3307_v29 = vrot.slane %v12735_v38, 7  ;;  %v3850_v11 = vrot.slane %v12735_v38, 1  ;;  %v4744_v22 = vmul.f32 %v4564_v15, %v12432_v52  ;;  %v12767_v15 = vpop.f32.mrb[139].mxu0 }
 0x217   : > { %v3465_v58 = vsel %vm3386_vm2, %v3304_v9, %v3305_v32  ;;  %v3466_v23 = vsel %vm3386_vm2, %v3303_v48, %v3304_v9  ;;  %v4006_v45 = vsel %vm3927_vm3, %v3847_v26, %v3848_v49  ;;  %v12759_v33 = vadd.f32 %v12072_v14, %v4741_v47 }
 0x218   : > { %v3667_v37 = vadd.f32 %v3466_v23, %v12722_v17  ;;  %v12763_v59 = vadd.f32 %v3465_v58, %v12692_v10  ;;  %v4007_v53 = vsel %vm3927_vm3, %v3846_v2, %v3847_v26  ;;  %v12770_v48 = vadd.f32 %v12072_v14, %v4744_v22  ;;  %v12778_v23 = vpop.permute.xlu0 %1165 }
 0x219   : > { %18532 = vst [vmem:[#allocation248_spill] sm:$0xff] %v12759_v33  ;;  %v4563_v9 = vadd.f32 %v4383_v43, %v12722_v17  ;;  %v4566_v52 = vadd.f32 %v4386_v44, %v12735_v38  ;;  %v12776_v47 = vmul.f32 %v12177_v20, %v12575_v25  ;;  %18534 = vst [vmem:[#allocation250_spill] sm:$0xff] %v12778_v23  ;;  %v12789_v43 = vpop.permute.xlu1 %1170 }
 0x21a   : > { %18533 = vst [vmem:[#allocation249_spill] sm:$0xff] %v12770_v48  ;;  %v4208_v58 = vadd.f32 %v4006_v45, %v3667_v37  ;;  %v4205_v33 = vadd.f32 %v4009_v24, %v12669_v0  ;;  %v12783_v2 = vmul.f32 %v12204_v13, %v12640_v19  ;;  %v12787_v26 = vmul.f32 %v12210_v41, %v12630_v42  ;;  %v12795_v37 = vpop.f32.mrb[140].mxu0 }
 0x21b   : > { %18535 = vst [vmem:[#allocation251_spill] sm:$0xff] %v12789_v43  ;;  %v4743_v44 = vmul.f32 %v4563_v9, %v12391_v28  ;;  %v4746_v20 = vmul.f32 %v4566_v52, %v12485_v18  ;;  %v3306_v22 = vrot.slane %v12776_v47, 7  ;;  %v3849_v45 = vrot.slane %v12776_v47, 1  ;;  %v12801_v48 = vpop.f32.mrb[141].mxu0 }
 0x21c   : > { %v4385_v0 = vadd.f32 %v4205_v33, %v12551_v57  ;;  %v3309_v13 = vrot.slane %v12783_v2, 7  ;;  %v3852_v24 = vrot.slane %v12783_v2, 1  ;;  %v4388_v41 = vadd.f32 %v4208_v58, %v12556_v3  ;;  %v12823_v21 = vpop.f32.mrb[142].mxu0 }
 0x21d   : > { %v12804_v9 = vadd.f32 %v12072_v14, %v4743_v44  ;;  %v12807_v52 = vadd.f32 %v12072_v14, %v4746_v20  ;;  %v3463_v18 = vsel %vm3386_vm2, %v3306_v22, %v3307_v29  ;;  %v3464_v57 = vsel %vm3386_vm2, %v3305_v32, %v3306_v22  ;;  %v12825_v32 = vpop.permute.xlu0 %1175 }
 0x21e   : > { %v3669_v33 = vadd.f32 %v3464_v57, %v12776_v47  ;;  %v3670_v28 = vadd.f32 %v3463_v18, %v12735_v38  ;;  %v4004_v3 = vsel %vm3927_vm3, %v3849_v45, %v3850_v11  ;;  %v4005_v58 = vsel %vm3927_vm3, %v3848_v49, %v3849_v45  ;;  %18538 = vst [vmem:[#allocation254_spill] sm:$0xff] %v12825_v32  ;;  %v12836_v45 = vpop.f32.mrb[143].mxu0 }
 0x21f   : > { %18536 = vst [vmem:[#allocation252_spill] sm:$0xff] %v12804_v9  ;;  %18537 = vst [vmem:[#allocation253_spill] sm:$0xff] %v12807_v52  ;;  %v4565_v44 = vadd.f32 %v4385_v0, %v12776_v47  ;;  %v4568_v20 = vadd.f32 %v4388_v41, %v12783_v2  ;;  %v3308_v52 = vrot.slane %v12787_v26, 7  ;;  %v3851_v9 = vrot.slane %v12787_v26, 1  ;;  %v12838_v0 = vpop.permute.xlu1 %1180 }
 0x220   : > { %v4210_v22 = vadd.f32 %v4004_v3, %v3669_v33  ;;  %v4207_v18 = vadd.f32 %v4007_v53, %v12708_v40  ;;  %v12830_v57 = vmul.f32 %v12235_v1, %v12684_v8  ;;  %v12834_v49 = vmul.f32 %v12248_v34, %v12679_v54  ;;  %18539 = vst [vmem:[#allocation255_spill] sm:$0xff] %v12836_v45 }
 0x221   : > { %18540 = vst [vmem:[#allocation256_spill] sm:$0xff] %v12838_v0  ;;  %v4745_v41 = vmul.f32 %v4565_v44, %v12445_v4  ;;  %v4748_v46 = vmul.f32 %v4568_v20, %v12528_v5  ;;  %v3461_v33 = vsel %vm3386_vm2, %v3308_v52, %v3309_v13  ;;  %v3462_v40 = vsel %vm3386_vm2, %v3307_v29, %v3308_v52  ;;  %v12862_v52 = vpop.f32.mrb[144].mxu0 }
 0x222   : > { %v3671_v1 = vadd.f32 %v3462_v40, %v12787_v26  ;;  %v12848_v53 = vadd.f32 %v3461_v33, %v12783_v2  ;;  %v4002_v34 = vsel %vm3927_vm3, %v3851_v9, %v3852_v24  ;;  %v4003_v3 = vsel %vm3927_vm3, %v3850_v11, %v3851_v9  ;;  %v12867_v11 = vpop.f32.mrb[145].mxu0 }
 0x223   : > { %v12855_v44 = vadd.f32 %v12072_v14, %v4745_v41  ;;  %v12858_v20 = vadd.f32 %v12072_v14, %v4748_v46  ;;  %v4387_v5 = vadd.f32 %v4207_v18, %v12561_v39  ;;  %v3311_v29 = vrot.slane %v12830_v57, 7  ;;  %18543 = vst [vmem:[#allocation259_spill] sm:$0xff] %v12867_v11  ;;  %v18544_v39 = vld [vmem:[#allocation200_spill] sm:$0xff] }
 0x224   : > { %v4212_v33 = vadd.f32 %v4002_v34, %v3671_v1  ;;  %v3854_v40 = vrot.slane %v12830_v57, 1  ;;  %v4390_v4 = vadd.f32 %v4210_v22, %v12606_v60  ;;  %v3310_v45 = vrot.slane %v12834_v49, 7  ;;  %v12884_v34 = vpop.permute.xlu1 %1190 }
 0x225   : > { %18541 = vst [vmem:[#allocation257_spill] sm:$0xff] %v12855_v44  ;;  %18542 = vst [vmem:[#allocation258_spill] sm:$0xff] %v12858_v20  ;;  %v4567_v9 = vadd.f32 %v4387_v5, %v12787_v26  ;;  %v3853_v46 = vrot.slane %v12834_v49, 1  ;;  %v4209_v41 = vadd.f32 %v4005_v58, %v12763_v59  ;;  %v12874_v18 = vmul.f32 %v18544_v39, %v12739_v56  ;;  %v12876_v20 = vpop.permute.xlu0 %1185  ;;  %v12893_v44 = vpop.f32.mrb[146].mxu0 }
 0x226   : > { %18545 = vst [vmem:[#allocation200_spill] sm:$0xff] %v12876_v20  ;;  %v4570_v1 = vadd.f32 %v4390_v4, %v12830_v57  ;;  %v3459_v60 = vsel %vm3386_vm2, %v3310_v45, %v3311_v29  ;;  %v3460_v22 = vsel %vm3386_vm2, %v3309_v13, %v3310_v45  ;;  %v4392_v5 = vadd.f32 %v4212_v33, %v12649_v35  ;;  %v12900_v33 = vpop.f32.mrb[147].mxu0 }
 0x227   : > { %18546 = vst [vmem:[#allocation260_spill] sm:$0xff] %v12884_v34  ;;  %v4747_v59 = vmul.f32 %v4567_v9, %v12491_v31  ;;  %v3673_v58 = vadd.f32 %v3460_v22, %v12834_v49  ;;  %v12889_v39 = vadd.f32 %v3459_v60, %v12830_v57  ;;  %v4000_v4 = vsel %vm3927_vm3, %v3853_v46, %v3854_v40 }
 0x228   : > { %18547 = vst [vmem:[#allocation261_spill] sm:$0xff] %v12893_v44  ;;  %v4750_v11 = vmul.f32 %v4570_v1, %v12575_v25  ;;  %v4001_v13 = vsel %vm3927_vm3, %v3852_v24, %v3853_v46  ;;  %v4389_v35 = vadd.f32 %v4209_v41, %v12610_v61  ;;  %v3313_v45 = vrot.slane %v12874_v18, 7  ;;  %v18550_v24 = vld [vmem:[#allocation201_spill] sm:$0xff] }
 0x229   : > { %v12903_v9 = vadd.f32 %v12072_v14, %v4747_v59  ;;  %v4214_v60 = vadd.f32 %v4000_v4, %v3673_v58  ;;  %v3856_v22 = vrot.slane %v12874_v18, 1  ;;  %v4572_v31 = vadd.f32 %v4392_v5, %v12874_v18  ;;  %v18551_v59 = vld [vmem:[#allocation203_spill] sm:$0xff]  ;;  %v12927_v4 = vpop.permute.xlu0 %1195 }
 0x22a   : > { %v12908_v44 = vadd.f32 %v12072_v14, %v4750_v11  ;;  %v4569_v1 = vadd.f32 %v4389_v35, %v12834_v49  ;;  %v12913_v61 = vmul.f32 %v18550_v24, %v12726_v55  ;;  %v4211_v46 = vadd.f32 %v4003_v3, %v3670_v28  ;;  %v12925_v11 = vpop.f32.mrb[148].mxu0  ;;  %18552 = vst [vmem:[#allocation201_spill] sm:$0xff] %v12927_v4 }
 0x22b   : > { %18548 = vst [vmem:[#allocation262_spill] sm:$0xff] %v12903_v9  ;;  %v4752_v41 = vmul.f32 %v4572_v31, %v12630_v42  ;;  %v12918_v25 = vmul.f32 %v18551_v59, %v12789_v43  ;;  %v4394_v58 = vadd.f32 %v4214_v60, %v12692_v10  ;;  %v12923_v5 = vmul.f32 %v12313_v12, %v12778_v23  ;;  %v12933_v24 = vpop.f32.mrb[149].mxu0  ;;  %v12935_v59 = vpop.permute.xlu1 %1200 }
 0x22c   : > { %18549 = vst [vmem:[#allocation263_spill] sm:$0xff] %v12908_v44  ;;  %v4749_v35 = vmul.f32 %v4569_v1, %v12538_v30  ;;  %v3312_v28 = vrot.slane %v12913_v61, 7  ;;  %v3855_v31 = vrot.slane %v12913_v61, 1  ;;  %v4391_v3 = vadd.f32 %v4211_v46, %v12653_v63  ;;  %18553 = vst [vmem:[#allocation203_spill] sm:$0xff] %v12933_v24  ;;  %v12946_v1 = vld [vmem:[%s17727_s3] ss:$0 sm:$0xff] }
 0x22d   : > { %18554 = vst [vmem:[#allocation264_spill] sm:$0xff] %v12935_v59  ;;  %v12938_v10 = vadd.f32 %v12072_v14, %v4752_v41  ;;  %v3315_v12 = vrot.slane %v12918_v25, 7  ;;  %v3858_v60 = vrot.slane %v12918_v25, 1  ;;  %v4574_v42 = vadd.f32 %v4394_v58, %v12918_v25 }
 0x22e   : > { %v12949_v63 = vadd.f32 %v12946_v1, %v4749_v35  ;;  %v3457_v46 = vsel %vm3386_vm2, %v3312_v28, %v3313_v45  ;;  %v3458_v14 = vsel %vm3386_vm2, %v3311_v29, %v3312_v28  ;;  %v3998_v41 = vsel %vm3927_vm3, %v3855_v31, %v3856_v22  ;;  %v12962_v35 = vpop.f32.mrb[150].mxu0 }
 0x22f   : > { %18555 = vst [vmem:[#allocation265_spill] sm:$0xff] %v12938_v10  ;;  %v3675_v10 = vadd.f32 %v3458_v14, %v12913_v61  ;;  %v3676_v58 = vadd.f32 %v3457_v46, %v12874_v18  ;;  %v3999_v44 = vsel %vm3927_vm3, %v3854_v40, %v3855_v31  ;;  %v4571_v30 = vadd.f32 %v4391_v3, %v12913_v61  ;;  %v12968_v24 = vpop.f32.mrb[151].mxu0  ;;  %v18559_v31 = vld [vmem:[#allocation207_spill] sm:$0xff] }
 0x230   : > { %18556 = vst [vmem:[#allocation266_spill] sm:$0xff] %v12949_v63  ;;  %18557 = vst [vmem:[#allocation267_spill] sm:$0xff] %v12962_v35  ;;  %v4754_v63 = vmul.f32 %v4574_v42, %v12679_v54  ;;  %v3314_v9 = vrot.slane %v12923_v5, 7  ;;  %v3857_v29 = vrot.slane %v12923_v5, 1  ;;  %v4213_v28 = vadd.f32 %v4001_v13, %v12848_v53  ;;  %v12979_v42 = vpop.permute.xlu0 %1205 }
 0x231   : > { %18558 = vst [vmem:[#allocation268_spill] sm:$0xff] %v12968_v24  ;;  %v4216_v14 = vadd.f32 %v3998_v41, %v3675_v10  ;;  %v4751_v46 = vmul.f32 %v4571_v30, %v12587_v6  ;;  %v12973_v40 = vmul.f32 %v12332_v27, %v12838_v0  ;;  %v12977_v3 = vmul.f32 %v18559_v31, %v12825_v32  ;;  %v12990_v27 = vpop.permute.xlu1 %1210 }
 0x232   : > { %18560 = vst [vmem:[#allocation207_spill] sm:$0xff] %v12979_v42  ;;  %v12982_v54 = vadd.f32 %v12946_v1, %v4754_v63  ;;  %v3455_v53 = vsel %vm3386_vm2, %v3314_v9, %v3315_v12  ;;  %v3456_v13 = vsel %vm3386_vm2, %v3313_v45, %v3314_v9  ;;  %v3996_v30 = vsel %vm3927_vm3, %v3857_v29, %v3858_v60 }
 0x233   : > { %18562 = vst [vmem:[#allocation270_spill] sm:$0xff] %v12990_v27  ;;  %v12993_v10 = vadd.f32 %v12946_v1, %v4751_v46  ;;  %v3677_v41 = vadd.f32 %v3456_v13, %v12923_v5  ;;  %v12997_v31 = vadd.f32 %v3455_v53, %v12918_v25  ;;  %v3997_v63 = vsel %vm3927_vm3, %v3856_v22, %v3857_v29 }
 0x234   : > { %18561 = vst [vmem:[#allocation269_spill] sm:$0xff] %v12982_v54  ;;  %v13001_v54 = vpop.f32.mrb[152].mxu0  ;;  %v4393_v45 = vadd.f32 %v4213_v28, %v12722_v17  ;;  %v3317_v9 = vrot.slane %v12973_v40, 7  ;;  %v3860_v6 = vrot.slane %v12973_v40, 1  ;;  %v4396_v24 = vadd.f32 %v4216_v14, %v12735_v38  ;;  %v18566_v28 = vld [vmem:[#allocation211_spill] sm:$0xff] }
 0x235   : > { %18563 = vst [vmem:[#allocation271_spill] sm:$0xff] %v12993_v10  ;;  %18564 = vst [vmem:[#allocation272_spill] sm:$0xff] %v13001_v54  ;;  %v13007_v46 = vpop.f32.mrb[153].mxu0  ;;  %v4218_v10 = vadd.f32 %v3996_v30, %v3677_v41  ;;  %v3316_v13 = vrot.slane %v12977_v3, 7  ;;  %v3859_v53 = vrot.slane %v12977_v3, 1  ;;  %v4215_v35 = vadd.f32 %v3999_v44, %v12889_v39 }
 0x236   : > { %18565 = vst [vmem:[#allocation273_spill] sm:$0xff] %v13007_v46  ;;  %v4573_v22 = vadd.f32 %v4393_v45, %v12923_v5  ;;  %v4576_v29 = vadd.f32 %v4396_v24, %v12973_v40  ;;  %v13016_v17 = vmul.f32 %v12363_v51, %v12884_v34  ;;  %v13020_v38 = vmul.f32 %v18566_v28, %v12876_v20  ;;  %v13030_v24 = vpop.f32.mrb[154].mxu0  ;;  %v13032_v51 = vpop.permute.xlu0 %1215 }
 0x237   : > { %v3453_v14 = vsel %vm3386_vm2, %v3316_v13, %v3317_v9  ;;  %v3454_v30 = vsel %vm3386_vm2, %v3315_v12, %v3316_v13  ;;  %v3994_v44 = vsel %vm3927_vm3, %v3859_v53, %v3860_v6  ;;  %v3995_v39 = vsel %vm3927_vm3, %v3858_v60, %v3859_v53  ;;  %18567 = vst [vmem:[#allocation211_spill] sm:$0xff] %v13030_v24  ;;  %v13038_v54 = vpop.f32.mrb[155].mxu0  ;;  %v13040_v12 = vpop.permute.xlu1 %1220 }
 0x238   : > { %18568 = vst [vmem:[#allocation274_spill] sm:$0xff] %v13032_v51  ;;  %v4753_v41 = vmul.f32 %v4573_v22, %v12640_v19  ;;  %v4756_v45 = vmul.f32 %v4576_v29, %v12726_v55  ;;  %v3679_v28 = vadd.f32 %v3454_v30, %v12977_v3  ;;  %v3680_v46 = vadd.f32 %v3453_v14, %v12973_v40 }
 0x239   : > { %18569 = vst [vmem:[#allocation275_spill] sm:$0xff] %v13038_v54  ;;  %18570 = vst [vmem:[#allocation276_spill] sm:$0xff] %v13040_v12  ;;  %v4395_v13 = vadd.f32 %v4215_v35, %v12776_v47  ;;  %v3319_v60 = vrot.slane %v13016_v17, 7  ;;  %v3862_v53 = vrot.slane %v13016_v17, 1  ;;  %v4398_v24 = vadd.f32 %v4218_v10, %v12783_v2  ;;  %v13056_v54 = vpop.f32.mrb[156].mxu0 }
 0x23a   : > { %v13047_v22 = vadd.f32 %v12946_v1, %v4753_v41  ;;  %v13050_v29 = vadd.f32 %v12946_v1, %v4756_v45  ;;  %v4220_v30 = vadd.f32 %v3994_v44, %v3679_v28  ;;  %v3318_v14 = vrot.slane %v13020_v38, 7  ;;  %v18573_v41 = vld [vmem:[#allocation213_spill] sm:$0xff]  ;;  %v13067_v28 = vpop.f32.mrb[157].mxu0 }
 0x23b   : > { %v4575_v55 = vadd.f32 %v4395_v13, %v12977_v3  ;;  %v4578_v19 = vadd.f32 %v4398_v24, %v13016_v17  ;;  %v3861_v47 = vrot.slane %v13020_v38, 1  ;;  %v4217_v35 = vadd.f32 %v3997_v63, %v3676_v58 }
 0x23c   : > { %18571 = vst [vmem:[#allocation277_spill] sm:$0xff] %v13047_v22  ;;  %18572 = vst [vmem:[#allocation278_spill] sm:$0xff] %v13050_v29  ;;  %v3451_v2 = vsel %vm3386_vm2, %v3318_v14, %v3319_v60  ;;  %v3452_v10 = vsel %vm3386_vm2, %v3317_v9, %v3318_v14  ;;  %v13064_v44 = vmul.f32 %v18573_v41, %v12935_v59  ;;  %v13075_v29 = vpop.permute.xlu0 %1225 }
 0x23d   : > { %v4400_v45 = vadd.f32 %v4220_v30, %v12830_v57  ;;  %v4755_v24 = vmul.f32 %v4575_v55, %v12684_v8  ;;  %v4758_v58 = vmul.f32 %v4578_v19, %v12778_v23  ;;  %v3681_v63 = vadd.f32 %v3452_v10, %v13020_v38  ;;  %18574 = vst [vmem:[#allocation213_spill] sm:$0xff] %v13075_v29  ;;  %v13083_v55 = vpop.permute.xlu1 %1230  ;;  %v13092_v23 = vpop.f32.mrb[158].mxu0 }
 0x23e   : > { %v13073_v13 = vadd.f32 %v3451_v2, %v13016_v17  ;;  %v3992_v9 = vsel %vm3927_vm3, %v3861_v47, %v3862_v53  ;;  %v3993_v14 = vsel %vm3927_vm3, %v3860_v6, %v3861_v47  ;;  %v4397_v57 = vadd.f32 %v4217_v35, %v12787_v26  ;;  %18575 = vst [vmem:[#allocation279_spill] sm:$0xff] %v13083_v55  ;;  %v18579_v26 = vld [vmem:[#allocation215_spill] sm:$0xff] }
 0x23f   : > { %v3321_v30 = vrot.slane %v13064_v44, 7  ;;  %v13086_v19 = vadd.f32 %v12946_v1, %v4755_v24  ;;  %v13089_v2 = vadd.f32 %v12946_v1, %v4758_v58  ;;  %v4222_v10 = vadd.f32 %v3992_v9, %v3681_v63  ;;  %18578 = vst [vmem:[#allocation282_spill] sm:$0xff] %v13092_v23  ;;  %v13101_v24 = vpop.f32.mrb[159].mxu0  ;;  %v18581_v58 = vld [vmem:[#allocation163_spill] sm:$0xff]  ;;  %v18582_v9 = vld [vmem:[#allocation218_spill] sm:$0xff] }
 0x240   : > { %v3864_v41 = vrot.slane %v13064_v44, 1  ;;  %v4577_v8 = vadd.f32 %v4397_v57, %v13020_v38  ;;  %v4580_v6 = vadd.f32 %v4400_v45, %v13064_v44  ;;  %v13098_v47 = vmul.f32 %v18579_v26, %v12927_v4  ;;  %18580 = vst [vmem:[#allocation215_spill] sm:$0xff] %v13101_v24 }
 0x241   : > { %18576 = vst [vmem:[#allocation280_spill] sm:$0xff] %v13086_v19  ;;  %18577 = vst [vmem:[#allocation281_spill] sm:$0xff] %v13089_v2  ;;  %v4219_v35 = vadd.f32 %v3995_v39, %v12997_v31  ;;  %v13105_v2 = vmul.f32 %v18581_v58, %v12990_v27  ;;  %v4402_v63 = vadd.f32 %v4222_v10, %v12874_v18  ;;  %v13120_v10 = vpop.f32.mrb[160].mxu0 }
 0x242   : > { %v13110_v19 = vmul.f32 %v18582_v9, %v12979_v42  ;;  %v4221_v57 = vadd.f32 %v3993_v14, %v3680_v46  ;;  %v4757_v45 = vmul.f32 %v4577_v8, %v12739_v56  ;;  %v4760_v26 = vmul.f32 %v4580_v6, %v12825_v32  ;;  %18583 = vst [vmem:[#allocation163_spill] sm:$0xff] %v13120_v10  ;;  %v13122_v9 = vpop.permute.xlu0 %1235  ;;  %v13134_v6 = vpop.f32.mrb[161].mxu0  ;;  %v18590_v10 = vld [vmem:[#allocation166_spill] sm:$0xff] }
 0x243   : > { %v3320_v22 = vrot.slane %v13098_v47, 7  ;;  %v3863_v31 = vrot.slane %v13098_v47, 1  ;;  %v4399_v39 = vadd.f32 %v4219_v35, %v12834_v49  ;;  %v3323_v58 = vrot.slane %v13105_v2, 7  ;;  %18584 = vst [vmem:[#allocation218_spill] sm:$0xff] %v13122_v9  ;;  %18587 = vst [vmem:[#allocation285_spill] sm:$0xff] %v13134_v6  ;;  %v13136_v35 = vpop.permute.xlu1 %1240 }
 0x244   : > { %v3866_v24 = vrot.slane %v13105_v2, 1  ;;  %v4582_v18 = vadd.f32 %v4402_v63, %v13105_v2  ;;  %v13125_v8 = vadd.f32 %v12946_v1, %v4757_v45  ;;  %v13128_v46 = vadd.f32 %v12946_v1, %v4760_v26  ;;  %18588 = vst [vmem:[#allocation286_spill] sm:$0xff] %v13136_v35 }
 0x245   : > { %v3449_v14 = vsel %vm3386_vm2, %v3320_v22, %v3321_v30  ;;  %v3450_v49 = vsel %vm3386_vm2, %v3319_v60, %v3320_v22  ;;  %v3990_v45 = vsel %vm3927_vm3, %v3863_v31, %v3864_v41  ;;  %v3991_v26 = vsel %vm3927_vm3, %v3862_v53, %v3863_v31  ;;  %v13157_v53 = vpop.f32.mrb[162].mxu0 }
 0x246   : > { %18585 = vst [vmem:[#allocation283_spill] sm:$0xff] %v13125_v8  ;;  %18586 = vst [vmem:[#allocation284_spill] sm:$0xff] %v13128_v46  ;;  %v3683_v63 = vadd.f32 %v3450_v49, %v13098_v47  ;;  %v3684_v32 = vadd.f32 %v3449_v14, %v13064_v44  ;;  %v4579_v46 = vadd.f32 %v4399_v39, %v13098_v47  ;;  %v3322_v60 = vrot.slane %v13110_v19, 7  ;;  %v18589_v49 = vld [vmem:[#allocation221_spill] sm:$0xff] }
 0x247   : > { %v4762_v8 = vmul.f32 %v4582_v18, %v12876_v20  ;;  %v3865_v22 = vrot.slane %v13110_v19, 1  ;;  %v4401_v6 = vadd.f32 %v4221_v57, %v12913_v61  ;;  %v13151_v14 = vmul.f32 %v18589_v49, %v13040_v12  ;;  %18591 = vst [vmem:[#allocation221_spill] sm:$0xff] %v13157_v53  ;;  %v13167_v57 = vpop.f32.mrb[163].mxu0 }
 0x248   : > { %v4224_v56 = vadd.f32 %v3990_v45, %v3683_v63  ;;  %v13155_v23 = vmul.f32 %v18590_v10, %v13032_v51  ;;  %v4759_v31 = vmul.f32 %v4579_v46, %v12789_v43  ;;  %v3447_v18 = vsel %vm3386_vm2, %v3322_v60, %v3323_v58  ;;  %18593 = vst [vmem:[#allocation287_spill] sm:$0xff] %v13167_v57  ;;  %v13177_v46 = vpop.permute.xlu0 %1245  ;;  %v18598_v57 = vld [vmem:[#allocation225_spill] sm:$0xff] }
 0x249   : > { %v13161_v39 = vadd.f32 %v12946_v1, %v4762_v8  ;;  %v3448_v61 = vsel %vm3386_vm2, %v3321_v30, %v3322_v60  ;;  %v13171_v10 = vadd.f32 %v3447_v18, %v13105_v2  ;;  %v3988_v45 = vsel %vm3927_vm3, %v3865_v22, %v3866_v24  ;;  %18594 = vst [vmem:[#allocation288_spill] sm:$0xff] %v13177_v46 }
 0x24a   : > { %v3685_v63 = vadd.f32 %v3448_v61, %v13110_v19  ;;  %v3989_v8 = vsel %vm3927_vm3, %v3864_v41, %v3865_v22  ;;  %v13180_v49 = vadd.f32 %v12946_v1, %v4759_v31  ;;  %v4581_v30 = vadd.f32 %v4401_v6, %v13110_v19  ;;  %v13190_v22 = vpop.f32.mrb[164].mxu0 }
 0x24b   : > { %18592 = vst [vmem:[#allocation166_spill] sm:$0xff] %v13161_v39  ;;  %v3325_v60 = vrot.slane %v13151_v14, 7  ;;  %v3868_v61 = vrot.slane %v13151_v14, 1  ;;  %v13185_v39 = vpop.permute.xlu1 %1250  ;;  %v4404_v20 = vadd.f32 %v4224_v56, %v12918_v25  ;;  %v3324_v43 = vrot.slane %v13155_v23, 7  ;;  %18597 = vst [vmem:[#allocation291_spill] sm:$0xff] %v13190_v22 }
 0x24c   : > { %18595 = vst [vmem:[#allocation289_spill] sm:$0xff] %v13180_v49  ;;  %18596 = vst [vmem:[#allocation290_spill] sm:$0xff] %v13185_v39  ;;  %v4226_v18 = vadd.f32 %v3988_v45, %v3685_v63  ;;  %v3867_v41 = vrot.slane %v13155_v23, 1  ;;  %v4761_v31 = vmul.f32 %v4581_v30, %v12838_v0  ;;  %v4223_v49 = vadd.f32 %v3991_v26, %v13073_v13  ;;  %v13202_v63 = vpop.f32.mrb[165].mxu0 }
 0x24d   : > { %v13196_v6 = vmul.f32 %v12497_v50, %v13083_v55  ;;  %v13200_v53 = vmul.f32 %v18598_v57, %v13075_v29  ;;  %18599 = vst [vmem:[#allocation225_spill] sm:$0xff] %v13202_v63  ;;  %v4584_v25 = vadd.f32 %v4404_v20, %v13151_v14  ;;  %v3445_v56 = vsel %vm3386_vm2, %v3324_v43, %v3325_v60  ;;  %v13224_v63 = vpop.f32.mrb[166].mxu0 }
 0x24e   : > { %v3446_v45 = vsel %vm3386_vm2, %v3323_v58, %v3324_v43  ;;  %v3986_v13 = vsel %vm3927_vm3, %v3867_v41, %v3868_v61  ;;  %v13212_v50 = vadd.f32 %v12946_v1, %v4761_v31  ;;  %v13216_v57 = vadd.f32 %v3445_v56, %v13151_v14  ;;  %18601 = vst [vmem:[#allocation293_spill] sm:$0xff] %v13224_v63  ;;  %v13226_v31 = vpop.permute.xlu0 %1255 }
 0x24f   : > { %v3687_v26 = vadd.f32 %v3446_v45, %v13155_v23  ;;  %v3987_v20 = vsel %vm3927_vm3, %v3866_v24, %v3867_v41  ;;  %v4764_v30 = vmul.f32 %v4584_v25, %v12927_v4  ;;  %v4403_v0 = vadd.f32 %v4223_v49, %v12923_v5  ;;  %18602 = vst [vmem:[#allocation294_spill] sm:$0xff] %v13226_v31  ;;  %v13231_v24 = vpop.f32.mrb[167].mxu0  ;;  %v13233_v41 = vpop.permute.xlu1 %1260  ;;  %v18606_v4 = vld [vmem:[#allocation172_spill] sm:$0xff] }
 0x250   : > { %18600 = vst [vmem:[#allocation292_spill] sm:$0xff] %v13212_v50  ;;  %v3327_v43 = vrot.slane %v13196_v6, 7  ;;  %v3870_v58 = vrot.slane %v13196_v6, 1  ;;  %v4406_v45 = vadd.f32 %v4226_v18, %v12973_v40  ;;  %v3326_v56 = vrot.slane %v13200_v53, 7  ;;  %18603 = vst [vmem:[#allocation295_spill] sm:$0xff] %v13231_v24 }
 0x251   : > { %v4228_v50 = vadd.f32 %v3986_v13, %v3687_v26  ;;  %v3869_v22 = vrot.slane %v13200_v53, 1  ;;  %18604 = vst [vmem:[#allocation296_spill] sm:$0xff] %v13233_v41  ;;  %v13236_v5 = vadd.f32 %v12946_v1, %v4764_v30  ;;  %v4583_v49 = vadd.f32 %v4403_v0, %v13155_v23 }
 0x252   : > { %v4225_v25 = vadd.f32 %v3989_v8, %v3684_v32  ;;  %v13241_v63 = vmul.f32 %v18606_v4, %v13136_v35  ;;  %v4586_v40 = vadd.f32 %v4406_v45, %v13196_v6  ;;  %v3443_v18 = vsel %vm3386_vm2, %v3326_v56, %v3327_v43  ;;  %v13257_v8 = vpop.f32.mrb[168].mxu0 }
 0x253   : > { %18605 = vst [vmem:[#allocation297_spill] sm:$0xff] %v13236_v5  ;;  %v3444_v13 = vsel %vm3386_vm2, %v3325_v60, %v3326_v56  ;;  %v3984_v26 = vsel %vm3927_vm3, %v3869_v22, %v3870_v58  ;;  %v4763_v30 = vmul.f32 %v4583_v49, %v12884_v34  ;;  %v13253_v32 = vadd.f32 %v3443_v18, %v13196_v6  ;;  %v13263_v24 = vpop.f32.mrb[169].mxu0  ;;  %v13273_v34 = vpop.permute.xlu0 %1265 }
 0x254   : > { %v3689_v0 = vadd.f32 %v3444_v13, %v13200_v53  ;;  %v3985_v4 = vsel %vm3927_vm3, %v3868_v61, %v3869_v22  ;;  %v4766_v45 = vmul.f32 %v4586_v40, %v12979_v42  ;;  %v4405_v5 = vadd.f32 %v4225_v25, %v12977_v3  ;;  %18607 = vst [vmem:[#allocation172_spill] sm:$0xff] %v13263_v24  ;;  %v18609_v61 = vld [vmem:[#allocation227_spill] sm:$0xff]  ;;  %v18612_v42 = vld [vmem:[#allocation173_spill] sm:$0xff] }
 0x255   : > { %v3329_v60 = vrot.slane %v13241_v63, 7  ;;  %v3872_v56 = vrot.slane %v13241_v63, 1  ;;  %v13266_v49 = vadd.f32 %v12946_v1, %v4763_v30  ;;  %v4408_v13 = vadd.f32 %v4228_v50, %v13016_v17  ;;  %18610 = vst [vmem:[#allocation227_spill] sm:$0xff] %v13273_v34 }
 0x256   : > { %v4230_v18 = vadd.f32 %v3984_v26, %v3689_v0  ;;  %v13271_v22 = vmul.f32 %v18609_v61, %v13122_v9  ;;  %v13276_v3 = vadd.f32 %v12946_v1, %v4766_v45  ;;  %v4585_v25 = vadd.f32 %v4405_v5, %v13200_v53  ;;  %v13284_v26 = vpop.permute.xlu1 %1270  ;;  %v13290_v45 = vpop.f32.mrb[170].mxu0 }
 0x257   : > { %18608 = vst [vmem:[#allocation298_spill] sm:$0xff] %v13266_v49  ;;  %v4227_v40 = vadd.f32 %v3987_v20, %v13171_v10  ;;  %v13282_v30 = vmul.f32 %v18612_v42, %v13185_v39  ;;  %18613 = vst [vmem:[#allocation173_spill] sm:$0xff] %v13284_v26  ;;  %v4588_v17 = vadd.f32 %v4408_v13, %v13241_v63 }
 0x258   : > { %18611 = vst [vmem:[#allocation299_spill] sm:$0xff] %v13276_v3  ;;  %v3328_v50 = vrot.slane %v13271_v22, 7  ;;  %v3871_v0 = vrot.slane %v13271_v22, 1  ;;  %v4410_v61 = vadd.f32 %v4230_v18, %v13064_v44  ;;  %18614 = vst [vmem:[#allocation300_spill] sm:$0xff] %v13290_v45  ;;  %v4765_v5 = vmul.f32 %v4585_v25, %v12935_v59  ;;  %v13296_v3 = vpop.f32.mrb[171].mxu0 }
 0x259   : > { %v4407_v10 = vadd.f32 %v4227_v40, %v13020_v38  ;;  %v3331_v20 = vrot.slane %v13282_v30, 7  ;;  %v3874_v42 = vrot.slane %v13282_v30, 1  ;;  %18615 = vst [vmem:[#allocation301_spill] sm:$0xff] %v13296_v3  ;;  %v4768_v13 = vmul.f32 %v4588_v17, %v13032_v51 }
 0x25a   : > { %v3441_v49 = vsel %vm3386_vm2, %v3328_v50, %v3329_v60  ;;  %v3442_v44 = vsel %vm3386_vm2, %v3327_v43, %v3328_v50  ;;  %v3982_v18 = vsel %vm3927_vm3, %v3871_v0, %v3872_v56  ;;  %v13306_v25 = vadd.f32 %v12946_v1, %v4765_v5  ;;  %v18618_v50 = vld [vmem:[#allocation174_spill] sm:$0xff]  ;;  %v13321_v5 = vpop.f32.mrb[172].mxu0 }
 0x25b   : > { %v3691_v38 = vadd.f32 %v3442_v44, %v13271_v22  ;;  %v3692_v40 = vadd.f32 %v3441_v49, %v13241_v63  ;;  %v3983_v59 = vsel %vm3927_vm3, %v3870_v58, %v3871_v0  ;;  %v13313_v17 = vadd.f32 %v12946_v1, %v4768_v13  ;;  %18619 = vst [vmem:[#allocation174_spill] sm:$0xff] %v13321_v5  ;;  %v18620_v49 = vld [vmem:[#allocation234_spill] sm:$0xff]  ;;  %v18621_v58 = vld [vmem:[#allocation235_spill] sm:$0xff]  ;;  %v13336_v13 = vpop.permute.xlu1 %1280 }
 0x25c   : > { %18616 = vst [vmem:[#allocation302_spill] sm:$0xff] %v13306_v25  ;;  %v4587_v51 = vadd.f32 %v4407_v10, %v13271_v22  ;;  %v4590_v43 = vadd.f32 %v4410_v61, %v13282_v30  ;;  %v13319_v3 = vmul.f32 %v18618_v50, %v13177_v46  ;;  %v4229_v44 = vadd.f32 %v3985_v4, %v13216_v57  ;;  %v13332_v10 = vpop.f32.mrb[173].mxu0  ;;  %v13334_v61 = vpop.permute.xlu0 %1275 }
 0x25d   : > { %18617 = vst [vmem:[#allocation303_spill] sm:$0xff] %v13313_v17  ;;  %v4232_v25 = vadd.f32 %v3982_v18, %v3691_v38  ;;  %v13326_v45 = vmul.f32 %v18620_v49, %v13233_v41  ;;  %v13330_v0 = vmul.f32 %v18621_v58, %v13226_v31  ;;  %18622 = vst [vmem:[#allocation234_spill] sm:$0xff] %v13332_v10 }
 0x25e   : > { %18623 = vst [vmem:[#allocation235_spill] sm:$0xff] %v13334_v61  ;;  %18624 = vst [vmem:[#allocation304_spill] sm:$0xff] %v13336_v13  ;;  %v4767_v50 = vmul.f32 %v4587_v51, %v12990_v27  ;;  %v4770_v18 = vmul.f32 %v4590_v43, %v13075_v29  ;;  %v3330_v57 = vrot.slane %v13319_v3, 7  ;;  %v3873_v4 = vrot.slane %v13319_v3, 1  ;;  %v18629_v27 = vld [vmem:[#allocation238_spill] sm:$0xff] }
 0x25f   : > { %v4409_v38 = vadd.f32 %v4229_v44, %v13098_v47  ;;  %v3333_v49 = vrot.slane %v13326_v45, 7  ;;  %v3876_v58 = vrot.slane %v13326_v45, 1  ;;  %v4412_v17 = vadd.f32 %v4232_v25, %v13105_v2 }
 0x260   : > { %v13347_v10 = vadd.f32 %v12946_v1, %v4767_v50  ;;  %v13350_v5 = vadd.f32 %v12946_v1, %v4770_v18  ;;  %v3439_v51 = vsel %vm3386_vm2, %v3330_v57, %v3331_v20  ;;  %v3440_v43 = vsel %vm3386_vm2, %v3329_v60, %v3330_v57 }
 0x261   : > { %v3693_v47 = vadd.f32 %v3440_v43, %v13319_v3  ;;  %v3694_v44 = vadd.f32 %v3439_v51, %v13282_v30  ;;  %v3980_v29 = vsel %vm3927_vm3, %v3873_v4, %v3874_v42  ;;  %v3981_v2 = vsel %vm3927_vm3, %v3872_v56, %v3873_v4  ;;  %v18628_v51 = vld [vmem:[#allocation181_spill] sm:$0xff] }
 0x262   : > { %18625 = vst [vmem:[#allocation305_spill] sm:$0xff] %v13347_v10  ;;  %18626 = vst [vmem:[#allocation306_spill] sm:$0xff] %v13350_v5  ;;  %v4589_v25 = vadd.f32 %v4409_v38, %v13319_v3  ;;  %v4592_v50 = vadd.f32 %v4412_v17, %v13326_v45  ;;  %v3332_v18 = vrot.slane %v13330_v0, 7  ;;  %v3875_v5 = vrot.slane %v13330_v0, 1  ;;  %v13366_v10 = vpop.f32.mrb[174].mxu0  ;;  %v13379_v17 = vpop.permute.xlu0 %1285 }
 0x263   : > { %18627 = vst [vmem:[#allocation307_spill] sm:$0xff] %v13366_v10  ;;  %v4234_v60 = vadd.f32 %v3980_v29, %v3693_v47  ;;  %v4231_v57 = vadd.f32 %v3983_v59, %v13253_v32  ;;  %v13371_v43 = vmul.f32 %v18628_v51, %v13284_v26  ;;  %v13375_v56 = vmul.f32 %v18629_v27, %v13273_v34  ;;  %v13377_v4 = vpop.f32.mrb[175].mxu0  ;;  %v13381_v38 = vpop.permute.xlu1 %1290 }
 0x264   : > { %18630 = vst [vmem:[#allocation181_spill] sm:$0xff] %v13377_v4  ;;  %18631 = vst [vmem:[#allocation238_spill] sm:$0xff] %v13379_v17  ;;  %v4769_v24 = vmul.f32 %v4589_v25, %v13040_v12  ;;  %v4772_v29 = vmul.f32 %v4592_v50, %v13122_v9  ;;  %v3437_v59 = vsel %vm3386_vm2, %v3332_v18, %v3333_v49  ;;  %v13408_v10 = vpop.f32.mrb[176].mxu0 }
 0x265   : > { %18632 = vst [vmem:[#allocation308_spill] sm:$0xff] %v13381_v38  ;;  %v3438_v32 = vsel %vm3386_vm2, %v3331_v20, %v3332_v18  ;;  %v13391_v27 = vadd.f32 %v3437_v59, %v13326_v45  ;;  %v3978_v51 = vsel %vm3927_vm3, %v3875_v5, %v3876_v58  ;;  %v3979_v4 = vsel %vm3927_vm3, %v3874_v42, %v3875_v5 }
 0x266   : > { %v3695_v47 = vadd.f32 %v3438_v32, %v13330_v0  ;;  %v13398_v25 = vadd.f32 %v12946_v1, %v4769_v24  ;;  %v13401_v50 = vadd.f32 %v12946_v1, %v4772_v29  ;;  %v4411_v9 = vadd.f32 %v4231_v57, %v13110_v19  ;;  %v18635_v29 = vld [vmem:[#allocation185_spill] sm:$0xff]  ;;  %v13416_v19 = vpop.f32.mrb[177].mxu0 }
 0x267   : > { %v3335_v20 = vrot.slane %v13371_v43, 7  ;;  %v3878_v59 = vrot.slane %v13371_v43, 1  ;;  %v4414_v32 = vadd.f32 %v4234_v60, %v13151_v14  ;;  %v3334_v12 = vrot.slane %v13375_v56, 7 }
 0x268   : > { %18633 = vst [vmem:[#allocation309_spill] sm:$0xff] %v13398_v25  ;;  %18634 = vst [vmem:[#allocation310_spill] sm:$0xff] %v13401_v50  ;;  %v4236_v18 = vadd.f32 %v3978_v51, %v3695_v47  ;;  %v4591_v42 = vadd.f32 %v4411_v9, %v13330_v0  ;;  %v3877_v24 = vrot.slane %v13375_v56, 1  ;;  %v4233_v5 = vadd.f32 %v3981_v2, %v3692_v40  ;;  %v13424_v9 = vpop.permute.xlu0 %1295  ;;  %v13426_v51 = vpop.permute.xlu1 %1300 }
 0x269   : > { %v13414_v50 = vmul.f32 %v18635_v29, %v13336_v13  ;;  %v4594_v57 = vadd.f32 %v4414_v32, %v13371_v43  ;;  %v3435_v14 = vsel %vm3386_vm2, %v3334_v12, %v3335_v20  ;;  %v3436_v60 = vsel %vm3386_vm2, %v3333_v49, %v3334_v12  ;;  %18636 = vst [vmem:[#allocation185_spill] sm:$0xff] %v13424_v9 }
 0x26a   : > { %v4416_v47 = vadd.f32 %v4236_v18, %v13196_v6  ;;  %18637 = vst [vmem:[#allocation311_spill] sm:$0xff] %v13426_v51  ;;  %v4771_v40 = vmul.f32 %v4591_v42, %v13083_v55  ;;  %v3697_v2 = vadd.f32 %v3436_v60, %v13375_v56  ;;  %v3698_v29 = vadd.f32 %v3435_v14, %v13371_v43 }
 0x26b   : > { %v3976_v32 = vsel %vm3927_vm3, %v3877_v24, %v3878_v59  ;;  %v4774_v25 = vmul.f32 %v4594_v57, %v13177_v46  ;;  %v3977_v12 = vsel %vm3927_vm3, %v3876_v58, %v3877_v24  ;;  %v4413_v6 = vadd.f32 %v4233_v5, %v13155_v23  ;;  %v18640_v46 = vld [vmem:[#allocation240_spill] sm:$0xff]  ;;  %v18641_v5 = vld [vmem:[#allocation186_spill] sm:$0xff] }
 0x26c   : > { %v3337_v49 = vrot.slane %v13414_v50, 7  ;;  %v13439_v18 = vadd.f32 %v12946_v1, %v4771_v40  ;;  %v4238_v42 = vadd.f32 %v3976_v32, %v3697_v2  ;;  %v3880_v60 = vrot.slane %v13414_v50, 1 }
 0x26d   : > { %v4596_v14 = vadd.f32 %v4416_v47, %v13414_v50  ;;  %v13444_v55 = vadd.f32 %v12946_v1, %v4774_v25  ;;  %v4593_v57 = vadd.f32 %v4413_v6, %v13375_v56  ;;  %v13449_v58 = vmul.f32 %v18640_v46, %v13334_v61  ;;  %v18642_v47 = vld [vmem:[#allocation244_spill] sm:$0xff] }
 0x26e   : > { %18638 = vst [vmem:[#allocation312_spill] sm:$0xff] %v13439_v18  ;;  %v4235_v23 = vadd.f32 %v3979_v4, %v3694_v44  ;;  %v13454_v40 = vmul.f32 %v18641_v5, %v13381_v38  ;;  %v4418_v2 = vadd.f32 %v4238_v42, %v13241_v63  ;;  %v13459_v32 = vmul.f32 %v18642_v47, %v13379_v17  ;;  %v13465_v4 = vpop.permute.xlu0 %1305 }
 0x26f   : > { %18639 = vst [vmem:[#allocation313_spill] sm:$0xff] %v13444_v55  ;;  %v4776_v24 = vmul.f32 %v4596_v14, %v13226_v31  ;;  %v4773_v25 = vmul.f32 %v4593_v57, %v13136_v35  ;;  %v3336_v6 = vrot.slane %v13449_v58, 7  ;;  %v3879_v46 = vrot.slane %v13449_v58, 1  ;;  %18643 = vst [vmem:[#allocation240_spill] sm:$0xff] %v13465_v4  ;;  %v13467_v14 = vpop.permute.xlu1 %1310 }
 0x270   : > { %v4415_v44 = vadd.f32 %v4235_v23, %v13200_v53  ;;  %18644 = vst [vmem:[#allocation186_spill] sm:$0xff] %v13467_v14  ;;  %v3339_v63 = vrot.slane %v13454_v40, 7  ;;  %v3882_v42 = vrot.slane %v13454_v40, 1  ;;  %v4598_v47 = vadd.f32 %v4418_v2, %v13454_v40 }
 0x271   : > { %v13470_v5 = vadd.f32 %v12946_v1, %v4776_v24  ;;  %v13476_v57 = vadd.f32 %v12946_v1, %v4773_v25  ;;  %v3433_v31 = vsel %vm3386_vm2, %v3336_v6, %v3337_v49  ;;  %v3434_v53 = vsel %vm3386_vm2, %v3335_v20, %v3336_v6  ;;  %v13484_v24 = vpop.f32.mrb[178].mxu0 }
 0x272   : > { %v3974_v23 = vsel %vm3927_vm3, %v3879_v46, %v3880_v60  ;;  %18647 = vst [vmem:[#allocation315_spill] sm:$0xff] %v13484_v24  ;;  %v3700_v55 = vadd.f32 %v3433_v31, %v13414_v50  ;;  %v3975_v2 = vsel %vm3927_vm3, %v3878_v59, %v3879_v46  ;;  %v4595_v25 = vadd.f32 %v4415_v44, %v13449_v58  ;;  %v13513_v44 = vpop.permute.xlu0 %1315 }
 0x273   : > { %18645 = vst [vmem:[#allocation244_spill] sm:$0xff] %v13470_v5  ;;  %18646 = vst [vmem:[#allocation314_spill] sm:$0xff] %v13476_v57  ;;  %v3699_v5 = vadd.f32 %v3434_v53, %v13449_v58  ;;  %v4778_v57 = vmul.f32 %v4598_v47, %v13273_v34  ;;  %v3338_v35 = vrot.slane %v13459_v32, 7  ;;  %v3881_v20 = vrot.slane %v13459_v32, 1 }
 0x274   : > { %v4237_v6 = vadd.f32 %v3977_v12, %v13391_v27  ;;  %v4775_v24 = vmul.f32 %v4595_v25, %v13185_v39  ;;  %v13498_v53 = vmul.f32 %v12724_v16, %v13426_v51  ;;  %v13502_v31 = vmul.f32 %v12737_v7, %v13424_v9  ;;  %18649 = vst [vmem:[#allocation317_spill] sm:$0xff] %v13513_v44  ;;  %v13515_v16 = vpop.permute.xlu1 %1320  ;;  %v18825_v39 = vld [vmem:[#allocation15_spill] sm:$0xff] }
 0x275   : > { %v4240_v18 = vadd.f32 %v3974_v23, %v3699_v5  ;;  %v13505_v59 = vadd.f32 %v12946_v1, %v4778_v57  ;;  %v3431_v46 = vsel %vm3386_vm2, %v3338_v35, %v3339_v63  ;;  %v3432_v27 = vsel %vm3386_vm2, %v3337_v49, %v3338_v35  ;;  %18650 = vst [vmem:[#allocation318_spill] sm:$0xff] %v13515_v16 }
 0x276   : > { %v3972_v12 = vsel %vm3927_vm3, %v3881_v20, %v3882_v42  ;;  %v13518_v5 = vadd.f32 %v12946_v1, %v4775_v24  ;;  %v3701_v7 = vadd.f32 %v3432_v27, %v13459_v32  ;;  %v3702_v47 = vadd.f32 %v3431_v46, %v13454_v40 }
 0x277   : > { %18648 = vst [vmem:[#allocation316_spill] sm:$0xff] %v13505_v59  ;;  %v3973_v57 = vsel %vm3927_vm3, %v3880_v60, %v3881_v20  ;;  %v4417_v23 = vadd.f32 %v4237_v6, %v13271_v22  ;;  %v3341_v35 = vrot.slane %v13498_v53, 7  ;;  %v3884_v49 = vrot.slane %v13498_v53, 1  ;;  %v13548_v20 = vpop.f32.mrb[179].mxu0 }
 0x278   : > { %18651 = vst [vmem:[#allocation319_spill] sm:$0xff] %v13518_v5  ;;  %v4420_v25 = vadd.f32 %v4240_v18, %v13282_v30  ;;  %v4242_v59 = vadd.f32 %v3972_v12, %v3701_v7  ;;  %v3340_v34 = vrot.slane %v13502_v31, 7  ;;  %v3883_v24 = vrot.slane %v13502_v31, 1  ;;  %v13554_v7 = vpop.permute.xlu0 %1325 }
 0x279   : > { %v4239_v5 = vadd.f32 %v3975_v2, %v3698_v29  ;;  %v4597_v27 = vadd.f32 %v4417_v23, %v13459_v32  ;;  %v13534_v60 = vmul.f32 %v12756_v62, %v13467_v14  ;;  %v13538_v22 = vmul.f32 %v12767_v15, %v13465_v4  ;;  %18652 = vst [vmem:[#allocation320_spill] sm:$0xff] %v13554_v7  ;;  %v13556_v23 = vpop.permute.xlu1 %1330 }
 0x27a   : > { %v4600_v46 = vadd.f32 %v4420_v25, %v13498_v53  ;;  %v3429_v30 = vsel %vm3386_vm2, %v3340_v34, %v3341_v35  ;;  %v3430_v18 = vsel %vm3386_vm2, %v3339_v63, %v3340_v34  ;;  %v3970_v29 = vsel %vm3927_vm3, %v3883_v24, %v3884_v49  ;;  %18653 = vst [vmem:[#allocation321_spill] sm:$0xff] %v13556_v23 }
 0x27b   : > { %v3971_v2 = vsel %vm3927_vm3, %v3882_v42, %v3883_v24  ;;  %v4777_v62 = vmul.f32 %v4597_v27, %v13233_v41  ;;  %v3703_v15 = vadd.f32 %v3430_v18, %v13502_v31  ;;  %v3704_v12 = vadd.f32 %v3429_v30, %v13498_v53 }
 0x27c   : > { %v4780_v6 = vmul.f32 %v4600_v46, %v13334_v61  ;;  %v4419_v34 = vadd.f32 %v4239_v5, %v13319_v3  ;;  %v3343_v63 = vrot.slane %v13534_v60, 7  ;;  %v3886_v42 = vrot.slane %v13534_v60, 1 }
 0x27d   : > { %v4422_v25 = vadd.f32 %v4242_v59, %v13326_v45  ;;  %v13563_v24 = vadd.f32 %v12946_v1, %v4777_v62  ;;  %v4244_v46 = vadd.f32 %v3970_v29, %v3703_v15  ;;  %v3342_v30 = vrot.slane %v13538_v22, 7 }
 0x27e   : > { %v13566_v27 = vadd.f32 %v12946_v1, %v4780_v6  ;;  %v4599_v18 = vadd.f32 %v4419_v34, %v13502_v31  ;;  %v3885_v3 = vrot.slane %v13538_v22, 1  ;;  %v4241_v5 = vadd.f32 %v3973_v57, %v3700_v55 }
 0x27f   : > { %18654 = vst [vmem:[#allocation322_spill] sm:$0xff] %v13563_v24  ;;  %v4602_v61 = vadd.f32 %v4422_v25, %v13534_v60  ;;  %v3427_v41 = vsel %vm3386_vm2, %v3342_v30, %v3343_v63  ;;  %v3428_v45 = vsel %vm3386_vm2, %v3341_v35, %v3342_v30  ;;  %v13578_v59 = vmul.f32 %v12795_v37, %v13515_v16  ;;  %v13595_v25 = vpop.permute.xlu1 %1340 }
 0x280   : > { %18655 = vst [vmem:[#allocation323_spill] sm:$0xff] %v13566_v27  ;;  %v4424_v29 = vadd.f32 %v4244_v46, %v13371_v43  ;;  %v4779_v62 = vmul.f32 %v4599_v18, %v13284_v26  ;;  %v3705_v15 = vadd.f32 %v3428_v45, %v13538_v22  ;;  %v13585_v55 = vadd.f32 %v3427_v41, %v13534_v60  ;;  %v13593_v43 = vpop.permute.xlu0 %1335  ;;  %v18824_v26 = vld [vmem:[#allocation95_spill] sm:$0xff] }
 0x281   : > { %v4782_v6 = vmul.f32 %v4602_v61, %v13379_v17  ;;  %v3968_v57 = vsel %vm3927_vm3, %v3885_v3, %v3886_v42  ;;  %v3969_v35 = vsel %vm3927_vm3, %v3884_v49, %v3885_v3  ;;  %v4421_v37 = vadd.f32 %v4241_v5, %v13330_v0  ;;  %18656 = vst [vmem:[#allocation324_spill] sm:$0xff] %v13593_v43 }
 0x282   : > { %v3345_v34 = vrot.slane %v13578_v59, 7  ;;  %18657 = vst [vmem:[#allocation325_spill] sm:$0xff] %v13595_v25  ;;  %v13598_v61 = vadd.f32 %v12946_v1, %v4779_v62  ;;  %v4246_v46 = vadd.f32 %v3968_v57, %v3705_v15  ;;  %v3888_v30 = vrot.slane %v13578_v59, 1  ;;  %v18660_v62 = vld [vmem:[#allocation255_spill] sm:$0xff] }
 0x283   : > { %v13601_v41 = vadd.f32 %v12946_v1, %v4782_v6  ;;  %v4601_v18 = vadd.f32 %v4421_v37, %v13538_v22  ;;  %v4604_v49 = vadd.f32 %v4424_v29, %v13578_v59  ;;  %v13608_v0 = vmul.f32 %v12801_v48, %v13513_v44 }
 0x284   : > { %18658 = vst [vmem:[#allocation326_spill] sm:$0xff] %v13598_v61  ;;  %v4243_v3 = vadd.f32 %v3971_v2, %v3702_v47  ;;  %v13612_v5 = vmul.f32 %v12823_v21, %v13556_v23  ;;  %v4426_v45 = vadd.f32 %v4246_v46, %v13414_v50  ;;  %v13617_v6 = vmul.f32 %v18660_v62, %v13554_v7 }
 0x285   : > { %18659 = vst [vmem:[#allocation327_spill] sm:$0xff] %v13601_v41  ;;  %v4245_v15 = vadd.f32 %v3969_v35, %v3704_v12  ;;  %v4781_v57 = vmul.f32 %v4601_v18, %v13336_v13  ;;  %v4784_v29 = vmul.f32 %v4604_v49, %v13424_v9  ;;  %v3344_v37 = vrot.slane %v13608_v0, 7  ;;  %v13637_v49 = vpop.permute.xlu0 %1345  ;;  %v18817_v13 = vld [vmem:[#allocation90_spill] sm:$0xff] }
 0x286   : > { %v3887_v48 = vrot.slane %v13608_v0, 1  ;;  %v4423_v47 = vadd.f32 %v4243_v3, %v13375_v56  ;;  %v3347_v21 = vrot.slane %v13612_v5, 7  ;;  %v3890_v2 = vrot.slane %v13612_v5, 1  ;;  %18663 = vst [vmem:[#allocation329_spill] sm:$0xff] %v13637_v49  ;;  %v13639_v56 = vpop.permute.xlu1 %1350 }
 0x287   : > { %v4606_v50 = vadd.f32 %v4426_v45, %v13612_v5  ;;  %v13628_v46 = vadd.f32 %v12946_v1, %v4781_v57  ;;  %v13631_v12 = vadd.f32 %v12946_v1, %v4784_v29  ;;  %v3425_v35 = vsel %vm3386_vm2, %v3344_v37, %v3345_v34  ;;  %18664 = vst [vmem:[#allocation330_spill] sm:$0xff] %v13639_v56 }
 0x288   : > { %v3426_v18 = vsel %vm3386_vm2, %v3343_v63, %v3344_v37  ;;  %v3708_v45 = vadd.f32 %v3425_v35, %v13578_v59  ;;  %v3966_v62 = vsel %vm3927_vm3, %v3887_v48, %v3888_v30  ;;  %v3967_v57 = vsel %vm3927_vm3, %v3886_v42, %v3887_v48 }
 0x289   : > { %18661 = vst [vmem:[#allocation255_spill] sm:$0xff] %v13628_v46  ;;  %18662 = vst [vmem:[#allocation328_spill] sm:$0xff] %v13631_v12  ;;  %v3707_v3 = vadd.f32 %v3426_v18, %v13608_v0  ;;  %v4603_v29 = vadd.f32 %v4423_v47, %v13608_v0  ;;  %v4786_v12 = vmul.f32 %v4606_v50, %v13465_v4  ;;  %v3346_v63 = vrot.slane %v13617_v6, 7  ;;  %v18665_v18 = vld [vmem:[#allocation259_spill] sm:$0xff] }
 0x28a   : > { %v3889_v37 = vrot.slane %v13617_v6, 1  ;;  %v4425_v41 = vadd.f32 %v4245_v15, %v13449_v58  ;;  %v13654_v35 = vmul.f32 %v12862_v52, %v13595_v25  ;;  %v13658_v17 = vmul.f32 %v18665_v18, %v13593_v43  ;;  %v18815_v46 = vld [vmem:[#allocation11_spill] sm:$0xff] }
 0x28b   : > { %v4248_v9 = vadd.f32 %v3966_v62, %v3707_v3  ;;  %v4783_v42 = vmul.f32 %v4603_v29, %v13381_v38  ;;  %v13662_v48 = vadd.f32 %v12946_v1, %v4786_v12  ;;  %v3423_v47 = vsel %vm3386_vm2, %v3346_v63, %v3347_v21 }
 0x28c   : > { %v3424_v50 = vsel %vm3386_vm2, %v3345_v34, %v3346_v63  ;;  %v3710_v52 = vadd.f32 %v3423_v47, %v13612_v5  ;;  %v3964_v15 = vsel %vm3927_vm3, %v3889_v37, %v3890_v2  ;;  %v3965_v3 = vsel %vm3927_vm3, %v3888_v30, %v3889_v37  ;;  %v13680_v34 = vpop.permute.xlu0 %1355  ;;  %v13682_v63 = vpop.permute.xlu1 %1360 }
 0x28d   : > { %18666 = vst [vmem:[#allocation259_spill] sm:$0xff] %v13662_v48  ;;  %v3709_v58 = vadd.f32 %v3424_v50, %v13617_v6  ;;  %v13675_v62 = vadd.f32 %v12946_v1, %v4783_v42  ;;  %v4605_v12 = vadd.f32 %v4425_v41, %v13617_v6  ;;  %v3349_v29 = vrot.slane %v13654_v35, 7  ;;  %18668 = vst [vmem:[#allocation332_spill] sm:$0xff] %v13680_v34  ;;  %v18670_v41 = vld [vmem:[#allocation261_spill] sm:$0xff] }
 0x28e   : > { %v3892_v18 = vrot.slane %v13654_v35, 1  ;;  %18669 = vst [vmem:[#allocation333_spill] sm:$0xff] %v13682_v63  ;;  %v4428_v50 = vadd.f32 %v4248_v9, %v13454_v40  ;;  %v3348_v48 = vrot.slane %v13658_v17, 7  ;;  %v3891_v30 = vrot.slane %v13658_v17, 1 }
 0x28f   : > { %18667 = vst [vmem:[#allocation331_spill] sm:$0xff] %v13675_v62  ;;  %v4250_v47 = vadd.f32 %v3964_v15, %v3709_v58  ;;  %v4785_v37 = vmul.f32 %v4605_v12, %v13426_v51  ;;  %v4247_v42 = vadd.f32 %v3967_v57, %v13585_v55  ;;  %v13691_v4 = vmul.f32 %v18670_v41, %v13639_v56 }
 0x290   : > { %v13695_v62 = vmul.f32 %v12900_v33, %v13637_v49  ;;  %v4608_v58 = vadd.f32 %v4428_v50, %v13654_v35  ;;  %v3421_v9 = vsel %vm3386_vm2, %v3348_v48, %v3349_v29  ;;  %v3422_v40 = vsel %vm3386_vm2, %v3347_v21, %v3348_v48 }
 0x291   : > { %v3962_v15 = vsel %vm3927_vm3, %v3891_v30, %v3892_v18  ;;  %v13705_v55 = vadd.f32 %v12946_v1, %v4785_v37  ;;  %v3711_v57 = vadd.f32 %v3422_v40, %v13658_v17  ;;  %v3712_v12 = vadd.f32 %v3421_v9, %v13654_v35  ;;  %v13720_v9 = vpop.permute.xlu1 %1370 }
 0x292   : > { %v3963_v33 = vsel %vm3927_vm3, %v3890_v2, %v3891_v30  ;;  %v4788_v50 = vmul.f32 %v4608_v58, %v13513_v44  ;;  %v4427_v41 = vadd.f32 %v4247_v42, %v13459_v32  ;;  %v3351_v51 = vrot.slane %v13691_v4, 7  ;;  %18673 = vst [vmem:[#allocation335_spill] sm:$0xff] %v13720_v9 }
 0x293   : > { %18671 = vst [vmem:[#allocation261_spill] sm:$0xff] %v13705_v55  ;;  %v3894_v21 = vrot.slane %v13691_v4, 1  ;;  %v4252_v48 = vadd.f32 %v3962_v15, %v3711_v57  ;;  %v4430_v38 = vadd.f32 %v4250_v47, %v13498_v53  ;;  %v3350_v37 = vrot.slane %v13695_v62, 7  ;;  %v13718_v55 = vpop.permute.xlu0 %1365 }
 0x294   : > { %v3893_v40 = vrot.slane %v13695_v62, 1  ;;  %18672 = vst [vmem:[#allocation334_spill] sm:$0xff] %v13718_v55  ;;  %v13723_v2 = vadd.f32 %v12946_v1, %v4788_v50  ;;  %v4607_v32 = vadd.f32 %v4427_v41, %v13658_v17  ;;  %v4249_v30 = vadd.f32 %v3965_v3, %v3708_v45 }
 0x295   : > { %v13728_v42 = vmul.f32 %v12925_v11, %v13682_v63  ;;  %v4610_v53 = vadd.f32 %v4430_v38, %v13691_v4  ;;  %v3419_v47 = vsel %vm3386_vm2, %v3350_v37, %v3351_v51  ;;  %v3420_v58 = vsel %vm3386_vm2, %v3349_v29, %v3350_v37 }
 0x296   : > { %18674 = vst [vmem:[#allocation336_spill] sm:$0xff] %v13723_v2  ;;  %v3960_v15 = vsel %vm3927_vm3, %v3893_v40, %v3894_v21  ;;  %v4787_v57 = vmul.f32 %v4607_v32, %v13467_v14  ;;  %v3713_v50 = vadd.f32 %v3420_v58, %v13695_v62  ;;  %v13740_v45 = vadd.f32 %v3419_v47, %v13691_v4  ;;  %v18676_v47 = vld [vmem:[#allocation203_spill] sm:$0xff] }
 0x297   : > { %v3961_v11 = vsel %vm3927_vm3, %v3892_v18, %v3893_v40  ;;  %v4790_v38 = vmul.f32 %v4610_v53, %v13554_v7  ;;  %v4429_v3 = vadd.f32 %v4249_v30, %v13502_v31  ;;  %v3353_v41 = vrot.slane %v13728_v42, 7  ;;  %v18678_v30 = vld [vmem:[#allocation267_spill] sm:$0xff]  ;;  %v13764_v7 = vpop.permute.xlu0 %1375 }
 0x298   : > { %v3896_v29 = vrot.slane %v13728_v42, 1  ;;  %v13749_v37 = vadd.f32 %v12946_v1, %v4787_v57  ;;  %v4254_v32 = vadd.f32 %v3960_v15, %v3713_v50  ;;  %v4432_v58 = vadd.f32 %v4252_v48, %v13534_v60  ;;  %18679 = vst [vmem:[#allocation267_spill] sm:$0xff] %v13764_v7  ;;  %v13766_v57 = vpop.permute.xlu1 %1380 }
 0x299   : > { %v13754_v2 = vmul.f32 %v18676_v47, %v13680_v34  ;;  %v13757_v18 = vadd.f32 %v12946_v1, %v4790_v38  ;;  %v4609_v40 = vadd.f32 %v4429_v3, %v13695_v62  ;;  %v4251_v31 = vadd.f32 %v3963_v33, %v3710_v52  ;;  %18680 = vst [vmem:[#allocation338_spill] sm:$0xff] %v13766_v57 }
 0x29a   : > { %18675 = vst [vmem:[#allocation337_spill] sm:$0xff] %v13749_v37  ;;  %v13762_v53 = vmul.f32 %v18678_v30, %v13720_v9  ;;  %v4612_v60 = vadd.f32 %v4432_v58, %v13728_v42  ;;  %v4434_v50 = vadd.f32 %v4254_v32, %v13578_v59  ;;  %v18814_v37 = vld [vmem:[#allocation85_spill] sm:$0xff] }
 0x29b   : > { %18677 = vst [vmem:[#allocation203_spill] sm:$0xff] %v13757_v18  ;;  %v3352_v48 = vrot.slane %v13754_v2, 7  ;;  %v3895_v15 = vrot.slane %v13754_v2, 1  ;;  %v4789_v38 = vmul.f32 %v4609_v40, %v13515_v16  ;;  %v4431_v52 = vadd.f32 %v4251_v31, %v13538_v22 }
 0x29c   : > { %v3355_v33 = vrot.slane %v13762_v53, 7  ;;  %v3898_v3 = vrot.slane %v13762_v53, 1  ;;  %v4792_v47 = vmul.f32 %v4612_v60, %v13593_v43 }
 0x29d   : > { %v3417_v30 = vsel %vm3386_vm2, %v3352_v48, %v3353_v41  ;;  %v3418_v58 = vsel %vm3386_vm2, %v3351_v51, %v3352_v48  ;;  %v3958_v18 = vsel %vm3927_vm3, %v3895_v15, %v3896_v29  ;;  %v13784_v59 = vadd.f32 %v12946_v1, %v4789_v38  ;;  %v18683_v48 = vld [vmem:[#allocation268_spill] sm:$0xff] }
 0x29e   : > { %v3715_v22 = vadd.f32 %v3418_v58, %v13754_v2  ;;  %v3716_v32 = vadd.f32 %v3417_v30, %v13728_v42  ;;  %v3959_v40 = vsel %vm3927_vm3, %v3894_v21, %v3895_v15  ;;  %v13791_v31 = vadd.f32 %v12946_v1, %v4792_v47  ;;  %v18684_v58 = vld [vmem:[#allocation272_spill] sm:$0xff]  ;;  %v18685_v30 = vld [vmem:[#allocation273_spill] sm:$0xff]  ;;  %v13807_v1 = vpop.permute.xlu0 %1385  ;;  %v13809_v15 = vpop.permute.xlu1 %1390 }
 0x29f   : > { %18681 = vst [vmem:[#allocation339_spill] sm:$0xff] %v13784_v59  ;;  %v4611_v60 = vadd.f32 %v4431_v52, %v13754_v2  ;;  %v4614_v51 = vadd.f32 %v4434_v50, %v13762_v53  ;;  %v13797_v43 = vmul.f32 %v18683_v48, %v13718_v55  ;;  %v4253_v59 = vadd.f32 %v3961_v11, %v3712_v12 }
 0x2a0   : > { %18682 = vst [vmem:[#allocation340_spill] sm:$0xff] %v13791_v31  ;;  %v4256_v38 = vadd.f32 %v3958_v18, %v3715_v22  ;;  %v13801_v16 = vmul.f32 %v18684_v58, %v13766_v57  ;;  %v13805_v21 = vmul.f32 %v18685_v30, %v13764_v7  ;;  %18686 = vst [vmem:[#allocation268_spill] sm:$0xff] %v13807_v1  ;;  %v13822_v58 = vld [vmem:[%s17727_s3] ss:$0 sm:$0xff] }
 0x2a1   : > { %18687 = vst [vmem:[#allocation272_spill] sm:$0xff] %v13809_v15  ;;  %v4791_v50 = vmul.f32 %v4611_v60, %v13556_v23  ;;  %v4794_v52 = vmul.f32 %v4614_v51, %v13637_v49  ;;  %v3354_v47 = vrot.slane %v13797_v43, 7  ;;  %v3897_v12 = vrot.slane %v13797_v43, 1 }
 0x2a2   : > { %v4433_v11 = vadd.f32 %v4253_v59, %v13608_v0  ;;  %v3357_v18 = vrot.slane %v13801_v16, 7  ;;  %v3900_v22 = vrot.slane %v13801_v16, 1  ;;  %v4436_v48 = vadd.f32 %v4256_v38, %v13612_v5 }
 0x2a3   : > { %v13825_v60 = vadd.f32 %v13822_v58, %v4791_v50  ;;  %v13828_v51 = vadd.f32 %v13822_v58, %v4794_v52  ;;  %v3415_v0 = vsel %vm3386_vm2, %v3354_v47, %v3355_v33  ;;  %v3416_v59 = vsel %vm3386_vm2, %v3353_v41, %v3354_v47  ;;  %v18690_v47 = vld [vmem:[#allocation211_spill] sm:$0xff] }
 0x2a4   : > { %v3717_v30 = vadd.f32 %v3416_v59, %v13797_v43  ;;  %v3718_v5 = vadd.f32 %v3415_v0, %v13762_v53  ;;  %v3956_v38 = vsel %vm3927_vm3, %v3897_v12, %v3898_v3  ;;  %v3957_v50 = vsel %vm3927_vm3, %v3896_v29, %v3897_v12  ;;  %v18691_v59 = vld [vmem:[#allocation275_spill] sm:$0xff]  ;;  %v13853_v29 = vpop.permute.xlu0 %1395  ;;  %v13855_v12 = vpop.permute.xlu1 %1400 }
 0x2a5   : > { %18688 = vst [vmem:[#allocation273_spill] sm:$0xff] %v13825_v60  ;;  %18689 = vst [vmem:[#allocation341_spill] sm:$0xff] %v13828_v51  ;;  %v4613_v49 = vadd.f32 %v4433_v11, %v13797_v43  ;;  %v4616_v52 = vadd.f32 %v4436_v48, %v13801_v16  ;;  %v3356_v51 = vrot.slane %v13805_v21, 7  ;;  %v3899_v31 = vrot.slane %v13805_v21, 1 }
 0x2a6   : > { %v4258_v60 = vadd.f32 %v3956_v38, %v3717_v30  ;;  %v4255_v41 = vadd.f32 %v3959_v40, %v13740_v45  ;;  %v13847_v0 = vmul.f32 %v18690_v47, %v13809_v15  ;;  %v13851_v23 = vmul.f32 %v18691_v59, %v13807_v1  ;;  %18692 = vst [vmem:[#allocation211_spill] sm:$0xff] %v13853_v29 }
 0x2a7   : > { %18693 = vst [vmem:[#allocation275_spill] sm:$0xff] %v13855_v12  ;;  %v4793_v11 = vmul.f32 %v4613_v49, %v13595_v25  ;;  %v4796_v48 = vmul.f32 %v4616_v52, %v13680_v34  ;;  %v3413_v30 = vsel %vm3386_vm2, %v3356_v51, %v3357_v18  ;;  %v3414_v45 = vsel %vm3386_vm2, %v3355_v33, %v3356_v51 }
 0x2a8   : > { %v3719_v40 = vadd.f32 %v3414_v45, %v13805_v21  ;;  %v3720_v38 = vadd.f32 %v3413_v30, %v13801_v16  ;;  %v3954_v47 = vsel %vm3927_vm3, %v3899_v31, %v3900_v22  ;;  %v3955_v59 = vsel %vm3927_vm3, %v3898_v3, %v3899_v31 }
 0x2a9   : > { %v13870_v49 = vadd.f32 %v13822_v58, %v4793_v11  ;;  %v13873_v52 = vadd.f32 %v13822_v58, %v4796_v48  ;;  %v4435_v34 = vadd.f32 %v4255_v41, %v13617_v6  ;;  %v3359_v33 = vrot.slane %v13847_v0, 7 }
 0x2aa   : > { %v4260_v51 = vadd.f32 %v3954_v47, %v3719_v40  ;;  %v3902_v45 = vrot.slane %v13847_v0, 1  ;;  %v4438_v30 = vadd.f32 %v4258_v60, %v13654_v35  ;;  %v3358_v25 = vrot.slane %v13851_v23, 7  ;;  %v13892_v60 = vpop.permute.xlu0 %1405 }
 0x2ab   : > { %18694 = vst [vmem:[#allocation342_spill] sm:$0xff] %v13870_v49  ;;  %18695 = vst [vmem:[#allocation343_spill] sm:$0xff] %v13873_v52  ;;  %v4615_v44 = vadd.f32 %v4435_v34, %v13805_v21  ;;  %v3901_v3 = vrot.slane %v13851_v23, 1  ;;  %v4257_v31 = vadd.f32 %v3957_v50, %v3716_v32  ;;  %v13884_v11 = vmul.f32 %v13056_v54, %v13855_v12  ;;  %v13894_v34 = vpop.permute.xlu1 %1410  ;;  %v18706_v52 = vld [vmem:[#allocation163_spill] sm:$0xff] }
 0x2ac   : > { %v4618_v6 = vadd.f32 %v4438_v30, %v13847_v0  ;;  %v3411_v41 = vsel %vm3386_vm2, %v3358_v25, %v3359_v33  ;;  %v3412_v48 = vsel %vm3386_vm2, %v3357_v18, %v3358_v25  ;;  %v4440_v35 = vadd.f32 %v4260_v51, %v13691_v4  ;;  %18696 = vst [vmem:[#allocation344_spill] sm:$0xff] %v13892_v60 }
 0x2ad   : > { %18697 = vst [vmem:[#allocation345_spill] sm:$0xff] %v13894_v34  ;;  %v4795_v32 = vmul.f32 %v4615_v44, %v13639_v56  ;;  %v3721_v50 = vadd.f32 %v3412_v48, %v13851_v23  ;;  %v3722_v54 = vadd.f32 %v3411_v41, %v13847_v0  ;;  %v3952_v40 = vsel %vm3927_vm3, %v3901_v3, %v3902_v45 }
 0x2ae   : > { %v4798_v47 = vmul.f32 %v4618_v6, %v13718_v55  ;;  %v3953_v25 = vsel %vm3927_vm3, %v3900_v22, %v3901_v3  ;;  %v4437_v4 = vadd.f32 %v4257_v31, %v13658_v17  ;;  %v3361_v18 = vrot.slane %v13884_v11, 7  ;;  %v18700_v31 = vld [vmem:[#allocation282_spill] sm:$0xff] }
 0x2af   : > { %v13907_v51 = vadd.f32 %v13822_v58, %v4795_v32  ;;  %v4262_v44 = vadd.f32 %v3952_v40, %v3721_v50  ;;  %v3904_v30 = vrot.slane %v13884_v11, 1  ;;  %v4620_v41 = vadd.f32 %v4440_v35, %v13884_v11  ;;  %v18701_v35 = vld [vmem:[#allocation215_spill] sm:$0xff] }
 0x2b0   : > { %v13912_v48 = vadd.f32 %v13822_v58, %v4798_v47  ;;  %v4617_v6 = vadd.f32 %v4437_v4, %v13851_v23  ;;  %v13917_v22 = vmul.f32 %v13067_v28, %v13853_v29  ;;  %v4259_v17 = vadd.f32 %v3955_v59, %v3718_v5  ;;  %v13933_v59 = vpop.permute.xlu0 %1415 }
 0x2b1   : > { %18698 = vst [vmem:[#allocation346_spill] sm:$0xff] %v13907_v51  ;;  %v4800_v3 = vmul.f32 %v4620_v41, %v13764_v7  ;;  %v13922_v32 = vmul.f32 %v18700_v31, %v13894_v34  ;;  %v4442_v50 = vadd.f32 %v4262_v44, %v13728_v42  ;;  %v13927_v40 = vmul.f32 %v18701_v35, %v13892_v60  ;;  %v13935_v41 = vpop.permute.xlu1 %1420 }
 0x2b2   : > { %18699 = vst [vmem:[#allocation347_spill] sm:$0xff] %v13912_v48  ;;  %v4797_v47 = vmul.f32 %v4617_v6, %v13682_v63  ;;  %v3360_v4 = vrot.slane %v13917_v22, 7  ;;  %v3903_v28 = vrot.slane %v13917_v22, 1  ;;  %v4439_v5 = vadd.f32 %v4259_v17, %v13695_v62  ;;  %18702 = vst [vmem:[#allocation282_spill] sm:$0xff] %v13933_v59 }
 0x2b3   : > { %18703 = vst [vmem:[#allocation215_spill] sm:$0xff] %v13935_v41  ;;  %v13938_v31 = vadd.f32 %v13822_v58, %v4800_v3  ;;  %v3363_v42 = vrot.slane %v13922_v32, 7  ;;  %v3906_v44 = vrot.slane %v13922_v32, 1  ;;  %v4622_v35 = vadd.f32 %v4442_v50, %v13922_v32 }
 0x2b4   : > { %v13944_v6 = vadd.f32 %v13822_v58, %v4797_v47  ;;  %v3409_v7 = vsel %vm3386_vm2, %v3360_v4, %v3361_v18  ;;  %v3410_v62 = vsel %vm3386_vm2, %v3359_v33, %v3360_v4  ;;  %v3950_v17 = vsel %vm3927_vm3, %v3903_v28, %v3904_v30 }
 0x2b5   : > { %18704 = vst [vmem:[#allocation348_spill] sm:$0xff] %v13938_v31  ;;  %v3723_v3 = vadd.f32 %v3410_v62, %v13917_v22  ;;  %v3724_v31 = vadd.f32 %v3409_v7, %v13884_v11  ;;  %v3951_v48 = vsel %vm3927_vm3, %v3902_v45, %v3903_v28  ;;  %v4619_v50 = vadd.f32 %v4439_v5, %v13917_v22  ;;  %v18707_v7 = vld [vmem:[#allocation285_spill] sm:$0xff]  ;;  %v13978_v5 = vpop.permute.xlu0 %1425 }
 0x2b6   : > { %18705 = vst [vmem:[#allocation349_spill] sm:$0xff] %v13944_v6  ;;  %v4802_v47 = vmul.f32 %v4622_v35, %v13807_v1  ;;  %v3362_v55 = vrot.slane %v13927_v40, 7  ;;  %v3905_v6 = vrot.slane %v13927_v40, 1  ;;  %v4261_v63 = vadd.f32 %v3953_v25, %v3720_v38  ;;  %18709 = vst [vmem:[#allocation285_spill] sm:$0xff] %v13978_v5 }
 0x2b7   : > { %v4264_v33 = vadd.f32 %v3950_v17, %v3723_v3  ;;  %v4799_v4 = vmul.f32 %v4619_v50, %v13720_v9  ;;  %v13963_v62 = vmul.f32 %v18706_v52, %v13935_v41  ;;  %v13967_v51 = vmul.f32 %v18707_v7, %v13933_v59  ;;  %v13980_v52 = vpop.permute.xlu1 %1430 }
 0x2b8   : > { %v13970_v45 = vadd.f32 %v13822_v58, %v4802_v47  ;;  %v3407_v28 = vsel %vm3386_vm2, %v3362_v55, %v3363_v42  ;;  %v3408_v38 = vsel %vm3386_vm2, %v3361_v18, %v3362_v55  ;;  %v3948_v25 = vsel %vm3927_vm3, %v3905_v6, %v3906_v44  ;;  %18710 = vst [vmem:[#allocation350_spill] sm:$0xff] %v13980_v52 }
 0x2b9   : > { %v13983_v35 = vadd.f32 %v13822_v58, %v4799_v4  ;;  %v3725_v17 = vadd.f32 %v3408_v38, %v13927_v40  ;;  %v3726_v3 = vadd.f32 %v3407_v28, %v13922_v32  ;;  %v3949_v50 = vsel %vm3927_vm3, %v3904_v30, %v3905_v6  ;;  %v18712_v30 = vld [vmem:[#allocation221_spill] sm:$0xff] }
 0x2ba   : > { %18708 = vst [vmem:[#allocation163_spill] sm:$0xff] %v13970_v45  ;;  %v4441_v47 = vadd.f32 %v4261_v63, %v13754_v2  ;;  %v3365_v55 = vrot.slane %v13963_v62, 7  ;;  %v3908_v18 = vrot.slane %v13963_v62, 1  ;;  %v4444_v7 = vadd.f32 %v4264_v33, %v13762_v53  ;;  %v18713_v63 = vld [vmem:[#allocation287_spill] sm:$0xff] }
 0x2bb   : > { %18711 = vst [vmem:[#allocation351_spill] sm:$0xff] %v13983_v35  ;;  %v4266_v45 = vadd.f32 %v3948_v25, %v3725_v17  ;;  %v3364_v1 = vrot.slane %v13967_v51, 7  ;;  %v3907_v4 = vrot.slane %v13967_v51, 1  ;;  %v4263_v35 = vadd.f32 %v3951_v48, %v3722_v54 }
 0x2bc   : > { %v4621_v38 = vadd.f32 %v4441_v47, %v13927_v40  ;;  %v4624_v28 = vadd.f32 %v4444_v7, %v13963_v62  ;;  %v13999_v6 = vmul.f32 %v18712_v30, %v13980_v52  ;;  %v14003_v2 = vmul.f32 %v18713_v63, %v13978_v5  ;;  %v14017_v30 = vpop.permute.xlu0 %1435  ;;  %v14019_v63 = vpop.permute.xlu1 %1440 }
 0x2bd   : > { %v3405_v53 = vsel %vm3386_vm2, %v3364_v1, %v3365_v55  ;;  %v3406_v33 = vsel %vm3386_vm2, %v3363_v42, %v3364_v1  ;;  %v3946_v54 = vsel %vm3927_vm3, %v3907_v4, %v3908_v18  ;;  %v3947_v48 = vsel %vm3927_vm3, %v3906_v44, %v3907_v4  ;;  %18714 = vst [vmem:[#allocation221_spill] sm:$0xff] %v14017_v30 }
 0x2be   : > { %v4801_v25 = vmul.f32 %v4621_v38, %v13766_v57  ;;  %v4804_v17 = vmul.f32 %v4624_v28, %v13853_v29  ;;  %v3727_v47 = vadd.f32 %v3406_v33, %v13967_v51  ;;  %v3728_v7 = vadd.f32 %v3405_v53, %v13963_v62  ;;  %18715 = vst [vmem:[#allocation287_spill] sm:$0xff] %v14019_v63 }
 0x2bf   : > { %v4443_v1 = vadd.f32 %v4263_v35, %v13797_v43  ;;  %v3367_v42 = vrot.slane %v13999_v6, 7  ;;  %v3910_v9 = vrot.slane %v13999_v6, 1  ;;  %v4446_v44 = vadd.f32 %v4266_v45, %v13801_v16  ;;  %v18718_v45 = vld [vmem:[#allocation291_spill] sm:$0xff] }
 0x2c0   : > { %v14026_v4 = vadd.f32 %v13822_v58, %v4801_v25  ;;  %v14029_v38 = vadd.f32 %v13822_v58, %v4804_v17  ;;  %v4268_v28 = vadd.f32 %v3946_v54, %v3727_v47  ;;  %v3366_v53 = vrot.slane %v14003_v2, 7 }
 0x2c1   : > { %v4623_v33 = vadd.f32 %v4443_v1, %v13967_v51  ;;  %v4626_v29 = vadd.f32 %v4446_v44, %v13999_v6  ;;  %v3909_v43 = vrot.slane %v14003_v2, 1  ;;  %v4265_v35 = vadd.f32 %v3949_v50, %v3724_v31 }
 0x2c2   : > { %18716 = vst [vmem:[#allocation352_spill] sm:$0xff] %v14026_v4  ;;  %18717 = vst [vmem:[#allocation353_spill] sm:$0xff] %v14029_v38  ;;  %v3403_v57 = vsel %vm3386_vm2, %v3366_v53, %v3367_v42  ;;  %v3404_v16 = vsel %vm3386_vm2, %v3365_v55, %v3366_v53  ;;  %v14041_v25 = vmul.f32 %v18718_v45, %v14019_v63 }
 0x2c3   : > { %v4448_v54 = vadd.f32 %v4268_v28, %v13847_v0  ;;  %v4803_v17 = vmul.f32 %v4623_v33, %v13809_v15  ;;  %v4806_v47 = vmul.f32 %v4626_v29, %v13892_v60  ;;  %v3729_v1 = vadd.f32 %v3404_v16, %v14003_v2  ;;  %v14056_v0 = vpop.permute.xlu0 %1445  ;;  %v14058_v28 = vpop.permute.xlu1 %1450  ;;  %v18724_v60 = vld [vmem:[#allocation293_spill] sm:$0xff] }
 0x2c4   : > { %v14048_v31 = vadd.f32 %v3403_v57, %v13999_v6  ;;  %v3944_v50 = vsel %vm3927_vm3, %v3909_v43, %v3910_v9  ;;  %v3945_v55 = vsel %vm3927_vm3, %v3908_v18, %v3909_v43  ;;  %v4445_v44 = vadd.f32 %v4265_v35, %v13805_v21  ;;  %18719 = vst [vmem:[#allocation291_spill] sm:$0xff] %v14056_v0  ;;  %v18723_v21 = vld [vmem:[#allocation225_spill] sm:$0xff] }
 0x2c5   : > { %v3369_v53 = vrot.slane %v14041_v25, 7  ;;  %18720 = vst [vmem:[#allocation354_spill] sm:$0xff] %v14058_v28  ;;  %v14061_v29 = vadd.f32 %v13822_v58, %v4803_v17  ;;  %v14064_v57 = vadd.f32 %v13822_v58, %v4806_v47  ;;  %v4270_v33 = vadd.f32 %v3944_v50, %v3729_v1  ;;  %v18725_v47 = vld [vmem:[#allocation295_spill] sm:$0xff] }
 0x2c6   : > { %v3912_v16 = vrot.slane %v14041_v25, 1  ;;  %v4625_v45 = vadd.f32 %v4445_v44, %v14003_v2  ;;  %v4628_v18 = vadd.f32 %v4448_v54, %v14041_v25  ;;  %v14071_v43 = vmul.f32 %v18723_v21, %v14017_v30 }
 0x2c7   : > { %18721 = vst [vmem:[#allocation355_spill] sm:$0xff] %v14061_v29  ;;  %18722 = vst [vmem:[#allocation356_spill] sm:$0xff] %v14064_v57  ;;  %v4267_v35 = vadd.f32 %v3947_v48, %v3726_v3  ;;  %v14075_v38 = vmul.f32 %v18724_v60, %v14058_v28  ;;  %v4450_v17 = vadd.f32 %v4270_v33, %v13884_v11 }
 0x2c8   : > { %v14080_v1 = vmul.f32 %v18725_v47, %v14056_v0  ;;  %v4269_v50 = vadd.f32 %v3945_v55, %v3728_v7  ;;  %v4805_v44 = vmul.f32 %v4625_v45, %v13855_v12  ;;  %v4808_v54 = vmul.f32 %v4628_v18, %v13933_v59  ;;  %v14100_v18 = vpop.permute.xlu0 %1455 }
 0x2c9   : > { %v3368_v57 = vrot.slane %v14071_v43, 7  ;;  %v3911_v21 = vrot.slane %v14071_v43, 1  ;;  %v4447_v3 = vadd.f32 %v4267_v35, %v13851_v23  ;;  %v3371_v60 = vrot.slane %v14075_v38, 7  ;;  %18728 = vst [vmem:[#allocation295_spill] sm:$0xff] %v14100_v18  ;;  %v14102_v23 = vpop.permute.xlu1 %1460 }
 0x2ca   : > { %v3914_v48 = vrot.slane %v14075_v38, 1  ;;  %v4630_v11 = vadd.f32 %v4450_v17, %v14075_v38  ;;  %v14091_v33 = vadd.f32 %v13822_v58, %v4805_v44  ;;  %v14094_v7 = vadd.f32 %v13822_v58, %v4808_v54  ;;  %18729 = vst [vmem:[#allocation357_spill] sm:$0xff] %v14102_v23 }
 0x2cb   : > { %v3401_v55 = vsel %vm3386_vm2, %v3368_v57, %v3369_v53  ;;  %v3402_v45 = vsel %vm3386_vm2, %v3367_v42, %v3368_v57  ;;  %v3942_v47 = vsel %vm3927_vm3, %v3911_v21, %v3912_v16  ;;  %v3943_v44 = vsel %vm3927_vm3, %v3910_v9, %v3911_v21 }
 0x2cc   : > { %18726 = vst [vmem:[#allocation225_spill] sm:$0xff] %v14091_v33  ;;  %18727 = vst [vmem:[#allocation293_spill] sm:$0xff] %v14094_v7  ;;  %v3731_v35 = vadd.f32 %v3402_v45, %v14071_v43  ;;  %v3732_v17 = vadd.f32 %v3401_v55, %v14041_v25  ;;  %v4627_v54 = vadd.f32 %v4447_v3, %v14071_v43  ;;  %v3370_v42 = vrot.slane %v14080_v1, 7  ;;  %v18730_v45 = vld [vmem:[#allocation172_spill] sm:$0xff] }
 0x2cd   : > { %v4810_v7 = vmul.f32 %v4630_v11, %v13978_v5  ;;  %v3913_v57 = vrot.slane %v14080_v1, 1  ;;  %v4449_v33 = vadd.f32 %v4269_v50, %v13917_v22  ;;  %v14117_v55 = vmul.f32 %v13257_v8, %v14102_v23 }
 0x2ce   : > { %v4272_v59 = vadd.f32 %v3942_v47, %v3731_v35  ;;  %v14121_v12 = vmul.f32 %v18730_v45, %v14100_v18  ;;  %v4807_v9 = vmul.f32 %v4627_v54, %v13894_v34  ;;  %v3399_v3 = vsel %vm3386_vm2, %v3370_v42, %v3371_v60 }
 0x2cf   : > { %v14125_v21 = vadd.f32 %v13822_v58, %v4810_v7  ;;  %v3400_v11 = vsel %vm3386_vm2, %v3369_v53, %v3370_v42  ;;  %v3734_v8 = vadd.f32 %v3399_v3, %v14075_v38  ;;  %v3940_v50 = vsel %vm3927_vm3, %v3913_v57, %v3914_v48  ;;  %v14143_v53 = vpop.permute.xlu0 %1465  ;;  %v14145_v42 = vpop.permute.xlu1 %1470 }
 0x2d0   : > { %v3733_v22 = vadd.f32 %v3400_v11, %v14080_v1  ;;  %v3941_v35 = vsel %vm3927_vm3, %v3912_v16, %v3913_v57  ;;  %v14138_v47 = vadd.f32 %v13822_v58, %v4807_v9  ;;  %v4629_v7 = vadd.f32 %v4449_v33, %v14080_v1  ;;  %18733 = vst [vmem:[#allocation359_spill] sm:$0xff] %v14143_v53  ;;  %v18735_v33 = vld [vmem:[#allocation300_spill] sm:$0xff] }
 0x2d1   : > { %18731 = vst [vmem:[#allocation172_spill] sm:$0xff] %v14125_v21  ;;  %v3373_v54 = vrot.slane %v14117_v55, 7  ;;  %v3916_v45 = vrot.slane %v14117_v55, 1  ;;  %18734 = vst [vmem:[#allocation360_spill] sm:$0xff] %v14145_v42  ;;  %v4452_v11 = vadd.f32 %v4272_v59, %v13922_v32  ;;  %v3372_v21 = vrot.slane %v14121_v12, 7 }
 0x2d2   : > { %18732 = vst [vmem:[#allocation358_spill] sm:$0xff] %v14138_v47  ;;  %v4274_v3 = vadd.f32 %v3940_v50, %v3733_v22  ;;  %v3915_v16 = vrot.slane %v14121_v12, 1  ;;  %v4809_v57 = vmul.f32 %v4629_v7, %v13935_v41  ;;  %v4271_v9 = vadd.f32 %v3943_v44, %v14048_v31  ;;  %v18736_v47 = vld [vmem:[#allocation301_spill] sm:$0xff] }
 0x2d3   : > { %v14154_v5 = vmul.f32 %v18735_v33, %v14145_v42  ;;  %v14158_v34 = vmul.f32 %v18736_v47, %v14143_v53  ;;  %v4632_v22 = vadd.f32 %v4452_v11, %v14117_v55  ;;  %v3397_v32 = vsel %vm3386_vm2, %v3372_v21, %v3373_v54  ;;  %v6815_v11 = vld [vmem:[%s17728_s4] sm:$0xff]  ;;  %v14189_v41 = vpop.permute.xlu1 %1480 }
 0x2d4   : > { %v3398_v59 = vsel %vm3386_vm2, %v3371_v60, %v3372_v21  ;;  %v3938_v50 = vsel %vm3927_vm3, %v3915_v16, %v3916_v45  ;;  %v14168_v31 = vadd.f32 %v13822_v58, %v4809_v57  ;;  %v14172_v7 = vadd.f32 %v3397_v32, %v14117_v55  ;;  %v6816_v60 = vld [vmem:[%s17728_s4 + $0x8] sm:$0xff]  ;;  %18738 = vst [vmem:[#allocation301_spill] sm:$0xff] %v14189_v41 }
 0x2d5   : > { %v3735_v44 = vadd.f32 %v3398_v59, %v14121_v12  ;;  %v3939_v47 = vsel %vm3927_vm3, %v3914_v48, %v3915_v16  ;;  %v4812_v21 = vmul.f32 %v4632_v22, %v14017_v30  ;;  %v4451_v57 = vadd.f32 %v4271_v9, %v13927_v40 }
 0x2d6   : > { %18737 = vst [vmem:[#allocation300_spill] sm:$0xff] %v14168_v31  ;;  %v3375_v33 = vrot.slane %v14154_v5, 7  ;;  %v3918_v32 = vrot.slane %v14154_v5, 1  ;;  %v4454_v31 = vadd.f32 %v4274_v3, %v13963_v62  ;;  %v3374_v48 = vrot.slane %v14158_v34, 7 }
 0x2d7   : > { %v4276_v59 = vadd.f32 %v3938_v50, %v3735_v44  ;;  %v3917_v16 = vrot.slane %v14158_v34, 1  ;;  %v14192_v29 = vadd.f32 %v13822_v58, %v4812_v21  ;;  %v4631_v22 = vadd.f32 %v4451_v57, %v14121_v12 }
 0x2d8   : > { %v4273_v30 = vadd.f32 %v3941_v35, %v3732_v17  ;;  %v9202_v40 = vpack.c.bf16 %v6816_v60, %v6815_v11  ;;  %v4634_v9 = vadd.f32 %v4454_v31, %v14154_v5  ;;  %v3395_v50 = vsel %vm3386_vm2, %v3374_v48, %v3375_v33  ;;  %v14209_v35 = vpop.permute.xlu0 %1475  ;;  %v18741_v11 = vld [vmem:[#allocation174_spill] sm:$0xff] }
 0x2d9   : > { %18739 = vst [vmem:[#allocation361_spill] sm:$0xff] %v14192_v29  ;;  %v3396_v62 = vsel %vm3386_vm2, %v3373_v54, %v3374_v48  ;;  %v3936_v3 = vsel %vm3927_vm3, %v3917_v16, %v3918_v32  ;;  %v4811_v44 = vmul.f32 %v4631_v22, %v13980_v52  ;;  %v14205_v29 = vadd.f32 %v3395_v50, %v14154_v5 }
 0x2da   : > { %v3737_v21 = vadd.f32 %v3396_v62, %v14158_v34  ;;  %v3937_v17 = vsel %vm3927_vm3, %v3916_v45, %v3917_v16  ;;  %9234 = vmatprep.subr.bf16.mxu1 %v9202_v40  ;;  %18740 = vst [vmem:[#allocation362_spill] sm:$0xff] %v14209_v35  ;;  %v4814_v31 = vmul.f32 %v4634_v9, %v14056_v0  ;;  %v18743_v45 = vld [vmem:[#allocation234_spill] sm:$0xff] }
 0x2db   : > { %v4453_v54 = vadd.f32 %v4273_v30, %v13967_v51  ;;  %9242 = vmatpush3.bf16.msra.mxu1 %v9202_v40  ;;  %v14215_v60 = vmul.f32 %v18741_v11, %v14189_v41  ;;  %v4456_v57 = vadd.f32 %v4276_v59, %v13999_v6  ;;  %v14219_v48 = vadd.f32 %v13822_v58, %v4811_v44  ;;  %v6817_v51 = vld [vmem:[%s17728_s4 + $0x10] sm:$0xff]  ;;  %v6818_v30 = vld [vmem:[%s17728_s4 + $0x18] sm:$0xff] }
 0x2dc   : > { %v4278_v22 = vadd.f32 %v3936_v3, %v3737_v21  ;;  %v14223_v16 = vmul.f32 %v18743_v45, %v14209_v35  ;;  %v4275_v50 = vadd.f32 %v3939_v47, %v3734_v8  ;;  %9203 = vmatprep.subr.bf16.mxu0 %v9202_v40  ;;  %v14232_v6 = vadd.f32 %v13822_v58, %v4814_v31  ;;  %v14237_v8 = vpop.permute.xlu1 %1490 }
 0x2dd   : > { %18742 = vst [vmem:[#allocation174_spill] sm:$0xff] %v14219_v48  ;;  %v4633_v59 = vadd.f32 %v4453_v54, %v14158_v34  ;;  %v3377_v9 = vrot.slane %v14215_v60, 7  ;;  %v3920_v62 = vrot.slane %v14215_v60, 1  ;;  %9205 = vmatpush3.bf16.msra.mxu0 %v9202_v40  ;;  %18745 = vst [vmem:[#allocation363_spill] sm:$0xff] %v14237_v8  ;;  %v4636_v47 = vadd.f32 %v4456_v57, %v14215_v60  ;;  %v18746_v54 = vld [vmem:[#allocation307_spill] sm:$0xff] }
 0x2de   : > { %18744 = vst [vmem:[#allocation234_spill] sm:$0xff] %v14232_v6  ;;  %v3376_v3 = vrot.slane %v14223_v16, 7  ;;  %v3919_v44 = vrot.slane %v14223_v16, 1  ;;  %v4455_v21 = vadd.f32 %v4275_v50, %v14003_v2  ;;  %v9206_v11 = vpack.c.bf16 %v6818_v30, %v6817_v51 }
 0x2df   : > { %v4813_v31 = vmul.f32 %v4633_v59, %v14019_v63  ;;  %v14246_v45 = vmul.f32 %v18746_v54, %v14237_v8  ;;  %v4458_v6 = vadd.f32 %v4278_v22, %v14041_v25  ;;  %v4816_v40 = vmul.f32 %v4636_v47, %v14100_v18  ;;  %v6819_v22 = vld [vmem:[%s17728_s4 + $0x20] sm:$0xff]  ;;  %v14271_v59 = vpop.permute.xlu0 %1485  ;;  %v18752_v63 = vld [vmem:[#allocation24_spill] sm:$0xff] }
 0x2e0   : > { %v3393_v57 = vsel %vm3386_vm2, %v3376_v3, %v3377_v9  ;;  %v3394_v0 = vsel %vm3386_vm2, %v3375_v33, %v3376_v3  ;;  %v3934_v2 = vsel %vm3927_vm3, %v3919_v44, %v3920_v62  ;;  %v3935_v25 = vsel %vm3927_vm3, %v3918_v32, %v3919_v44  ;;  %9235 = vmatprep.subr.bf16.mxu1 %v9206_v11  ;;  %v6820_v33 = vld [vmem:[%s17728_s4 + $0x28] sm:$0xff]  ;;  %v18750_v54 = vld [vmem:[#allocation181_spill] sm:$0xff] }
 0x2e1   : > { %v14257_v50 = vadd.f32 %v13822_v58, %v4813_v31  ;;  %v3739_v51 = vadd.f32 %v3394_v0, %v14223_v16  ;;  %v14261_v30 = vadd.f32 %v3393_v57, %v14215_v60  ;;  %18748 = vst [vmem:[#allocation364_spill] sm:$0xff] %v14271_v59  ;;  %v14274_v47 = vadd.f32 %v13822_v58, %v4816_v40 }
 0x2e2   : > { %v4635_v0 = vadd.f32 %v4455_v21, %v14223_v16  ;;  %9243 = vmatpush3.bf16.msra.mxu1 %v9206_v11  ;;  %v3379_v3 = vrot.slane %v14246_v45, 7  ;;  %v3922_v32 = vrot.slane %v14246_v45, 1  ;;  %9207 = vmatprep.subr.bf16.mxu0 %v9206_v11  ;;  %v4638_v31 = vadd.f32 %v4458_v6, %v14246_v45  ;;  %v18751_v21 = vld [vmem:[#allocation25_spill] sm:$0xff] }
 0x2e3   : > { %18747 = vst [vmem:[#allocation307_spill] sm:$0xff] %v14257_v50  ;;  %18749 = vst [vmem:[#allocation365_spill] sm:$0xff] %v14274_v47  ;;  %v4280_v44 = vadd.f32 %v3934_v2, %v3739_v51  ;;  %v14282_v57 = vmul.f32 %v18750_v54, %v14271_v59  ;;  %v4277_v18 = vadd.f32 %v3937_v17, %v14172_v7  ;;  %9209 = vmatpush3.bf16.msra.mxu0 %v9206_v11  ;;  %v18754_v11 = vld [vmem:[#allocation57_spill] sm:$0xff] }
 0x2e4   : > { %v4815_v40 = vmul.f32 %v4635_v0, %v14058_v28  ;;  %v9210_v47 = vpack.c.bf16 %v6820_v33, %v6819_v22  ;;  %v14288_v50 = vmul.f32 %v13408_v10, %v18751_v21  ;;  %v3200_v48 = vmul.f32 %v13416_v19, %v18752_v63  ;;  %v18756_v10 = vld [vmem:[#allocation51_spill] sm:$0xff] }
 0x2e5   : > { %v4818_v2 = vmul.f32 %v4638_v31, %v14143_v53  ;;  %v3378_v6 = vrot.slane %v14282_v57, 7  ;;  %v3921_v51 = vrot.slane %v14282_v57, 1  ;;  %v4457_v54 = vadd.f32 %v4277_v18, %v14071_v43 }
 0x2e6   : > { %v14297_v7 = vadd.f32 %v13822_v58, %v4815_v40  ;;  %9236 = vmatprep.subr.bf16.mxu1 %v9210_v47  ;;  %v4290_v22 = vadd.f32 %v18754_v11, %v14288_v50  ;;  %9211 = vmatprep.subr.bf16.mxu0 %v9210_v47  ;;  %v4460_v11 = vadd.f32 %v4280_v44, %v14075_v38  ;;  %v6821_v44 = vld [vmem:[%s17728_s4 + $0x30] sm:$0xff] }
 0x2e7   : > { %v14304_v19 = vadd.f32 %v13822_v58, %v4818_v2  ;;  %v3391_v33 = vsel %vm3386_vm2, %v3378_v6, %v3379_v3  ;;  %v3392_v43 = vsel %vm3386_vm2, %v3377_v9, %v3378_v6  ;;  %v3932_v18 = vsel %vm3927_vm3, %v3921_v51, %v3922_v32  ;;  %9244 = vmatpush3.bf16.msra.mxu1 %v9210_v47 }
 0x2e8   : > { %18753 = vst [vmem:[#allocation181_spill] sm:$0xff] %v14297_v7  ;;  %v3741_v0 = vadd.f32 %v3392_v43, %v14282_v57  ;;  %v3742_v31 = vadd.f32 %v3391_v33, %v14246_v45  ;;  %v14316_v40 = vsel %vm3927_vm3, %v3920_v62, %v3921_v51  ;;  %v4637_v2 = vadd.f32 %v4457_v54, %v14282_v57  ;;  %v18757_v7 = vld [vmem:[#allocation55_spill] sm:$0xff]  ;;  %v18758_v62 = vld [vmem:[#allocation6_spill] sm:$0xff] }
 0x2e9   : > { %18755 = vst [vmem:[#allocation57_spill] sm:$0xff] %v14304_v19  ;;  %9213 = vmatpush3.bf16.msra.mxu0 %v9210_v47  ;;  %v4470_v17 = vadd.f32 %v4290_v22, %v18756_v10  ;;  %v3380_v9 = vrot.slane %v3200_v48, 7  ;;  %v3923_v6 = vrot.slane %v3200_v48, 1  ;;  %v4279_v43 = vadd.f32 %v3935_v25, %v14205_v29  ;;  %v6822_v29 = vld [vmem:[%s17728_s4 + $0x38] sm:$0xff] }
 0x2ea   : > { %v4282_v19 = vadd.f32 %v3932_v18, %v3741_v0  ;;  %v4817_v53 = vmul.f32 %v4637_v2, %v14102_v23  ;;  %v4289_v33 = vadd.f32 %v18757_v7, %v3200_v48  ;;  %v4640_v28 = vadd.f32 %v4460_v11, %v14288_v50  ;;  %v18765_v23 = vld [vmem:[#allocation315_spill] sm:$0xff] }
 0x2eb   : > { %v4650_v51 = vmul.f32 %v4470_v17, %v18758_v62  ;;  %v18759_v54 = vrot.slane %v14288_v50, 7  ;;  %v3390_v47 = vsel %vm3386_vm2, %v3379_v3, %v3380_v9  ;;  %v18761_v10 = vrot.slane %v14288_v50, 1 }
 0x2ec   : > { %v14339_v25 = vadd.f32 %v13822_v58, %v4817_v53  ;;  %v3743_v7 = vadd.f32 %v3390_v47, %v3200_v48  ;;  %v4820_v3 = vmul.f32 %v4640_v28, %v14209_v35  ;;  %v3931_v0 = vsel %vm3927_vm3, %v3922_v32, %v3923_v6  ;;  %v18766_v35 = vld [vmem:[#allocation56_spill] sm:$0xff] }
 0x2ed   : > { %v3389_v38 = vsel %vm3386_vm2, %v3380_v9, %v18759_v54  ;;  %v3930_v22 = vsel %vm3927_vm3, %v3923_v6, %v18761_v10  ;;  %v14348_v18 = vadd.f32 %v13822_v58, %v4650_v51  ;;  %v4459_v2 = vadd.f32 %v4279_v43, %v14080_v1  ;;  %v18762_v9 = vld [vmem:[#allocation53_spill] sm:$0xff]  ;;  %v18764_v10 = vld [vmem:[#allocation27_spill] sm:$0xff]  ;;  %v18767_v51 = vld [vmem:[#allocation62_spill] sm:$0xff] }
 0x2ee   : > { %18760 = vst [vmem:[#allocation51_spill] sm:$0xff] %v14339_v25  ;;  %v3744_v17 = vadd.f32 %v3389_v38, %v14288_v50  ;;  %v4283_v53 = vadd.f32 %v3931_v0, %v3742_v31  ;;  %v4284_v11 = vadd.f32 %v3930_v22, %v3743_v7  ;;  %v4469_v54 = vadd.f32 %v4289_v33, %v18762_v9  ;;  %v18768_v1 = vld [vmem:[#allocation7_spill] sm:$0xff]  ;;  %v18776_v9 = vld [vmem:[#allocation9_spill] sm:$0xff] }
 0x2ef   : > { %v9214_v38 = vpack.c.bf16 %v6822_v29, %v6821_v44  ;;  %v14355_v47 = vadd.f32 %v13822_v58, %v4820_v3  ;;  %v4639_v25 = vadd.f32 %v4459_v2, %v3200_v48  ;;  %v3203_v28 = vmul.f32 %v18765_v23, %v18764_v10  ;;  %v18769_v23 = vld [vmem:[#allocation41_spill] sm:$0xff] }
 0x2f0   : > { %v4112_v52 = vadd.f32 %v18767_v51, %v18766_v35  ;;  %v4463_v15 = vadd.f32 %v4283_v53, %v14158_v34  ;;  %v4464_v32 = vadd.f32 %v4284_v11, %v14154_v5  ;;  %v14364_v31 = vmul.f32 %v4469_v54, %v18768_v1  ;;  %v18770_v35 = vld [vmem:[#allocation39_spill] sm:$0xff]  ;;  %v18771_v5 = vld [vmem:[#allocation26_spill] sm:$0xff]  ;;  %v18778_v51 = vld [vmem:[#allocation49_spill] sm:$0xff] }
 0x2f1   : > { %18763 = vst [vmem:[#allocation55_spill] sm:$0xff] %v14355_v47  ;;  %9237 = vmatprep.subr.bf16.mxu1 %v9214_v38  ;;  %v4462_v6 = vadd.f32 %v4282_v19, %v14117_v55  ;;  %v4819_v43 = vmul.f32 %v4639_v25, %v14145_v42  ;;  %v3383_v48 = vrot.slane %v3203_v28, 7  ;;  %v3926_v33 = vrot.slane %v3203_v28, 1  ;;  %9215 = vmatprep.subr.bf16.mxu0 %v9214_v38  ;;  %v18775_v25 = vld [vmem:[#allocation58_spill] sm:$0xff]  ;;  %v18812_v42 = vld [vmem:[#allocation87_spill] sm:$0xff] }
 0x2f2   : > { %9245 = vmatpush3.bf16.msra.mxu1 %v9214_v38  ;;  %v4292_v44 = vadd.f32 %v4112_v52, %v3203_v28  ;;  %v14369_v29 = vadd.f32 %v4463_v15, %v18769_v23  ;;  %v4644_v34 = vadd.f32 %v4464_v32, %v18770_v35  ;;  %v3202_v22 = vmul.f32 %v13548_v20, %v18771_v5 }
 0x2f3   : > { %v4642_v7 = vadd.f32 %v4462_v6, %v3203_v28  ;;  %9217 = vmatpush3.bf16.msra.mxu0 %v9214_v38  ;;  %v14375_v3 = vadd.f32 %v13822_v58, %v4819_v43  ;;  %v18773_v55 = vrot.slane %v18769_v23, 7  ;;  %v18774_v52 = vrot.slane %v18769_v23, 1  ;;  %v18777_v38 = vld [vmem:[#allocation43_spill] sm:$0xff]  ;;  %v18779_v43 = vld [vmem:[#allocation50_spill] sm:$0xff] }
 0x2f4   : > { %v4472_v0 = vadd.f32 %v4292_v44, %v18775_v25  ;;  %v4824_v2 = vmul.f32 %v4644_v34, %v18752_v63  ;;  %v3382_v11 = vrot.slane %v3202_v22, 7  ;;  %v3570_v32 = vadd.f32 %v18778_v51, %v18777_v38  ;;  %v6823_v25 = vld [vmem:[%s17728_s4 + $0x40] sm:$0xff] }
 0x2f5   : > { %18772 = vst [vmem:[#allocation6_spill] sm:$0xff] %v14375_v3  ;;  %v3566_v19 = vsel %vm3386_vm2, %v3383_v48, %v18773_v55  ;;  %v4107_v15 = vsel %vm3927_vm3, %v3926_v33, %v18774_v52  ;;  %v4822_v53 = vmul.f32 %v4642_v7, %v14271_v59  ;;  %v3925_v6 = vrot.slane %v3202_v22, 1  ;;  %v18782_v52 = vld [vmem:[#allocation44_spill] sm:$0xff] }
 0x2f6   : > { %v3567_v20 = vadd.f32 %v3566_v19, %v18769_v23  ;;  %v4652_v54 = vmul.f32 %v4472_v0, %v18776_v9  ;;  %v18780_v35 = vrot.slane %v18779_v43, 1  ;;  %v18781_v55 = vrot.slane %v18777_v38, 1 }
 0x2f7   : > { %v5011_v34 = vadd.f32 %v13822_v58, %v4824_v2  ;;  %v14401_v7 = vadd.f32 %v13822_v58, %v4822_v53  ;;  %v3387_v19 = vsel %vm3386_vm2, %v3382_v11, %v3383_v48  ;;  %v18784_v51 = vrot.slane %v14288_v50, 7  ;;  %v6824_v48 = vld [vmem:[%s17728_s4 + $0x48] sm:$0xff]  ;;  %v6825_v53 = vld [vmem:[%s17728_s4 + $0x50] sm:$0xff] }
 0x2f8   : > { %v4103_v44 = vsel %vm3927_vm3, %v18781_v55, %v18780_v35  ;;  %v4108_v23 = vadd.f32 %v18782_v52, %v3567_v20  ;;  %v14409_v0 = vadd.f32 %v13822_v58, %v4652_v54  ;;  %v3746_v35 = vadd.f32 %v3387_v19, %v3203_v28  ;;  %v6826_v54 = vld [vmem:[%s17728_s4 + $0x58] sm:$0xff]  ;;  %v6827_v19 = vld [vmem:[%s17728_s4 + $0x60] sm:$0xff] }
 0x2f9   : > { %18783 = vst [vmem:[#allocation53_spill] sm:$0xff] %v14401_v7  ;;  %v3388_v2 = vsel %vm3386_vm2, %v18784_v51, %v3382_v11  ;;  %v3928_v20 = vsel %vm3927_vm3, %v3925_v6, %v3926_v33  ;;  %v14427_v55 = vmul.f32 %v5011_v34, %v18752_v63  ;;  %v18786_v33 = vrot.slane %v14288_v50, 1  ;;  %v6829_v50 = vld [vmem:[%s17728_s4 + $0x70] sm:$0xff]  ;;  %v18787_v34 = vld [vmem:[#allocation48_spill] sm:$0xff] }
 0x2fa   : > { %v4288_v28 = vadd.f32 %v4108_v23, %v14246_v45  ;;  %v3745_v11 = vadd.f32 %v3388_v2, %v3202_v22  ;;  %v4111_v51 = vadd.f32 %v4103_v44, %v3570_v32  ;;  %v4281_v7 = vadd.f32 %v14316_v40, %v14261_v30  ;;  %v6828_v45 = vld [vmem:[%s17728_s4 + $0x68] sm:$0xff] }
 0x2fb   : > { %18785 = vst [vmem:[#allocation315_spill] sm:$0xff] %v14427_v55  ;;  %v3929_v52 = vsel %vm3927_vm3, %v18786_v33, %v3925_v6  ;;  %v4287_v47 = vadd.f32 %v4107_v15, %v3746_v35  ;;  %v6830_v6 = vld [vmem:[%s17728_s4 + $0x78] sm:$0xff]  ;;  %v9218_v44 = vpack.c.bf16 %v6824_v48, %v6823_v25  ;;  %v9222_v2 = vpack.c.bf16 %v6826_v54, %v6825_v53  ;;  %v18788_v35 = vld [vmem:[#allocation5_spill] sm:$0xff] }
 0x2fc   : > { %v4285_v59 = vadd.f32 %v3929_v52, %v3744_v17  ;;  %v4468_v23 = vadd.f32 %v4288_v28, %v18787_v34  ;;  %v4286_v32 = vadd.f32 %v3928_v20, %v3745_v11  ;;  %v4291_v30 = vadd.f32 %v4111_v51, %v3202_v22  ;;  %v18789_v28 = vld [vmem:[#allocation60_spill] sm:$0xff]  ;;  %v18790_v48 = vld [vmem:[#allocation45_spill] sm:$0xff] }
 0x2fd   : > { %v4461_v40 = vadd.f32 %v4281_v7, %v14121_v12  ;;  %v4467_v15 = vadd.f32 %v4287_v47, %v14282_v57  ;;  %9238 = vmatprep.subr.bf16.mxu1 %v9218_v44  ;;  %v9226_v63 = vpack.c.bf16 %v6828_v45, %v6827_v19  ;;  %v14456_v3 = vpack.c.bf16 %v6830_v6, %v6829_v50  ;;  %v18792_v47 = vld [vmem:[#allocation68_spill] sm:$0xff] }
 0x2fe   : > { %v4465_v17 = vadd.f32 %v4285_v59, %v14223_v16  ;;  %v14453_v33 = vmul.f32 %v4468_v23, %v18788_v35  ;;  %v4466_v52 = vadd.f32 %v4286_v32, %v14215_v60  ;;  %v4471_v20 = vadd.f32 %v4291_v30, %v18789_v28  ;;  %9246 = vmatpush3.bf16.msra.mxu1 %v9218_v44  ;;  %v18791_v60 = vld [vmem:[#allocation78_spill] sm:$0xff]  ;;  %v18793_v54 = vld [vmem:[#allocation8_spill] sm:$0xff]  ;;  %v18801_v28 = vld [vmem:[#allocation77_spill] sm:$0xff] }
 0x2ff   : > { %v4641_v25 = vadd.f32 %v4461_v40, %v3202_v22  ;;  %v4647_v12 = vadd.f32 %v4467_v15, %v18779_v43  ;;  %9239 = vmatprep.subr.bf16.mxu1 %v9222_v2  ;;  %v4836_v59 = vadd.f32 %v13822_v58, %v14364_v31  ;;  %v4846_v57 = vadd.f32 %v13822_v58, %v18791_v60  ;;  %v18794_v43 = vld [vmem:[#allocation65_spill] sm:$0xff]  ;;  %v18796_v45 = vld [vmem:[#allocation16_spill] sm:$0xff] }
 0x300   : > { %v14460_v53 = vadd.f32 %v4465_v17, %v18790_v48  ;;  %v4646_v16 = vadd.f32 %v4466_v52, %v18777_v38  ;;  %v18091_v7 = vrot.slane %v18792_v47, 7  ;;  %9219 = vmatprep.subr.bf16.mxu0 %v9218_v44  ;;  %v4651_v22 = vmul.f32 %v4471_v20, %v18793_v54  ;;  %v18798_v40 = vld [vmem:[#allocation72_spill] sm:$0xff]  ;;  %v18800_v52 = vld [vmem:[#allocation17_spill] sm:$0xff] }
 0x301   : > { %v4821_v11 = vmul.f32 %v4641_v25, %v14189_v41  ;;  %v4827_v19 = vmul.f32 %v4647_v12, %v18764_v10  ;;  %v5201_v51 = vrot.slane %v18794_v43, 7  ;;  %9221 = vmatpush3.bf16.msra.mxu0 %v9218_v44  ;;  %v14477_v31 = vmul.f32 %v4836_v59, %v18768_v1  ;;  %v18802_v25 = vld [vmem:[#allocation70_spill] sm:$0xff]  ;;  %v18805_v59 = vld [vmem:[#allocation83_spill] sm:$0xff] }
 0x302   : > { %v14474_v38 = vmul.f32 %v4646_v16, %v18771_v5  ;;  %v14480_v50 = vmul.f32 %v4846_v57, %v18796_v45  ;;  %v18090_v6 = vrot.slane %v18794_v43, 1  ;;  %9223 = vmatprep.subr.bf16.mxu0 %v9222_v2  ;;  %v4838_v34 = vadd.f32 %v13822_v58, %v4651_v22  ;;  %9247 = vmatpush3.bf16.msra.mxu1 %v9222_v2  ;;  %v18804_v16 = vld [vmem:[#allocation18_spill] sm:$0xff]  ;;  %v18806_v22 = vld [vmem:[#allocation76_spill] sm:$0xff] }
 0x303   : > { %18795 = vst [vmem:[#allocation56_spill] sm:$0xff] %v14477_v31  ;;  %v14485_v23 = vadd.f32 %v13822_v58, %v4821_v11  ;;  %v14488_v32 = vadd.f32 %v13822_v58, %v4827_v19  ;;  %v5548_v44 = vsel %vm3386_vm2, %v18091_v7, %v5201_v51  ;;  %9240 = vmatprep.subr.bf16.mxu1 %v9226_v63  ;;  %v5742_v17 = vrot.slane %v18798_v40, 1 }
 0x304   : > { %v5561_v30 = vadd.f32 %v5548_v44, %v18794_v43  ;;  %v14498_v15 = vmul.f32 %v14348_v18, %v18758_v62  ;;  %v14502_v20 = vmul.f32 %v18801_v28, %v18800_v52  ;;  %v5202_v58 = vrot.slane %v18798_v40, 7  ;;  %v18808_v28 = vld [vmem:[#allocation19_spill] sm:$0xff] }
 0x305   : > { %18797 = vst [vmem:[#allocation62_spill] sm:$0xff] %v14485_v23  ;;  %v5743_v48 = vrot.slane %v18802_v25, 1  ;;  %v14507_v12 = vmul.f32 %v4838_v34, %v18793_v54  ;;  %v14511_v60 = vmul.f32 %v18805_v59, %v18804_v16  ;;  %9225 = vmatpush3.bf16.msra.mxu0 %v9222_v2  ;;  %v6087_v18 = vsel %vm3927_vm3, %v18090_v6, %v5742_v17  ;;  %v18809_v59 = vld [vmem:[#allocation81_spill] sm:$0xff] }
 0x306   : > { %18799 = vst [vmem:[#allocation7_spill] sm:$0xff] %v14498_v15  ;;  %v5203_v57 = vrot.slane %v18802_v25, 7  ;;  %v5744_v11 = vrot.slane %v18806_v22, 1  ;;  %v14521_v19 = vmul.f32 %v14409_v0, %v18776_v9  ;;  %9227 = vmatprep.subr.bf16.mxu0 %v9226_v63  ;;  %9248 = vmatpush3.bf16.msra.mxu1 %v9226_v63  ;;  %v6101_v34 = vadd.f32 %v6087_v18, %v5561_v30  ;;  %v18810_v23 = vld [vmem:[#allocation73_spill] sm:$0xff] }
 0x307   : > { %18803 = vst [vmem:[#allocation41_spill] sm:$0xff] %v14507_v12  ;;  %v5547_v44 = vsel %vm3386_vm2, %v5201_v51, %v5202_v58  ;;  %v6086_v2 = vsel %vm3927_vm3, %v5742_v17, %v5743_v48  ;;  %v14529_v6 = vmul.f32 %v18809_v59, %v18808_v28  ;;  %9241 = vmatprep.subr.bf16.mxu1 %v14456_v3  ;;  %v5204_v18 = vrot.slane %v18806_v22, 7  ;;  %v18811_v59 = vld [vmem:[#allocation20_spill] sm:$0xff] }
 0x308   : > { %18807 = vst [vmem:[#allocation39_spill] sm:$0xff] %v14521_v19  ;;  %v5562_v7 = vadd.f32 %v5547_v44, %v18798_v40  ;;  %v5546_v0 = vsel %vm3386_vm2, %v5202_v58, %v5203_v57  ;;  %v6085_v30 = vsel %vm3927_vm3, %v5743_v48, %v5744_v11  ;;  %v6281_v51 = vadd.f32 %v6101_v34, %v14477_v31 }
 0x309   : > { %v5563_v17 = vadd.f32 %v5546_v0, %v18802_v25  ;;  %v5745_v41 = vrot.slane %v18810_v23, 1  ;;  %v14543_v4 = vmul.f32 %v18812_v42, %v18811_v59  ;;  %9229 = vmatpush3.bf16.msra.mxu0 %v9226_v63  ;;  %v5545_v58 = vsel %vm3386_vm2, %v5203_v57, %v5204_v18 }
 0x30a   : > { %v6102_v44 = vadd.f32 %v6086_v2, %v5562_v7  ;;  %v5205_v56 = vrot.slane %v18810_v23, 7  ;;  %v5746_v48 = vrot.slane %v14480_v50, 1  ;;  %9231 = vmatprep.subr.bf16.mxu0 %v14456_v3  ;;  %9249 = vmatpush3.bf16.msra.mxu1 %v14456_v3  ;;  %v6461_v34 = vadd.f32 %v6281_v51, %v14480_v50  ;;  %v18813_v2 = vld [vmem:[#allocation21_spill] sm:$0xff] }
 0x30b   : > { %v6103_v0 = vadd.f32 %v6085_v30, %v5563_v17  ;;  %v5564_v49 = vadd.f32 %v5545_v58, %v18806_v22  ;;  %v6084_v63 = vsel %vm3927_vm3, %v5744_v11, %v5745_v41  ;;  %v14562_v14 = vmul.f32 %v18814_v37, %v18813_v2 }
 0x30c   : > { %v6282_v42 = vadd.f32 %v6102_v44, %v14498_v15  ;;  %v5544_v7 = vsel %vm3386_vm2, %v5204_v18, %v5205_v56  ;;  %v6083_v57 = vsel %vm3927_vm3, %v5745_v41, %v5746_v48  ;;  %v6641_v51 = vmul.f32 %v6461_v34, %v18815_v46  ;;  %v18816_v41 = vld [vmem:[#allocation22_spill] sm:$0xff] }
 0x30d   : > { %v6283_v30 = vadd.f32 %v6103_v0, %v14507_v12  ;;  %v6104_v17 = vadd.f32 %v6084_v63, %v5564_v49  ;;  %v5565_v58 = vadd.f32 %v5544_v7, %v18810_v23  ;;  %9233 = vmatpush3.bf16.msra.mxu0 %v14456_v3  ;;  %v5206_v18 = vrot.slane %v14480_v50, 7  ;;  %v18818_v0 = vld [vmem:[#allocation12_spill] sm:$0xff] }
 0x30e   : > { %v6462_v11 = vadd.f32 %v6282_v42, %v14502_v20  ;;  %v5747_v44 = vrot.slane %v14502_v20, 1  ;;  %v14573_v27 = vmul.f32 %v18817_v13, %v18816_v41  ;;  %8941 = vmatprep.mubr.f32.mxu1 %v6641_v51  ;;  %v5207_v34 = vrot.slane %v14502_v20, 7  ;;  %v18819_v13 = vld [vmem:[#allocation13_spill] sm:$0xff] }
 0x30f   : > { %v6463_v46 = vadd.f32 %v6283_v30, %v14511_v60  ;;  %v6284_v37 = vadd.f32 %v6104_v17, %v14521_v19  ;;  %v6105_v49 = vadd.f32 %v6083_v57, %v5565_v58  ;;  %v5543_v63 = vsel %vm3386_vm2, %v5205_v56, %v5206_v18  ;;  %v18820_v58 = vld [vmem:[#allocation23_spill] sm:$0xff] }
 0x310   : > { %v6642_v3 = vmul.f32 %v6462_v11, %v18818_v0  ;;  %v6082_v42 = vsel %vm3927_vm3, %v5746_v48, %v5747_v44  ;;  %v5748_v7 = vrot.slane %v14511_v60, 1  ;;  %v5566_v57 = vadd.f32 %v5543_v63, %v14480_v50  ;;  %v18821_v11 = vld [vmem:[#allocation89_spill] sm:$0xff] }
 0x311   : > { %v6643_v61 = vmul.f32 %v6463_v46, %v18819_v13  ;;  %v6464_v51 = vadd.f32 %v6284_v37, %v14529_v6  ;;  %v6285_v30 = vadd.f32 %v6105_v49, %v18792_v47  ;;  %v5542_v17 = vsel %vm3386_vm2, %v5206_v18, %v5207_v34  ;;  %v18822_v46 = vld [vmem:[#allocation14_spill] sm:$0xff] }
 0x312   : > { %8942 = vmatmul.mubr.f32.vlgmr.msra.gmra.mrb[0].mxu1 %v6642_v3  ;;  %v6081_v56 = vsel %vm3927_vm3, %v5747_v44, %v5748_v7  ;;  %v14594_v48 = vmul.f32 %v18821_v11, %v18820_v58  ;;  %v5208_v0 = vrot.slane %v14511_v60, 7  ;;  %v6106_v13 = vadd.f32 %v6082_v42, %v5566_v57  ;;  %v18823_v44 = vld [vmem:[#allocation28_spill] sm:$0xff] }
 0x313   : > { %8944 = vmatprep.mubr.f32.mxu1 %v6643_v61  ;;  %v6644_v37 = vmul.f32 %v6464_v51, %v18822_v46  ;;  %v6465_v49 = vadd.f32 %v6285_v30, %v14543_v4  ;;  %v5567_v3 = vadd.f32 %v5542_v17, %v14502_v20  ;;  %v5749_v63 = vrot.slane %v14529_v6, 1  ;;  %v18827_v17 = vld [vmem:[#allocation93_spill] sm:$0xff] }
 0x314   : > { %v5541_v18 = vsel %vm3386_vm2, %v5207_v34, %v5208_v0  ;;  %v14605_v24 = vmul.f32 %v18824_v26, %v18823_v44  ;;  %v5209_v11 = vrot.slane %v14529_v6, 7  ;;  %v6286_v51 = vadd.f32 %v6106_v13, %v18794_v43  ;;  %v18826_v26 = vld [vmem:[#allocation29_spill] sm:$0xff] }
 0x315   : > { %v6645_v61 = vmul.f32 %v6465_v49, %v18825_v39  ;;  %v6107_v46 = vadd.f32 %v6081_v56, %v5567_v3  ;;  %v5568_v42 = vadd.f32 %v5541_v18, %v14511_v60  ;;  %v6080_v30 = vsel %vm3927_vm3, %v5748_v7, %v5749_v63 }
 0x316   : > { %8945 = vmatmul.mubr.f32.gmra.mrb[2].mxu1 %v6644_v37  ;;  %v5540_v34 = vsel %vm3386_vm2, %v5208_v0, %v5209_v11  ;;  %v5750_v57 = vrot.slane %v14543_v4, 1  ;;  %v14618_v44 = vmul.f32 %v18827_v17, %v18826_v26  ;;  %v6466_v39 = vadd.f32 %v6286_v51, %v14562_v14 }
 0x317   : > { %8947 = vmatprep.mubr.f32.mxu1 %v6645_v61  ;;  %v6287_v56 = vadd.f32 %v6107_v46, %v18798_v40  ;;  %v6108_v49 = vadd.f32 %v6080_v30, %v5568_v42  ;;  %v5569_v37 = vadd.f32 %v5540_v34, %v14529_v6  ;;  %v5210_v13 = vrot.slane %v14543_v4, 7  ;;  %v14639_v30 = vld [vmem:[%s17727_s3] ss:$0 sm:$0xff] }
 0x318   : > { %v6079_v7 = vsel %vm3927_vm3, %v5749_v63, %v5750_v57  ;;  %v5751_v0 = vrot.slane %v14562_v14, 1  ;;  %v4823_v3 = vmul.f32 %v14369_v29, %v14237_v8  ;;  %v6646_v18 = vmul.f32 %v6466_v39, %v18796_v45 }
 0x319   : > { %v6467_v61 = vadd.f32 %v6287_v56, %v14573_v27  ;;  %v6288_v51 = vadd.f32 %v6108_v49, %v18802_v25  ;;  %v6109_v46 = vadd.f32 %v6079_v7, %v5569_v37  ;;  %v5539_v42 = vsel %vm3386_vm2, %v5209_v11, %v5210_v13 }
 0x31a   : > { %v6078_v63 = vsel %vm3927_vm3, %v5750_v57, %v5751_v0  ;;  %v4835_v29 = vadd.f32 %v14639_v30, %v14453_v33  ;;  %v5010_v45 = vadd.f32 %v14639_v30, %v4823_v3  ;;  %8948 = vmatmul.mubr.f32.gmra.mrb[4].mxu1 %v6646_v18  ;;  %v5570_v39 = vadd.f32 %v5539_v42, %v14543_v4  ;;  %v18831_v3 = vld [vmem:[#allocation30_spill] sm:$0xff] }
 0x31b   : > { %v6647_v34 = vmul.f32 %v6467_v61, %v18800_v52  ;;  %v6468_v17 = vadd.f32 %v6288_v51, %v14594_v48  ;;  %v6289_v11 = vadd.f32 %v6109_v46, %v18806_v22  ;;  %v14656_v33 = vmul.f32 %v14488_v32, %v18764_v10  ;;  %v18832_v18 = vld [vmem:[#allocation98_spill] sm:$0xff] }
 0x31c   : > { %v14649_v57 = vmul.f32 %v4835_v29, %v18788_v35  ;;  %v14652_v56 = vmul.f32 %v5010_v45, %v14237_v8  ;;  %v5736_v49 = vrot.slane %v14477_v31, 1  ;;  %v6110_v7 = vadd.f32 %v6078_v63, %v5570_v39  ;;  %v18833_v8 = vld [vmem:[#allocation31_spill] sm:$0xff] }
 0x31d   : > { %18830 = vst [vmem:[#allocation43_spill] sm:$0xff] %v14656_v33  ;;  %8950 = vmatprep.mubr.f32.mxu1 %v6647_v34  ;;  %v6648_v52 = vmul.f32 %v6468_v17, %v18804_v16  ;;  %v6469_v37 = vadd.f32 %v6289_v11, %v14605_v24  ;;  %v14663_v61 = vmul.f32 %v18832_v18, %v18831_v3  ;;  %v18107_v46 = vrot.slane %v14656_v33, 7 }
 0x31e   : > { %18828 = vst [vmem:[#allocation58_spill] sm:$0xff] %v14649_v57  ;;  %18829 = vst [vmem:[#allocation9_spill] sm:$0xff] %v14652_v56  ;;  %v5195_v51 = vrot.slane %v14649_v57, 7  ;;  %v18106_v42 = vrot.slane %v14649_v57, 1  ;;  %v5211_v32 = vrot.slane %v14562_v14, 7  ;;  %v6290_v16 = vadd.f32 %v6110_v7, %v18810_v23 }
 0x31f   : > { %8951 = vmatmul.mubr.f32.gmra.mrb[6].mxu1 %v6648_v52  ;;  %v6649_v29 = vmul.f32 %v6469_v37, %v18808_v28  ;;  %v5752_v45 = vrot.slane %v14573_v27, 1  ;;  %v5196_v63 = vrot.slane %v14477_v31, 7  ;;  %v5737_v28 = vrot.slane %v14498_v15, 1 }
 0x320   : > { %v5554_v34 = vsel %vm3386_vm2, %v18107_v46, %v5195_v51  ;;  %v6093_v17 = vsel %vm3927_vm3, %v18106_v42, %v5736_v49  ;;  %v5538_v11 = vsel %vm3386_vm2, %v5210_v13, %v5211_v32  ;;  %v6470_v39 = vadd.f32 %v6290_v16, %v14618_v44 }
 0x321   : > { %8953 = vmatprep.mubr.f32.mxu1 %v6649_v29  ;;  %v5555_v52 = vadd.f32 %v5554_v34, %v14649_v57  ;;  %v5571_v37 = vadd.f32 %v5538_v11, %v14562_v14  ;;  %v6077_v7 = vsel %vm3927_vm3, %v5751_v0, %v5752_v45  ;;  %v5553_v18 = vsel %vm3386_vm2, %v5195_v51, %v5196_v63 }
 0x322   : > { %v6092_v42 = vsel %vm3927_vm3, %v5736_v49, %v5737_v28  ;;  %v4825_v13 = vmul.f32 %v14460_v53, %v18751_v21  ;;  %v5197_v29 = vrot.slane %v14498_v15, 7  ;;  %v6650_v16 = vmul.f32 %v6470_v39, %v18811_v59  ;;  %v18834_v49 = vld [vmem:[#allocation97_spill] sm:$0xff] }
 0x323   : > { %v6095_v46 = vadd.f32 %v6093_v17, %v5555_v52  ;;  %v6111_v34 = vadd.f32 %v6077_v7, %v5571_v37  ;;  %v5556_v11 = vadd.f32 %v5553_v18, %v14477_v31  ;;  %v5738_v51 = vrot.slane %v14507_v12, 1 }
 0x324   : > { %v5012_v10 = vadd.f32 %v14639_v30, %v4825_v13  ;;  %v5552_v0 = vsel %vm3386_vm2, %v5196_v63, %v5197_v29  ;;  %v14704_v3 = vmul.f32 %v18834_v49, %v18833_v8  ;;  %8954 = vmatmul.mubr.f32.gmra.mrb[8].mxu1 %v6650_v16  ;;  %v5212_v37 = vrot.slane %v14573_v27, 7  ;;  %v18836_v16 = vld [vmem:[#allocation32_spill] sm:$0xff] }
 0x325   : > { %v6275_v53 = vadd.f32 %v6095_v46, %v14652_v56  ;;  %v6291_v59 = vadd.f32 %v6111_v34, %v14480_v50  ;;  %v6096_v17 = vadd.f32 %v6092_v42, %v5556_v11  ;;  %v5557_v39 = vadd.f32 %v5552_v0, %v14498_v15  ;;  %v18837_v34 = vld [vmem:[#allocation102_spill] sm:$0xff] }
 0x326   : > { %v14710_v52 = vmul.f32 %v5012_v10, %v18751_v21  ;;  %v6091_v63 = vsel %vm3927_vm3, %v5737_v28, %v5738_v51  ;;  %v5753_v7 = vrot.slane %v14594_v48, 1  ;;  %v5537_v42 = vsel %vm3386_vm2, %v5211_v32, %v5212_v37 }
 0x327   : > { %v6455_v18 = vadd.f32 %v6275_v53, %v18792_v47  ;;  %v6471_v13 = vadd.f32 %v6291_v59, %v14663_v61  ;;  %v6276_v46 = vadd.f32 %v6096_v17, %v14427_v55  ;;  %v6097_v50 = vadd.f32 %v6091_v63, %v5557_v39 }
 0x328   : > { %18835 = vst [vmem:[#allocation49_spill] sm:$0xff] %v14710_v52  ;;  %v6076_v10 = vsel %vm3927_vm3, %v5752_v45, %v5753_v7  ;;  %v14725_v28 = vmul.f32 %v18837_v34, %v18836_v16  ;;  %v5213_v11 = vrot.slane %v14594_v48, 7  ;;  %v5572_v17 = vadd.f32 %v5537_v42, %v14573_v27 }
 0x329   : > { %v6635_v0 = vmul.f32 %v6455_v18, %v18788_v35  ;;  %v6651_v49 = vmul.f32 %v6471_v13, %v18813_v2  ;;  %v6456_v53 = vadd.f32 %v6276_v46, %v18794_v43  ;;  %v6277_v59 = vadd.f32 %v6097_v50, %v14710_v52 }
 0x32a   : > { %v5536_v32 = vsel %vm3386_vm2, %v5212_v37, %v5213_v11  ;;  %v5754_v45 = vrot.slane %v14605_v24, 1  ;;  %v5013_v39 = vadd.f32 %v14639_v30, %v14474_v38  ;;  %v5198_v18 = vrot.slane %v14507_v12, 7 }
 0x32b   : > { %8932 = vmatprep.mubr.f32.mxu0 %v6635_v0  ;;  %8956 = vmatprep.mubr.f32.mxu1 %v6651_v49  ;;  %v6636_v35 = vmul.f32 %v6456_v53, %v18768_v1  ;;  %v6457_v2 = vadd.f32 %v6277_v59, %v18798_v40  ;;  %v5573_v63 = vadd.f32 %v5536_v32, %v14594_v48  ;;  %v5739_v50 = vrot.slane %v14521_v19, 1  ;;  %v18839_v49 = vld [vmem:[#allocation33_spill] sm:$0xff]  ;;  %v18840_v53 = vld [vmem:[#allocation100_spill] sm:$0xff] }
 0x32c   : > { %v6112_v13 = vadd.f32 %v6076_v10, %v5572_v17  ;;  %v6075_v46 = vsel %vm3927_vm3, %v5753_v7, %v5754_v45  ;;  %v14745_v37 = vmul.f32 %v5013_v39, %v18771_v5  ;;  %v5551_v1 = vsel %vm3386_vm2, %v5197_v29, %v5198_v18 }
 0x32d   : > { %8933 = vmatmul.mubr.f32.vlgmr.msra.gmra.mrb[180].mxu0 %v6636_v35  ;;  %v6637_v38 = vmul.f32 %v6457_v2, %v18758_v62  ;;  %v6113_v30 = vadd.f32 %v6075_v46, %v5573_v63  ;;  %v5199_v40 = vrot.slane %v14521_v19, 7  ;;  %v5558_v10 = vadd.f32 %v5551_v1, %v14507_v12  ;;  %v18841_v2 = vld [vmem:[#allocation34_spill] sm:$0xff] }
 0x32e   : > { %18838 = vst [vmem:[#allocation50_spill] sm:$0xff] %v14745_v37  ;;  %v6292_v42 = vadd.f32 %v6112_v13, %v14502_v20  ;;  %v6090_v7 = vsel %vm3927_vm3, %v5738_v51, %v5739_v50  ;;  %v5740_v34 = vrot.slane %v18792_v47, 1  ;;  %v14762_v29 = vmul.f32 %v18840_v53, %v18839_v49  ;;  %v18842_v63 = vld [vmem:[#allocation106_spill] sm:$0xff] }
 0x32f   : > { %8935 = vmatprep.mubr.f32.mxu0 %v6637_v38  ;;  %v6293_v0 = vadd.f32 %v6113_v30, %v14511_v60  ;;  %v5550_v62 = vsel %vm3386_vm2, %v5198_v18, %v5199_v40  ;;  %v5214_v59 = vrot.slane %v14605_v24, 7  ;;  %v6098_v17 = vadd.f32 %v6090_v7, %v5558_v10 }
 0x330   : > { %v6472_v20 = vadd.f32 %v6292_v42, %v14704_v3  ;;  %v5559_v32 = vadd.f32 %v5550_v62, %v14521_v19  ;;  %v6089_v51 = vsel %vm3927_vm3, %v5739_v50, %v5740_v34  ;;  %v5755_v35 = vrot.slane %v14618_v44, 1  ;;  %v19007_v19 = vld [vmem:[#allocation277_spill] sm:$0xff] }
 0x331   : > { %v6473_v39 = vadd.f32 %v6293_v0, %v14725_v28  ;;  %v5535_v60 = vsel %vm3386_vm2, %v5213_v11, %v5214_v59  ;;  %v14775_v18 = vmul.f32 %v18842_v63, %v18841_v2  ;;  %v6278_v46 = vadd.f32 %v6098_v17, %v14745_v37  ;;  %v19025_v37 = vld [vmem:[#allocation166_spill] sm:$0xff] }
 0x332   : > { %v6652_v13 = vmul.f32 %v6472_v20, %v18816_v41  ;;  %v6099_v38 = vadd.f32 %v6089_v51, %v5559_v32  ;;  %v5574_v30 = vadd.f32 %v5535_v60, %v14605_v24  ;;  %v6074_v1 = vsel %vm3927_vm3, %v5754_v45, %v5755_v35  ;;  %v18846_v60 = vld [vmem:[#allocation103_spill] sm:$0xff] }
 0x333   : > { %v6653_v50 = vmul.f32 %v6473_v39, %v18820_v58  ;;  %v5215_v11 = vrot.slane %v14618_v44, 7  ;;  %v5756_v42 = vrot.slane %v14663_v61, 1  ;;  %v6458_v10 = vadd.f32 %v6278_v46, %v18802_v25 }
 0x334   : > { %8957 = vmatmul.mubr.f32.gmra.mrb[10].mxu1 %v6652_v13  ;;  %v6279_v7 = vadd.f32 %v6099_v38, %v14656_v33  ;;  %v6114_v41 = vadd.f32 %v6074_v1, %v5574_v30  ;;  %v18843_v0 = vrot.slane %v18792_v47, 7  ;;  %v18844_v20 = vrot.slane %v18794_v43, 1  ;;  %v18848_v13 = vld [vmem:[#allocation110_spill] sm:$0xff]  ;;  %v18849_v1 = vld [vmem:[#allocation28_spill] sm:$0xff] }
 0x335   : > { %8959 = vmatprep.mubr.f32.mxu1 %v6653_v50  ;;  %v5534_v58 = vsel %vm3386_vm2, %v5214_v59, %v5215_v11  ;;  %v6073_v45 = vsel %vm3927_vm3, %v5755_v35, %v5756_v42  ;;  %v6638_v17 = vmul.f32 %v6458_v10, %v18793_v54  ;;  %v18845_v59 = vld [vmem:[#allocation35_spill] sm:$0xff]  ;;  %v5757_v43 = vrot.slane %v14704_v3, 1 }
 0x336   : > { %v5549_v62 = vsel %vm3386_vm2, %v5199_v40, %v18843_v0  ;;  %v6088_v25 = vsel %vm3927_vm3, %v5740_v34, %v18844_v20  ;;  %v6459_v32 = vadd.f32 %v6279_v7, %v18806_v22  ;;  %v6294_v40 = vadd.f32 %v6114_v41, %v14529_v6  ;;  %v18847_v22 = vld [vmem:[#allocation36_spill] sm:$0xff] }
 0x337   : > { %v5560_v53 = vadd.f32 %v5549_v62, %v18792_v47  ;;  %v5575_v51 = vadd.f32 %v5534_v58, %v14618_v44  ;;  %v14806_v63 = vmul.f32 %v18846_v60, %v18845_v59  ;;  %v5216_v47 = vrot.slane %v14663_v61, 7  ;;  %8936 = vmatmul.mubr.f32.gmra.mrb[182].mxu0 %v6638_v17  ;;  %v18851_v58 = vld [vmem:[#allocation107_spill] sm:$0xff]  ;;  %v18852_v17 = vld [vmem:[#allocation10_spill] sm:$0xff] }
 0x338   : > { %v6639_v34 = vmul.f32 %v6459_v32, %v18776_v9  ;;  %v6474_v54 = vadd.f32 %v6294_v40, %v14762_v29  ;;  %v14814_v6 = vmul.f32 %v18848_v13, %v18847_v22  ;;  %v6072_v30 = vsel %vm3927_vm3, %v5756_v42, %v5757_v43 }
 0x339   : > { %v6100_v39 = vadd.f32 %v6088_v25, %v5560_v53  ;;  %v6115_v35 = vadd.f32 %v6073_v45, %v5575_v51  ;;  %v5533_v38 = vsel %vm3386_vm2, %v5215_v11, %v5216_v47  ;;  %v5217_v50 = vrot.slane %v14704_v3, 7  ;;  %v18850_v11 = vld [vmem:[#allocation37_spill] sm:$0xff]  ;;  %v18853_v51 = vld [vmem:[#allocation38_spill] sm:$0xff] }
 0x33a   : > { %8938 = vmatprep.mubr.f32.mxu0 %v6639_v34  ;;  %v6654_v9 = vmul.f32 %v6474_v54, %v18849_v1  ;;  %v5576_v7 = vadd.f32 %v5533_v38, %v14663_v61  ;;  %v5758_v41 = vrot.slane %v14725_v28, 1  ;;  %v14831_v45 = vmul.f32 %v18851_v58, %v18850_v11  ;;  %v18855_v38 = vld [vmem:[#allocation40_spill] sm:$0xff] }
 0x33b   : > { %v6280_v46 = vadd.f32 %v6100_v39, %v14649_v57  ;;  %v6295_v10 = vadd.f32 %v6115_v35, %v14543_v4  ;;  %v5532_v62 = vsel %vm3386_vm2, %v5216_v47, %v5217_v50  ;;  %v5218_v42 = vrot.slane %v14725_v28, 7  ;;  %v18854_v39 = vld [vmem:[#allocation115_spill] sm:$0xff]  ;;  %v19023_v57 = vld [vmem:[#allocation292_spill] sm:$0xff] }
 0x33c   : > { %8960 = vmatmul.mubr.f32.gmra.mrb[12].mxu1 %v6654_v9  ;;  %v6116_v20 = vadd.f32 %v6072_v30, %v5576_v7  ;;  %v5577_v4 = vadd.f32 %v5532_v62, %v14704_v3  ;;  %v6071_v25 = vsel %vm3927_vm3, %v5757_v43, %v5758_v41  ;;  %v5759_v40 = vrot.slane %v14762_v29, 1  ;;  %v18856_v30 = vld [vmem:[#allocation111_spill] sm:$0xff]  ;;  %v18858_v62 = vld [vmem:[#allocation121_spill] sm:$0xff] }
 0x33d   : > { %v6460_v0 = vadd.f32 %v6280_v46, %v18810_v23  ;;  %v6475_v53 = vadd.f32 %v6295_v10, %v14775_v18  ;;  %v5531_v32 = vsel %vm3386_vm2, %v5217_v50, %v5218_v42  ;;  %v14844_v60 = vmul.f32 %v18854_v39, %v18853_v51 }
 0x33e   : > { %v6296_v34 = vadd.f32 %v6116_v20, %v14562_v14  ;;  %v6117_v54 = vadd.f32 %v6071_v25, %v5577_v4  ;;  %v5578_v35 = vadd.f32 %v5531_v32, %v14725_v28  ;;  %v6070_v43 = vsel %vm3927_vm3, %v5758_v41, %v5759_v40 }
 0x33f   : > { %v6640_v23 = vmul.f32 %v6460_v0, %v18852_v17  ;;  %v6655_v47 = vmul.f32 %v6475_v53, %v18826_v26  ;;  %v5219_v13 = vrot.slane %v14762_v29, 7  ;;  %v5760_v46 = vrot.slane %v14775_v18, 1  ;;  %v18857_v0 = vld [vmem:[#allocation42_spill] sm:$0xff] }
 0x340   : > { %v14855_v50 = vmul.f32 %v18856_v30, %v18855_v38  ;;  %v6476_v26 = vadd.f32 %v6296_v34, %v14806_v63  ;;  %v6297_v14 = vadd.f32 %v6117_v54, %v14573_v27  ;;  %v6118_v1 = vadd.f32 %v6070_v43, %v5578_v35  ;;  %v18859_v53 = vld [vmem:[#allocation30_spill] sm:$0xff] }
 0x341   : > { %8939 = vmatmul.mubr.f32.gmra.mrb[184].mxu0 %v6640_v23  ;;  %8962 = vmatprep.mubr.f32.mxu1 %v6655_v47  ;;  %v5220_v9 = vrot.slane %v14775_v18, 7  ;;  %v5530_v10 = vsel %vm3386_vm2, %v5218_v42, %v5219_v13  ;;  %v6069_v7 = vsel %vm3927_vm3, %v5759_v40, %v5760_v46  ;;  %v5761_v41 = vrot.slane %v14806_v63, 1  ;;  %v18860_v35 = vld [vmem:[#allocation46_spill] sm:$0xff] }
 0x342   : > { %v14867_v58 = vmul.f32 %v18858_v62, %v18857_v0  ;;  %v6656_v20 = vmul.f32 %v6476_v26, %v18859_v53  ;;  %v6477_v4 = vadd.f32 %v6297_v14, %v14814_v6  ;;  %v6298_v27 = vadd.f32 %v6118_v1, %v14594_v48  ;;  %v18861_v43 = vld [vmem:[#allocation114_spill] sm:$0xff] }
 0x343   : > { %v5579_v25 = vadd.f32 %v5530_v10, %v14762_v29  ;;  %v5529_v42 = vsel %vm3386_vm2, %v5219_v13, %v5220_v9  ;;  %v6068_v17 = vsel %vm3927_vm3, %v5760_v46, %v5761_v41  ;;  %v5221_v23 = vrot.slane %v14806_v63, 7  ;;  %v18862_v10 = vld [vmem:[#allocation47_spill] sm:$0xff] }
 0x344   : > { %v5762_v32 = vrot.slane %v14814_v6, 1  ;;  %8963 = vmatmul.mubr.f32.gmra.mrb[14].mxu1 %v6656_v20  ;;  %v6657_v40 = vmul.f32 %v6477_v4, %v18833_v8  ;;  %v6478_v39 = vadd.f32 %v6298_v27, %v14831_v45  ;;  %v5580_v48 = vadd.f32 %v5529_v42, %v14775_v18  ;;  %v18864_v42 = vld [vmem:[#allocation52_spill] sm:$0xff] }
 0x345   : > { %v6119_v47 = vadd.f32 %v6069_v7, %v5579_v25  ;;  %v5528_v34 = vsel %vm3386_vm2, %v5220_v9, %v5221_v23  ;;  %v14888_v13 = vmul.f32 %v18861_v43, %v18860_v35  ;;  %v5222_v46 = vrot.slane %v14814_v6, 7  ;;  %v18863_v7 = vld [vmem:[#allocation126_spill] sm:$0xff] }
 0x346   : > { %v6067_v54 = vsel %vm3927_vm3, %v5761_v41, %v5762_v32  ;;  %8965 = vmatprep.mubr.f32.mxu1 %v6657_v40  ;;  %v6658_v8 = vmul.f32 %v6478_v39, %v18836_v16  ;;  %v6120_v26 = vadd.f32 %v6068_v17, %v5580_v48  ;;  %v5581_v14 = vadd.f32 %v5528_v34, %v14806_v63  ;;  %v18865_v17 = vld [vmem:[#allocation119_spill] sm:$0xff] }
 0x347   : > { %v6299_v30 = vadd.f32 %v6119_v47, %v14605_v24  ;;  %v5527_v1 = vsel %vm3386_vm2, %v5221_v23, %v5222_v46  ;;  %v5763_v9 = vrot.slane %v14831_v45, 1  ;;  %v14899_v41 = vmul.f32 %v18863_v7, %v18862_v10 }
 0x348   : > { %v5223_v62 = vrot.slane %v14831_v45, 7  ;;  %8966 = vmatmul.mubr.f32.gmra.mrb[16].mxu1 %v6658_v8  ;;  %v6300_v16 = vadd.f32 %v6120_v26, %v14618_v44  ;;  %v6121_v24 = vadd.f32 %v6067_v54, %v5581_v14  ;;  %v5582_v20 = vadd.f32 %v5527_v1, %v14814_v6  ;;  %v18866_v8 = vld [vmem:[#allocation54_spill] sm:$0xff] }
 0x349   : > { %v6479_v53 = vadd.f32 %v6299_v30, %v14844_v60  ;;  %v6066_v4 = vsel %vm3927_vm3, %v5762_v32, %v5763_v9  ;;  %v5764_v25 = vrot.slane %v14844_v60, 1  ;;  %v14912_v23 = vmul.f32 %v18865_v17, %v18864_v42  ;;  %v18867_v30 = vld [vmem:[#allocation130_spill] sm:$0xff] }
 0x34a   : > { %v5526_v27 = vsel %vm3386_vm2, %v5222_v46, %v5223_v62  ;;  %v6480_v39 = vadd.f32 %v6300_v16, %v14855_v50  ;;  %v6301_v44 = vadd.f32 %v6121_v24, %v14663_v61  ;;  %v6122_v47 = vadd.f32 %v6066_v4, %v5582_v20  ;;  %v18869_v20 = vld [vmem:[#allocation127_spill] sm:$0xff] }
 0x34b   : > { %v6659_v40 = vmul.f32 %v6479_v53, %v18839_v49  ;;  %v5583_v48 = vadd.f32 %v5526_v27, %v14831_v45  ;;  %v6065_v32 = vsel %vm3927_vm3, %v5763_v9, %v5764_v25  ;;  %v5224_v34 = vrot.slane %v14844_v60, 7 }
 0x34c   : > { %v5765_v54 = vrot.slane %v14855_v50, 1  ;;  %v6660_v43 = vmul.f32 %v6480_v39, %v18841_v2  ;;  %v6481_v46 = vadd.f32 %v6301_v44, %v14867_v58  ;;  %v6302_v49 = vadd.f32 %v6122_v47, %v14704_v3  ;;  %v18870_v47 = vld [vmem:[#allocation61_spill] sm:$0xff] }
 0x34d   : > { %8968 = vmatprep.mubr.f32.mxu1 %v6659_v40  ;;  %v14927_v61 = vmul.f32 %v18867_v30, %v18866_v8  ;;  %v6123_v26 = vadd.f32 %v6065_v32, %v5583_v48  ;;  %v5525_v14 = vsel %vm3386_vm2, %v5223_v62, %v5224_v34  ;;  %v5225_v9 = vrot.slane %v14855_v50, 7  ;;  %v18868_v62 = vld [vmem:[#allocation59_spill] sm:$0xff]  ;;  %v18871_v48 = vld [vmem:[#allocation134_spill] sm:$0xff] }
 0x34e   : > { %v6064_v1 = vsel %vm3927_vm3, %v5764_v25, %v5765_v54  ;;  %8969 = vmatmul.mubr.f32.gmra.mrb[18].mxu1 %v6660_v43  ;;  %v6661_v2 = vmul.f32 %v6481_v46, %v18845_v59  ;;  %v6482_v7 = vadd.f32 %v6302_v49, %v14888_v13  ;;  %v5584_v3 = vadd.f32 %v5525_v14, %v14844_v60  ;;  %v18873_v14 = vld [vmem:[#allocation131_spill] sm:$0xff] }
 0x34f   : > { %v5766_v53 = vrot.slane %v14867_v58, 1  ;;  %v6303_v16 = vadd.f32 %v6123_v26, %v14725_v28  ;;  %v5524_v24 = vsel %vm3386_vm2, %v5224_v34, %v5225_v9  ;;  %v14943_v4 = vmul.f32 %v18869_v20, %v18868_v62  ;;  %v18872_v26 = vld [vmem:[#allocation63_spill] sm:$0xff] }
 0x350   : > { %v5226_v27 = vrot.slane %v14867_v58, 7  ;;  %8971 = vmatprep.mubr.f32.mxu1 %v6661_v2  ;;  %v6662_v59 = vmul.f32 %v6482_v7, %v18847_v22  ;;  %v6124_v25 = vadd.f32 %v6064_v1, %v5584_v3  ;;  %v5585_v17 = vadd.f32 %v5524_v24, %v14855_v50 }
 0x351   : > { %v6063_v40 = vsel %vm3927_vm3, %v5765_v54, %v5766_v53  ;;  %v6483_v28 = vadd.f32 %v6303_v16, %v14899_v41  ;;  %v5767_v44 = vrot.slane %v14888_v13, 1  ;;  %v14956_v32 = vmul.f32 %v18871_v48, %v18870_v47 }
 0x352   : > { %v5523_v39 = vsel %vm3386_vm2, %v5225_v9, %v5226_v27  ;;  %8972 = vmatmul.mubr.f32.gmra.mrb[20].mxu1 %v6662_v59  ;;  %v6304_v22 = vadd.f32 %v6124_v25, %v14762_v29  ;;  %v6125_v34 = vadd.f32 %v6063_v40, %v5585_v17  ;;  %v5227_v46 = vrot.slane %v14888_v13, 7  ;;  %v18874_v59 = vld [vmem:[#allocation64_spill] sm:$0xff]  ;;  %v18875_v25 = vld [vmem:[#allocation139_spill] sm:$0xff] }
 0x353   : > { %v5586_v43 = vadd.f32 %v5523_v39, %v14867_v58  ;;  %v6663_v54 = vmul.f32 %v6483_v28, %v18850_v11  ;;  %v6062_v49 = vsel %vm3927_vm3, %v5766_v53, %v5767_v44  ;;  %v5768_v30 = vrot.slane %v14899_v41, 1 }
 0x354   : > { %v14967_v1 = vmul.f32 %v18873_v14, %v18872_v26  ;;  %v6484_v9 = vadd.f32 %v6304_v22, %v14912_v23  ;;  %v6305_v29 = vadd.f32 %v6125_v34, %v14775_v18  ;;  %v5522_v7 = vsel %vm3386_vm2, %v5226_v27, %v5227_v46 }
 0x355   : > { %v6126_v2 = vadd.f32 %v6062_v49, %v5586_v43  ;;  %8974 = vmatprep.mubr.f32.mxu1 %v6663_v54  ;;  %v5587_v11 = vadd.f32 %v5522_v7, %v14888_v13  ;;  %v6061_v3 = vsel %vm3927_vm3, %v5767_v44, %v5768_v30  ;;  %v5228_v53 = vrot.slane %v14899_v41, 7  ;;  %v18876_v43 = vld [vmem:[#allocation66_spill] sm:$0xff]  ;;  %v18878_v7 = vld [vmem:[#allocation67_spill] sm:$0xff] }
 0x356   : > { %v5769_v16 = vrot.slane %v14912_v23, 1  ;;  %v6664_v24 = vmul.f32 %v6484_v9, %v18853_v51  ;;  %v6485_v20 = vadd.f32 %v6305_v29, %v14927_v61  ;;  %v14983_v17 = vmul.f32 %v18875_v25, %v18874_v59 }
 0x357   : > { %v6306_v18 = vadd.f32 %v6126_v2, %v14806_v63  ;;  %v6127_v27 = vadd.f32 %v6061_v3, %v5587_v11  ;;  %v5521_v40 = vsel %vm3386_vm2, %v5227_v46, %v5228_v53  ;;  %v5229_v39 = vrot.slane %v14912_v23, 7  ;;  %v18877_v46 = vld [vmem:[#allocation135_spill] sm:$0xff]  ;;  %v18879_v11 = vld [vmem:[#allocation140_spill] sm:$0xff] }
 0x358   : > { %v6060_v28 = vsel %vm3927_vm3, %v5768_v30, %v5769_v16  ;;  %8975 = vmatmul.mubr.f32.gmra.mrb[22].mxu1 %v6664_v24  ;;  %v6665_v51 = vmul.f32 %v6485_v20, %v18855_v38  ;;  %v5588_v63 = vadd.f32 %v5521_v40, %v14899_v41  ;;  %v5770_v48 = vrot.slane %v14927_v61, 1  ;;  %v18881_v40 = vld [vmem:[#allocation136_spill] sm:$0xff] }
 0x359   : > { %v6486_v44 = vadd.f32 %v6306_v18, %v14943_v4  ;;  %v6307_v22 = vadd.f32 %v6127_v27, %v14814_v6  ;;  %v5520_v34 = vsel %vm3386_vm2, %v5228_v53, %v5229_v39  ;;  %v14999_v54 = vmul.f32 %v18877_v46, %v18876_v43  ;;  %v18880_v27 = vld [vmem:[#allocation69_spill] sm:$0xff] }
 0x35a   : > { %v5230_v49 = vrot.slane %v14927_v61, 7  ;;  %8977 = vmatprep.mubr.f32.mxu1 %v6665_v51  ;;  %v6128_v30 = vadd.f32 %v6060_v28, %v5588_v63  ;;  %v5589_v14 = vadd.f32 %v5520_v34, %v14912_v23  ;;  %v6059_v9 = vsel %vm3927_vm3, %v5769_v16, %v5770_v48 }
 0x35b   : > { %v6666_v38 = vmul.f32 %v6486_v44, %v18857_v0  ;;  %v6487_v6 = vadd.f32 %v6307_v22, %v14956_v32  ;;  %v5771_v2 = vrot.slane %v14943_v4, 1  ;;  %v15012_v3 = vmul.f32 %v18879_v11, %v18878_v7 }
 0x35c   : > { %v5519_v29 = vsel %vm3386_vm2, %v5229_v39, %v5230_v49  ;;  %v6308_v0 = vadd.f32 %v6128_v30, %v14831_v45  ;;  %v6129_v53 = vadd.f32 %v6059_v9, %v5589_v14  ;;  %v5231_v20 = vrot.slane %v14943_v4, 7  ;;  %v18883_v30 = vld [vmem:[#allocation144_spill] sm:$0xff] }
 0x35d   : > { %8978 = vmatmul.mubr.f32.gmra.mrb[24].mxu1 %v6666_v38  ;;  %v5590_v24 = vadd.f32 %v5519_v29, %v14927_v61  ;;  %v6667_v16 = vmul.f32 %v6487_v6, %v18860_v35  ;;  %v6058_v18 = vsel %vm3927_vm3, %v5770_v48, %v5771_v2  ;;  %v5772_v25 = vrot.slane %v14956_v32, 1  ;;  %v18882_v38 = vld [vmem:[#allocation71_spill] sm:$0xff] }
 0x35e   : > { %v15023_v28 = vmul.f32 %v18881_v40, %v18880_v27  ;;  %v6488_v39 = vadd.f32 %v6308_v0, %v14967_v1  ;;  %v6309_v45 = vadd.f32 %v6129_v53, %v14844_v60  ;;  %v5518_v44 = vsel %vm3386_vm2, %v5230_v49, %v5231_v20 }
 0x35f   : > { %v6130_v51 = vadd.f32 %v6058_v18, %v5590_v24  ;;  %8980 = vmatprep.mubr.f32.mxu1 %v6667_v16  ;;  %v5591_v35 = vadd.f32 %v5518_v44, %v14943_v4  ;;  %v6057_v63 = vsel %vm3927_vm3, %v5771_v2, %v5772_v25  ;;  %v5232_v48 = vrot.slane %v14956_v32, 7  ;;  %v18884_v24 = vld [vmem:[#allocation74_spill] sm:$0xff]  ;;  %v18886_v44 = vld [vmem:[#allocation75_spill] sm:$0xff] }
 0x360   : > { %v5773_v22 = vrot.slane %v14967_v1, 1  ;;  %v6668_v34 = vmul.f32 %v6488_v39, %v18862_v10  ;;  %v6489_v46 = vadd.f32 %v6309_v45, %v14983_v17  ;;  %v15039_v14 = vmul.f32 %v18883_v30, %v18882_v38 }
 0x361   : > { %v6310_v60 = vadd.f32 %v6130_v51, %v14855_v50  ;;  %v6131_v49 = vadd.f32 %v6057_v63, %v5591_v35  ;;  %v5517_v9 = vsel %vm3386_vm2, %v5231_v20, %v5232_v48  ;;  %v5233_v29 = vrot.slane %v14967_v1, 7  ;;  %v18885_v20 = vld [vmem:[#allocation143_spill] sm:$0xff]  ;;  %v18887_v35 = vld [vmem:[#allocation146_spill] sm:$0xff] }
 0x362   : > { %v6056_v6 = vsel %vm3927_vm3, %v5772_v25, %v5773_v22  ;;  %8981 = vmatmul.mubr.f32.gmra.mrb[26].mxu1 %v6668_v34  ;;  %v6669_v10 = vmul.f32 %v6489_v46, %v18864_v42  ;;  %v5592_v50 = vadd.f32 %v5517_v9, %v14956_v32  ;;  %v5774_v11 = vrot.slane %v14983_v17, 1  ;;  %v18889_v9 = vld [vmem:[#allocation145_spill] sm:$0xff] }
 0x363   : > { %v6490_v2 = vadd.f32 %v6310_v60, %v14999_v54  ;;  %v6311_v0 = vadd.f32 %v6131_v49, %v14867_v58  ;;  %v5516_v53 = vsel %vm3386_vm2, %v5232_v48, %v5233_v29  ;;  %v15055_v16 = vmul.f32 %v18885_v20, %v18884_v24  ;;  %v18888_v49 = vld [vmem:[#allocation79_spill] sm:$0xff] }
 0x364   : > { %v5234_v18 = vrot.slane %v14983_v17, 7  ;;  %8983 = vmatprep.mubr.f32.mxu1 %v6669_v10  ;;  %v6132_v25 = vadd.f32 %v6056_v6, %v5592_v50  ;;  %v5593_v40 = vadd.f32 %v5516_v53, %v14967_v1  ;;  %v6055_v39 = vsel %vm3927_vm3, %v5773_v22, %v5774_v11 }
 0x365   : > { %v6670_v42 = vmul.f32 %v6490_v2, %v18866_v8  ;;  %v6491_v58 = vadd.f32 %v6311_v0, %v15012_v3  ;;  %v5775_v51 = vrot.slane %v14999_v54, 1  ;;  %v15068_v63 = vmul.f32 %v18887_v35, %v18886_v44 }
 0x366   : > { %v5515_v45 = vsel %vm3386_vm2, %v5233_v29, %v5234_v18  ;;  %v6312_v8 = vadd.f32 %v6132_v25, %v14888_v13  ;;  %v6133_v48 = vadd.f32 %v6055_v39, %v5593_v40  ;;  %v5235_v46 = vrot.slane %v14999_v54, 7  ;;  %v18891_v25 = vld [vmem:[#allocation149_spill] sm:$0xff] }
 0x367   : > { %8984 = vmatmul.mubr.f32.gmra.mrb[28].mxu1 %v6670_v42  ;;  %v5594_v34 = vadd.f32 %v5515_v45, %v14983_v17  ;;  %v6671_v22 = vmul.f32 %v6491_v58, %v18868_v62  ;;  %v6054_v60 = vsel %vm3927_vm3, %v5774_v11, %v5775_v51  ;;  %v5776_v30 = vrot.slane %v15012_v3, 1  ;;  %v18890_v42 = vld [vmem:[#allocation80_spill] sm:$0xff] }
 0x368   : > { %v15079_v6 = vmul.f32 %v18889_v9, %v18888_v49  ;;  %v6492_v29 = vadd.f32 %v6312_v8, %v15023_v28  ;;  %v6313_v13 = vadd.f32 %v6133_v48, %v14899_v41  ;;  %v5514_v2 = vsel %vm3386_vm2, %v5234_v18, %v5235_v46 }
 0x369   : > { %v6134_v10 = vadd.f32 %v6054_v60, %v5594_v34  ;;  %8986 = vmatprep.mubr.f32.mxu1 %v6671_v22  ;;  %v5595_v62 = vadd.f32 %v5514_v2, %v14999_v54  ;;  %v6053_v50 = vsel %vm3927_vm3, %v5775_v51, %v5776_v30  ;;  %v5236_v11 = vrot.slane %v15012_v3, 7  ;;  %v18892_v34 = vld [vmem:[#allocation82_spill] sm:$0xff]  ;;  %v18894_v2 = vld [vmem:[#allocation84_spill] sm:$0xff] }
 0x36a   : > { %v5777_v0 = vrot.slane %v15023_v28, 1  ;;  %v6672_v53 = vmul.f32 %v6492_v29, %v18870_v47  ;;  %v6493_v20 = vadd.f32 %v6313_v13, %v15039_v14  ;;  %v15095_v40 = vmul.f32 %v18891_v25, %v18890_v42 }
 0x36b   : > { %v6314_v41 = vadd.f32 %v6134_v10, %v14912_v23  ;;  %v6135_v18 = vadd.f32 %v6053_v50, %v5595_v62  ;;  %v5513_v39 = vsel %vm3386_vm2, %v5235_v46, %v5236_v11  ;;  %v5237_v45 = vrot.slane %v15023_v28, 7  ;;  %v18893_v46 = vld [vmem:[#allocation147_spill] sm:$0xff]  ;;  %v18895_v62 = vld [vmem:[#allocation152_spill] sm:$0xff] }
 0x36c   : > { %v6052_v58 = vsel %vm3927_vm3, %v5776_v30, %v5777_v0  ;;  %8987 = vmatmul.mubr.f32.gmra.mrb[30].mxu1 %v6672_v53  ;;  %v6673_v47 = vmul.f32 %v6493_v20, %v18872_v26  ;;  %v5596_v23 = vadd.f32 %v5513_v39, %v15012_v3  ;;  %v5778_v35 = vrot.slane %v15039_v14, 1  ;;  %v18897_v39 = vld [vmem:[#allocation150_spill] sm:$0xff] }
 0x36d   : > { %v6494_v51 = vadd.f32 %v6314_v41, %v15055_v16  ;;  %v6315_v8 = vadd.f32 %v6135_v18, %v14927_v61  ;;  %v5512_v48 = vsel %vm3386_vm2, %v5236_v11, %v5237_v45  ;;  %v15111_v22 = vmul.f32 %v18893_v46, %v18892_v34  ;;  %v18896_v18 = vld [vmem:[#allocation86_spill] sm:$0xff] }
 0x36e   : > { %v5238_v60 = vrot.slane %v15039_v14, 7  ;;  %8989 = vmatprep.mubr.f32.mxu1 %v6673_v47  ;;  %v6136_v30 = vadd.f32 %v6052_v58, %v5596_v23  ;;  %v5597_v9 = vadd.f32 %v5512_v48, %v15023_v28  ;;  %v6051_v29 = vsel %vm3927_vm3, %v5777_v0, %v5778_v35 }
 0x36f   : > { %v6674_v26 = vmul.f32 %v6494_v51, %v18874_v59  ;;  %v6495_v61 = vadd.f32 %v6315_v8, %v15068_v63  ;;  %v5779_v10 = vrot.slane %v15055_v16, 1  ;;  %v15124_v50 = vmul.f32 %v18895_v62, %v18894_v2 }
 0x370   : > { %v5511_v13 = vsel %vm3386_vm2, %v5237_v45, %v5238_v60  ;;  %v6316_v59 = vadd.f32 %v6136_v30, %v14943_v4  ;;  %v6137_v11 = vadd.f32 %v6051_v29, %v5597_v9  ;;  %v5239_v20 = vrot.slane %v15055_v16, 7  ;;  %v18899_v30 = vld [vmem:[#allocation154_spill] sm:$0xff] }
 0x371   : > { %8990 = vmatmul.mubr.f32.gmra.mrb[32].mxu1 %v6674_v26  ;;  %v5598_v53 = vadd.f32 %v5511_v13, %v15039_v14  ;;  %v6675_v0 = vmul.f32 %v6495_v61, %v18876_v43  ;;  %v6050_v41 = vsel %vm3927_vm3, %v5778_v35, %v5779_v10  ;;  %v5780_v25 = vrot.slane %v15068_v63, 1  ;;  %v18898_v26 = vld [vmem:[#allocation88_spill] sm:$0xff] }
 0x372   : > { %v15135_v58 = vmul.f32 %v18897_v39, %v18896_v18  ;;  %v6496_v45 = vadd.f32 %v6316_v59, %v15079_v6  ;;  %v6317_v4 = vadd.f32 %v6137_v11, %v14956_v32  ;;  %v5510_v51 = vsel %vm3386_vm2, %v5238_v60, %v5239_v20 }
 0x373   : > { %v6138_v47 = vadd.f32 %v6050_v41, %v5598_v53  ;;  %8992 = vmatprep.mubr.f32.mxu1 %v6675_v0  ;;  %v5599_v43 = vadd.f32 %v5510_v51, %v15055_v16  ;;  %v6049_v23 = vsel %vm3927_vm3, %v5779_v10, %v5780_v25  ;;  %v5240_v35 = vrot.slane %v15068_v63, 7  ;;  %v18900_v53 = vld [vmem:[#allocation91_spill] sm:$0xff]  ;;  %v18902_v51 = vld [vmem:[#allocation92_spill] sm:$0xff] }
 0x374   : > { %v5781_v8 = vrot.slane %v15079_v6, 1  ;;  %v6676_v48 = vmul.f32 %v6496_v45, %v18878_v7  ;;  %v6497_v46 = vadd.f32 %v6317_v4, %v15095_v40  ;;  %v15151_v9 = vmul.f32 %v18899_v30, %v18898_v26 }
 0x375   : > { %v6318_v32 = vadd.f32 %v6138_v47, %v14967_v1  ;;  %v6139_v60 = vadd.f32 %v6049_v23, %v5599_v43  ;;  %v5509_v29 = vsel %vm3386_vm2, %v5239_v20, %v5240_v35  ;;  %v5241_v13 = vrot.slane %v15079_v6, 7  ;;  %v18901_v20 = vld [vmem:[#allocation153_spill] sm:$0xff]  ;;  %v18903_v43 = vld [vmem:[#allocation158_spill] sm:$0xff] }
 0x376   : > { %v6048_v61 = vsel %vm3927_vm3, %v5780_v25, %v5781_v8  ;;  %8993 = vmatmul.mubr.f32.gmra.mrb[34].mxu1 %v6676_v48  ;;  %v6677_v7 = vmul.f32 %v6497_v46, %v18880_v27  ;;  %v5600_v1 = vadd.f32 %v5509_v29, %v15068_v63  ;;  %v5782_v62 = vrot.slane %v15095_v40, 1  ;;  %v18905_v29 = vld [vmem:[#allocation155_spill] sm:$0xff] }
 0x377   : > { %v6498_v10 = vadd.f32 %v6318_v32, %v15111_v22  ;;  %v6319_v59 = vadd.f32 %v6139_v60, %v14983_v17  ;;  %v5508_v11 = vsel %vm3386_vm2, %v5240_v35, %v5241_v13  ;;  %v15167_v0 = vmul.f32 %v18901_v20, %v18900_v53  ;;  %v18904_v60 = vld [vmem:[#allocation94_spill] sm:$0xff] }
 0x378   : > { %v5242_v41 = vrot.slane %v15095_v40, 7  ;;  %8995 = vmatprep.mubr.f32.mxu1 %v6677_v7  ;;  %v6140_v25 = vadd.f32 %v6048_v61, %v5600_v1  ;;  %v5601_v39 = vadd.f32 %v5508_v11, %v15079_v6  ;;  %v6047_v45 = vsel %vm3927_vm3, %v5781_v8, %v5782_v62 }
 0x379   : > { %v6678_v27 = vmul.f32 %v6498_v10, %v18882_v38  ;;  %v6499_v17 = vadd.f32 %v6319_v59, %v15124_v50  ;;  %v5783_v47 = vrot.slane %v15111_v22, 1  ;;  %v15180_v23 = vmul.f32 %v18903_v43, %v18902_v51 }
 0x37a   : > { %v5507_v4 = vsel %vm3386_vm2, %v5241_v13, %v5242_v41  ;;  %v6320_v38 = vadd.f32 %v6140_v25, %v14999_v54  ;;  %v6141_v35 = vadd.f32 %v6047_v45, %v5601_v39  ;;  %v5243_v46 = vrot.slane %v15111_v22, 7  ;;  %v18907_v25 = vld [vmem:[#allocation160_spill] sm:$0xff] }
 0x37b   : > { %8996 = vmatmul.mubr.f32.gmra.mrb[36].mxu1 %v6678_v27  ;;  %v5602_v48 = vadd.f32 %v5507_v4, %v15095_v40  ;;  %v6679_v8 = vmul.f32 %v6499_v17, %v18884_v24  ;;  %v6046_v32 = vsel %vm3927_vm3, %v5782_v62, %v5783_v47  ;;  %v5784_v30 = vrot.slane %v15124_v50, 1  ;;  %v18906_v27 = vld [vmem:[#allocation96_spill] sm:$0xff] }
 0x37c   : > { %v15191_v61 = vmul.f32 %v18905_v29, %v18904_v60  ;;  %v6500_v13 = vadd.f32 %v6320_v38, %v15135_v58  ;;  %v6321_v54 = vadd.f32 %v6141_v35, %v15012_v3  ;;  %v5506_v10 = vsel %vm3386_vm2, %v5242_v41, %v5243_v46 }
 0x37d   : > { %v6142_v7 = vadd.f32 %v6046_v32, %v5602_v48  ;;  %8998 = vmatprep.mubr.f32.mxu1 %v6679_v8  ;;  %v5603_v24 = vadd.f32 %v5506_v10, %v15111_v22  ;;  %v6045_v1 = vsel %vm3927_vm3, %v5783_v47, %v5784_v30  ;;  %v5244_v62 = vrot.slane %v15124_v50, 7  ;;  %v18908_v48 = vld [vmem:[#allocation99_spill] sm:$0xff]  ;;  %v18910_v10 = vld [vmem:[#allocation101_spill] sm:$0xff] }
 0x37e   : > { %v5785_v59 = vrot.slane %v15135_v58, 1  ;;  %v6680_v11 = vmul.f32 %v6500_v13, %v18886_v44  ;;  %v6501_v20 = vadd.f32 %v6321_v54, %v15151_v9  ;;  %v15207_v39 = vmul.f32 %v18907_v25, %v18906_v27 }
 0x37f   : > { %v6322_v3 = vadd.f32 %v6142_v7, %v15023_v28  ;;  %v6143_v41 = vadd.f32 %v6045_v1, %v5603_v24  ;;  %v5505_v45 = vsel %vm3386_vm2, %v5243_v46, %v5244_v62  ;;  %v5245_v4 = vrot.slane %v15135_v58, 7  ;;  %v18909_v46 = vld [vmem:[#allocation157_spill] sm:$0xff]  ;;  %v18911_v24 = vld [vmem:[#allocation164_spill] sm:$0xff] }
 0x380   : > { %v6044_v17 = vsel %vm3927_vm3, %v5784_v30, %v5785_v59  ;;  %8999 = vmatmul.mubr.f32.gmra.mrb[38].mxu1 %v6680_v11  ;;  %v6681_v44 = vmul.f32 %v6501_v20, %v18888_v49  ;;  %v5604_v28 = vadd.f32 %v5505_v45, %v15124_v50  ;;  %v5786_v43 = vrot.slane %v15151_v9, 1  ;;  %v18913_v45 = vld [vmem:[#allocation159_spill] sm:$0xff] }
 0x381   : > { %v6502_v47 = vadd.f32 %v6322_v3, %v15167_v0  ;;  %v6323_v38 = vadd.f32 %v6143_v41, %v15039_v14  ;;  %v5504_v35 = vsel %vm3386_vm2, %v5244_v62, %v5245_v4  ;;  %v15223_v8 = vmul.f32 %v18909_v46, %v18908_v48  ;;  %v18912_v41 = vld [vmem:[#allocation104_spill] sm:$0xff] }
 0x382   : > { %v5246_v32 = vrot.slane %v15151_v9, 7  ;;  %9001 = vmatprep.mubr.f32.mxu1 %v6681_v44  ;;  %v6144_v30 = vadd.f32 %v6044_v17, %v5604_v28  ;;  %v5605_v29 = vadd.f32 %v5504_v35, %v15135_v58  ;;  %v6043_v13 = vsel %vm3927_vm3, %v5785_v59, %v5786_v43 }
 0x383   : > { %v6682_v49 = vmul.f32 %v6502_v47, %v18890_v42  ;;  %v6503_v14 = vadd.f32 %v6323_v38, %v15180_v23  ;;  %v5787_v7 = vrot.slane %v15167_v0, 1  ;;  %v15236_v1 = vmul.f32 %v18911_v24, %v18910_v10 }
 0x384   : > { %v5503_v54 = vsel %vm3386_vm2, %v5245_v4, %v5246_v32  ;;  %v6324_v42 = vadd.f32 %v6144_v30, %v15055_v16  ;;  %v6145_v62 = vadd.f32 %v6043_v13, %v5605_v29  ;;  %v5247_v20 = vrot.slane %v15167_v0, 7  ;;  %v18915_v30 = vld [vmem:[#allocation170_spill] sm:$0xff] }
 0x385   : > { %9002 = vmatmul.mubr.f32.gmra.mrb[40].mxu1 %v6682_v49  ;;  %v5606_v11 = vadd.f32 %v5503_v54, %v15151_v9  ;;  %v6683_v59 = vmul.f32 %v6503_v14, %v18892_v34  ;;  %v6042_v3 = vsel %vm3927_vm3, %v5786_v43, %v5787_v7  ;;  %v5788_v25 = vrot.slane %v15180_v23, 1  ;;  %v18914_v49 = vld [vmem:[#allocation105_spill] sm:$0xff] }
 0x386   : > { %v15247_v17 = vmul.f32 %v18913_v45, %v18912_v41  ;;  %v6504_v4 = vadd.f32 %v6324_v42, %v15191_v61  ;;  %v6325_v16 = vadd.f32 %v6145_v62, %v15068_v63  ;;  %v5502_v47 = vsel %vm3386_vm2, %v5246_v32, %v5247_v20 }
 0x387   : > { %v6146_v44 = vadd.f32 %v6042_v3, %v5606_v11  ;;  %9004 = vmatprep.mubr.f32.mxu1 %v6683_v59  ;;  %v5607_v34 = vadd.f32 %v5502_v47, %v15167_v0  ;;  %v6041_v28 = vsel %vm3927_vm3, %v5787_v7, %v5788_v25  ;;  %v5248_v43 = vrot.slane %v15180_v23, 7  ;;  %v18916_v11 = vld [vmem:[#allocation108_spill] sm:$0xff]  ;;  %v18918_v47 = vld [vmem:[#allocation109_spill] sm:$0xff] }
 0x388   : > { %v5789_v38 = vrot.slane %v15191_v61, 1  ;;  %v6684_v35 = vmul.f32 %v6504_v4, %v18894_v2  ;;  %v6505_v46 = vadd.f32 %v6325_v16, %v15207_v39  ;;  %v15263_v29 = vmul.f32 %v18915_v30, %v18914_v49 }
 0x389   : > { %v6326_v63 = vadd.f32 %v6146_v44, %v15079_v6  ;;  %v6147_v32 = vadd.f32 %v6041_v28, %v5607_v34  ;;  %v5501_v13 = vsel %vm3386_vm2, %v5247_v20, %v5248_v43  ;;  %v5249_v54 = vrot.slane %v15191_v61, 7  ;;  %v18917_v20 = vld [vmem:[#allocation165_spill] sm:$0xff]  ;;  %v18919_v34 = vld [vmem:[#allocation176_spill] sm:$0xff] }
 0x38a   : > { %v6040_v14 = vsel %vm3927_vm3, %v5788_v25, %v5789_v38  ;;  %9005 = vmatmul.mubr.f32.gmra.mrb[42].mxu1 %v6684_v35  ;;  %v6685_v2 = vmul.f32 %v6505_v46, %v18896_v18  ;;  %v5608_v6 = vadd.f32 %v5501_v13, %v15180_v23  ;;  %v5790_v24 = vrot.slane %v15207_v39, 1  ;;  %v18921_v13 = vld [vmem:[#allocation171_spill] sm:$0xff] }
 0x38b   : > { %v6506_v7 = vadd.f32 %v6326_v63, %v15223_v8  ;;  %v6327_v42 = vadd.f32 %v6147_v32, %v15095_v40  ;;  %v5500_v62 = vsel %vm3386_vm2, %v5248_v43, %v5249_v54  ;;  %v15279_v59 = vmul.f32 %v18917_v20, %v18916_v11  ;;  %v18920_v32 = vld [vmem:[#allocation112_spill] sm:$0xff] }
 0x38c   : > { %v5250_v3 = vrot.slane %v15207_v39, 7  ;;  %9007 = vmatprep.mubr.f32.mxu1 %v6685_v2  ;;  %v6148_v25 = vadd.f32 %v6040_v14, %v5608_v6  ;;  %v5609_v45 = vadd.f32 %v5500_v62, %v15191_v61  ;;  %v6039_v4 = vsel %vm3927_vm3, %v5789_v38, %v5790_v24 }
 0x38d   : > { %v6686_v18 = vmul.f32 %v6506_v7, %v18898_v26  ;;  %v6507_v40 = vadd.f32 %v6327_v42, %v15236_v1  ;;  %v5791_v44 = vrot.slane %v15223_v8, 1  ;;  %v15292_v28 = vmul.f32 %v18919_v34, %v18918_v47 }
 0x38e   : > { %v5499_v16 = vsel %vm3386_vm2, %v5249_v54, %v5250_v3  ;;  %v6328_v26 = vadd.f32 %v6148_v25, %v15111_v22  ;;  %v6149_v43 = vadd.f32 %v6039_v4, %v5609_v45  ;;  %v5251_v46 = vrot.slane %v15223_v8, 7  ;;  %v18923_v25 = vld [vmem:[#allocation183_spill] sm:$0xff] }
 0x38f   : > { %9008 = vmatmul.mubr.f32.gmra.mrb[44].mxu1 %v6686_v18  ;;  %v5610_v35 = vadd.f32 %v5499_v16, %v15207_v39  ;;  %v6687_v38 = vmul.f32 %v6507_v40, %v18900_v53  ;;  %v6038_v63 = vsel %vm3927_vm3, %v5790_v24, %v5791_v44  ;;  %v5792_v30 = vrot.slane %v15236_v1, 1  ;;  %v18922_v18 = vld [vmem:[#allocation113_spill] sm:$0xff] }
 0x390   : > { %v15303_v14 = vmul.f32 %v18921_v13, %v18920_v32  ;;  %v6508_v54 = vadd.f32 %v6328_v26, %v15247_v17  ;;  %v6329_v22 = vadd.f32 %v6149_v43, %v15124_v50  ;;  %v5498_v7 = vsel %vm3386_vm2, %v5250_v3, %v5251_v46 }
 0x391   : > { %v6150_v2 = vadd.f32 %v6038_v63, %v5610_v35  ;;  %9010 = vmatprep.mubr.f32.mxu1 %v6687_v38  ;;  %v5611_v53 = vadd.f32 %v5498_v7, %v15223_v8  ;;  %v6037_v6 = vsel %vm3927_vm3, %v5791_v44, %v5792_v30  ;;  %v5252_v24 = vrot.slane %v15236_v1, 7  ;;  %v18924_v35 = vld [vmem:[#allocation116_spill] sm:$0xff]  ;;  %v18926_v7 = vld [vmem:[#allocation117_spill] sm:$0xff] }
 0x392   : > { %v5793_v42 = vrot.slane %v15247_v17, 1  ;;  %v6688_v62 = vmul.f32 %v6508_v54, %v18902_v51  ;;  %v6509_v20 = vadd.f32 %v6329_v22, %v15263_v29  ;;  %v15319_v45 = vmul.f32 %v18923_v25, %v18922_v18 }
 0x393   : > { %v6330_v50 = vadd.f32 %v6150_v2, %v15135_v58  ;;  %v6151_v3 = vadd.f32 %v6037_v6, %v5611_v53  ;;  %v5497_v4 = vsel %vm3386_vm2, %v5251_v46, %v5252_v24  ;;  %v5253_v16 = vrot.slane %v15247_v17, 7  ;;  %v18925_v46 = vld [vmem:[#allocation177_spill] sm:$0xff]  ;;  %v18927_v53 = vld [vmem:[#allocation148_spill] sm:$0xff] }
 0x394   : > { %v6036_v40 = vsel %vm3927_vm3, %v5792_v30, %v5793_v42  ;;  %9011 = vmatmul.mubr.f32.gmra.mrb[46].mxu1 %v6688_v62  ;;  %v6689_v51 = vmul.f32 %v6509_v20, %v18904_v60  ;;  %v5612_v58 = vadd.f32 %v5497_v4, %v15236_v1  ;;  %v5794_v34 = vrot.slane %v15263_v29, 1  ;;  %v18929_v4 = vld [vmem:[#allocation180_spill] sm:$0xff] }
 0x395   : > { %v6510_v44 = vadd.f32 %v6330_v50, %v15279_v59  ;;  %v6331_v26 = vadd.f32 %v6151_v3, %v15151_v9  ;;  %v5496_v43 = vsel %vm3386_vm2, %v5252_v24, %v5253_v16  ;;  %v15335_v38 = vmul.f32 %v18925_v46, %v18924_v35  ;;  %v18928_v3 = vld [vmem:[#allocation123_spill] sm:$0xff] }
 0x396   : > { %v5254_v63 = vrot.slane %v15263_v29, 7  ;;  %9013 = vmatprep.mubr.f32.mxu1 %v6689_v51  ;;  %v6152_v30 = vadd.f32 %v6036_v40, %v5612_v58  ;;  %v5613_v13 = vadd.f32 %v5496_v43, %v15247_v17  ;;  %v6035_v54 = vsel %vm3927_vm3, %v5793_v42, %v5794_v34 }
 0x397   : > { %v6690_v60 = vmul.f32 %v6510_v44, %v18906_v27  ;;  %v6511_v9 = vadd.f32 %v6331_v26, %v15292_v28  ;;  %v5795_v2 = vrot.slane %v15279_v59, 1  ;;  %v15348_v6 = vmul.f32 %v18927_v53, %v18926_v7 }
 0x398   : > { %v5495_v22 = vsel %vm3386_vm2, %v5253_v16, %v5254_v63  ;;  %v6332_v27 = vadd.f32 %v6152_v30, %v15167_v0  ;;  %v6153_v24 = vadd.f32 %v6035_v54, %v5613_v13  ;;  %v5255_v20 = vrot.slane %v15279_v59, 7  ;;  %v18931_v30 = vld [vmem:[#allocation151_spill] sm:$0xff] }
 0x399   : > { %9014 = vmatmul.mubr.f32.gmra.mrb[48].mxu1 %v6690_v60  ;;  %v5614_v62 = vadd.f32 %v5495_v22, %v15263_v29  ;;  %v6691_v42 = vmul.f32 %v6511_v9, %v18908_v48  ;;  %v6034_v50 = vsel %vm3927_vm3, %v5794_v34, %v5795_v2  ;;  %v5796_v25 = vrot.slane %v15292_v28, 1  ;;  %v18930_v60 = vld [vmem:[#allocation125_spill] sm:$0xff] }
 0x39a   : > { %v15359_v40 = vmul.f32 %v18929_v4, %v18928_v3  ;;  %v6512_v16 = vadd.f32 %v6332_v27, %v15303_v14  ;;  %v6333_v0 = vadd.f32 %v6153_v24, %v15180_v23  ;;  %v5494_v44 = vsel %vm3386_vm2, %v5254_v63, %v5255_v20 }
 0x39b   : > { %v6154_v51 = vadd.f32 %v6034_v50, %v5614_v62  ;;  %9016 = vmatprep.mubr.f32.mxu1 %v6691_v42  ;;  %v5615_v48 = vadd.f32 %v5494_v44, %v15279_v59  ;;  %v6033_v58 = vsel %vm3927_vm3, %v5795_v2, %v5796_v25  ;;  %v5256_v34 = vrot.slane %v15292_v28, 7  ;;  %v18932_v62 = vld [vmem:[#allocation128_spill] sm:$0xff]  ;;  %v18934_v44 = vld [vmem:[#allocation129_spill] sm:$0xff] }
 0x39c   : > { %v5797_v26 = vrot.slane %v15303_v14, 1  ;;  %v6692_v43 = vmul.f32 %v6512_v16, %v18910_v10  ;;  %v6513_v46 = vadd.f32 %v6333_v0, %v15319_v45  ;;  %v15375_v13 = vmul.f32 %v18931_v30, %v18930_v60 }
 0x39d   : > { %v6334_v23 = vadd.f32 %v6154_v51, %v15191_v61  ;;  %v6155_v63 = vadd.f32 %v6033_v58, %v5615_v48  ;;  %v5493_v54 = vsel %vm3386_vm2, %v5255_v20, %v5256_v34  ;;  %v5257_v22 = vrot.slane %v15303_v14, 7  ;;  %v18933_v20 = vld [vmem:[#allocation190_spill] sm:$0xff] }
 0x39e   : > { %v6032_v9 = vsel %vm3927_vm3, %v5796_v25, %v5797_v26  ;;  %9017 = vmatmul.mubr.f32.gmra.mrb[50].mxu1 %v6692_v43  ;;  %v6693_v10 = vmul.f32 %v6513_v46, %v18912_v41  ;;  %v5616_v61 = vadd.f32 %v5493_v54, %v15292_v28  ;;  %v5798_v53 = vrot.slane %v15319_v45, 1  ;;  %v18935_v48 = vld [vmem:[#allocation194_spill] sm:$0xff]  ;;  %v18937_v54 = vld [vmem:[#allocation192_spill] sm:$0xff] }
 0x39f   : > { %v6514_v2 = vadd.f32 %v6334_v23, %v15335_v38  ;;  %v6335_v27 = vadd.f32 %v6155_v63, %v15207_v39  ;;  %v5492_v24 = vsel %vm3386_vm2, %v5256_v34, %v5257_v22  ;;  %v15391_v42 = vmul.f32 %v18933_v20, %v18932_v62  ;;  %v18936_v63 = vld [vmem:[#allocation132_spill] sm:$0xff] }
 0x3a0   : > { %v5258_v50 = vrot.slane %v15319_v45, 7  ;;  %9019 = vmatprep.mubr.f32.mxu1 %v6693_v10  ;;  %v6156_v25 = vadd.f32 %v6032_v9, %v5616_v61  ;;  %v5617_v4 = vadd.f32 %v5492_v24, %v15303_v14  ;;  %v6031_v16 = vsel %vm3927_vm3, %v5797_v26, %v5798_v53 }
 0x3a1   : > { %v6694_v41 = vmul.f32 %v6514_v2, %v18914_v49  ;;  %v6515_v39 = vadd.f32 %v6335_v27, %v15348_v6  ;;  %v5799_v51 = vrot.slane %v15335_v38, 1  ;;  %v15404_v58 = vmul.f32 %v18935_v48, %v18934_v44 }
 0x3a2   : > { %v5491_v0 = vsel %vm3386_vm2, %v5257_v22, %v5258_v50  ;;  %v6336_v49 = vadd.f32 %v6156_v25, %v15223_v8  ;;  %v6157_v34 = vadd.f32 %v6031_v16, %v5617_v4  ;;  %v5259_v46 = vrot.slane %v15335_v38, 7  ;;  %v18939_v25 = vld [vmem:[#allocation198_spill] sm:$0xff] }
 0x3a3   : > { %9020 = vmatmul.mubr.f32.gmra.mrb[52].mxu1 %v6694_v41  ;;  %v5618_v43 = vadd.f32 %v5491_v0, %v15319_v45  ;;  %v6695_v26 = vmul.f32 %v6515_v39, %v18916_v11  ;;  %v6030_v23 = vsel %vm3927_vm3, %v5798_v53, %v5799_v51  ;;  %v5800_v30 = vrot.slane %v15348_v6, 1  ;;  %v18938_v41 = vld [vmem:[#allocation133_spill] sm:$0xff] }
 0x3a4   : > { %v15415_v9 = vmul.f32 %v18937_v54, %v18936_v63  ;;  %v6516_v22 = vadd.f32 %v6336_v49, %v15359_v40  ;;  %v6337_v8 = vadd.f32 %v6157_v34, %v15236_v1  ;;  %v5490_v2 = vsel %vm3386_vm2, %v5258_v50, %v5259_v46 }
 0x3a5   : > { %v6158_v10 = vadd.f32 %v6030_v23, %v5618_v43  ;;  %9022 = vmatprep.mubr.f32.mxu1 %v6695_v26  ;;  %v5619_v11 = vadd.f32 %v5490_v2, %v15335_v38  ;;  %v6029_v61 = vsel %vm3927_vm3, %v5799_v51, %v5800_v30  ;;  %v5260_v53 = vrot.slane %v15348_v6, 7  ;;  %v18940_v43 = vld [vmem:[#allocation137_spill] sm:$0xff]  ;;  %v18942_v2 = vld [vmem:[#allocation138_spill] sm:$0xff] }
 0x3a6   : > { %v5801_v27 = vrot.slane %v15359_v40, 1  ;;  %v6696_v24 = vmul.f32 %v6516_v22, %v18918_v47  ;;  %v6517_v20 = vadd.f32 %v6337_v8, %v15375_v13  ;;  %v15431_v4 = vmul.f32 %v18939_v25, %v18938_v41 }
 0x3a7   : > { %v6338_v1 = vadd.f32 %v6158_v10, %v15247_v17  ;;  %v6159_v50 = vadd.f32 %v6029_v61, %v5619_v11  ;;  %v5489_v16 = vsel %vm3386_vm2, %v5259_v46, %v5260_v53  ;;  %v5261_v0 = vrot.slane %v15359_v40, 7  ;;  %v18941_v46 = vld [vmem:[#allocation195_spill] sm:$0xff]  ;;  %v18943_v11 = vld [vmem:[#allocation204_spill] sm:$0xff] }
 0x3a8   : > { %v6028_v39 = vsel %vm3927_vm3, %v5800_v30, %v5801_v27  ;;  %9023 = vmatmul.mubr.f32.gmra.mrb[54].mxu1 %v6696_v24  ;;  %v6697_v47 = vmul.f32 %v6517_v20, %v18920_v32  ;;  %v5620_v17 = vadd.f32 %v5489_v16, %v15348_v6  ;;  %v5802_v48 = vrot.slane %v15375_v13, 1  ;;  %v18945_v16 = vld [vmem:[#allocation199_spill] sm:$0xff] }
 0x3a9   : > { %v6518_v51 = vadd.f32 %v6338_v1, %v15391_v42  ;;  %v6339_v49 = vadd.f32 %v6159_v50, %v15263_v29  ;;  %v5488_v34 = vsel %vm3386_vm2, %v5260_v53, %v5261_v0  ;;  %v15447_v26 = vmul.f32 %v18941_v46, %v18940_v43  ;;  %v18944_v50 = vld [vmem:[#allocation141_spill] sm:$0xff] }
 0x3aa   : > { %v5262_v23 = vrot.slane %v15375_v13, 7  ;;  %9025 = vmatprep.mubr.f32.mxu1 %v6697_v47  ;;  %v6160_v30 = vadd.f32 %v6028_v39, %v5620_v17  ;;  %v5621_v54 = vadd.f32 %v5488_v34, %v15359_v40  ;;  %v6027_v22 = vsel %vm3927_vm3, %v5801_v27, %v5802_v48 }
 0x3ab   : > { %v6698_v32 = vmul.f32 %v6518_v51, %v18922_v18  ;;  %v6519_v29 = vadd.f32 %v6339_v49, %v15404_v58  ;;  %v5803_v10 = vrot.slane %v15391_v42, 1  ;;  %v15460_v61 = vmul.f32 %v18943_v11, %v18942_v2 }
 0x3ac   : > { %v5487_v8 = vsel %vm3386_vm2, %v5261_v0, %v5262_v23  ;;  %v6340_v18 = vadd.f32 %v6160_v30, %v15279_v59  ;;  %v6161_v53 = vadd.f32 %v6027_v22, %v5621_v54  ;;  %v5263_v20 = vrot.slane %v15391_v42, 7  ;;  %v18947_v30 = vld [vmem:[#allocation209_spill] sm:$0xff] }
 0x3ad   : > { %9026 = vmatmul.mubr.f32.gmra.mrb[56].mxu1 %v6698_v32  ;;  %v5622_v24 = vadd.f32 %v5487_v8, %v15375_v13  ;;  %v6699_v27 = vmul.f32 %v6519_v29, %v18924_v35  ;;  %v6026_v1 = vsel %vm3927_vm3, %v5802_v48, %v5803_v10  ;;  %v5804_v25 = vrot.slane %v15404_v58, 1  ;;  %v18946_v32 = vld [vmem:[#allocation142_spill] sm:$0xff] }
 0x3ae   : > { %v15471_v39 = vmul.f32 %v18945_v16, %v18944_v50  ;;  %v6520_v0 = vadd.f32 %v6340_v18, %v15415_v9  ;;  %v6341_v59 = vadd.f32 %v6161_v53, %v15292_v28  ;;  %v5486_v51 = vsel %vm3386_vm2, %v5262_v23, %v5263_v20 }
 0x3af   : > { %v6162_v47 = vadd.f32 %v6026_v1, %v5622_v24  ;;  %9028 = vmatprep.mubr.f32.mxu1 %v6699_v27  ;;  %v5623_v35 = vadd.f32 %v5486_v51, %v15391_v42  ;;  %v6025_v17 = vsel %vm3927_vm3, %v5803_v10, %v5804_v25  ;;  %v5264_v48 = vrot.slane %v15404_v58, 7  ;;  %v18948_v24 = vld [vmem:[#allocation118_spill] sm:$0xff]  ;;  %v18950_v51 = vld [vmem:[#allocation120_spill] sm:$0xff] }
 0x3b0   : > { %v5805_v49 = vrot.slane %v15415_v9, 1  ;;  %v6700_v34 = vmul.f32 %v6520_v0, %v18926_v7  ;;  %v6521_v46 = vadd.f32 %v6341_v59, %v15431_v4  ;;  %v15487_v54 = vmul.f32 %v18947_v30, %v18946_v32 }
 0x3b1   : > { %v6342_v28 = vadd.f32 %v6162_v47, %v15303_v14  ;;  %v6163_v23 = vadd.f32 %v6025_v17, %v5623_v35  ;;  %v5485_v22 = vsel %vm3386_vm2, %v5263_v20, %v5264_v48  ;;  %v5265_v8 = vrot.slane %v15415_v9, 7  ;;  %v18949_v20 = vld [vmem:[#allocation205_spill] sm:$0xff]  ;;  %v18951_v35 = vld [vmem:[#allocation214_spill] sm:$0xff] }
 0x3b2   : > { %v6024_v29 = vsel %vm3927_vm3, %v5804_v25, %v5805_v49  ;;  %9029 = vmatmul.mubr.f32.gmra.mrb[58].mxu1 %v6700_v34  ;;  %v6701_v7 = vmul.f32 %v6521_v46, %v18928_v3  ;;  %v5624_v14 = vadd.f32 %v5485_v22, %v15404_v58  ;;  %v5806_v11 = vrot.slane %v15431_v4, 1  ;;  %v18953_v22 = vld [vmem:[#allocation210_spill] sm:$0xff] }
 0x3b3   : > { %v6522_v10 = vadd.f32 %v6342_v28, %v15447_v26  ;;  %v6343_v18 = vadd.f32 %v6163_v23, %v15319_v45  ;;  %v5484_v53 = vsel %vm3386_vm2, %v5264_v48, %v5265_v8  ;;  %v15503_v27 = vmul.f32 %v18949_v20, %v18948_v24  ;;  %v18952_v23 = vld [vmem:[#allocation168_spill] sm:$0xff] }
 0x3b4   : > { %v5266_v1 = vrot.slane %v15431_v4, 7  ;;  %9031 = vmatprep.mubr.f32.mxu1 %v6701_v7  ;;  %v6164_v25 = vadd.f32 %v6024_v29, %v5624_v14  ;;  %v5625_v16 = vadd.f32 %v5484_v53, %v15415_v9  ;;  %v6023_v0 = vsel %vm3927_vm3, %v5805_v49, %v5806_v11 }
 0x3b5   : > { %v6702_v3 = vmul.f32 %v6522_v10, %v18930_v60  ;;  %v6523_v45 = vadd.f32 %v6343_v18, %v15460_v61  ;;  %v5807_v47 = vrot.slane %v15447_v26, 1  ;;  %v15516_v17 = vmul.f32 %v18951_v35, %v18950_v51 }
 0x3b6   : > { %v5483_v59 = vsel %vm3386_vm2, %v5265_v8, %v5266_v1  ;;  %v6344_v60 = vadd.f32 %v6164_v25, %v15335_v38  ;;  %v6165_v48 = vadd.f32 %v6023_v0, %v5625_v16  ;;  %v5267_v46 = vrot.slane %v15447_v26, 7  ;;  %v18955_v25 = vld [vmem:[#allocation220_spill] sm:$0xff] }
 0x3b7   : > { %9032 = vmatmul.mubr.f32.gmra.mrb[60].mxu1 %v6702_v3  ;;  %v5626_v34 = vadd.f32 %v5483_v59, %v15431_v4  ;;  %v6703_v49 = vmul.f32 %v6523_v45, %v18932_v62  ;;  %v6022_v28 = vsel %vm3927_vm3, %v5806_v11, %v5807_v47  ;;  %v5808_v30 = vrot.slane %v15460_v61, 1  ;;  %v18954_v3 = vld [vmem:[#allocation169_spill] sm:$0xff] }
 0x3b8   : > { %v15527_v29 = vmul.f32 %v18953_v22, %v18952_v23  ;;  %v6524_v8 = vadd.f32 %v6344_v60, %v15471_v39  ;;  %v6345_v38 = vadd.f32 %v6165_v48, %v15348_v6  ;;  %v5482_v10 = vsel %vm3386_vm2, %v5266_v1, %v5267_v46 }
 0x3b9   : > { %v6166_v7 = vadd.f32 %v6022_v28, %v5626_v34  ;;  %9034 = vmatprep.mubr.f32.mxu1 %v6703_v49  ;;  %v5627_v62 = vadd.f32 %v5482_v10, %v15447_v26  ;;  %v6021_v14 = vsel %vm3927_vm3, %v5807_v47, %v5808_v30  ;;  %v5268_v11 = vrot.slane %v15460_v61, 7  ;;  %v18956_v34 = vld [vmem:[#allocation175_spill] sm:$0xff] }
 0x3ba   : > { %v5809_v18 = vrot.slane %v15471_v39, 1  ;;  %v6704_v53 = vmul.f32 %v6524_v8, %v18934_v44  ;;  %v6525_v20 = vadd.f32 %v6345_v38, %v15487_v54  ;;  %v15543_v16 = vmul.f32 %v18955_v25, %v18954_v3  ;;  %v18958_v10 = vld [vmem:[#allocation179_spill] sm:$0xff] }
 0x3bb   : > { %v6346_v6 = vadd.f32 %v6166_v7, %v15359_v40  ;;  %v6167_v1 = vadd.f32 %v6021_v14, %v5627_v62  ;;  %v5481_v0 = vsel %vm3386_vm2, %v5267_v46, %v5268_v11  ;;  %v5269_v59 = vrot.slane %v15471_v39, 7  ;;  %v18957_v46 = vld [vmem:[#allocation212_spill] sm:$0xff]  ;;  %v18959_v62 = vld [vmem:[#allocation223_spill] sm:$0xff] }
 0x3bc   : > { %v6020_v45 = vsel %vm3927_vm3, %v5808_v30, %v5809_v18  ;;  %9035 = vmatmul.mubr.f32.gmra.mrb[62].mxu1 %v6704_v53  ;;  %v6705_v44 = vmul.f32 %v6525_v20, %v18936_v63  ;;  %v5628_v40 = vadd.f32 %v5481_v0, %v15460_v61  ;;  %v5810_v35 = vrot.slane %v15487_v54, 1  ;;  %v18961_v0 = vld [vmem:[#allocation217_spill] sm:$0xff] }
 0x3bd   : > { %v6526_v47 = vadd.f32 %v6346_v6, %v15503_v27  ;;  %v6347_v60 = vadd.f32 %v6167_v1, %v15375_v13  ;;  %v5480_v48 = vsel %vm3386_vm2, %v5268_v11, %v5269_v59  ;;  %v15559_v49 = vmul.f32 %v18957_v46, %v18956_v34  ;;  %v18960_v1 = vld [vmem:[#allocation182_spill] sm:$0xff] }
 0x3be   : > { %v5270_v28 = vrot.slane %v15487_v54, 7  ;;  %9037 = vmatprep.mubr.f32.mxu1 %v6705_v44  ;;  %v6168_v30 = vadd.f32 %v6020_v45, %v5628_v40  ;;  %v5629_v22 = vadd.f32 %v5480_v48, %v15471_v39  ;;  %v6019_v8 = vsel %vm3927_vm3, %v5809_v18, %v5810_v35 }
 0x3bf   : > { %v6706_v63 = vmul.f32 %v6526_v47, %v18938_v41  ;;  %v6527_v13 = vadd.f32 %v6347_v60, %v15516_v17  ;;  %v5811_v7 = vrot.slane %v15503_v27, 1  ;;  %v15572_v14 = vmul.f32 %v18959_v62, %v18958_v10 }
 0x3c0   : > { %v5479_v38 = vsel %vm3386_vm2, %v5269_v59, %v5270_v28  ;;  %v6348_v41 = vadd.f32 %v6168_v30, %v15391_v42  ;;  %v6169_v11 = vadd.f32 %v6019_v8, %v5629_v22  ;;  %v5271_v20 = vrot.slane %v15503_v27, 7  ;;  %v18963_v30 = vld [vmem:[#allocation229_spill] sm:$0xff] }
 0x3c1   : > { %9038 = vmatmul.mubr.f32.gmra.mrb[64].mxu1 %v6706_v63  ;;  %v5630_v53 = vadd.f32 %v5479_v38, %v15487_v54  ;;  %v6707_v18 = vmul.f32 %v6527_v13, %v18940_v43  ;;  %v6018_v6 = vsel %vm3927_vm3, %v5810_v35, %v5811_v7  ;;  %v5812_v25 = vrot.slane %v15516_v17, 1  ;;  %v18962_v63 = vld [vmem:[#allocation184_spill] sm:$0xff] }
 0x3c2   : > { %v15583_v45 = vmul.f32 %v18961_v0, %v18960_v1  ;;  %v6528_v59 = vadd.f32 %v6348_v41, %v15527_v29  ;;  %v6349_v42 = vadd.f32 %v6169_v11, %v15404_v58  ;;  %v5478_v47 = vsel %vm3386_vm2, %v5270_v28, %v5271_v20 }
 0x3c3   : > { %v6170_v44 = vadd.f32 %v6018_v6, %v5630_v53  ;;  %9040 = vmatprep.mubr.f32.mxu1 %v6707_v18  ;;  %v5631_v43 = vadd.f32 %v5478_v47, %v15503_v27  ;;  %v6017_v40 = vsel %vm3927_vm3, %v5811_v7, %v5812_v25  ;;  %v5272_v35 = vrot.slane %v15516_v17, 7  ;;  %v18964_v53 = vld [vmem:[#allocation187_spill] sm:$0xff]  ;;  %v18966_v47 = vld [vmem:[#allocation189_spill] sm:$0xff] }
 0x3c4   : > { %v5813_v60 = vrot.slane %v15527_v29, 1  ;;  %v6708_v48 = vmul.f32 %v6528_v59, %v18942_v2  ;;  %v6529_v46 = vadd.f32 %v6349_v42, %v15543_v16  ;;  %v15599_v22 = vmul.f32 %v18963_v30, %v18962_v63 }
 0x3c5   : > { %v6350_v58 = vadd.f32 %v6170_v44, %v15415_v9  ;;  %v6171_v28 = vadd.f32 %v6017_v40, %v5631_v43  ;;  %v5477_v8 = vsel %vm3386_vm2, %v5271_v20, %v5272_v35  ;;  %v5273_v38 = vrot.slane %v15527_v29, 7  ;;  %v18965_v20 = vld [vmem:[#allocation224_spill] sm:$0xff]  ;;  %v18967_v43 = vld [vmem:[#allocation231_spill] sm:$0xff] }
 0x3c6   : > { %v6016_v13 = vsel %vm3927_vm3, %v5812_v25, %v5813_v60  ;;  %9041 = vmatmul.mubr.f32.gmra.mrb[66].mxu1 %v6708_v48  ;;  %v6709_v2 = vmul.f32 %v6529_v46, %v18944_v50  ;;  %v5632_v9 = vadd.f32 %v5477_v8, %v15516_v17  ;;  %v5814_v62 = vrot.slane %v15543_v16, 1  ;;  %v18969_v8 = vld [vmem:[#allocation230_spill] sm:$0xff] }
 0x3c7   : > { %v6530_v7 = vadd.f32 %v6350_v58, %v15559_v49  ;;  %v6351_v41 = vadd.f32 %v6171_v28, %v15431_v4  ;;  %v5476_v11 = vsel %vm3386_vm2, %v5272_v35, %v5273_v38  ;;  %v15615_v18 = vmul.f32 %v18965_v20, %v18964_v53  ;;  %v18968_v28 = vld [vmem:[#allocation191_spill] sm:$0xff] }
 0x3c8   : > { %v5274_v6 = vrot.slane %v15543_v16, 7  ;;  %9043 = vmatprep.mubr.f32.mxu1 %v6709_v2  ;;  %v6172_v25 = vadd.f32 %v6016_v13, %v5632_v9  ;;  %v5633_v0 = vadd.f32 %v5476_v11, %v15527_v29  ;;  %v6015_v59 = vsel %vm3927_vm3, %v5813_v60, %v5814_v62 }
 0x3c9   : > { %v6710_v50 = vmul.f32 %v6530_v7, %v18946_v32  ;;  %v6531_v4 = vadd.f32 %v6351_v41, %v15572_v14  ;;  %v5815_v44 = vrot.slane %v15559_v49, 1  ;;  %v15628_v40 = vmul.f32 %v18967_v43, %v18966_v47 }
 0x3ca   : > { %v5475_v42 = vsel %vm3386_vm2, %v5273_v38, %v5274_v6  ;;  %v6352_v32 = vadd.f32 %v6172_v25, %v15447_v26  ;;  %v6173_v35 = vadd.f32 %v6015_v59, %v5633_v0  ;;  %v5275_v46 = vrot.slane %v15559_v49, 7  ;;  %v18971_v25 = vld [vmem:[#allocation237_spill] sm:$0xff] }
 0x3cb   : > { %9044 = vmatmul.mubr.f32.gmra.mrb[68].mxu1 %v6710_v50  ;;  %v5634_v48 = vadd.f32 %v5475_v42, %v15543_v16  ;;  %v6711_v60 = vmul.f32 %v6531_v4, %v18948_v24  ;;  %v6014_v58 = vsel %vm3927_vm3, %v5814_v62, %v5815_v44  ;;  %v5816_v30 = vrot.slane %v15572_v14, 1  ;;  %v18970_v50 = vld [vmem:[#allocation193_spill] sm:$0xff] }
 0x3cc   : > { %v15639_v13 = vmul.f32 %v18969_v8, %v18968_v28  ;;  %v6532_v38 = vadd.f32 %v6352_v32, %v15583_v45  ;;  %v6353_v26 = vadd.f32 %v6173_v35, %v15460_v61  ;;  %v5474_v7 = vsel %vm3386_vm2, %v5274_v6, %v5275_v46 }
 0x3cd   : > { %v6174_v2 = vadd.f32 %v6014_v58, %v5634_v48  ;;  %9046 = vmatprep.mubr.f32.mxu1 %v6711_v60  ;;  %v5635_v24 = vadd.f32 %v5474_v7, %v15559_v49  ;;  %v6013_v9 = vsel %vm3927_vm3, %v5815_v44, %v5816_v30  ;;  %v5276_v62 = vrot.slane %v15572_v14, 7  ;;  %v18972_v48 = vld [vmem:[#allocation196_spill] sm:$0xff]  ;;  %v18974_v7 = vld [vmem:[#allocation197_spill] sm:$0xff] }
 0x3ce   : > { %v5817_v41 = vrot.slane %v15583_v45, 1  ;;  %v6712_v11 = vmul.f32 %v6532_v38, %v18950_v51  ;;  %v6533_v20 = vadd.f32 %v6353_v26, %v15599_v22  ;;  %v15655_v0 = vmul.f32 %v18971_v25, %v18970_v50 }
 0x3cf   : > { %v6354_v61 = vadd.f32 %v6174_v2, %v15471_v39  ;;  %v6175_v6 = vadd.f32 %v6013_v9, %v5635_v24  ;;  %v5473_v59 = vsel %vm3386_vm2, %v5275_v46, %v5276_v62  ;;  %v5277_v42 = vrot.slane %v15583_v45, 7  ;;  %v18973_v46 = vld [vmem:[#allocation232_spill] sm:$0xff] }
 0x3d0   : > { %v6012_v4 = vsel %vm3927_vm3, %v5816_v30, %v5817_v41  ;;  %9047 = vmatmul.mubr.f32.gmra.mrb[70].mxu1 %v6712_v11  ;;  %v6713_v51 = vmul.f32 %v6533_v20, %v18952_v23  ;;  %v5636_v39 = vadd.f32 %v5473_v59, %v15572_v14  ;;  %v5818_v43 = vrot.slane %v15599_v22, 1  ;;  %v18975_v24 = vld [vmem:[#allocation124_spill] sm:$0xff]  ;;  %v18977_v59 = vld [vmem:[#allocation122_spill] sm:$0xff] }
 0x3d1   : > { %v6534_v44 = vadd.f32 %v6354_v61, %v15615_v18  ;;  %v6355_v32 = vadd.f32 %v6175_v6, %v15487_v54  ;;  %v5472_v35 = vsel %vm3386_vm2, %v5276_v62, %v5277_v42  ;;  %v15671_v60 = vmul.f32 %v18973_v46, %v18972_v48  ;;  %v18976_v6 = vld [vmem:[#allocation202_spill] sm:$0xff] }
 0x3d2   : > { %v5278_v58 = vrot.slane %v15599_v22, 7  ;;  %9049 = vmatprep.mubr.f32.mxu1 %v6713_v51  ;;  %v6176_v30 = vadd.f32 %v6012_v4, %v5636_v39  ;;  %v5637_v8 = vadd.f32 %v5472_v35, %v15583_v45  ;;  %v6011_v38 = vsel %vm3927_vm3, %v5817_v41, %v5818_v43 }
 0x3d3   : > { %v6714_v23 = vmul.f32 %v6534_v44, %v18954_v3  ;;  %v6535_v54 = vadd.f32 %v6355_v32, %v15628_v40  ;;  %v5819_v2 = vrot.slane %v15615_v18, 1  ;;  %v15684_v9 = vmul.f32 %v18975_v24, %v18974_v7 }
 0x3d4   : > { %v5471_v26 = vsel %vm3386_vm2, %v5277_v42, %v5278_v58  ;;  %v6356_v3 = vadd.f32 %v6176_v30, %v15503_v27  ;;  %v6177_v62 = vadd.f32 %v6011_v38, %v5637_v8  ;;  %v5279_v20 = vrot.slane %v15615_v18, 7  ;;  %v18979_v30 = vld [vmem:[#allocation245_spill] sm:$0xff] }
 0x3d5   : > { %9050 = vmatmul.mubr.f32.gmra.mrb[72].mxu1 %v6714_v23  ;;  %v5638_v11 = vadd.f32 %v5471_v26, %v15599_v22  ;;  %v6715_v41 = vmul.f32 %v6535_v54, %v18956_v34  ;;  %v6010_v61 = vsel %vm3927_vm3, %v5818_v43, %v5819_v2  ;;  %v5820_v25 = vrot.slane %v15628_v40, 1  ;;  %v18978_v23 = vld [vmem:[#allocation156_spill] sm:$0xff] }
 0x3d6   : > { %v15695_v4 = vmul.f32 %v18977_v59, %v18976_v6  ;;  %v6536_v42 = vadd.f32 %v6356_v3, %v15639_v13  ;;  %v6357_v27 = vadd.f32 %v6177_v62, %v15516_v17  ;;  %v5470_v44 = vsel %vm3386_vm2, %v5278_v58, %v5279_v20 }
 0x3d7   : > { %v6178_v51 = vadd.f32 %v6010_v61, %v5638_v11  ;;  %9052 = vmatprep.mubr.f32.mxu1 %v6715_v41  ;;  %v5639_v34 = vadd.f32 %v5470_v44, %v15615_v18  ;;  %v6009_v39 = vsel %vm3927_vm3, %v5819_v2, %v5820_v25  ;;  %v5280_v43 = vrot.slane %v15628_v40, 7  ;;  %v18980_v11 = vld [vmem:[#allocation206_spill] sm:$0xff]  ;;  %v18982_v44 = vld [vmem:[#allocation208_spill] sm:$0xff] }
 0x3d8   : > { %v5821_v32 = vrot.slane %v15639_v13, 1  ;;  %v6716_v35 = vmul.f32 %v6536_v42, %v18958_v10  ;;  %v6537_v46 = vadd.f32 %v6357_v27, %v15655_v0  ;;  %v15711_v8 = vmul.f32 %v18979_v30, %v18978_v23 }
 0x3d9   : > { %v6358_v17 = vadd.f32 %v6178_v51, %v15527_v29  ;;  %v6179_v58 = vadd.f32 %v6009_v39, %v5639_v34  ;;  %v5469_v38 = vsel %vm3386_vm2, %v5279_v20, %v5280_v43  ;;  %v5281_v26 = vrot.slane %v15639_v13, 7  ;;  %v18981_v20 = vld [vmem:[#allocation243_spill] sm:$0xff]  ;;  %v18983_v34 = vld [vmem:[#allocation248_spill] sm:$0xff] }
 0x3da   : > { %v6008_v54 = vsel %vm3927_vm3, %v5820_v25, %v5821_v32  ;;  %9053 = vmatmul.mubr.f32.gmra.mrb[74].mxu1 %v6716_v35  ;;  %v6717_v10 = vmul.f32 %v6537_v46, %v18960_v1  ;;  %v5640_v29 = vadd.f32 %v5469_v38, %v15628_v40  ;;  %v5822_v24 = vrot.slane %v15655_v0, 1  ;;  %v18985_v38 = vld [vmem:[#allocation246_spill] sm:$0xff] }
 0x3db   : > { %v6538_v2 = vadd.f32 %v6358_v17, %v15671_v60  ;;  %v6359_v3 = vadd.f32 %v6179_v58, %v15543_v16  ;;  %v5468_v62 = vsel %vm3386_vm2, %v5280_v43, %v5281_v26  ;;  %v15727_v41 = vmul.f32 %v18981_v20, %v18980_v11  ;;  %v18984_v58 = vld [vmem:[#allocation161_spill] sm:$0xff] }
 0x3dc   : > { %v5282_v61 = vrot.slane %v15655_v0, 7  ;;  %9055 = vmatprep.mubr.f32.mxu1 %v6717_v10  ;;  %v6180_v25 = vadd.f32 %v6008_v54, %v5640_v29  ;;  %v5641_v59 = vadd.f32 %v5468_v62, %v15639_v13  ;;  %v6007_v42 = vsel %vm3927_vm3, %v5821_v32, %v5822_v24 }
 0x3dd   : > { %v6718_v1 = vmul.f32 %v6538_v2, %v18962_v63  ;;  %v6539_v16 = vadd.f32 %v6359_v3, %v15684_v9  ;;  %v5823_v51 = vrot.slane %v15671_v60, 1  ;;  %v15740_v39 = vmul.f32 %v18983_v34, %v18982_v44 }
 0x3de   : > { %v5467_v27 = vsel %vm3386_vm2, %v5281_v26, %v5282_v61  ;;  %v6360_v63 = vadd.f32 %v6180_v25, %v15559_v49  ;;  %v6181_v43 = vadd.f32 %v6007_v42, %v5641_v59  ;;  %v5283_v46 = vrot.slane %v15671_v60, 7  ;;  %v18987_v25 = vld [vmem:[#allocation252_spill] sm:$0xff] }
 0x3df   : > { %9056 = vmatmul.mubr.f32.gmra.mrb[76].mxu1 %v6718_v1  ;;  %v5642_v35 = vadd.f32 %v5467_v27, %v15655_v0  ;;  %v6719_v32 = vmul.f32 %v6539_v16, %v18964_v53  ;;  %v6006_v17 = vsel %vm3927_vm3, %v5822_v24, %v5823_v51  ;;  %v5824_v30 = vrot.slane %v15684_v9, 1  ;;  %v18986_v1 = vld [vmem:[#allocation162_spill] sm:$0xff] }
 0x3e0   : > { %v15751_v54 = vmul.f32 %v18985_v38, %v18984_v58  ;;  %v6540_v26 = vadd.f32 %v6360_v63, %v15695_v4  ;;  %v6361_v49 = vadd.f32 %v6181_v43, %v15572_v14  ;;  %v5466_v2 = vsel %vm3386_vm2, %v5282_v61, %v5283_v46 }
 0x3e1   : > { %v6182_v10 = vadd.f32 %v6006_v17, %v5642_v35  ;;  %9058 = vmatprep.mubr.f32.mxu1 %v6719_v32  ;;  %v5643_v53 = vadd.f32 %v5466_v2, %v15671_v60  ;;  %v6005_v29 = vsel %vm3927_vm3, %v5823_v51, %v5824_v30  ;;  %v5284_v24 = vrot.slane %v15684_v9, 7  ;;  %v18988_v35 = vld [vmem:[#allocation216_spill] sm:$0xff] }
 0x3e2   : > { %v5825_v3 = vrot.slane %v15695_v4, 1  ;;  %v6720_v62 = vmul.f32 %v6540_v26, %v18966_v47  ;;  %v6541_v20 = vadd.f32 %v6361_v49, %v15711_v8  ;;  %v15767_v59 = vmul.f32 %v18987_v25, %v18986_v1 }
 0x3e3   : > { %v6362_v14 = vadd.f32 %v6182_v10, %v15583_v45  ;;  %v6183_v61 = vadd.f32 %v6005_v29, %v5643_v53  ;;  %v5465_v42 = vsel %vm3386_vm2, %v5283_v46, %v5284_v24  ;;  %v5285_v27 = vrot.slane %v15695_v4, 7  ;;  %v18989_v46 = vld [vmem:[#allocation249_spill] sm:$0xff]  ;;  %v18990_v29 = vld [vmem:[#allocation219_spill] sm:$0xff] }
 0x3e4   : > { %v6004_v16 = vsel %vm3927_vm3, %v5824_v30, %v5825_v3  ;;  %9059 = vmatmul.mubr.f32.gmra.mrb[78].mxu1 %v6720_v62  ;;  %v6721_v47 = vmul.f32 %v6541_v20, %v18968_v28  ;;  %v5644_v45 = vadd.f32 %v5465_v42, %v15684_v9  ;;  %v5826_v34 = vrot.slane %v15711_v8, 1 }
 0x3e5   : > { %v6542_v51 = vadd.f32 %v6362_v14, %v15727_v41  ;;  %v6363_v63 = vadd.f32 %v6183_v61, %v15599_v22  ;;  %v5464_v43 = vsel %vm3386_vm2, %v5284_v24, %v5285_v27  ;;  %v15783_v32 = vmul.f32 %v18989_v46, %v18988_v35  ;;  %v15786_v30 = vpop.f32.mrb[0].mxu1  ;;  %v18991_v24 = vld [vmem:[#allocation257_spill] sm:$0xff] }
 0x3e6   : > { %v5286_v17 = vrot.slane %v15711_v8, 7  ;;  %9061 = vmatprep.mubr.f32.mxu1 %v6721_v47  ;;  %v6184_v38 = vadd.f32 %v6004_v16, %v5644_v45  ;;  %v5645_v26 = vadd.f32 %v5464_v43, %v15695_v4  ;;  %v6003_v22 = vsel %vm3927_vm3, %v5825_v3, %v5826_v34  ;;  %v15792_v49 = vpop.f32.mrb[1].mxu1  ;;  %v18992_v16 = vld [vmem:[#allocation167_spill] sm:$0xff] }
 0x3e7   : > { %v6722_v28 = vmul.f32 %v6542_v51, %v18970_v50  ;;  %v6543_v10 = vadd.f32 %v6363_v63, %v15740_v39  ;;  %v5827_v53 = vrot.slane %v15727_v41, 1  ;;  %v15800_v62 = vmul.f32 %v18991_v24, %v18990_v29 }
 0x3e8   : > { %v5463_v2 = vsel %vm3386_vm2, %v5285_v27, %v5286_v17  ;;  %v6364_v50 = vadd.f32 %v6184_v38, %v15615_v18  ;;  %v6185_v20 = vadd.f32 %v6003_v22, %v5645_v26  ;;  %v5287_v3 = vrot.slane %v15727_v41, 7  ;;  %v18993_v27 = vld [vmem:[#allocation253_spill] sm:$0xff] }
 0x3e9   : > { %9062 = vmatmul.mubr.f32.gmra.mrb[80].mxu1 %v6722_v28  ;;  %v5646_v14 = vadd.f32 %v5463_v2, %v15711_v8  ;;  %v6723_v25 = vmul.f32 %v6543_v10, %v18972_v48  ;;  %v6002_v61 = vsel %vm3927_vm3, %v5826_v34, %v5827_v53  ;;  %v5828_v42 = vrot.slane %v15740_v39, 1  ;;  %v15813_v51 = vpop.f32.mrb[2].mxu1  ;;  %v18994_v10 = vld [vmem:[#allocation222_spill] sm:$0xff] }
 0x3ea   : > { %v15811_v47 = vmul.f32 %v18993_v27, %v18992_v16  ;;  %v6544_v18 = vadd.f32 %v6364_v50, %v15751_v54  ;;  %v6365_v45 = vadd.f32 %v6185_v20, %v15628_v40  ;;  %v5462_v43 = vsel %vm3386_vm2, %v5286_v17, %v5287_v3  ;;  %v15819_v48 = vpop.f32.mrb[3].mxu1  ;;  %v18995_v17 = vld [vmem:[#allocation262_spill] sm:$0xff] }
 0x3eb   : > { %v6186_v63 = vadd.f32 %v6002_v61, %v5646_v14  ;;  %9064 = vmatprep.mubr.f32.mxu1 %v6723_v25  ;;  %v5647_v34 = vadd.f32 %v5462_v43, %v15727_v41  ;;  %v6001_v46 = vsel %vm3927_vm3, %v5827_v53, %v5828_v42  ;;  %v5288_v28 = vrot.slane %v15740_v39, 7 }
 0x3ec   : > { %v5829_v38 = vrot.slane %v15751_v54, 1  ;;  %v6724_v26 = vmul.f32 %v6544_v18, %v18974_v7  ;;  %v6545_v40 = vadd.f32 %v6365_v45, %v15767_v59  ;;  %v15831_v2 = vmul.f32 %v18995_v17, %v18994_v10  ;;  %v18996_v18 = vld [vmem:[#allocation226_spill] sm:$0xff] }
 0x3ed   : > { %v6366_v22 = vadd.f32 %v6186_v63, %v15639_v13  ;;  %v6187_v24 = vadd.f32 %v6001_v46, %v5647_v34  ;;  %v5461_v50 = vsel %vm3386_vm2, %v5287_v3, %v5288_v28  ;;  %v5289_v20 = vrot.slane %v15751_v54, 7  ;;  %v15842_v61 = vpop.f32.mrb[4].mxu1  ;;  %v18999_v17 = vld [vmem:[#allocation266_spill] sm:$0xff] }
 0x3ee   : > { %v6000_v53 = vsel %vm3927_vm3, %v5828_v42, %v5829_v38  ;;  %9065 = vmatmul.mubr.f32.gmra.mrb[82].mxu1 %v6724_v26  ;;  %v6725_v7 = vmul.f32 %v6545_v40, %v18976_v6  ;;  %v5648_v13 = vadd.f32 %v5461_v50, %v15740_v39  ;;  %v5830_v25 = vrot.slane %v15767_v59, 1  ;;  %v18997_v42 = vld [vmem:[#allocation258_spill] sm:$0xff]  ;;  %v15852_v6 = vpop.f32.mrb[5].mxu1 }
 0x3ef   : > { %v6546_v14 = vadd.f32 %v6366_v22, %v15783_v32  ;;  %v6367_v27 = vadd.f32 %v6187_v24, %v15655_v0  ;;  %v5460_v3 = vsel %vm3386_vm2, %v5288_v28, %v5289_v20  ;;  %v15849_v45 = vmul.f32 %v18997_v42, %v18996_v18  ;;  %v18998_v22 = vld [vmem:[#allocation228_spill] sm:$0xff] }
 0x3f0   : > { %v5290_v63 = vrot.slane %v15767_v59, 7  ;;  %9067 = vmatprep.mubr.f32.mxu1 %v6725_v7  ;;  %v6188_v34 = vadd.f32 %v6000_v53, %v5648_v13  ;;  %v5649_v46 = vadd.f32 %v5460_v3, %v15751_v54  ;;  %v5999_v0 = vsel %vm3927_vm3, %v5829_v38, %v5830_v25  ;;  %v19001_v3 = vld [vmem:[#allocation263_spill] sm:$0xff] }
 0x3f1   : > { %v6726_v43 = vmul.f32 %v6546_v14, %v18978_v23  ;;  %v6547_v26 = vadd.f32 %v6367_v27, %v15800_v62  ;;  %v5831_v40 = vrot.slane %v15783_v32, 1  ;;  %v15864_v24 = vmul.f32 %v18999_v17, %v18998_v22  ;;  %v19000_v27 = vld [vmem:[#allocation178_spill] sm:$0xff] }
 0x3f2   : > { %v5459_v28 = vsel %vm3386_vm2, %v5289_v20, %v5290_v63  ;;  %v6368_v23 = vadd.f32 %v6188_v34, %v15671_v60  ;;  %v6189_v50 = vadd.f32 %v5999_v0, %v5649_v46  ;;  %v5291_v7 = vrot.slane %v15783_v32, 7  ;;  %v15869_v38 = vpop.f32.mrb[6].mxu1 }
 0x3f3   : > { %9068 = vmatmul.mubr.f32.gmra.mrb[84].mxu1 %v6726_v43  ;;  %v5650_v53 = vadd.f32 %v5459_v28, %v15767_v59  ;;  %v6727_v14 = vmul.f32 %v6547_v26, %v18980_v11  ;;  %v5998_v20 = vsel %vm3927_vm3, %v5830_v25, %v5831_v40  ;;  %v5832_v13 = vrot.slane %v15800_v62, 1  ;;  %v15879_v43 = vpop.f32.mrb[7].mxu1 }
 0x3f4   : > { %v15877_v42 = vmul.f32 %v19001_v3, %v19000_v27  ;;  %v6548_v60 = vadd.f32 %v6368_v23, %v15811_v47  ;;  %v6369_v34 = vadd.f32 %v6189_v50, %v15684_v9  ;;  %v5458_v0 = vsel %vm3386_vm2, %v5290_v63, %v5291_v7  ;;  %v19002_v50 = vld [vmem:[#allocation233_spill] sm:$0xff] }
 0x3f5   : > { %v6190_v46 = vadd.f32 %v5998_v20, %v5650_v53  ;;  %9070 = vmatprep.mubr.f32.mxu1 %v6727_v14  ;;  %v5651_v11 = vadd.f32 %v5458_v0, %v15783_v32  ;;  %v5997_v25 = vsel %vm3927_vm3, %v5831_v40, %v5832_v13  ;;  %v5292_v26 = vrot.slane %v15800_v62, 7  ;;  %v19003_v53 = vld [vmem:[#allocation271_spill] sm:$0xff] }
 0x3f6   : > { %v5833_v28 = vrot.slane %v15811_v47, 1  ;;  %v6728_v17 = vmul.f32 %v6548_v60, %v18982_v44  ;;  %v6549_v23 = vadd.f32 %v6369_v34, %v15831_v2  ;;  %v15895_v20 = vmul.f32 %v19003_v53, %v19002_v50 }
 0x3f7   : > { %v6370_v9 = vadd.f32 %v6190_v46, %v15695_v4  ;;  %v6191_v63 = vadd.f32 %v5997_v25, %v5651_v11  ;;  %v5457_v14 = vsel %vm3386_vm2, %v5291_v7, %v5292_v26  ;;  %v5293_v3 = vrot.slane %v15811_v47, 7  ;;  %v15906_v46 = vpop.f32.mrb[8].mxu1  ;;  %v19004_v11 = vld [vmem:[#allocation236_spill] sm:$0xff] }
 0x3f8   : > { %v5996_v40 = vsel %vm3927_vm3, %v5832_v13, %v5833_v28  ;;  %9071 = vmatmul.mubr.f32.gmra.mrb[86].mxu1 %v6728_v17  ;;  %v6729_v44 = vmul.f32 %v6549_v23, %v18984_v58  ;;  %v5652_v4 = vadd.f32 %v5457_v14, %v15800_v62  ;;  %v5834_v34 = vrot.slane %v15831_v2, 1  ;;  %v19005_v13 = vld [vmem:[#allocation265_spill] sm:$0xff]  ;;  %v15916_v58 = vpop.f32.mrb[9].mxu1 }
 0x3f9   : > { %v6550_v60 = vadd.f32 %v6370_v9, %v15849_v45  ;;  %v6371_v0 = vadd.f32 %v6191_v63, %v15711_v8  ;;  %v5456_v7 = vsel %vm3386_vm2, %v5292_v26, %v5293_v3  ;;  %v15913_v25 = vmul.f32 %v19005_v13, %v19004_v11  ;;  %v19006_v13 = vld [vmem:[#allocation239_spill] sm:$0xff] }
 0x3fa   : > { %v5294_v17 = vrot.slane %v15831_v2, 7  ;;  %9073 = vmatprep.mubr.f32.mxu1 %v6729_v44  ;;  %v6192_v9 = vadd.f32 %v5996_v40, %v5652_v4  ;;  %v5653_v53 = vadd.f32 %v5456_v7, %v15811_v47  ;;  %v5995_v8 = vsel %vm3927_vm3, %v5833_v28, %v5834_v34  ;;  %v19009_v7 = vld [vmem:[#allocation269_spill] sm:$0xff] }
 0x3fb   : > { %v6730_v23 = vmul.f32 %v6550_v60, %v18986_v1  ;;  %v6551_v63 = vadd.f32 %v6371_v0, %v15864_v24  ;;  %v5835_v14 = vrot.slane %v15849_v45, 1  ;;  %v15928_v5 = vmul.f32 %v19007_v19, %v19006_v13  ;;  %v19008_v0 = vld [vmem:[#allocation241_spill] sm:$0xff] }
 0x3fc   : > { %v5455_v26 = vsel %vm3386_vm2, %v5293_v3, %v5294_v17  ;;  %v6372_v1 = vadd.f32 %v6192_v9, %v15727_v41  ;;  %v6193_v40 = vadd.f32 %v5995_v8, %v5653_v53  ;;  %v5295_v60 = vrot.slane %v15849_v45, 7 }
 0x3fd   : > { %9074 = vmatmul.mubr.f32.gmra.mrb[88].mxu1 %v6730_v23  ;;  %v5654_v44 = vadd.f32 %v5455_v26, %v15831_v2  ;;  %v6731_v28 = vmul.f32 %v6551_v63, %v18988_v35  ;;  %v5994_v4 = vsel %vm3927_vm3, %v5834_v34, %v5835_v14  ;;  %v5836_v3 = vrot.slane %v15864_v24, 1 }
 0x3fe   : > { %v15939_v21 = vmul.f32 %v19009_v7, %v19008_v0  ;;  %v6552_v19 = vadd.f32 %v6372_v1, %v15877_v42  ;;  %v6373_v41 = vadd.f32 %v6193_v40, %v15740_v39  ;;  %v5454_v9 = vsel %vm3386_vm2, %v5294_v17, %v5295_v60  ;;  %v19010_v1 = vld [vmem:[#allocation242_spill] sm:$0xff]  ;;  %v19011_v40 = vld [vmem:[#allocation280_spill] sm:$0xff] }
 0x3ff   : > { %v6194_v23 = vadd.f32 %v5994_v4, %v5654_v44  ;;  %9076 = vmatprep.mubr.f32.mxu1 %v6731_v28  ;;  %v5655_v35 = vadd.f32 %v5454_v9, %v15849_v45  ;;  %v5993_v34 = vsel %vm3927_vm3, %v5835_v14, %v5836_v3  ;;  %v5296_v53 = vrot.slane %v15864_v24, 7 }
 0x400   : > { %v5837_v8 = vrot.slane %v15877_v42, 1  ;;  %v6732_v63 = vmul.f32 %v6552_v19, %v18990_v29  ;;  %v6553_v26 = vadd.f32 %v6373_v41, %v15895_v20  ;;  %v15955_v44 = vmul.f32 %v19011_v40, %v19010_v1  ;;  %v15957_v17 = vpop.f32.mrb[180].mxu0 }
 0x401   : > { %v6374_v39 = vadd.f32 %v6194_v23, %v15751_v54  ;;  %v6195_v28 = vadd.f32 %v5993_v34, %v5655_v35  ;;  %v5453_v14 = vsel %vm3386_vm2, %v5295_v60, %v5296_v53  ;;  %v5297_v7 = vrot.slane %v15877_v42, 7  ;;  %v15964_v29 = vpop.f32.mrb[181].mxu0  ;;  %v19012_v35 = vld [vmem:[#allocation188_spill] sm:$0xff] }
 0x402   : > { %v5992_v4 = vsel %vm3927_vm3, %v5836_v3, %v5837_v8  ;;  %9077 = vmatmul.mubr.f32.gmra.mrb[90].mxu1 %v6732_v63  ;;  %v6733_v54 = vmul.f32 %v6553_v26, %v18992_v16  ;;  %v5656_v41 = vadd.f32 %v5453_v14, %v15864_v24  ;;  %v5838_v23 = vrot.slane %v15895_v20, 1  ;;  %v19013_v3 = vld [vmem:[#allocation278_spill] sm:$0xff]  ;;  %v19014_v14 = vld [vmem:[#allocation247_spill] sm:$0xff] }
 0x403   : > { %v6554_v19 = vadd.f32 %v6374_v39, %v15913_v25  ;;  %v6375_v9 = vadd.f32 %v6195_v28, %v15767_v59  ;;  %v5452_v60 = vsel %vm3386_vm2, %v5296_v53, %v5297_v7  ;;  %v15975_v34 = vmul.f32 %v19013_v3, %v19012_v35  ;;  %v19015_v3 = vld [vmem:[#allocation283_spill] sm:$0xff] }
 0x404   : > { %v5298_v40 = vrot.slane %v15895_v20, 7  ;;  %9079 = vmatprep.mubr.f32.mxu1 %v6733_v54  ;;  %v6196_v63 = vadd.f32 %v5992_v4, %v5656_v41  ;;  %v5657_v26 = vadd.f32 %v5452_v60, %v15877_v42  ;;  %v5991_v39 = vsel %vm3927_vm3, %v5837_v8, %v5838_v23  ;;  %v19017_v60 = vld [vmem:[#allocation281_spill] sm:$0xff] }
 0x405   : > { %v6734_v16 = vmul.f32 %v6554_v19, %v18994_v10  ;;  %v6555_v59 = vadd.f32 %v6375_v9, %v15928_v5  ;;  %v5839_v28 = vrot.slane %v15913_v25, 1  ;;  %v15988_v12 = vmul.f32 %v19015_v3, %v19014_v14  ;;  %v19016_v9 = vld [vmem:[#allocation250_spill] sm:$0xff] }
 0x406   : > { %v5451_v53 = vsel %vm3386_vm2, %v5297_v7, %v5298_v40  ;;  %v6376_v10 = vadd.f32 %v6196_v63, %v15783_v32  ;;  %v6197_v4 = vadd.f32 %v5991_v39, %v5657_v26  ;;  %v5299_v19 = vrot.slane %v15913_v25, 7 }
 0x407   : > { %9080 = vmatmul.mubr.f32.gmra.mrb[92].mxu1 %v6734_v16  ;;  %v5658_v54 = vadd.f32 %v5451_v53, %v15895_v20  ;;  %v6735_v8 = vmul.f32 %v6555_v59, %v18996_v18  ;;  %v5990_v41 = vsel %vm3927_vm3, %v5838_v23, %v5839_v28  ;;  %v5840_v7 = vrot.slane %v15928_v5, 1  ;;  %v16001_v3 = vpop.f32.mrb[10].mxu1 }
 0x408   : > { %v15999_v15 = vmul.f32 %v19017_v60, %v19016_v9  ;;  %v6556_v32 = vadd.f32 %v6376_v10, %v15939_v21  ;;  %v6377_v16 = vadd.f32 %v6197_v4, %v15800_v62  ;;  %v5450_v26 = vsel %vm3386_vm2, %v5298_v40, %v5299_v19  ;;  %v16007_v18 = vpop.f32.mrb[11].mxu1  ;;  %v19019_v40 = vld [vmem:[#allocation289_spill] sm:$0xff] }
 0x409   : > { %v6198_v63 = vadd.f32 %v5990_v41, %v5658_v54  ;;  %9082 = vmatprep.mubr.f32.mxu1 %v6735_v8  ;;  %v5659_v23 = vadd.f32 %v5450_v26, %v15913_v25  ;;  %v5989_v39 = vsel %vm3927_vm3, %v5839_v28, %v5840_v7  ;;  %v5300_v59 = vrot.slane %v15928_v5, 7  ;;  %v19018_v54 = vld [vmem:[#allocation251_spill] sm:$0xff] }
 0x40a   : > { %v5841_v53 = vrot.slane %v15939_v21, 1  ;;  %v6736_v10 = vmul.f32 %v6556_v32, %v18998_v22  ;;  %v6557_v62 = vadd.f32 %v6377_v16, %v15955_v44  ;;  %v16019_v41 = vmul.f32 %v19019_v40, %v19018_v54  ;;  %v16026_v31 = vpop.f32.mrb[182].mxu0 }
 0x40b   : > { %v6378_v4 = vadd.f32 %v6198_v63, %v15811_v47  ;;  %v6199_v8 = vadd.f32 %v5989_v39, %v5659_v23  ;;  %v5449_v60 = vsel %vm3386_vm2, %v5299_v19, %v5300_v59  ;;  %v5301_v26 = vrot.slane %v15939_v21, 7  ;;  %v16032_v63 = vpop.f32.mrb[183].mxu0  ;;  %v19020_v23 = vld [vmem:[#allocation254_spill] sm:$0xff]  ;;  %v19021_v39 = vld [vmem:[#allocation284_spill] sm:$0xff] }
 0x40c   : > { %v5988_v28 = vsel %vm3927_vm3, %v5840_v7, %v5841_v53  ;;  %9083 = vmatmul.mubr.f32.gmra.mrb[94].mxu1 %v6736_v10  ;;  %v6737_v22 = vmul.f32 %v6557_v62, %v19000_v27  ;;  %v5660_v32 = vadd.f32 %v5449_v60, %v15928_v5  ;;  %v5842_v16 = vrot.slane %v15955_v44, 1 }
 0x40d   : > { %v6558_v47 = vadd.f32 %v6378_v4, %v15975_v34  ;;  %v6379_v19 = vadd.f32 %v6199_v8, %v15831_v2  ;;  %v5448_v7 = vsel %vm3386_vm2, %v5300_v59, %v5301_v26  ;;  %v16039_v40 = vmul.f32 %v19021_v39, %v19020_v23  ;;  %v19022_v39 = vld [vmem:[#allocation256_spill] sm:$0xff] }
 0x40e   : > { %v5302_v10 = vrot.slane %v15955_v44, 7  ;;  %9085 = vmatprep.mubr.f32.mxu1 %v6737_v22  ;;  %v6200_v62 = vadd.f32 %v5988_v28, %v5660_v32  ;;  %v5661_v4 = vadd.f32 %v5448_v7, %v15939_v21  ;;  %v5987_v60 = vsel %vm3927_vm3, %v5841_v53, %v5842_v16  ;;  %v19024_v7 = vld [vmem:[#allocation200_spill] sm:$0xff] }
 0x40f   : > { %v6738_v27 = vmul.f32 %v6558_v47, %v19002_v50  ;;  %v6559_v2 = vadd.f32 %v6379_v19, %v15988_v12  ;;  %v5843_v8 = vrot.slane %v15975_v34, 1  ;;  %v16052_v33 = vmul.f32 %v19023_v57, %v19022_v39  ;;  %v16054_v22 = vpop.f32.mrb[12].mxu1 }
 0x410   : > { %v5447_v59 = vsel %vm3386_vm2, %v5301_v26, %v5302_v10  ;;  %v6380_v50 = vadd.f32 %v6200_v62, %v15849_v45  ;;  %v6201_v28 = vadd.f32 %v5987_v60, %v5661_v4  ;;  %v5303_v53 = vrot.slane %v15975_v34, 7  ;;  %v16059_v32 = vpop.f32.mrb[13].mxu1 }
 0x411   : > { %9086 = vmatmul.mubr.f32.gmra.mrb[96].mxu1 %v6738_v27  ;;  %v5662_v47 = vadd.f32 %v5447_v59, %v15955_v44  ;;  %v6739_v26 = vmul.f32 %v6559_v2, %v19004_v11  ;;  %v5986_v19 = vsel %vm3927_vm3, %v5842_v16, %v5843_v8  ;;  %v5844_v57 = vrot.slane %v15988_v12, 1 }
 0x412   : > { %v16067_v27 = vmul.f32 %v19025_v37, %v19024_v7  ;;  %v6560_v45 = vadd.f32 %v6380_v50, %v15999_v15  ;;  %v6381_v62 = vadd.f32 %v6201_v28, %v15864_v24  ;;  %v5446_v60 = vsel %vm3386_vm2, %v5302_v10, %v5303_v53 }
 0x413   : > { %v6202_v4 = vadd.f32 %v5986_v19, %v5662_v47  ;;  %9088 = vmatprep.mubr.f32.mxu1 %v6739_v26  ;;  %v5663_v11 = vadd.f32 %v5446_v60, %v15975_v34  ;;  %v5985_v16 = vsel %vm3927_vm3, %v5843_v8, %v5844_v57  ;;  %v5304_v2 = vrot.slane %v15988_v12, 7  ;;  %v19026_v47 = vld [vmem:[#allocation260_spill] sm:$0xff]  ;;  %v19027_v26 = vld [vmem:[#allocation298_spill] sm:$0xff] }
 0x414   : > { %v16073_v59 = vpop.f32.mrb[184].mxu0  ;;  %v5845_v37 = vrot.slane %v15999_v15, 1  ;;  %v6740_v24 = vmul.f32 %v6560_v45, %v19006_v13  ;;  %v6561_v10 = vadd.f32 %v6381_v62, %v16019_v41  ;;  %v16088_v19 = vmul.f32 %v19027_v26, %v19026_v47 }
 0x415   : > { %v16081_v50 = vpop.f32.mrb[185].mxu0  ;;  %v6382_v28 = vadd.f32 %v6202_v4, %v15877_v42  ;;  %v6203_v60 = vadd.f32 %v5985_v16, %v5663_v11  ;;  %v5445_v8 = vsel %vm3386_vm2, %v5303_v53, %v5304_v2  ;;  %v5305_v55 = vrot.slane %v15999_v15, 7  ;;  %v19029_v11 = vld [vmem:[#allocation297_spill] sm:$0xff] }
 0x416   : > { %v5984_v52 = vsel %vm3927_vm3, %v5844_v57, %v5845_v37  ;;  %9089 = vmatmul.mubr.f32.gmra.mrb[98].mxu1 %v6740_v24  ;;  %v6741_v13 = vmul.f32 %v6561_v10, %v19008_v0  ;;  %v5664_v42 = vadd.f32 %v5445_v8, %v15988_v12  ;;  %v5846_v62 = vrot.slane %v16019_v41, 1  ;;  %v19028_v57 = vld [vmem:[#allocation201_spill] sm:$0xff] }
 0x417   : > { %v6562_v45 = vadd.f32 %v6382_v28, %v16039_v40  ;;  %v6383_v4 = vadd.f32 %v6203_v60, %v15895_v20  ;;  %v5444_v53 = vsel %vm3386_vm2, %v5304_v2, %v5305_v55  ;;  %v16108_v16 = vmul.f32 %v19029_v11, %v19028_v57  ;;  %v16111_v24 = vpop.f32.mrb[14].mxu1  ;;  %v16120_v2 = vld [vmem:[%s17729_s5] ss:$0 sm:$0xff] }
 0x418   : > { %v5306_v0 = vrot.slane %v16019_v41, 7  ;;  %19030 = vst [vmem:[#allocation44_spill] sm:$0xff] %v16111_v24  ;;  %9091 = vmatprep.mubr.f32.mxu1 %v6741_v13  ;;  %v6204_v28 = vadd.f32 %v5984_v52, %v5664_v42  ;;  %v5665_v26 = vadd.f32 %v5444_v53, %v15999_v15  ;;  %v5983_v20 = vsel %vm3927_vm3, %v5845_v37, %v5846_v62  ;;  %v16122_v60 = vpop.f32.mrb[15].mxu1  ;;  %v19032_v52 = vld [vmem:[#allocation264_spill] sm:$0xff] }
 0x419   : > { %v6742_v10 = vmul.f32 %v6562_v45, %v19010_v1  ;;  %19031 = vst [vmem:[#allocation48_spill] sm:$0xff] %v16122_v60  ;;  %v6563_v8 = vadd.f32 %v6383_v4, %v16052_v33  ;;  %v5847_v1 = vrot.slane %v16039_v40, 1  ;;  %v19033_v45 = vld [vmem:[#allocation302_spill] sm:$0xff]  ;;  %v5307_v56 = vrot.slane %v16039_v40, 7 }
 0x41a   : > { %v5443_v13 = vsel %vm3386_vm2, %v5305_v55, %v5306_v0  ;;  %v16130_v42 = vmul.f32 %v19033_v45, %v19032_v52  ;;  %v6384_v37 = vadd.f32 %v6204_v28, %v15913_v25  ;;  %v6205_v53 = vadd.f32 %v5983_v20, %v5665_v26 }
 0x41b   : > { %9092 = vmatmul.mubr.f32.gmra.mrb[100].mxu1 %v6742_v10  ;;  %v5666_v11 = vadd.f32 %v5443_v13, %v16019_v41  ;;  %v6743_v4 = vmul.f32 %v6563_v8, %v19012_v35  ;;  %v5982_v55 = vsel %vm3927_vm3, %v5846_v62, %v5847_v1  ;;  %v5848_v60 = vrot.slane %v16052_v33, 1  ;;  %v16141_v24 = vpop.f32.mrb[16].mxu1  ;;  %v19035_v8 = vld [vmem:[#allocation299_spill] sm:$0xff] }
 0x41c   : > { %v6940_v45 = vadd.f32 %v15786_v30, %v16120_v2  ;;  %v6564_v25 = vadd.f32 %v6384_v37, %v16067_v27  ;;  %v6385_v10 = vadd.f32 %v6205_v53, %v15928_v5  ;;  %v5442_v26 = vsel %vm3386_vm2, %v5306_v0, %v5307_v56  ;;  %v16147_v20 = vpop.f32.mrb[17].mxu1  ;;  %v19034_v30 = vld [vmem:[#allocation207_spill] sm:$0xff] }
 0x41d   : > { %v6206_v28 = vadd.f32 %v5982_v55, %v5666_v11  ;;  %9094 = vmatprep.mubr.f32.mxu1 %v6743_v4  ;;  %v5667_v35 = vadd.f32 %v5442_v26, %v16039_v40  ;;  %v5981_v62 = vsel %vm3927_vm3, %v5847_v1, %v5848_v60  ;;  %v6935_v5 = vadd.f32 %v16120_v2, %v15792_v49  ;;  %v19036_v55 = vld [vmem:[#allocation270_spill] sm:$0xff] }
 0x41e   : > { %7810 = vst [vmem:[%s16153_s14 + $0x38] sm:$0xff] %v6940_v45  ;;  %v16160_v13 = vmul.f32 %v19035_v8, %v19034_v30  ;;  %v6744_v0 = vmul.f32 %v6564_v25, %v19014_v14  ;;  %v6565_v37 = vadd.f32 %v6385_v10, %v16088_v19  ;;  %v5308_v1 = vrot.slane %v16052_v33, 7  ;;  %v19037_v45 = vld [vmem:[#allocation305_spill] sm:$0xff] }
 0x41f   : > { %v6386_v53 = vadd.f32 %v6206_v28, %v15939_v21  ;;  %v6207_v11 = vadd.f32 %v5981_v62, %v5667_v35  ;;  %7809 = vst [vmem:[%s16153_s14 + $0x30] sm:$0xff] %v6935_v5  ;;  %v5849_v4 = vrot.slane %v16067_v27, 1  ;;  %v16170_v26 = vmul.f32 %v19037_v45, %v19036_v55  ;;  %v19039_v45 = vld [vmem:[#allocation303_spill] sm:$0xff] }
 0x420   : > { %v5309_v49 = vrot.slane %v16067_v27, 7  ;;  %9095 = vmatmul.mubr.f32.gmra.mrb[102].mxu1 %v6744_v0  ;;  %v6745_v8 = vmul.f32 %v6565_v37, %v19016_v9  ;;  %v5441_v21 = vsel %vm3386_vm2, %v5307_v56, %v5308_v1  ;;  %v5850_v25 = vrot.slane %v16088_v19, 1 }
 0x421   : > { %v6566_v14 = vadd.f32 %v6386_v53, %v16108_v16  ;;  %v6387_v10 = vadd.f32 %v6207_v11, %v15955_v44  ;;  %v5668_v28 = vadd.f32 %v5441_v21, %v16052_v33  ;;  %v5980_v35 = vsel %vm3927_vm3, %v5848_v60, %v5849_v4  ;;  %v16184_v5 = vpop.f32.mrb[18].mxu1  ;;  %v19038_v11 = vld [vmem:[#allocation274_spill] sm:$0xff]  ;;  %v19041_v21 = vld [vmem:[#allocation309_spill] sm:$0xff] }
 0x422   : > { %v5440_v62 = vsel %vm3386_vm2, %v5308_v1, %v5309_v49  ;;  %9097 = vmatprep.mubr.f32.mxu1 %v6745_v8  ;;  %v5979_v44 = vsel %vm3927_vm3, %v5849_v4, %v5850_v25  ;;  %v6950_v0 = vadd.f32 %v15813_v51, %v16120_v2  ;;  %v16192_v37 = vpop.f32.mrb[19].mxu1  ;;  %v6945_v1 = vadd.f32 %v16120_v2, %v15819_v48  ;;  %v19040_v51 = vld [vmem:[#allocation276_spill] sm:$0xff] }
 0x423   : > { %v6746_v9 = vmul.f32 %v6566_v14, %v19018_v54  ;;  %v5669_v56 = vadd.f32 %v5440_v62, %v16067_v27  ;;  %v6567_v60 = vadd.f32 %v6387_v10, %v16130_v42  ;;  %v6208_v53 = vadd.f32 %v5980_v35, %v5668_v28 }
 0x424   : > { %v16199_v54 = vmul.f32 %v19039_v45, %v19038_v11  ;;  %7812 = vst [vmem:[%s16153_s14 + $0x48] sm:$0xff] %v6950_v0  ;;  %v5310_v4 = vrot.slane %v16088_v19, 7  ;;  %v5851_v14 = vrot.slane %v16108_v16, 1  ;;  %v16206_v62 = vmul.f32 %v19041_v21, %v19040_v51  ;;  %7811 = vst [vmem:[%s16153_s14 + $0x40] sm:$0xff] %v6945_v1  ;;  %v19043_v45 = vld [vmem:[#allocation213_spill] sm:$0xff] }
 0x425   : > { %9098 = vmatmul.mubr.f32.gmra.mrb[104].mxu1 %v6746_v9  ;;  %v6209_v8 = vadd.f32 %v5979_v44, %v5669_v56  ;;  %v6747_v10 = vmul.f32 %v6567_v60, %v19020_v23  ;;  %v6388_v28 = vadd.f32 %v6208_v53, %v15975_v34  ;;  %v5311_v48 = vrot.slane %v16108_v16, 7  ;;  %v16213_v9 = vpop.f32.mrb[20].mxu1 }
 0x426   : > { %v5852_v35 = vrot.slane %v16130_v42, 1  ;;  %v5439_v44 = vsel %vm3386_vm2, %v5309_v49, %v5310_v4  ;;  %v5978_v0 = vsel %vm3927_vm3, %v5850_v25, %v5851_v14  ;;  %v6960_v23 = vadd.f32 %v15842_v61, %v16120_v2  ;;  %v16222_v34 = vpop.f32.mrb[21].mxu1 }
 0x427   : > { %v6389_v56 = vadd.f32 %v6209_v8, %v15988_v12  ;;  %19042 = vst [vmem:[#allocation5_spill] sm:$0xff] %v16222_v34  ;;  %9100 = vmatprep.mubr.f32.mxu1 %v6747_v10  ;;  %v6568_v60 = vadd.f32 %v6388_v28, %v16160_v13  ;;  %v5670_v53 = vadd.f32 %v5439_v44, %v16088_v19  ;;  %v19044_v8 = vld [vmem:[#allocation306_spill] sm:$0xff]  ;;  %v5853_v44 = vrot.slane %v16160_v13, 1 }
 0x428   : > { %v5438_v12 = vsel %vm3386_vm2, %v5310_v4, %v5311_v48  ;;  %v5977_v49 = vsel %vm3927_vm3, %v5851_v14, %v5852_v35  ;;  %7814 = vst [vmem:[%s16153_s14 + $0x58] sm:$0xff] %v6960_v23  ;;  %v6955_v61 = vadd.f32 %v16120_v2, %v15852_v6  ;;  %v16237_v21 = vmul.f32 %v19044_v8, %v19043_v45  ;;  %v19046_v23 = vld [vmem:[#allocation312_spill] sm:$0xff] }
 0x429   : > { %v6569_v1 = vadd.f32 %v6389_v56, %v16170_v26  ;;  %v5671_v25 = vadd.f32 %v5438_v12, %v16108_v16  ;;  %v6748_v10 = vmul.f32 %v6568_v60, %v19022_v39  ;;  %v6210_v28 = vadd.f32 %v5978_v0, %v5670_v53  ;;  %v19045_v12 = vld [vmem:[#allocation279_spill] sm:$0xff] }
 0x42a   : > { %v5312_v4 = vrot.slane %v16130_v42, 7  ;;  %7813 = vst [vmem:[%s16153_s14 + $0x50] sm:$0xff] %v6955_v61  ;;  %v16246_v34 = vmul.f32 %v19046_v23, %v19045_v12  ;;  %v5313_v6 = vrot.slane %v16160_v13, 7  ;;  %v5976_v0 = vsel %vm3927_vm3, %v5852_v35, %v5853_v44 }
 0x42b   : > { %v6749_v14 = vmul.f32 %v6569_v1, %v19024_v7  ;;  %v6211_v56 = vadd.f32 %v5977_v49, %v5671_v25  ;;  %9101 = vmatmul.mubr.f32.gmra.mrb[106].mxu1 %v6748_v10  ;;  %v6390_v8 = vadd.f32 %v6210_v28, %v15999_v15  ;;  %v5854_v7 = vrot.slane %v16170_v26, 1  ;;  %v16255_v60 = vpop.f32.mrb[22].mxu1 }
 0x42c   : > { %v5437_v39 = vsel %vm3386_vm2, %v5311_v48, %v5312_v4  ;;  %v5436_v15 = vsel %vm3386_vm2, %v5312_v4, %v5313_v6  ;;  %v6970_v48 = vadd.f32 %v15869_v38, %v16120_v2  ;;  %v16263_v1 = vpop.f32.mrb[23].mxu1  ;;  %v19048_v4 = vld [vmem:[#allocation218_spill] sm:$0xff]  ;;  %v5314_v38 = vrot.slane %v16170_v26, 7 }
 0x42d   : > { %9103 = vmatprep.mubr.f32.mxu1 %v6749_v14  ;;  %v6391_v53 = vadd.f32 %v6211_v56, %v16019_v41  ;;  %v5672_v49 = vadd.f32 %v5437_v39, %v16130_v42  ;;  %19047 = vst [vmem:[#allocation60_spill] sm:$0xff] %v16263_v1  ;;  %v6570_v35 = vadd.f32 %v6390_v8, %v16199_v54  ;;  %v19049_v14 = vld [vmem:[#allocation310_spill] sm:$0xff]  ;;  %v5855_v39 = vrot.slane %v16199_v54, 1 }
 0x42e   : > { %v5673_v25 = vadd.f32 %v5436_v15, %v16160_v13  ;;  %v5975_v61 = vsel %vm3927_vm3, %v5853_v44, %v5854_v7  ;;  %v6965_v41 = vadd.f32 %v16120_v2, %v15879_v43  ;;  %7816 = vst [vmem:[%s16153_s14 + $0x68] sm:$0xff] %v6970_v48  ;;  %v16275_v56 = vmul.f32 %v19049_v14, %v19048_v4  ;;  %v19050_v44 = vld [vmem:[#allocation286_spill] sm:$0xff] }
 0x42f   : > { %v6571_v10 = vadd.f32 %v6391_v53, %v16206_v62  ;;  %v6212_v28 = vadd.f32 %v5976_v0, %v5672_v49  ;;  %v6750_v23 = vmul.f32 %v6570_v35, %v19026_v47  ;;  %v19051_v15 = vld [vmem:[#allocation314_spill] sm:$0xff]  ;;  %v5435_v49 = vsel %vm3386_vm2, %v5313_v6, %v5314_v38 }
 0x430   : > { %v6213_v8 = vadd.f32 %v5975_v61, %v5673_v25  ;;  %7815 = vst [vmem:[%s16153_s14 + $0x60] sm:$0xff] %v6965_v41  ;;  %v16283_v1 = vmul.f32 %v19051_v15, %v19050_v44  ;;  %v16285_v43 = vpop.f32.mrb[24].mxu1  ;;  %v5315_v48 = vrot.slane %v16199_v54, 7  ;;  %v5674_v25 = vadd.f32 %v5435_v49, %v16170_v26 }
 0x431   : > { %v6751_v0 = vmul.f32 %v6571_v10, %v19028_v57  ;;  %v6392_v53 = vadd.f32 %v6212_v28, %v16039_v40  ;;  %v16292_v47 = vpop.f32.mrb[25].mxu1  ;;  %9104 = vmatmul.mubr.f32.gmra.mrb[108].mxu1 %v6750_v23  ;;  %v5974_v61 = vsel %vm3927_vm3, %v5854_v7, %v5855_v39  ;;  %v5856_v57 = vrot.slane %v16206_v62, 1 }
 0x432   : > { %v6393_v35 = vadd.f32 %v6213_v8, %v16052_v33  ;;  %v5434_v6 = vsel %vm3386_vm2, %v5314_v38, %v5315_v48  ;;  %v6980_v41 = vadd.f32 %v15906_v46, %v16120_v2  ;;  %v6975_v10 = vadd.f32 %v16120_v2, %v15916_v58  ;;  %v19052_v8 = vld [vmem:[#allocation288_spill] sm:$0xff]  ;;  %v19053_v38 = vld [vmem:[#allocation313_spill] sm:$0xff] }
 0x433   : > { %9106 = vmatprep.mubr.f32.mxu1 %v6751_v0  ;;  %v6572_v40 = vadd.f32 %v6392_v53, %v16237_v21  ;;  %v6214_v28 = vadd.f32 %v5974_v61, %v5674_v25  ;;  %v5675_v14 = vadd.f32 %v5434_v6, %v16199_v54  ;;  %v5973_v7 = vsel %vm3927_vm3, %v5855_v39, %v5856_v57  ;;  %v19054_v61 = vld [vmem:[#allocation290_spill] sm:$0xff] }
 0x434   : > { %v6573_v33 = vadd.f32 %v6393_v35, %v16246_v34  ;;  %7818 = vst [vmem:[%s16153_s14 + $0x78] sm:$0xff] %v6980_v41  ;;  %7817 = vst [vmem:[%s16153_s14 + $0x70] sm:$0xff] %v6975_v10  ;;  %v16315_v15 = vmul.f32 %v19053_v38, %v19052_v8  ;;  %v5316_v46 = vrot.slane %v16206_v62, 7  ;;  %v5857_v58 = vrot.slane %v16237_v21, 1 }
 0x435   : > { %v6752_v23 = vmul.f32 %v6572_v40, %v19032_v52  ;;  %v6394_v53 = vadd.f32 %v6214_v28, %v16067_v27  ;;  %v6215_v49 = vadd.f32 %v5973_v7, %v5675_v14  ;;  %v6910_v39 = vadd.f32 %v15957_v17, %v16120_v2  ;;  %v16323_v52 = vpop.f32.mrb[26].mxu1  ;;  %v19055_v40 = vld [vmem:[#allocation319_spill] sm:$0xff] }
 0x436   : > { %v6753_v0 = vmul.f32 %v6573_v33, %v19034_v30  ;;  %v5433_v35 = vsel %vm3386_vm2, %v5315_v48, %v5316_v46  ;;  %v5972_v25 = vsel %vm3927_vm3, %v5856_v57, %v5857_v58  ;;  %v16331_v6 = vmul.f32 %v19055_v40, %v19054_v61  ;;  %v16334_v27 = vpop.f32.mrb[27].mxu1 }
 0x437   : > { %9107 = vmatmul.mubr.f32.gmra.mrb[110].mxu1 %v6752_v23  ;;  %v5317_v30 = vrot.slane %v16237_v21, 7  ;;  %v6574_v17 = vadd.f32 %v6394_v53, %v16275_v56  ;;  %v6395_v41 = vadd.f32 %v6215_v49, %v16088_v19  ;;  %v5676_v48 = vadd.f32 %v5433_v35, %v16206_v62  ;;  %7804 = vst [vmem:[%s16153_s14 + $0x8] sm:$0xff] %v6910_v39 }
 0x438   : > { %9109 = vmatprep.mubr.f32.mxu1 %v6753_v0  ;;  %v5858_v57 = vrot.slane %v16246_v34, 1  ;;  %v6905_v33 = vadd.f32 %v16120_v2, %v15964_v29  ;;  %v6990_v28 = vadd.f32 %v16001_v3, %v16120_v2  ;;  %v6985_v14 = vadd.f32 %v16120_v2, %v16007_v18  ;;  %v19056_v29 = vld [vmem:[#allocation294_spill] sm:$0xff]  ;;  %v19057_v3 = vld [vmem:[#allocation244_spill] sm:$0xff] }
 0x439   : > { %v5432_v10 = vsel %vm3386_vm2, %v5316_v46, %v5317_v30  ;;  %v6754_v19 = vmul.f32 %v6574_v17, %v19036_v55  ;;  %v6575_v7 = vadd.f32 %v6395_v41, %v16283_v1  ;;  %v6216_v23 = vadd.f32 %v5972_v25, %v5676_v48  ;;  %v19058_v41 = vld [vmem:[#allocation296_spill] sm:$0xff]  ;;  %v19059_v48 = vld [vmem:[#allocation322_spill] sm:$0xff] }
 0x43a   : > { %v5677_v38 = vadd.f32 %v5432_v10, %v16237_v21  ;;  %v16352_v0 = vpop.f32.mrb[28].mxu1  ;;  %v5971_v46 = vsel %vm3927_vm3, %v5857_v58, %v5858_v57  ;;  %7803 = vst [vmem:[%s16153_s14] sm:$0xff] %v6905_v33  ;;  %7820 = vst [vmem:[%s16153_s14 + $0x88] sm:$0xff] %v6990_v28  ;;  %v16361_v53 = vmul.f32 %v19057_v3, %v19056_v29  ;;  %v5318_v18 = vrot.slane %v16246_v34, 7 }
 0x43b   : > { %7819 = vst [vmem:[%s16153_s14 + $0x80] sm:$0xff] %v6985_v14  ;;  %v5859_v55 = vrot.slane %v16275_v56, 1  ;;  %v16365_v49 = vpop.f32.mrb[29].mxu1  ;;  %9110 = vmatmul.mubr.f32.gmra.mrb[112].mxu1 %v6754_v19  ;;  %v6755_v39 = vmul.f32 %v6575_v7, %v19038_v11  ;;  %v6396_v35 = vadd.f32 %v6216_v23, %v16108_v16  ;;  %v6920_v25 = vadd.f32 %v16026_v31, %v16120_v2 }
 0x43c   : > { %v6217_v58 = vadd.f32 %v5971_v46, %v5677_v38  ;;  %v5431_v40 = vsel %vm3386_vm2, %v5317_v30, %v5318_v18  ;;  %v16377_v10 = vmul.f32 %v19059_v48, %v19058_v41  ;;  %v5319_v33 = vrot.slane %v16275_v56, 7  ;;  %v19062_v48 = vld [vmem:[#allocation173_spill] sm:$0xff] }
 0x43d   : > { %v5970_v17 = vsel %vm3927_vm3, %v5858_v57, %v5859_v55  ;;  %9112 = vmatprep.mubr.f32.mxu1 %v6755_v39  ;;  %v6576_v16 = vadd.f32 %v6396_v35, %v16315_v15  ;;  %v5678_v31 = vadd.f32 %v5431_v40, %v16246_v34  ;;  %7806 = vst [vmem:[%s16153_s14 + $0x18] sm:$0xff] %v6920_v25  ;;  %v5860_v30 = vrot.slane %v16283_v1, 1 }
 0x43e   : > { %v6397_v11 = vadd.f32 %v6217_v58, %v16130_v42  ;;  %v5430_v57 = vsel %vm3386_vm2, %v5318_v18, %v5319_v33  ;;  %v6915_v28 = vadd.f32 %v16120_v2, %v16032_v63  ;;  %v7000_v14 = vadd.f32 %v16054_v22, %v16120_v2  ;;  %v19060_v63 = vld [vmem:[#allocation227_spill] sm:$0xff]  ;;  %v19061_v22 = vld [vmem:[#allocation316_spill] sm:$0xff] }
 0x43f   : > { %v6995_v19 = vadd.f32 %v16120_v2, %v16059_v32  ;;  %v6756_v42 = vmul.f32 %v6576_v16, %v19040_v51  ;;  %v6218_v23 = vadd.f32 %v5970_v17, %v5678_v31  ;;  %v5679_v38 = vadd.f32 %v5430_v57, %v16275_v56  ;;  %v16396_v46 = vpop.f32.mrb[30].mxu1  ;;  %v19063_v16 = vld [vmem:[#allocation326_spill] sm:$0xff] }
 0x440   : > { %v6577_v7 = vadd.f32 %v6397_v11, %v16331_v6  ;;  %v5969_v3 = vsel %vm3927_vm3, %v5859_v55, %v5860_v30  ;;  %7805 = vst [vmem:[%s16153_s14 + $0x10] sm:$0xff] %v6915_v28  ;;  %7822 = vst [vmem:[%s16153_s14 + $0x98] sm:$0xff] %v7000_v14  ;;  %v16405_v18 = vmul.f32 %v19061_v22, %v19060_v63  ;;  %v5320_v32 = vrot.slane %v16283_v1, 7  ;;  %v16409_v39 = vpop.f32.mrb[31].mxu1  ;;  %v19064_v14 = vld [vmem:[#allocation44_spill] sm:$0xff] }
 0x441   : > { %7821 = vst [vmem:[%s16153_s14 + $0x90] sm:$0xff] %v6995_v19  ;;  %v5861_v51 = vrot.slane %v16315_v15, 1  ;;  %9113 = vmatmul.mubr.f32.gmra.mrb[114].mxu1 %v6756_v42  ;;  %v6398_v58 = vadd.f32 %v6218_v23, %v16160_v13  ;;  %v6219_v55 = vadd.f32 %v5969_v3, %v5679_v38  ;;  %v6930_v25 = vadd.f32 %v16073_v59, %v16120_v2  ;;  %v19065_v42 = vld [vmem:[#allocation48_spill] sm:$0xff] }
 0x442   : > { %v6757_v35 = vmul.f32 %v6577_v7, %v19043_v45  ;;  %v5429_v40 = vsel %vm3386_vm2, %v5319_v33, %v5320_v32  ;;  %v16421_v11 = vmul.f32 %v19063_v16, %v19062_v48  ;;  %v5321_v31 = vrot.slane %v16315_v15, 7  ;;  %v19068_v16 = vld [vmem:[#allocation304_spill] sm:$0xff] }
 0x443   : > { %v5968_v17 = vsel %vm3927_vm3, %v5860_v30, %v5861_v51  ;;  %v6578_v45 = vadd.f32 %v6398_v58, %v16361_v53  ;;  %v6399_v13 = vadd.f32 %v6219_v55, %v16170_v26  ;;  %v5680_v59 = vadd.f32 %v5429_v40, %v16283_v1  ;;  %7808 = vst [vmem:[%s16153_s14 + $0x28] sm:$0xff] %v6930_v25 }
 0x444   : > { %9115 = vmatprep.mubr.f32.mxu1 %v6757_v35  ;;  %v5862_v33 = vrot.slane %v16331_v6, 1  ;;  %v16429_v30 = vpop.f32.mrb[32].mxu1  ;;  %v5428_v57 = vsel %vm3386_vm2, %v5320_v32, %v5321_v31  ;;  %v6925_v28 = vadd.f32 %v16120_v2, %v16081_v50  ;;  %v7010_v19 = vadd.f32 %v19064_v14, %v16120_v2  ;;  %v19066_v50 = vld [vmem:[#allocation235_spill] sm:$0xff] }
 0x445   : > { %v7005_v26 = vadd.f32 %v16120_v2, %v19065_v42  ;;  %v16439_v7 = vpop.f32.mrb[33].mxu1  ;;  %v6758_v23 = vmul.f32 %v6578_v45, %v19045_v12  ;;  %v6579_v38 = vadd.f32 %v6399_v13, %v16377_v10  ;;  %v6220_v3 = vadd.f32 %v5968_v17, %v5680_v59  ;;  %v19067_v35 = vld [vmem:[#allocation323_spill] sm:$0xff] }
 0x446   : > { %v5681_v22 = vadd.f32 %v5428_v57, %v16315_v15  ;;  %v5967_v32 = vsel %vm3927_vm3, %v5861_v51, %v5862_v33  ;;  %7807 = vst [vmem:[%s16153_s14 + $0x20] sm:$0xff] %v6925_v28  ;;  %7824 = vst [vmem:[%s16153_s14 + $0xa8] sm:$0xff] %v7010_v19  ;;  %v16451_v58 = vmul.f32 %v19067_v35, %v19066_v50  ;;  %v5322_v55 = vrot.slane %v16331_v6, 7  ;;  %v19069_v45 = vld [vmem:[#allocation255_spill] sm:$0xff] }
 0x447   : > { %7823 = vst [vmem:[%s16153_s14 + $0xa0] sm:$0xff] %v7005_v26  ;;  %v5863_v25 = vrot.slane %v16361_v53, 1  ;;  %9116 = vmatmul.mubr.f32.gmra.mrb[116].mxu1 %v6758_v23  ;;  %v6759_v12 = vmul.f32 %v6579_v38, %v19048_v4  ;;  %v6400_v40 = vadd.f32 %v6220_v3, %v16199_v54  ;;  %v16459_v51 = vmul.f32 %v19069_v45, %v19068_v16  ;;  %v19070_v23 = vld [vmem:[#allocation238_spill] sm:$0xff]  ;;  %v19071_v38 = vld [vmem:[#allocation327_spill] sm:$0xff] }
 0x448   : > { %v6221_v17 = vadd.f32 %v5967_v32, %v5681_v22  ;;  %v5427_v13 = vsel %vm3386_vm2, %v5321_v31, %v5322_v55  ;;  %v5323_v57 = vrot.slane %v16361_v53, 7  ;;  %v5864_v28 = vrot.slane %v16377_v10, 1 }
 0x449   : > { %v5966_v59 = vsel %vm3927_vm3, %v5862_v33, %v5863_v25  ;;  %9118 = vmatprep.mubr.f32.mxu1 %v6759_v12  ;;  %v6580_v54 = vadd.f32 %v6400_v40, %v16405_v18  ;;  %v5682_v14 = vadd.f32 %v5427_v13, %v16331_v6  ;;  %v7020_v19 = vadd.f32 %v16141_v24, %v16120_v2  ;;  %v16472_v31 = vpop.f32.mrb[34].mxu1  ;;  %v19073_v12 = vld [vmem:[#allocation331_spill] sm:$0xff] }
 0x44a   : > { %v6401_v4 = vadd.f32 %v6221_v17, %v16206_v62  ;;  %v5426_v33 = vsel %vm3386_vm2, %v5322_v55, %v5323_v57  ;;  %v5965_v42 = vsel %vm3927_vm3, %v5863_v25, %v5864_v28  ;;  %v7015_v26 = vadd.f32 %v16120_v2, %v16147_v20  ;;  %v16484_v62 = vpop.f32.mrb[35].mxu1  ;;  %v19072_v20 = vld [vmem:[#allocation308_spill] sm:$0xff] }
 0x44b   : > { %v16482_v3 = vmul.f32 %v19071_v38, %v19070_v23  ;;  %v6760_v22 = vmul.f32 %v6580_v54, %v19050_v44  ;;  %v6222_v32 = vadd.f32 %v5966_v59, %v5682_v14  ;;  %v5683_v35 = vadd.f32 %v5426_v33, %v16361_v53  ;;  %7826 = vst [vmem:[%s16153_s14 + $0xb8] sm:$0xff] %v7020_v19 }
 0x44c   : > { %v6581_v24 = vadd.f32 %v6401_v4, %v16421_v11  ;;  %7825 = vst [vmem:[%s16153_s14 + $0xb0] sm:$0xff] %v7015_v26  ;;  %v5324_v55 = vrot.slane %v16377_v10, 7  ;;  %v5865_v25 = vrot.slane %v16405_v18, 1  ;;  %v16495_v40 = vmul.f32 %v19073_v12, %v19072_v20 }
 0x44d   : > { %v5325_v17 = vrot.slane %v16405_v18, 7  ;;  %9119 = vmatmul.mubr.f32.gmra.mrb[118].mxu1 %v6760_v22  ;;  %v6402_v45 = vadd.f32 %v6222_v32, %v16237_v21  ;;  %v6223_v13 = vadd.f32 %v5965_v42, %v5683_v35  ;;  %v5866_v59 = vrot.slane %v16421_v11, 1  ;;  %v19075_v22 = vld [vmem:[#allocation328_spill] sm:$0xff] }
 0x44e   : > { %v6761_v44 = vmul.f32 %v6581_v24, %v19052_v8  ;;  %v16501_v54 = vpop.f32.mrb[36].mxu1  ;;  %v5425_v4 = vsel %vm3386_vm2, %v5323_v57, %v5324_v55  ;;  %v5964_v14 = vsel %vm3927_vm3, %v5864_v28, %v5865_v25  ;;  %v7030_v8 = vadd.f32 %v16184_v5, %v16120_v2  ;;  %v19074_v5 = vld [vmem:[#allocation185_spill] sm:$0xff] }
 0x44f   : > { %v5424_v19 = vsel %vm3386_vm2, %v5324_v55, %v5325_v17  ;;  %v16511_v33 = vpop.f32.mrb[37].mxu1  ;;  %v6582_v21 = vadd.f32 %v6402_v45, %v16451_v58  ;;  %v6403_v42 = vadd.f32 %v6223_v13, %v16246_v34  ;;  %v5684_v26 = vadd.f32 %v5425_v4, %v16377_v10  ;;  %v19076_v45 = vld [vmem:[#allocation311_spill] sm:$0xff] }
 0x450   : > { %9121 = vmatprep.mubr.f32.mxu1 %v6761_v44  ;;  %v5685_v57 = vadd.f32 %v5424_v19, %v16405_v18  ;;  %v5963_v28 = vsel %vm3927_vm3, %v5865_v25, %v5866_v59  ;;  %7828 = vst [vmem:[%s16153_s14 + $0xc8] sm:$0xff] %v7030_v8  ;;  %v7025_v38 = vadd.f32 %v16120_v2, %v16192_v37  ;;  %v5326_v32 = vrot.slane %v16421_v11, 7  ;;  %v19077_v37 = vld [vmem:[#allocation261_spill] sm:$0xff] }
 0x451   : > { %v16524_v24 = vmul.f32 %v19075_v22, %v19074_v5  ;;  %v6762_v35 = vmul.f32 %v6582_v21, %v19054_v61  ;;  %v6583_v34 = vadd.f32 %v6403_v42, %v16459_v51  ;;  %v6224_v55 = vadd.f32 %v5964_v14, %v5684_v26  ;;  %v19078_v22 = vld [vmem:[#allocation5_spill] sm:$0xff] }
 0x452   : > { %v6225_v12 = vadd.f32 %v5963_v28, %v5685_v57  ;;  %7827 = vst [vmem:[%s16153_s14 + $0xc0] sm:$0xff] %v7025_v38  ;;  %v5423_v25 = vsel %vm3386_vm2, %v5325_v17, %v5326_v32  ;;  %v5867_v44 = vrot.slane %v16451_v58, 1  ;;  %v16535_v13 = vmul.f32 %v19077_v37, %v19076_v45 }
 0x453   : > { %v5327_v4 = vrot.slane %v16451_v58, 7  ;;  %9122 = vmatmul.mubr.f32.gmra.mrb[120].mxu1 %v6762_v35  ;;  %v6763_v19 = vmul.f32 %v6583_v34, %v19056_v29  ;;  %v6404_v61 = vadd.f32 %v6224_v55, %v16275_v56  ;;  %v5686_v8 = vadd.f32 %v5423_v25, %v16421_v11  ;;  %v16542_v21 = vpop.f32.mrb[38].mxu1  ;;  %v19079_v35 = vld [vmem:[#allocation240_spill] sm:$0xff] }
 0x454   : > { %v6405_v14 = vadd.f32 %v6225_v12, %v16283_v1  ;;  %v5962_v17 = vsel %vm3927_vm3, %v5866_v59, %v5867_v44  ;;  %v5868_v26 = vrot.slane %v16459_v51, 1  ;;  %v7040_v29 = vadd.f32 %v16213_v9, %v16120_v2  ;;  %v16551_v57 = vpop.f32.mrb[39].mxu1  ;;  %v19080_v9 = vld [vmem:[#allocation259_spill] sm:$0xff] }
 0x455   : > { %v5422_v42 = vsel %vm3386_vm2, %v5326_v32, %v5327_v4  ;;  %9124 = vmatprep.mubr.f32.mxu1 %v6763_v19  ;;  %v6584_v1 = vadd.f32 %v6404_v61, %v16482_v3  ;;  %v6226_v28 = vadd.f32 %v5962_v17, %v5686_v8  ;;  %v7035_v32 = vadd.f32 %v16120_v2, %v19078_v22  ;;  %v19081_v8 = vld [vmem:[#allocation186_spill] sm:$0xff]  ;;  %v19082_v17 = vld [vmem:[#allocation337_spill] sm:$0xff] }
 0x456   : > { %v6585_v56 = vadd.f32 %v6405_v14, %v16495_v40  ;;  %v5687_v38 = vadd.f32 %v5422_v42, %v16451_v58  ;;  %v5961_v59 = vsel %vm3927_vm3, %v5867_v44, %v5868_v26  ;;  %7830 = vst [vmem:[%s16153_s14 + $0xd8] sm:$0xff] %v7040_v29  ;;  %v16563_v34 = vmul.f32 %v19080_v9, %v19079_v35 }
 0x457   : > { %v5328_v55 = vrot.slane %v16459_v51, 7  ;;  %v6764_v12 = vmul.f32 %v6584_v1, %v19058_v41  ;;  %v6406_v37 = vadd.f32 %v6226_v28, %v16315_v15  ;;  %7829 = vst [vmem:[%s16153_s14 + $0xd0] sm:$0xff] %v7035_v32  ;;  %v5869_v14 = vrot.slane %v16482_v3, 1 }
 0x458   : > { %v6765_v25 = vmul.f32 %v6585_v56, %v19060_v63  ;;  %v6227_v19 = vadd.f32 %v5961_v59, %v5687_v38  ;;  %v16569_v61 = vpop.f32.mrb[40].mxu1  ;;  %v16577_v42 = vmul.f32 %v19082_v17, %v19081_v8  ;;  %v5329_v29 = vrot.slane %v16482_v3, 7  ;;  %v19083_v59 = vld [vmem:[#allocation60_spill] sm:$0xff] }
 0x459   : > { %v5421_v44 = vsel %vm3386_vm2, %v5327_v4, %v5328_v55  ;;  %v16580_v41 = vpop.f32.mrb[41].mxu1  ;;  %9125 = vmatmul.mubr.f32.gmra.mrb[122].mxu1 %v6764_v12  ;;  %v6586_v15 = vadd.f32 %v6406_v37, %v16524_v24  ;;  %v5870_v4 = vrot.slane %v16495_v40, 1  ;;  %v5960_v56 = vsel %vm3927_vm3, %v5868_v26, %v5869_v14  ;;  %v19084_v26 = vld [vmem:[#allocation317_spill] sm:$0xff] }
 0x45a   : > { %v6407_v63 = vadd.f32 %v6227_v19, %v16331_v6  ;;  %v5688_v1 = vadd.f32 %v5421_v44, %v16459_v51  ;;  %9127 = vmatprep.mubr.f32.mxu1 %v6765_v25  ;;  %v5420_v28 = vsel %vm3386_vm2, %v5328_v55, %v5329_v29  ;;  %v7050_v38 = vadd.f32 %v16255_v60, %v16120_v2  ;;  %v19085_v55 = vld [vmem:[#allocation336_spill] sm:$0xff] }
 0x45b   : > { %v7045_v22 = vadd.f32 %v16120_v2, %v19083_v59  ;;  %v6766_v32 = vmul.f32 %v6586_v15, %v19062_v48  ;;  %v5689_v12 = vadd.f32 %v5420_v28, %v16482_v3  ;;  %v5959_v25 = vsel %vm3927_vm3, %v5869_v14, %v5870_v4  ;;  %v19086_v15 = vld [vmem:[#allocation318_spill] sm:$0xff] }
 0x45c   : > { %v6587_v6 = vadd.f32 %v6407_v63, %v16535_v13  ;;  %v6228_v9 = vadd.f32 %v5960_v56, %v5688_v1  ;;  %7832 = vst [vmem:[%s16153_s14 + $0xe8] sm:$0xff] %v7050_v38  ;;  %v16603_v37 = vmul.f32 %v19085_v55, %v19084_v26  ;;  %v5330_v60 = vrot.slane %v16495_v40, 7  ;;  %v19087_v63 = vld [vmem:[#allocation339_spill] sm:$0xff] }
 0x45d   : > { %7831 = vst [vmem:[%s16153_s14 + $0xe0] sm:$0xff] %v7045_v22  ;;  %v5871_v19 = vrot.slane %v16524_v24, 1  ;;  %9128 = vmatmul.mubr.f32.gmra.mrb[124].mxu1 %v6766_v32  ;;  %v6229_v17 = vadd.f32 %v5959_v25, %v5689_v12  ;;  %v16611_v1 = vmul.f32 %v19087_v63, %v19086_v15  ;;  %v16613_v14 = vpop.f32.mrb[42].mxu1  ;;  %v5331_v38 = vrot.slane %v16524_v24, 7  ;;  %v19088_v12 = vld [vmem:[#allocation320_spill] sm:$0xff]  ;;  %v19089_v25 = vld [vmem:[#allocation203_spill] sm:$0xff] }
 0x45e   : > { %v6767_v48 = vmul.f32 %v6587_v6, %v19066_v50  ;;  %v6408_v44 = vadd.f32 %v6228_v9, %v16361_v53  ;;  %v5419_v56 = vsel %vm3386_vm2, %v5329_v29, %v5330_v60  ;;  %v5872_v50 = vrot.slane %v16535_v13, 1  ;;  %v16621_v59 = vpop.f32.mrb[43].mxu1  ;;  %v19091_v63 = vld [vmem:[#allocation273_spill] sm:$0xff] }
 0x45f   : > { %v5958_v28 = vsel %vm3927_vm3, %v5870_v4, %v5871_v19  ;;  %v6409_v22 = vadd.f32 %v6229_v17, %v16377_v10  ;;  %v5690_v32 = vadd.f32 %v5419_v56, %v16495_v40  ;;  %v7060_v29 = vadd.f32 %v16285_v43, %v16120_v2 }
 0x460   : > { %9130 = vmatprep.mubr.f32.mxu1 %v6767_v48  ;;  %v6588_v53 = vadd.f32 %v6408_v44, %v16563_v34  ;;  %v5418_v4 = vsel %vm3386_vm2, %v5330_v60, %v5331_v38  ;;  %v5957_v6 = vsel %vm3927_vm3, %v5871_v19, %v5872_v50  ;;  %v7055_v9 = vadd.f32 %v16120_v2, %v16292_v47  ;;  %v19090_v47 = vld [vmem:[#allocation321_spill] sm:$0xff] }
 0x461   : > { %v16636_v55 = vmul.f32 %v19089_v25, %v19088_v12  ;;  %v6589_v48 = vadd.f32 %v6409_v22, %v16577_v42  ;;  %v6230_v44 = vadd.f32 %v5958_v28, %v5690_v32  ;;  %v5691_v43 = vadd.f32 %v5418_v4, %v16524_v24  ;;  %7834 = vst [vmem:[%s16153_s14 + $0xf8] sm:$0xff] %v7060_v29 }
 0x462   : > { %v6768_v10 = vmul.f32 %v6588_v53, %v19068_v16  ;;  %v16642_v17 = vpop.f32.mrb[44].mxu1  ;;  %7833 = vst [vmem:[%s16153_s14 + $0xf0] sm:$0xff] %v7055_v9  ;;  %v5332_v60 = vrot.slane %v16535_v13, 7  ;;  %v5873_v19 = vrot.slane %v16563_v34, 1  ;;  %v16649_v56 = vmul.f32 %v19091_v63, %v19090_v47 }
 0x463   : > { %v5333_v25 = vrot.slane %v16563_v34, 7  ;;  %v16652_v16 = vpop.f32.mrb[45].mxu1  ;;  %v6769_v28 = vmul.f32 %v6589_v48, %v19070_v23  ;;  %v6410_v53 = vadd.f32 %v6230_v44, %v16405_v18  ;;  %v6231_v22 = vadd.f32 %v5957_v6, %v5691_v43  ;;  %v19093_v48 = vld [vmem:[#allocation324_spill] sm:$0xff] }
 0x464   : > { %19092 = vst [vmem:[#allocation45_spill] sm:$0xff] %v16652_v16  ;;  %9131 = vmatmul.mubr.f32.gmra.mrb[126].mxu1 %v6768_v10  ;;  %v5874_v32 = vrot.slane %v16577_v42, 1  ;;  %v5417_v29 = vsel %vm3386_vm2, %v5331_v38, %v5332_v60  ;;  %v5956_v4 = vsel %vm3927_vm3, %v5872_v50, %v5873_v19  ;;  %v7070_v63 = vadd.f32 %v16323_v52, %v16120_v2  ;;  %v19094_v44 = vld [vmem:[#allocation340_spill] sm:$0xff] }
 0x465   : > { %v5416_v9 = vsel %vm3386_vm2, %v5332_v60, %v5333_v25  ;;  %9133 = vmatprep.mubr.f32.mxu1 %v6769_v28  ;;  %v6590_v23 = vadd.f32 %v6410_v53, %v16603_v37  ;;  %v6411_v18 = vadd.f32 %v6231_v22, %v16421_v11  ;;  %v5692_v6 = vadd.f32 %v5417_v29, %v16535_v13  ;;  %v19095_v29 = vld [vmem:[#allocation325_spill] sm:$0xff] }
 0x466   : > { %v5693_v10 = vadd.f32 %v5416_v9, %v16563_v34  ;;  %v5955_v38 = vsel %vm3927_vm3, %v5873_v19, %v5874_v32  ;;  %7836 = vst [vmem:[%s16153_s14 + $0x108] sm:$0xff] %v7070_v63  ;;  %v7065_v50 = vadd.f32 %v16120_v2, %v16334_v27  ;;  %v16676_v52 = vmul.f32 %v19094_v44, %v19093_v48  ;;  %v19096_v9 = vld [vmem:[#allocation342_spill] sm:$0xff] }
 0x467   : > { %v5334_v43 = vrot.slane %v16577_v42, 7  ;;  %v6770_v60 = vmul.f32 %v6590_v23, %v19072_v20  ;;  %v6591_v11 = vadd.f32 %v6411_v18, %v16611_v1  ;;  %v6232_v28 = vadd.f32 %v5956_v4, %v5692_v6  ;;  %v16681_v22 = vpop.f32.mrb[46].mxu1 }
 0x468   : > { %v6233_v53 = vadd.f32 %v5955_v38, %v5693_v10  ;;  %7835 = vst [vmem:[%s16153_s14 + $0x100] sm:$0xff] %v7065_v50  ;;  %v5875_v27 = vrot.slane %v16603_v37, 1  ;;  %v16689_v63 = vmul.f32 %v19096_v9, %v19095_v29  ;;  %v5335_v44 = vrot.slane %v16603_v37, 7  ;;  %v16692_v16 = vpop.f32.mrb[47].mxu1 }
 0x469   : > { %v5415_v19 = vsel %vm3386_vm2, %v5333_v25, %v5334_v43  ;;  %9134 = vmatmul.mubr.f32.gmra.mrb[128].mxu1 %v6770_v60  ;;  %v6771_v20 = vmul.f32 %v6591_v11, %v19074_v5  ;;  %v6412_v4 = vadd.f32 %v6232_v28, %v16451_v58  ;;  %v5876_v10 = vrot.slane %v16611_v1, 1  ;;  %v19097_v11 = vld [vmem:[#allocation329_spill] sm:$0xff] }
 0x46a   : > { %v6413_v23 = vadd.f32 %v6233_v53, %v16459_v51  ;;  %v5694_v25 = vadd.f32 %v5415_v19, %v16577_v42  ;;  %v5954_v18 = vsel %vm3927_vm3, %v5874_v32, %v5875_v27  ;;  %v5414_v6 = vsel %vm3386_vm2, %v5334_v43, %v5335_v44 }
 0x46b   : > { %v7080_v38 = vadd.f32 %v16352_v0, %v16120_v2  ;;  %9136 = vmatprep.mubr.f32.mxu1 %v6771_v20  ;;  %v6592_v5 = vadd.f32 %v6412_v4, %v16636_v55  ;;  %v5695_v50 = vadd.f32 %v5414_v6, %v16603_v37  ;;  %v5953_v32 = vsel %vm3927_vm3, %v5875_v27, %v5876_v10  ;;  %v19098_v0 = vld [vmem:[#allocation341_spill] sm:$0xff] }
 0x46c   : > { %v6593_v58 = vadd.f32 %v6413_v23, %v16649_v56  ;;  %v6234_v51 = vadd.f32 %v5954_v18, %v5694_v25  ;;  %v16708_v60 = vpop.f32.mrb[48].mxu1  ;;  %v7075_v43 = vadd.f32 %v16120_v2, %v16365_v49  ;;  %v16717_v28 = vmul.f32 %v19098_v0, %v19097_v11  ;;  %v19099_v25 = vld [vmem:[#allocation330_spill] sm:$0xff] }
 0x46d   : > { %7838 = vst [vmem:[%s16153_s14 + $0x118] sm:$0xff] %v7080_v38  ;;  %v5336_v53 = vrot.slane %v16611_v1, 7  ;;  %v16720_v19 = vpop.f32.mrb[49].mxu1  ;;  %v6772_v9 = vmul.f32 %v6592_v5, %v19076_v45  ;;  %v6235_v23 = vadd.f32 %v5953_v32, %v5695_v50  ;;  %v5877_v49 = vrot.slane %v16636_v55, 1  ;;  %v19100_v18 = vld [vmem:[#allocation346_spill] sm:$0xff] }
 0x46e   : > { %v6773_v20 = vmul.f32 %v6593_v58, %v19079_v35  ;;  %v6414_v4 = vadd.f32 %v6234_v51, %v16482_v3  ;;  %7837 = vst [vmem:[%s16153_s14 + $0x110] sm:$0xff] %v7075_v43  ;;  %v16731_v6 = vmul.f32 %v19100_v18, %v19099_v25  ;;  %v5337_v38 = vrot.slane %v16636_v55, 7 }
 0x46f   : > { %v5413_v27 = vsel %vm3386_vm2, %v5335_v44, %v5336_v53  ;;  %9137 = vmatmul.mubr.f32.gmra.mrb[130].mxu1 %v6772_v9  ;;  %v6415_v3 = vadd.f32 %v6235_v23, %v16495_v40  ;;  %v5878_v5 = vrot.slane %v16649_v56, 1  ;;  %v5952_v44 = vsel %vm3927_vm3, %v5876_v10, %v5877_v49 }
 0x470   : > { %v6594_v45 = vadd.f32 %v6414_v4, %v16676_v52  ;;  %v5696_v35 = vadd.f32 %v5413_v27, %v16611_v1  ;;  %9139 = vmatprep.mubr.f32.mxu1 %v6773_v20  ;;  %v5412_v58 = vsel %vm3386_vm2, %v5336_v53, %v5337_v38  ;;  %v7090_v51 = vadd.f32 %v16396_v46, %v16120_v2  ;;  %v19101_v53 = vld [vmem:[#allocation332_spill] sm:$0xff]  ;;  %v19102_v20 = vld [vmem:[#allocation343_spill] sm:$0xff] }
 0x471   : > { %v7085_v50 = vadd.f32 %v16120_v2, %v16409_v39  ;;  %v6595_v40 = vadd.f32 %v6415_v3, %v16689_v63  ;;  %v5697_v0 = vadd.f32 %v5412_v58, %v16636_v55  ;;  %v16749_v9 = vpop.f32.mrb[50].mxu1  ;;  %v5951_v10 = vsel %vm3927_vm3, %v5877_v49, %v5878_v5  ;;  %v19104_v49 = vld [vmem:[#allocation349_spill] sm:$0xff] }
 0x472   : > { %v6774_v32 = vmul.f32 %v6594_v45, %v19081_v8  ;;  %v6236_v43 = vadd.f32 %v5952_v44, %v5696_v35  ;;  %7840 = vst [vmem:[%s16153_s14 + $0x128] sm:$0xff] %v7090_v51  ;;  %v16757_v46 = vmul.f32 %v19102_v20, %v19101_v53  ;;  %v5338_v39 = vrot.slane %v16649_v56, 7  ;;  %v16761_v4 = vpop.f32.mrb[51].mxu1  ;;  %v19103_v45 = vld [vmem:[#allocation333_spill] sm:$0xff] }
 0x473   : > { %7839 = vst [vmem:[%s16153_s14 + $0x120] sm:$0xff] %v7085_v50  ;;  %v5879_v8 = vrot.slane %v16676_v52, 1  ;;  %v6775_v23 = vmul.f32 %v6595_v40, %v19084_v26  ;;  %v6237_v18 = vadd.f32 %v5951_v10, %v5697_v0  ;;  %v16767_v3 = vmul.f32 %v19104_v49, %v19103_v45  ;;  %v19105_v0 = vld [vmem:[#allocation334_spill] sm:$0xff]  ;;  %v19106_v10 = vld [vmem:[#allocation347_spill] sm:$0xff] }
 0x474   : > { %9140 = vmatmul.mubr.f32.gmra.mrb[132].mxu1 %v6774_v32  ;;  %v6416_v27 = vadd.f32 %v6236_v43, %v16524_v24  ;;  %v5411_v35 = vsel %vm3386_vm2, %v5337_v38, %v5338_v39  ;;  %v5339_v58 = vrot.slane %v16676_v52, 7  ;;  %v5880_v51 = vrot.slane %v16689_v63, 1  ;;  %v19108_v49 = vld [vmem:[#allocation351_spill] sm:$0xff] }
 0x475   : > { %v5950_v44 = vsel %vm3927_vm3, %v5878_v5, %v5879_v8  ;;  %9142 = vmatprep.mubr.f32.mxu1 %v6775_v23  ;;  %v6417_v26 = vadd.f32 %v6237_v18, %v16535_v13  ;;  %v5698_v50 = vadd.f32 %v5411_v35, %v16649_v56  ;;  %v7100_v32 = vadd.f32 %v16429_v30, %v16120_v2 }
 0x476   : > { %v6596_v24 = vadd.f32 %v6416_v27, %v16717_v28  ;;  %v16780_v38 = vpop.f32.mrb[52].mxu1  ;;  %v5410_v5 = vsel %vm3386_vm2, %v5338_v39, %v5339_v58  ;;  %v5949_v40 = vsel %vm3927_vm3, %v5879_v8, %v5880_v51  ;;  %v7095_v43 = vadd.f32 %v16120_v2, %v16439_v7  ;;  %v19107_v7 = vld [vmem:[#allocation335_spill] sm:$0xff] }
 0x477   : > { %v16790_v20 = vmul.f32 %v19106_v10, %v19105_v0  ;;  %v16792_v13 = vpop.f32.mrb[53].mxu1  ;;  %v6597_v30 = vadd.f32 %v6417_v26, %v16731_v6  ;;  %v6238_v27 = vadd.f32 %v5950_v44, %v5698_v50  ;;  %v5699_v18 = vadd.f32 %v5410_v5, %v16676_v52  ;;  %7842 = vst [vmem:[%s16153_s14 + $0x138] sm:$0xff] %v7100_v32 }
 0x478   : > { %v6776_v23 = vmul.f32 %v6596_v24, %v19086_v15  ;;  %7841 = vst [vmem:[%s16153_s14 + $0x130] sm:$0xff] %v7095_v43  ;;  %v5340_v39 = vrot.slane %v16689_v63, 7  ;;  %v5881_v8 = vrot.slane %v16717_v28, 1  ;;  %v16803_v35 = vmul.f32 %v19108_v49, %v19107_v7 }
 0x479   : > { %v5341_v10 = vrot.slane %v16717_v28, 7  ;;  %v6777_v15 = vmul.f32 %v6597_v30, %v19088_v12  ;;  %v6418_v44 = vadd.f32 %v6238_v27, %v16563_v34  ;;  %v6239_v24 = vadd.f32 %v5949_v40, %v5699_v18  ;;  %v19109_v30 = vld [vmem:[#allocation267_spill] sm:$0xff] }
 0x47a   : > { %9143 = vmatmul.mubr.f32.gmra.mrb[134].mxu1 %v6776_v23  ;;  %v5882_v26 = vrot.slane %v16731_v6, 1  ;;  %v5409_v50 = vsel %vm3386_vm2, %v5339_v58, %v5340_v39  ;;  %v5948_v32 = vsel %vm3927_vm3, %v5880_v51, %v5881_v8  ;;  %v7110_v43 = vadd.f32 %v16472_v31, %v16120_v2  ;;  %v16829_v2 = vld [vmem:[%s17729_s5] ss:$0 sm:$0xff] }
 0x47b   : > { %v5408_v5 = vsel %vm3386_vm2, %v5340_v39, %v5341_v10  ;;  %9145 = vmatprep.mubr.f32.mxu1 %v6777_v15  ;;  %v6598_v12 = vadd.f32 %v6418_v44, %v16757_v46  ;;  %v6419_v34 = vadd.f32 %v6239_v24, %v16577_v42  ;;  %v5700_v40 = vadd.f32 %v5409_v50, %v16689_v63  ;;  %v16821_v58 = vpop.f32.mrb[54].mxu1  ;;  %v19110_v42 = vld [vmem:[#allocation348_spill] sm:$0xff]  ;;  %v19112_v50 = vld [vmem:[#allocation338_spill] sm:$0xff] }
 0x47c   : > { %v5701_v23 = vadd.f32 %v5408_v5, %v16717_v28  ;;  %v5947_v51 = vsel %vm3927_vm3, %v5881_v8, %v5882_v26  ;;  %7844 = vst [vmem:[%s16153_s14 + $0x148] sm:$0xff] %v7110_v43  ;;  %v7105_v31 = vadd.f32 %v16829_v2, %v16484_v62  ;;  %v16835_v27 = vmul.f32 %v19110_v42, %v19109_v30  ;;  %v16838_v39 = vpop.f32.mrb[55].mxu1  ;;  %v19113_v5 = vld [vmem:[#allocation352_spill] sm:$0xff] }
 0x47d   : > { %v5342_v18 = vrot.slane %v16731_v6, 7  ;;  %19111 = vst [vmem:[#allocation78_spill] sm:$0xff] %v16838_v39  ;;  %v6778_v49 = vmul.f32 %v6598_v12, %v19090_v47  ;;  %v6599_v8 = vadd.f32 %v6419_v34, %v16767_v3  ;;  %v6240_v15 = vadd.f32 %v5948_v32, %v5700_v40 }
 0x47e   : > { %v6241_v44 = vadd.f32 %v5947_v51, %v5701_v23  ;;  %7843 = vst [vmem:[%s16153_s14 + $0x140] sm:$0xff] %v7105_v31  ;;  %v5883_v62 = vrot.slane %v16757_v46, 1  ;;  %v16848_v43 = vmul.f32 %v19113_v5, %v19112_v50  ;;  %v5343_v42 = vrot.slane %v16757_v46, 7 }
 0x47f   : > { %v5407_v24 = vsel %vm3386_vm2, %v5341_v10, %v5342_v18  ;;  %9146 = vmatmul.mubr.f32.gmra.mrb[136].mxu1 %v6778_v49  ;;  %v6779_v39 = vmul.f32 %v6599_v8, %v19093_v48  ;;  %v6420_v47 = vadd.f32 %v6240_v15, %v16603_v37  ;;  %v5884_v23 = vrot.slane %v16767_v3, 1  ;;  %v19114_v8 = vld [vmem:[#allocation268_spill] sm:$0xff] }
 0x480   : > { %v6421_v32 = vadd.f32 %v6241_v44, %v16611_v1  ;;  %v5702_v12 = vadd.f32 %v5407_v24, %v16731_v6  ;;  %v16855_v34 = vpop.f32.mrb[56].mxu1  ;;  %v5946_v10 = vsel %vm3927_vm3, %v5882_v26, %v5883_v62  ;;  %v5406_v40 = vsel %vm3386_vm2, %v5342_v18, %v5343_v42 }
 0x481   : > { %v7120_v48 = vadd.f32 %v16829_v2, %v16501_v54  ;;  %v16864_v51 = vpop.f32.mrb[57].mxu1  ;;  %9148 = vmatprep.mubr.f32.mxu1 %v6779_v39  ;;  %v6600_v37 = vadd.f32 %v6420_v47, %v16790_v20  ;;  %v5703_v49 = vadd.f32 %v5406_v40, %v16757_v46  ;;  %v5945_v26 = vsel %vm3927_vm3, %v5883_v62, %v5884_v23  ;;  %v19115_v54 = vld [vmem:[#allocation163_spill] sm:$0xff] }
 0x482   : > { %v6601_v1 = vadd.f32 %v6421_v32, %v16803_v35  ;;  %v6242_v31 = vadd.f32 %v5946_v10, %v5702_v12  ;;  %v7115_v18 = vadd.f32 %v16829_v2, %v16511_v33  ;;  %v16876_v15 = vmul.f32 %v19115_v54, %v19114_v8  ;;  %v19116_v33 = vld [vmem:[#allocation272_spill] sm:$0xff]  ;;  %v19117_v12 = vld [vmem:[#allocation355_spill] sm:$0xff] }
 0x483   : > { %7846 = vst [vmem:[%s16153_s14 + $0x158] sm:$0xff] %v7120_v48  ;;  %v5344_v39 = vrot.slane %v16767_v3, 7  ;;  %v6780_v44 = vmul.f32 %v6600_v37, %v19095_v29  ;;  %v6243_v47 = vadd.f32 %v5945_v26, %v5703_v49  ;;  %v5885_v32 = vrot.slane %v16790_v20, 1 }
 0x484   : > { %v6781_v24 = vmul.f32 %v6601_v1, %v19097_v11  ;;  %v6422_v5 = vadd.f32 %v6242_v31, %v16636_v55  ;;  %7845 = vst [vmem:[%s16153_s14 + $0x150] sm:$0xff] %v7115_v18  ;;  %v16888_v10 = vmul.f32 %v19117_v12, %v19116_v33  ;;  %v5345_v40 = vrot.slane %v16790_v20, 7  ;;  %v19120_v12 = vld [vmem:[#allocation275_spill] sm:$0xff] }
 0x485   : > { %v5405_v62 = vsel %vm3386_vm2, %v5343_v42, %v5344_v39  ;;  %9149 = vmatmul.mubr.f32.gmra.mrb[138].mxu1 %v6780_v44  ;;  %v6423_v11 = vadd.f32 %v6243_v47, %v16649_v56  ;;  %v5886_v48 = vrot.slane %v16803_v35, 1  ;;  %v16895_v42 = vpop.f32.mrb[58].mxu1  ;;  %v5944_v37 = vsel %vm3927_vm3, %v5884_v23, %v5885_v32 }
 0x486   : > { %v6602_v29 = vadd.f32 %v6422_v5, %v16835_v27  ;;  %v5704_v55 = vadd.f32 %v5405_v62, %v16767_v3  ;;  %9151 = vmatprep.mubr.f32.mxu1 %v6781_v24  ;;  %v5404_v1 = vsel %vm3386_vm2, %v5344_v39, %v5345_v40  ;;  %v7130_v31 = vadd.f32 %v16829_v2, %v16542_v21  ;;  %v16905_v49 = vpop.f32.mrb[59].mxu1  ;;  %v19118_v39 = vld [vmem:[#allocation211_spill] sm:$0xff]  ;;  %v19119_v24 = vld [vmem:[#allocation353_spill] sm:$0xff] }
 0x487   : > { %v7125_v56 = vadd.f32 %v16829_v2, %v16551_v57  ;;  %v6603_v18 = vadd.f32 %v6423_v11, %v16848_v43  ;;  %v5705_v44 = vadd.f32 %v5404_v1, %v16790_v20  ;;  %v5943_v23 = vsel %vm3927_vm3, %v5885_v32, %v5886_v48 }
 0x488   : > { %v6782_v26 = vmul.f32 %v6602_v29, %v19099_v25  ;;  %v6244_v54 = vadd.f32 %v5944_v37, %v5704_v55  ;;  %7848 = vst [vmem:[%s16153_s14 + $0x168] sm:$0xff] %v7130_v31  ;;  %v16916_v21 = vmul.f32 %v19119_v24, %v19118_v39  ;;  %v5346_v57 = vrot.slane %v16803_v35, 7  ;;  %v19121_v29 = vld [vmem:[#allocation225_spill] sm:$0xff] }
 0x489   : > { %7847 = vst [vmem:[%s16153_s14 + $0x160] sm:$0xff] %v7125_v56  ;;  %v5887_v5 = vrot.slane %v16835_v27, 1  ;;  %v6783_v25 = vmul.f32 %v6603_v18, %v19101_v53  ;;  %v6245_v62 = vadd.f32 %v5943_v23, %v5705_v44  ;;  %v16924_v11 = vmul.f32 %v19121_v29, %v19120_v12  ;;  %v19122_v44 = vld [vmem:[#allocation344_spill] sm:$0xff]  ;;  %v19125_v29 = vld [vmem:[#allocation358_spill] sm:$0xff] }
 0x48a   : > { %9152 = vmatmul.mubr.f32.gmra.mrb[140].mxu1 %v6782_v26  ;;  %v6424_v47 = vadd.f32 %v6244_v54, %v16676_v52  ;;  %v16926_v32 = vpop.f32.mrb[60].mxu1  ;;  %v5403_v55 = vsel %vm3386_vm2, %v5345_v40, %v5346_v57  ;;  %v5347_v1 = vrot.slane %v16835_v27, 7  ;;  %v5888_v53 = vrot.slane %v16848_v43, 1  ;;  %v19123_v23 = vld [vmem:[#allocation356_spill] sm:$0xff] }
 0x48b   : > { %v5942_v37 = vsel %vm3927_vm3, %v5886_v48, %v5887_v5  ;;  %v16934_v52 = vpop.f32.mrb[61].mxu1  ;;  %9154 = vmatprep.mubr.f32.mxu1 %v6783_v25  ;;  %v6425_v56 = vadd.f32 %v6245_v62, %v16689_v63  ;;  %v5706_v26 = vadd.f32 %v5403_v55, %v16803_v35  ;;  %v7140_v40 = vadd.f32 %v16829_v2, %v16569_v61  ;;  %v19124_v62 = vld [vmem:[#allocation345_spill] sm:$0xff] }
 0x48c   : > { %v6604_v31 = vadd.f32 %v6424_v47, %v16876_v15  ;;  %v5402_v48 = vsel %vm3386_vm2, %v5346_v57, %v5347_v1  ;;  %v5941_v18 = vsel %vm3927_vm3, %v5887_v5, %v5888_v53  ;;  %v7135_v54 = vadd.f32 %v16829_v2, %v16580_v41 }
 0x48d   : > { %v16949_v24 = vmul.f32 %v19123_v23, %v19122_v44  ;;  %v6605_v25 = vadd.f32 %v6425_v56, %v16888_v10  ;;  %v6246_v47 = vadd.f32 %v5942_v37, %v5706_v26  ;;  %v5707_v61 = vadd.f32 %v5402_v48, %v16835_v27  ;;  %7850 = vst [vmem:[%s16153_s14 + $0x178] sm:$0xff] %v7140_v40 }
 0x48e   : > { %v6784_v63 = vmul.f32 %v6604_v31, %v19103_v45  ;;  %7849 = vst [vmem:[%s16153_s14 + $0x170] sm:$0xff] %v7135_v54  ;;  %v5348_v57 = vrot.slane %v16848_v43, 7  ;;  %v5889_v5 = vrot.slane %v16876_v15, 1  ;;  %v16960_v41 = vmul.f32 %v19125_v29, %v19124_v62 }
 0x48f   : > { %v5349_v55 = vrot.slane %v16876_v15, 7  ;;  %v6785_v45 = vmul.f32 %v6605_v25, %v19105_v0  ;;  %v6426_v37 = vadd.f32 %v6246_v47, %v16717_v28  ;;  %v6247_v31 = vadd.f32 %v5941_v18, %v5707_v61  ;;  %v16966_v26 = vpop.f32.mrb[62].mxu1  ;;  %v19128_v47 = vld [vmem:[#allocation293_spill] sm:$0xff] }
 0x490   : > { %9155 = vmatmul.mubr.f32.gmra.mrb[142].mxu1 %v6784_v63  ;;  %v5890_v56 = vrot.slane %v16888_v10, 1  ;;  %v5401_v40 = vsel %vm3386_vm2, %v5347_v1, %v5348_v57  ;;  %v5940_v48 = vsel %vm3927_vm3, %v5888_v53, %v5889_v5  ;;  %v7150_v0 = vadd.f32 %v16829_v2, %v16613_v14  ;;  %v16976_v23 = vpop.f32.mrb[63].mxu1  ;;  %v19127_v14 = vld [vmem:[#allocation282_spill] sm:$0xff] }
 0x491   : > { %v5400_v54 = vsel %vm3386_vm2, %v5348_v57, %v5349_v55  ;;  %19126 = vst [vmem:[#allocation68_spill] sm:$0xff] %v16976_v23  ;;  %9157 = vmatprep.mubr.f32.mxu1 %v6785_v45  ;;  %v6606_v28 = vadd.f32 %v6426_v37, %v16916_v21  ;;  %v6427_v18 = vadd.f32 %v6247_v31, %v16731_v6  ;;  %v5350_v57 = vrot.slane %v16888_v10, 7 }
 0x492   : > { %v5708_v63 = vadd.f32 %v5401_v40, %v16848_v43  ;;  %v5709_v1 = vadd.f32 %v5400_v54, %v16876_v15  ;;  %v5939_v53 = vsel %vm3927_vm3, %v5889_v5, %v5890_v56  ;;  %7852 = vst [vmem:[%s16153_s14 + $0x188] sm:$0xff] %v7150_v0  ;;  %v7145_v25 = vadd.f32 %v16829_v2, %v16621_v59  ;;  %v19129_v40 = vld [vmem:[#allocation215_spill] sm:$0xff]  ;;  %v19130_v54 = vld [vmem:[#allocation300_spill] sm:$0xff] }
 0x493   : > { %v16989_v61 = vmul.f32 %v19128_v47, %v19127_v14  ;;  %v6786_v29 = vmul.f32 %v6606_v28, %v19107_v7  ;;  %v6607_v6 = vadd.f32 %v6427_v18, %v16924_v11  ;;  %v5399_v5 = vsel %vm3386_vm2, %v5349_v55, %v5350_v57 }
 0x494   : > { %v6248_v45 = vadd.f32 %v5940_v48, %v5708_v63  ;;  %v6249_v37 = vadd.f32 %v5939_v53, %v5709_v1  ;;  %v16994_v31 = vpop.f32.mrb[64].mxu1  ;;  %7851 = vst [vmem:[%s16153_s14 + $0x180] sm:$0xff] %v7145_v25  ;;  %v5891_v59 = vrot.slane %v16916_v21, 1  ;;  %v17002_v0 = vmul.f32 %v19130_v54, %v19129_v40 }
 0x495   : > { %v5351_v47 = vrot.slane %v16916_v21, 7  ;;  %v17005_v23 = vpop.f32.mrb[65].mxu1  ;;  %9158 = vmatmul.mubr.f32.gmra.mrb[144].mxu1 %v6786_v29  ;;  %v6787_v7 = vmul.f32 %v6607_v6, %v19109_v30  ;;  %v5710_v55 = vadd.f32 %v5399_v5, %v16888_v10  ;;  %v5892_v1 = vrot.slane %v16924_v11, 1  ;;  %v19131_v29 = vld [vmem:[#allocation45_spill] sm:$0xff] }
 0x496   : > { %v6428_v48 = vadd.f32 %v6248_v45, %v16757_v46  ;;  %v6429_v28 = vadd.f32 %v6249_v37, %v16767_v3  ;;  %v5938_v18 = vsel %vm3927_vm3, %v5890_v56, %v5891_v59  ;;  %v7160_v53 = vadd.f32 %v16829_v2, %v16642_v17  ;;  %v19132_v6 = vld [vmem:[#allocation285_spill] sm:$0xff]  ;;  %v19133_v45 = vld [vmem:[#allocation172_spill] sm:$0xff] }
 0x497   : > { %v5398_v63 = vsel %vm3386_vm2, %v5350_v57, %v5351_v47  ;;  %9160 = vmatprep.mubr.f32.mxu1 %v6787_v7  ;;  %v6250_v3 = vadd.f32 %v5938_v18, %v5710_v55  ;;  %v5937_v56 = vsel %vm3927_vm3, %v5891_v59, %v5892_v1  ;;  %v7155_v57 = vadd.f32 %v16829_v2, %v19131_v29  ;;  %v19134_v18 = vld [vmem:[#allocation350_spill] sm:$0xff] }
 0x498   : > { %v6608_v30 = vadd.f32 %v6428_v48, %v16949_v24  ;;  %v6609_v46 = vadd.f32 %v6429_v28, %v16960_v41  ;;  %v5711_v25 = vadd.f32 %v5398_v63, %v16916_v21  ;;  %7854 = vst [vmem:[%s16153_s14 + $0x198] sm:$0xff] %v7160_v53  ;;  %v17028_v37 = vmul.f32 %v19133_v45, %v19132_v6  ;;  %v19135_v63 = vld [vmem:[#allocation174_spill] sm:$0xff] }
 0x499   : > { %v5352_v17 = vrot.slane %v16924_v11, 7  ;;  %v6430_v7 = vadd.f32 %v6250_v3, %v16790_v20  ;;  %v17034_v28 = vpop.f32.mrb[66].mxu1  ;;  %7853 = vst [vmem:[%s16153_s14 + $0x190] sm:$0xff] %v7155_v57  ;;  %v5893_v55 = vrot.slane %v16949_v24, 1  ;;  %v17042_v53 = vmul.f32 %v19135_v63, %v19134_v18 }
 0x49a   : > { %v6788_v5 = vmul.f32 %v6608_v30, %v19112_v50  ;;  %v6789_v54 = vmul.f32 %v6609_v46, %v19114_v8  ;;  %v6251_v48 = vadd.f32 %v5937_v56, %v5711_v25  ;;  %v5353_v29 = vrot.slane %v16949_v24, 7  ;;  %v17045_v50 = vpop.f32.mrb[67].mxu1 }
 0x49b   : > { %v5397_v59 = vsel %vm3386_vm2, %v5351_v47, %v5352_v17  ;;  %v6610_v20 = vadd.f32 %v6430_v7, %v16989_v61  ;;  %v5894_v47 = vrot.slane %v16960_v41, 1  ;;  %v5936_v46 = vsel %vm3927_vm3, %v5892_v1, %v5893_v55  ;;  %v19137_v7 = vld [vmem:[#allocation361_spill] sm:$0xff] }
 0x49c   : > { %9161 = vmatmul.mubr.f32.gmra.mrb[146].mxu1 %v6788_v5  ;;  %v6431_v8 = vadd.f32 %v6251_v48, %v16803_v35  ;;  %v5712_v30 = vadd.f32 %v5397_v59, %v16924_v11  ;;  %v5396_v3 = vsel %vm3386_vm2, %v5352_v17, %v5353_v29  ;;  %v7170_v25 = vadd.f32 %v16829_v2, %v16681_v22  ;;  %v19136_v17 = vld [vmem:[#allocation221_spill] sm:$0xff] }
 0x49d   : > { %9163 = vmatprep.mubr.f32.mxu1 %v6789_v54  ;;  %v7165_v56 = vadd.f32 %v16829_v2, %v16692_v16  ;;  %v6790_v57 = vmul.f32 %v6610_v20, %v19116_v33  ;;  %v5713_v5 = vadd.f32 %v5396_v3, %v16949_v24  ;;  %v5935_v1 = vsel %vm3927_vm3, %v5893_v55, %v5894_v47  ;;  %v19139_v55 = vld [vmem:[#allocation307_spill] sm:$0xff] }
 0x49e   : > { %v6611_v35 = vadd.f32 %v6431_v8, %v17002_v0  ;;  %v6252_v45 = vadd.f32 %v5936_v46, %v5712_v30  ;;  %v17062_v54 = vpop.f32.mrb[68].mxu1  ;;  %7856 = vst [vmem:[%s16153_s14 + $0x1a8] sm:$0xff] %v7170_v25  ;;  %v17070_v22 = vmul.f32 %v19137_v7, %v19136_v17  ;;  %v5354_v16 = vrot.slane %v16960_v41, 7  ;;  %v19138_v8 = vld [vmem:[#allocation287_spill] sm:$0xff] }
 0x49f   : > { %7855 = vst [vmem:[%s16153_s14 + $0x1a0] sm:$0xff] %v7165_v56  ;;  %v5895_v33 = vrot.slane %v16989_v61, 1  ;;  %v17074_v48 = vpop.f32.mrb[69].mxu1  ;;  %v6253_v20 = vadd.f32 %v5935_v1, %v5713_v5  ;;  %v17080_v30 = vmul.f32 %v19139_v55, %v19138_v8  ;;  %v5355_v25 = vrot.slane %v16989_v61, 7  ;;  %v19140_v5 = vld [vmem:[#allocation291_spill] sm:$0xff]  ;;  %v19141_v1 = vld [vmem:[#allocation234_spill] sm:$0xff] }
 0x4a0   : > { %9164 = vmatmul.mubr.f32.gmra.mrb[148].mxu1 %v6790_v57  ;;  %v6791_v59 = vmul.f32 %v6611_v35, %v19118_v39  ;;  %v6432_v63 = vadd.f32 %v6252_v45, %v16835_v27  ;;  %v5395_v46 = vsel %vm3386_vm2, %v5353_v29, %v5354_v16  ;;  %v5896_v56 = vrot.slane %v17002_v0, 1  ;;  %v19143_v55 = vld [vmem:[#allocation181_spill] sm:$0xff] }
 0x4a1   : > { %v5934_v3 = vsel %vm3927_vm3, %v5894_v47, %v5895_v33  ;;  %v6433_v39 = vadd.f32 %v6253_v20, %v16848_v43  ;;  %v5714_v57 = vadd.f32 %v5395_v46, %v16960_v41  ;;  %v7180_v35 = vadd.f32 %v16829_v2, %v16708_v60 }
 0x4a2   : > { %9166 = vmatprep.mubr.f32.mxu1 %v6791_v59  ;;  %v6612_v27 = vadd.f32 %v6432_v63, %v17028_v37  ;;  %v5394_v29 = vsel %vm3386_vm2, %v5354_v16, %v5355_v25  ;;  %v5933_v47 = vsel %vm3927_vm3, %v5895_v33, %v5896_v56  ;;  %v7175_v45 = vadd.f32 %v16829_v2, %v16720_v19  ;;  %v19142_v19 = vld [vmem:[#allocation354_spill] sm:$0xff] }
 0x4a3   : > { %v17101_v7 = vmul.f32 %v19141_v1, %v19140_v5  ;;  %v6613_v59 = vadd.f32 %v6433_v39, %v17042_v53  ;;  %v6254_v63 = vadd.f32 %v5934_v3, %v5714_v57  ;;  %v5715_v60 = vadd.f32 %v5394_v29, %v16989_v61  ;;  %7858 = vst [vmem:[%s16153_s14 + $0x1b8] sm:$0xff] %v7180_v35  ;;  %v17107_v20 = vpop.f32.mrb[70].mxu1 }
 0x4a4   : > { %v6792_v43 = vmul.f32 %v6612_v27, %v19120_v12  ;;  %7857 = vst [vmem:[%s16153_s14 + $0x1b0] sm:$0xff] %v7175_v45  ;;  %v5356_v16 = vrot.slane %v17002_v0, 7  ;;  %v5897_v33 = vrot.slane %v17028_v37, 1  ;;  %v17114_v46 = vmul.f32 %v19143_v55, %v19142_v19  ;;  %v17117_v12 = vpop.f32.mrb[71].mxu1 }
 0x4a5   : > { %v5357_v1 = vrot.slane %v17028_v37, 7  ;;  %v6793_v3 = vmul.f32 %v6613_v59, %v19122_v44  ;;  %v6434_v27 = vadd.f32 %v6254_v63, %v16876_v15  ;;  %v6255_v39 = vadd.f32 %v5933_v47, %v5715_v60  ;;  %v19146_v60 = vld [vmem:[#allocation365_spill] sm:$0xff] }
 0x4a6   : > { %9167 = vmatmul.mubr.f32.gmra.mrb[150].mxu1 %v6792_v43  ;;  %v5898_v57 = vrot.slane %v17042_v53, 1  ;;  %v5393_v35 = vsel %vm3386_vm2, %v5355_v25, %v5356_v16  ;;  %v5932_v29 = vsel %vm3927_vm3, %v5896_v56, %v5897_v33  ;;  %v7190_v43 = vadd.f32 %v16829_v2, %v16749_v9  ;;  %v19145_v9 = vld [vmem:[#allocation295_spill] sm:$0xff] }
 0x4a7   : > { %v5392_v45 = vsel %vm3386_vm2, %v5356_v16, %v5357_v1  ;;  %9169 = vmatprep.mubr.f32.mxu1 %v6793_v3  ;;  %v6614_v44 = vadd.f32 %v6434_v27, %v17070_v22  ;;  %v6435_v15 = vadd.f32 %v6255_v39, %v16888_v10  ;;  %v5716_v47 = vadd.f32 %v5393_v35, %v17002_v0 }
 0x4a8   : > { %v5717_v59 = vadd.f32 %v5392_v45, %v17028_v37  ;;  %v17134_v25 = vpop.f32.mrb[72].mxu1  ;;  %v5931_v56 = vsel %vm3927_vm3, %v5897_v33, %v5898_v57  ;;  %7860 = vst [vmem:[%s16153_s14 + $0x1c8] sm:$0xff] %v7190_v43  ;;  %v7185_v63 = vadd.f32 %v16829_v2, %v16761_v4  ;;  %v17143_v16 = vmul.f32 %v19146_v60, %v19145_v9  ;;  %v19147_v45 = vld [vmem:[#allocation357_spill] sm:$0xff]  ;;  %v19148_v43 = vld [vmem:[#allocation51_spill] sm:$0xff] }
 0x4a9   : > { %19144 = vst [vmem:[#allocation8_spill] sm:$0xff] %v17134_v25  ;;  %v5358_v55 = vrot.slane %v17042_v53, 7  ;;  %v17146_v10 = vpop.f32.mrb[73].mxu1  ;;  %v6794_v3 = vmul.f32 %v6614_v44, %v19124_v62  ;;  %v6615_v27 = vadd.f32 %v6435_v15, %v17080_v30  ;;  %v6256_v39 = vadd.f32 %v5932_v29, %v5716_v47 }
 0x4aa   : > { %v6257_v35 = vadd.f32 %v5931_v56, %v5717_v59  ;;  %7859 = vst [vmem:[%s16153_s14 + $0x1c0] sm:$0xff] %v7185_v63  ;;  %v5899_v4 = vrot.slane %v17070_v22, 1  ;;  %v17156_v60 = vmul.f32 %v19148_v43, %v19147_v45  ;;  %v5359_v25 = vrot.slane %v17070_v22, 7 }
 0x4ab   : > { %v5391_v33 = vsel %vm3386_vm2, %v5357_v1, %v5358_v55  ;;  %9170 = vmatmul.mubr.f32.gmra.mrb[152].mxu1 %v6794_v3  ;;  %v6795_v62 = vmul.f32 %v6615_v27, %v19127_v14  ;;  %v6436_v44 = vadd.f32 %v6256_v39, %v16916_v21  ;;  %v5900_v59 = vrot.slane %v17080_v30, 1  ;;  %v19149_v27 = vld [vmem:[#allocation359_spill] sm:$0xff] }
 0x4ac   : > { %v6437_v29 = vadd.f32 %v6257_v35, %v16924_v11  ;;  %v5718_v15 = vadd.f32 %v5391_v33, %v17042_v53  ;;  %v5930_v1 = vsel %vm3927_vm3, %v5898_v57, %v5899_v4  ;;  %v5390_v47 = vsel %vm3386_vm2, %v5358_v55, %v5359_v25 }
 0x4ad   : > { %v7200_v56 = vadd.f32 %v16829_v2, %v16780_v38  ;;  %9172 = vmatprep.mubr.f32.mxu1 %v6795_v62  ;;  %v6616_v14 = vadd.f32 %v6436_v44, %v17101_v7  ;;  %v5719_v63 = vadd.f32 %v5390_v47, %v17070_v22  ;;  %v17173_v3 = vpop.f32.mrb[74].mxu1  ;;  %v5929_v57 = vsel %vm3927_vm3, %v5899_v4, %v5900_v59  ;;  %v19150_v38 = vld [vmem:[#allocation57_spill] sm:$0xff] }
 0x4ae   : > { %v6617_v21 = vadd.f32 %v6437_v29, %v17114_v46  ;;  %v6258_v11 = vadd.f32 %v5930_v1, %v5718_v15  ;;  %v7195_v55 = vadd.f32 %v16829_v2, %v16792_v13  ;;  %v17182_v39 = vmul.f32 %v19150_v38, %v19149_v27  ;;  %v17185_v33 = vpop.f32.mrb[75].mxu1  ;;  %v19151_v15 = vld [vmem:[#allocation360_spill] sm:$0xff]  ;;  %v19152_v1 = vld [vmem:[#allocation6_spill] sm:$0xff] }
 0x4af   : > { %7862 = vst [vmem:[%s16153_s14 + $0x1d8] sm:$0xff] %v7200_v56  ;;  %v5360_v35 = vrot.slane %v17080_v30, 7  ;;  %v6796_v43 = vmul.f32 %v6616_v14, %v19129_v40  ;;  %v6259_v29 = vadd.f32 %v5929_v57, %v5719_v63  ;;  %v5901_v13 = vrot.slane %v17101_v7, 1  ;;  %v19153_v57 = vld [vmem:[#allocation78_spill] sm:$0xff] }
 0x4b0   : > { %v6797_v62 = vmul.f32 %v6617_v21, %v19132_v6  ;;  %v6438_v44 = vadd.f32 %v6258_v11, %v16949_v24  ;;  %7861 = vst [vmem:[%s16153_s14 + $0x1d0] sm:$0xff] %v7195_v55  ;;  %v17196_v47 = vmul.f32 %v19152_v1, %v19151_v15  ;;  %v5361_v56 = vrot.slane %v17101_v7, 7 }
 0x4b1   : > { %v5389_v4 = vsel %vm3386_vm2, %v5359_v25, %v5360_v35  ;;  %9173 = vmatmul.mubr.f32.gmra.mrb[154].mxu1 %v6796_v43  ;;  %v6439_v6 = vadd.f32 %v6259_v29, %v16960_v41  ;;  %v5902_v14 = vrot.slane %v17114_v46, 1  ;;  %v5928_v21 = vsel %vm3927_vm3, %v5900_v59, %v5901_v13  ;;  %v19155_v29 = vld [vmem:[#allocation55_spill] sm:$0xff] }
 0x4b2   : > { %v6618_v40 = vadd.f32 %v6438_v44, %v17143_v16  ;;  %v5720_v24 = vadd.f32 %v5389_v4, %v17080_v30  ;;  %v17203_v25 = vpop.f32.mrb[76].mxu1  ;;  %9175 = vmatprep.mubr.f32.mxu1 %v6797_v62  ;;  %v5388_v11 = vsel %vm3386_vm2, %v5360_v35, %v5361_v56  ;;  %v7210_v63 = vadd.f32 %v16829_v2, %v16821_v58  ;;  %v19154_v35 = vld [vmem:[#allocation362_spill] sm:$0xff] }
 0x4b3   : > { %v7205_v41 = vadd.f32 %v16829_v2, %v19153_v57  ;;  %v17213_v55 = vpop.f32.mrb[77].mxu1  ;;  %v6619_v43 = vadd.f32 %v6439_v6, %v17156_v60  ;;  %v5721_v62 = vadd.f32 %v5388_v11, %v17101_v7  ;;  %v5927_v59 = vsel %vm3927_vm3, %v5901_v13, %v5902_v14 }
 0x4b4   : > { %v6798_v38 = vmul.f32 %v6618_v40, %v19134_v18  ;;  %v6260_v44 = vadd.f32 %v5928_v21, %v5720_v24  ;;  %7864 = vst [vmem:[%s16153_s14 + $0x1e8] sm:$0xff] %v7210_v63  ;;  %v17224_v58 = vmul.f32 %v19155_v29, %v19154_v35  ;;  %v5362_v4 = vrot.slane %v17114_v46, 7  ;;  %v19156_v24 = vld [vmem:[#allocation301_spill] sm:$0xff]  ;;  %v19157_v21 = vld [vmem:[#allocation62_spill] sm:$0xff] }
 0x4b5   : > { %7863 = vst [vmem:[%s16153_s14 + $0x1e0] sm:$0xff] %v7205_v41  ;;  %v5903_v1 = vrot.slane %v17143_v16, 1  ;;  %v6799_v18 = vmul.f32 %v6619_v43, %v19136_v17  ;;  %v6261_v6 = vadd.f32 %v5927_v59, %v5721_v62  ;;  %v17232_v11 = vmul.f32 %v19157_v21, %v19156_v24  ;;  %v19158_v59 = vld [vmem:[#allocation364_spill] sm:$0xff]  ;;  %v19159_v29 = vld [vmem:[#allocation53_spill] sm:$0xff] }
 0x4b6   : > { %9176 = vmatmul.mubr.f32.gmra.mrb[156].mxu1 %v6798_v38  ;;  %v6440_v40 = vadd.f32 %v6260_v44, %v16989_v61  ;;  %v5387_v13 = vsel %vm3386_vm2, %v5361_v56, %v5362_v4  ;;  %v5363_v57 = vrot.slane %v17143_v16, 7  ;;  %v5904_v41 = vrot.slane %v17156_v60, 1 }
 0x4b7   : > { %v5926_v63 = vsel %vm3927_vm3, %v5902_v14, %v5903_v1  ;;  %9178 = vmatprep.mubr.f32.mxu1 %v6799_v18  ;;  %v6441_v17 = vadd.f32 %v6261_v6, %v17002_v0  ;;  %v5722_v38 = vadd.f32 %v5387_v13, %v17114_v46  ;;  %v7220_v43 = vadd.f32 %v16829_v2, %v16855_v34  ;;  %v17245_v56 = vpop.f32.mrb[78].mxu1 }
 0x4b8   : > { %v6620_v61 = vadd.f32 %v6440_v40, %v17182_v39  ;;  %v5386_v14 = vsel %vm3386_vm2, %v5362_v4, %v5363_v57  ;;  %v5925_v44 = vsel %vm3927_vm3, %v5903_v1, %v5904_v41  ;;  %v7215_v62 = vadd.f32 %v16829_v2, %v16864_v51  ;;  %v17257_v0 = vpop.f32.mrb[79].mxu1 }
 0x4b9   : > { %v17255_v18 = vmul.f32 %v19159_v29, %v19158_v59  ;;  %v6621_v34 = vadd.f32 %v6441_v17, %v17196_v47  ;;  %v6262_v6 = vadd.f32 %v5926_v63, %v5722_v38  ;;  %v5723_v21 = vadd.f32 %v5386_v14, %v17143_v16  ;;  %7866 = vst [vmem:[%s16153_s14 + $0x1f8] sm:$0xff] %v7220_v43 }
 0x4ba   : > { %v6800_v40 = vmul.f32 %v6620_v61, %v19138_v8  ;;  %7865 = vst [vmem:[%s16153_s14 + $0x1f0] sm:$0xff] %v7215_v62  ;;  %v5364_v4 = vrot.slane %v17156_v60, 7  ;;  %v5905_v1 = vrot.slane %v17182_v39, 1  ;;  %v5365_v51 = vrot.slane %v17182_v39, 7 }
 0x4bb   : > { %v5906_v13 = vrot.slane %v17196_v47, 1  ;;  %v6801_v29 = vmul.f32 %v6621_v34, %v19140_v5  ;;  %v6442_v8 = vadd.f32 %v6262_v6, %v17028_v37  ;;  %v6263_v61 = vadd.f32 %v5925_v44, %v5723_v21 }
 0x4bc   : > { %9179 = vmatmul.mubr.f32.gmra.mrb[158].mxu1 %v6800_v40  ;;  %v7230_v63 = vadd.f32 %v16829_v2, %v16895_v42  ;;  %v17272_v17 = vpop.f32.mrb[80].mxu1  ;;  %v5385_v38 = vsel %vm3386_vm2, %v5363_v57, %v5364_v4  ;;  %v5924_v43 = vsel %vm3927_vm3, %v5904_v41, %v5905_v1  ;;  %v5384_v14 = vsel %vm3386_vm2, %v5364_v4, %v5365_v51 }
 0x4bd   : > { %v5923_v5 = vsel %vm3927_vm3, %v5905_v1, %v5906_v13  ;;  %v17282_v37 = vpop.f32.mrb[81].mxu1  ;;  %9181 = vmatprep.mubr.f32.mxu1 %v6801_v29  ;;  %v6622_v42 = vadd.f32 %v6442_v8, %v17224_v58  ;;  %v6443_v44 = vadd.f32 %v6263_v61, %v17042_v53  ;;  %v5724_v62 = vadd.f32 %v5385_v38, %v17156_v60 }
 0x4be   : > { %v5725_v57 = vadd.f32 %v5384_v14, %v17182_v39  ;;  %7868 = vst [vmem:[%s16153_s14 + $0x208] sm:$0xff] %v7230_v63  ;;  %v7225_v41 = vadd.f32 %v16829_v2, %v16905_v49  ;;  %v5366_v40 = vrot.slane %v17196_v47, 7  ;;  %v5907_v34 = vrot.slane %v17224_v58, 1 }
 0x4bf   : > { %v5367_v6 = vrot.slane %v17224_v58, 7  ;;  %v6802_v21 = vmul.f32 %v6622_v42, %v19142_v19  ;;  %v6623_v4 = vadd.f32 %v6443_v44, %v17232_v11  ;;  %v6264_v1 = vadd.f32 %v5924_v43, %v5724_v62 }
 0x4c0   : > { %v6265_v53 = vadd.f32 %v5923_v5, %v5725_v57  ;;  %7867 = vst [vmem:[%s16153_s14 + $0x200] sm:$0xff] %v7225_v41  ;;  %v5383_v29 = vsel %vm3386_vm2, %v5365_v51, %v5366_v40  ;;  %v5922_v8 = vsel %vm3927_vm3, %v5906_v13, %v5907_v34  ;;  %v5908_v61 = vrot.slane %v17232_v11, 1 }
 0x4c1   : > { %v5382_v49 = vsel %vm3386_vm2, %v5366_v40, %v5367_v6  ;;  %9182 = vmatmul.mubr.f32.gmra.mrb[160].mxu1 %v6802_v21  ;;  %v6803_v63 = vmul.f32 %v6623_v4, %v19145_v9  ;;  %v6444_v19 = vadd.f32 %v6264_v1, %v17070_v22  ;;  %v5726_v43 = vadd.f32 %v5383_v29, %v17196_v47  ;;  %v17308_v51 = vpop.f32.mrb[82].mxu1 }
 0x4c2   : > { %v6445_v38 = vadd.f32 %v6265_v53, %v17080_v30  ;;  %v5727_v13 = vadd.f32 %v5382_v49, %v17224_v58  ;;  %v5921_v14 = vsel %vm3927_vm3, %v5907_v34, %v5908_v61  ;;  %v7240_v5 = vadd.f32 %v16829_v2, %v16926_v32  ;;  %v17317_v42 = vpop.f32.mrb[83].mxu1  ;;  %v19160_v30 = vld [vmem:[#allocation9_spill] sm:$0xff] }
 0x4c3   : > { %v7235_v9 = vadd.f32 %v16829_v2, %v16934_v52  ;;  %9184 = vmatprep.mubr.f32.mxu1 %v6803_v63  ;;  %v6624_v22 = vadd.f32 %v6444_v19, %v17255_v18  ;;  %v6266_v62 = vadd.f32 %v5922_v8, %v5726_v43  ;;  %v5368_v57 = vrot.slane %v17232_v11, 7 }
 0x4c4   : > { %v6625_v44 = vadd.f32 %v6445_v38, %v19160_v30  ;;  %v6267_v41 = vadd.f32 %v5921_v14, %v5727_v13  ;;  %7870 = vst [vmem:[%s16153_s14 + $0x218] sm:$0xff] %v7240_v5  ;;  %v5909_v40 = vrot.slane %v17255_v18, 1  ;;  %v5369_v32 = vrot.slane %v17255_v18, 7  ;;  %v19162_v38 = vld [vmem:[#allocation49_spill] sm:$0xff]  ;;  %v19163_v13 = vld [vmem:[#allocation68_spill] sm:$0xff] }
 0x4c5   : > { %7869 = vst [vmem:[%s16153_s14 + $0x210] sm:$0xff] %v7235_v9  ;;  %v5910_v34 = vrot.slane %v19160_v30, 1  ;;  %v6804_v52 = vmul.f32 %v6624_v22, %v19147_v45  ;;  %v6446_v4 = vadd.f32 %v6266_v62, %v17101_v7  ;;  %v5381_v1 = vsel %vm3386_vm2, %v5367_v6, %v5368_v57  ;;  %v19161_v7 = vld [vmem:[#allocation315_spill] sm:$0xff] }
 0x4c6   : > { %v6805_v21 = vmul.f32 %v6625_v44, %v19149_v27  ;;  %v17332_v53 = vpop.f32.mrb[84].mxu1  ;;  %v6447_v29 = vadd.f32 %v6267_v41, %v17114_v46  ;;  %v5728_v8 = vadd.f32 %v5381_v1, %v17232_v11  ;;  %v5920_v49 = vsel %vm3927_vm3, %v5908_v61, %v5909_v40 }
 0x4c7   : > { %v5380_v45 = vsel %vm3386_vm2, %v5368_v57, %v5369_v32  ;;  %v17340_v63 = vpop.f32.mrb[85].mxu1  ;;  %9185 = vmatmul.mubr.f32.gmra.mrb[162].mxu1 %v6804_v52  ;;  %v6626_v27 = vadd.f32 %v6446_v4, %v19161_v7  ;;  %v5919_v46 = vsel %vm3927_vm3, %v5909_v40, %v5910_v34  ;;  %v7250_v19 = vadd.f32 %v16829_v2, %v16966_v26 }
 0x4c8   : > { %v5729_v6 = vadd.f32 %v5380_v45, %v17255_v18  ;;  %9187 = vmatprep.mubr.f32.mxu1 %v6805_v21  ;;  %v6627_v61 = vadd.f32 %v6447_v29, %v19162_v38  ;;  %v6268_v43 = vadd.f32 %v5920_v49, %v5728_v8  ;;  %v7245_v14 = vadd.f32 %v16829_v2, %v19163_v13 }
 0x4c9   : > { %v5370_v5 = vrot.slane %v19160_v30, 7  ;;  %v6806_v9 = vmul.f32 %v6626_v27, %v19151_v15  ;;  %7872 = vst [vmem:[%s16153_s14 + $0x228] sm:$0xff] %v7250_v19  ;;  %v5911_v44 = vrot.slane %v19161_v7, 1  ;;  %v5371_v62 = vrot.slane %v19161_v7, 7 }
 0x4ca   : > { %v6269_v22 = vadd.f32 %v5919_v46, %v5729_v6  ;;  %v6807_v57 = vmul.f32 %v6627_v61, %v19154_v35  ;;  %v6448_v26 = vadd.f32 %v6268_v43, %v17143_v16  ;;  %7871 = vst [vmem:[%s16153_s14 + $0x220] sm:$0xff] %v7245_v14  ;;  %v5912_v40 = vrot.slane %v19162_v38, 1  ;;  %v19164_v16 = vld [vmem:[#allocation50_spill] sm:$0xff] }
 0x4cb   : > { %v5379_v41 = vsel %vm3386_vm2, %v5369_v32, %v5370_v5  ;;  %9188 = vmatmul.mubr.f32.gmra.mrb[164].mxu1 %v6806_v9  ;;  %v5918_v21 = vsel %vm3927_vm3, %v5910_v34, %v5911_v44  ;;  %v5378_v35 = vsel %vm3386_vm2, %v5370_v5, %v5371_v62  ;;  %v17368_v4 = vpop.f32.mrb[86].mxu1  ;;  %v19165_v34 = vld [vmem:[#allocation43_spill] sm:$0xff]  ;;  %v7255_v45 = vadd.f32 %v16829_v2, %v17005_v23  ;;  %v19166_v9 = vld [vmem:[#allocation58_spill] sm:$0xff] }
 0x4cc   : > { %v6449_v52 = vadd.f32 %v6269_v22, %v17156_v60  ;;  %v5730_v15 = vadd.f32 %v5379_v41, %v19160_v30  ;;  %9190 = vmatprep.mubr.f32.mxu1 %v6807_v57  ;;  %v6628_v1 = vadd.f32 %v6448_v26, %v19164_v16  ;;  %v5731_v32 = vadd.f32 %v5378_v35, %v19161_v7  ;;  %v17376_v29 = vpop.f32.mrb[87].mxu1 }
 0x4cd   : > { %v5917_v60 = vsel %vm3927_vm3, %v5911_v44, %v5912_v40  ;;  %v7260_v30 = vadd.f32 %v16829_v2, %v16994_v31  ;;  %v5372_v27 = vrot.slane %v19162_v38, 7  ;;  %v5913_v7 = vrot.slane %v19164_v16, 1  ;;  %7873 = vst [vmem:[%s16153_s14 + $0x230] sm:$0xff] %v7255_v45 }
 0x4ce   : > { %v6629_v8 = vadd.f32 %v6449_v52, %v19165_v34  ;;  %v6270_v49 = vadd.f32 %v5918_v21, %v5730_v15  ;;  %v6808_v6 = vmul.f32 %v6628_v1, %v19156_v24  ;;  %v6271_v46 = vadd.f32 %v5917_v60, %v5731_v32  ;;  %v19169_v15 = vld [vmem:[#allocation363_spill] sm:$0xff]  ;;  %v19171_v32 = vld [vmem:[#allocation24_spill] sm:$0xff] }
 0x4cf   : > { %7874 = vst [vmem:[%s16153_s14 + $0x238] sm:$0xff] %v7260_v30  ;;  %v5373_v19 = vrot.slane %v19164_v16, 7  ;;  %v5377_v43 = vsel %vm3386_vm2, %v5371_v62, %v5372_v27  ;;  %v5914_v23 = vrot.slane %v19165_v34, 1  ;;  %v5916_v5 = vsel %vm3927_vm3, %v5912_v40, %v5913_v7  ;;  %v19167_v62 = vld [vmem:[#allocation56_spill] sm:$0xff] }
 0x4d0   : > { %v6809_v31 = vmul.f32 %v6629_v8, %v19158_v59  ;;  %v6450_v61 = vadd.f32 %v6270_v49, %v17182_v39  ;;  %v17392_v13 = vpop.f32.mrb[88].mxu1  ;;  %9191 = vmatmul.mubr.f32.gmra.mrb[166].mxu1 %v6808_v6  ;;  %v6451_v24 = vadd.f32 %v6271_v46, %v17196_v47  ;;  %v5732_v14 = vadd.f32 %v5377_v43, %v19162_v38  ;;  %v19175_v43 = vld [vmem:[#allocation25_spill] sm:$0xff] }
 0x4d1   : > { %v5376_v39 = vsel %vm3386_vm2, %v5372_v27, %v5373_v19  ;;  %v17400_v59 = vpop.f32.mrb[89].mxu1  ;;  %v5915_v47 = vsel %vm3927_vm3, %v5913_v7, %v5914_v23  ;;  %v7270_v38 = vadd.f32 %v16829_v2, %v17034_v28  ;;  %v7265_v41 = vadd.f32 %v16829_v2, %v17045_v50  ;;  %v19172_v27 = vld [vmem:[#allocation7_spill] sm:$0xff] }
 0x4d2   : > { %9193 = vmatprep.mubr.f32.mxu1 %v6809_v31  ;;  %v6630_v22 = vadd.f32 %v6450_v61, %v19166_v9  ;;  %v5733_v44 = vadd.f32 %v5376_v39, %v19164_v16  ;;  %v6631_v57 = vadd.f32 %v6451_v24, %v19167_v62  ;;  %v6272_v26 = vadd.f32 %v5916_v5, %v5732_v14 }
 0x4d3   : > { %v19168_v40 = vrot.slane %v19165_v34, 7  ;;  %7876 = vst [vmem:[%s16153_s14 + $0x248] sm:$0xff] %v7270_v38  ;;  %v19170_v28 = vrot.slane %v19166_v9, 1  ;;  %7875 = vst [vmem:[%s16153_s14 + $0x240] sm:$0xff] %v7265_v41  ;;  %v7280_v30 = vadd.f32 %v16829_v2, %v17062_v54  ;;  %v7275_v8 = vadd.f32 %v16829_v2, %v17074_v48  ;;  %v19173_v48 = vld [vmem:[#allocation8_spill] sm:$0xff] }
 0x4d4   : > { %v6810_v21 = vmul.f32 %v6630_v22, %v19169_v15  ;;  %v6273_v35 = vadd.f32 %v5915_v47, %v5733_v44  ;;  %v6811_v50 = vmul.f32 %v6631_v57, %v19171_v32  ;;  %v6452_v60 = vadd.f32 %v6272_v26, %v17224_v58  ;;  %v19178_v22 = vld [vmem:[#allocation27_spill] sm:$0xff] }
 0x4d5   : > { %v5375_v52 = vsel %vm3386_vm2, %v5373_v19, %v19168_v40  ;;  %v6094_v1 = vsel %vm3927_vm3, %v5914_v23, %v19170_v28  ;;  %v7290_v36 = vadd.f32 %v16829_v2, %v17107_v20  ;;  %v7285_v45 = vadd.f32 %v16829_v2, %v17117_v12  ;;  %v9078_v58 = vpop.f32.mrb[90].mxu1  ;;  %7878 = vst [vmem:[%s16153_s14 + $0x258] sm:$0xff] %v7280_v30  ;;  %v19174_v12 = vld [vmem:[#allocation41_spill] sm:$0xff]  ;;  %v19176_v23 = vld [vmem:[#allocation26_spill] sm:$0xff] }
 0x4d6   : > { %v5734_v16 = vadd.f32 %v5375_v52, %v19165_v34  ;;  %9194 = vmatmul.mubr.f32.gmra.mrb[168].mxu1 %v6810_v21  ;;  %v6453_v34 = vadd.f32 %v6273_v35, %v17232_v11  ;;  %v6632_v54 = vadd.f32 %v6452_v60, %v19172_v27  ;;  %7877 = vst [vmem:[%s16153_s14 + $0x250] sm:$0xff] %v7275_v8  ;;  %v7384_v46 = vpop.f32.mrb[91].mxu1 }
 0x4d7   : > { %9196 = vmatprep.mubr.f32.mxu1 %v6811_v50  ;;  %v7300_v11 = vadd.f32 %v16829_v2, %v19173_v48  ;;  %v7295_v6 = vadd.f32 %v16829_v2, %v17146_v10  ;;  %v7310_v20 = vadd.f32 %v16829_v2, %v17173_v3  ;;  %7880 = vst [vmem:[%s16153_s14 + $0x268] sm:$0xff] %v7290_v36  ;;  %7879 = vst [vmem:[%s16153_s14 + $0x260] sm:$0xff] %v7285_v45 }
 0x4d8   : > { %v6274_v49 = vadd.f32 %v6094_v1, %v5734_v16  ;;  %v6633_v7 = vadd.f32 %v6453_v34, %v19174_v12  ;;  %v7305_v31 = vadd.f32 %v16829_v2, %v17185_v33  ;;  %v7320_v61 = vadd.f32 %v16829_v2, %v17203_v25  ;;  %v19177_v25 = vld [vmem:[#allocation39_spill] sm:$0xff] }
 0x4d9   : > { %v6812_v10 = vmul.f32 %v6632_v54, %v19175_v43  ;;  %7882 = vst [vmem:[%s16153_s14 + $0x278] sm:$0xff] %v7300_v11  ;;  %7881 = vst [vmem:[%s16153_s14 + $0x270] sm:$0xff] %v7295_v6  ;;  %v7315_v3 = vadd.f32 %v16829_v2, %v17213_v55  ;;  %v7325_v33 = vadd.f32 %v16829_v2, %v17257_v0 }
 0x4da   : > { %v6454_v19 = vadd.f32 %v6274_v49, %v17255_v18  ;;  %7884 = vst [vmem:[%s16153_s14 + $0x288] sm:$0xff] %v7310_v20  ;;  %v7330_v18 = vadd.f32 %v16829_v2, %v17245_v56  ;;  %v6813_v24 = vmul.f32 %v6633_v7, %v19176_v23  ;;  %7883 = vst [vmem:[%s16153_s14 + $0x280] sm:$0xff] %v7305_v31  ;;  %v9081_v39 = vpop.f32.mrb[92].mxu1 }
 0x4db   : > { %7886 = vst [vmem:[%s16153_s14 + $0x298] sm:$0xff] %v7320_v61  ;;  %v7340_v5 = vadd.f32 %v16829_v2, %v17272_v17  ;;  %v7335_v55 = vadd.f32 %v16829_v2, %v17282_v37  ;;  %9197 = vmatmul.mubr.f32.gmra.mrb[170].mxu1 %v6812_v10  ;;  %7885 = vst [vmem:[%s16153_s14 + $0x290] sm:$0xff] %v7315_v3  ;;  %v7350_v56 = vadd.f32 %v16829_v2, %v17308_v51  ;;  %v7394_v9 = vpop.f32.mrb[93].mxu1 }
 0x4dc   : > { %v6634_v14 = vadd.f32 %v6454_v19, %v19177_v25  ;;  %7888 = vst [vmem:[%s16153_s14 + $0x2a8] sm:$0xff] %v7330_v18  ;;  %7887 = vst [vmem:[%s16153_s14 + $0x2a0] sm:$0xff] %v7325_v33  ;;  %v7345_v0 = vadd.f32 %v16829_v2, %v17317_v42  ;;  %v7360_v17 = vadd.f32 %v16829_v2, %v17332_v53  ;;  %9199 = vmatprep.mubr.f32.mxu1 %v6813_v24 }
 0x4dd   : > { %v7355_v37 = vadd.f32 %v16829_v2, %v17340_v63  ;;  %7890 = vst [vmem:[%s16153_s14 + $0x2b8] sm:$0xff] %v7340_v5  ;;  %7889 = vst [vmem:[%s16153_s14 + $0x2b0] sm:$0xff] %v7335_v55  ;;  %v7370_v51 = vadd.f32 %v16829_v2, %v17368_v4  ;;  %v7365_v42 = vadd.f32 %v16829_v2, %v17376_v29  ;;  %v17500_v29 = vld [vmem:[%s17729_s5] ss:$0 sm:$0xff] }
 0x4de   : > { %v6814_v44 = vmul.f32 %v6634_v14, %v19178_v22  ;;  %v7380_v53 = vadd.f32 %v16829_v2, %v17392_v13  ;;  %7892 = vst [vmem:[%s16153_s14 + $0x2c8] sm:$0xff] %v7350_v56  ;;  %7891 = vst [vmem:[%s16153_s14 + $0x2c0] sm:$0xff] %v7345_v0  ;;  %v7375_v63 = vadd.f32 %v16829_v2, %v17400_v59 }
 0x4df   : > { %7894 = vst [vmem:[%s16153_s14 + $0x2d8] sm:$0xff] %v7360_v17  ;;  %7893 = vst [vmem:[%s16153_s14 + $0x2d0] sm:$0xff] %v7355_v37  ;;  %v7390_v4 = vadd.f32 %v16829_v2, %v9078_v58  ;;  %v7385_v47 = vadd.f32 %v16829_v2, %v7384_v46  ;;  %v7400_v13 = vadd.f32 %v17500_v29, %v9081_v39  ;;  %v9084_v2 = vpop.f32.mrb[94].mxu1 }
 0x4e0   : > { %7896 = vst [vmem:[%s16153_s14 + $0x2e8] sm:$0xff] %v7370_v51  ;;  %7895 = vst [vmem:[%s16153_s14 + $0x2e0] sm:$0xff] %v7365_v42  ;;  %v7395_v38 = vadd.f32 %v17500_v29, %v7394_v9  ;;  %9200 = vmatmul.mubr.f32.gmra.mrb[172].mxu1 %v6814_v44  ;;  %v7410_v59 = vadd.f32 %v17500_v29, %v9084_v2  ;;  %v7404_v62 = vpop.f32.mrb[95].mxu1 }
 0x4e1   : > { %7898 = vst [vmem:[%s16153_s14 + $0x2f8] sm:$0xff] %v7380_v53  ;;  %7897 = vst [vmem:[%s16153_s14 + $0x2f0] sm:$0xff] %v7375_v63  ;;  %v7405_v57 = vadd.f32 %v17500_v29, %v7404_v62 }
 0x4e2   : > { %7900 = vst [vmem:[%s16153_s14 + $0x308] sm:$0xff] %v7390_v4  ;;  %7899 = vst [vmem:[%s16153_s14 + $0x300] sm:$0xff] %v7385_v47 }
 0x4e3   : > { %7902 = vst [vmem:[%s16153_s14 + $0x318] sm:$0xff] %v7400_v13  ;;  %7901 = vst [vmem:[%s16153_s14 + $0x310] sm:$0xff] %v7395_v38 }
 0x4e4   : > { %7904 = vst [vmem:[%s16153_s14 + $0x328] sm:$0xff] %v7410_v59  ;;  %7903 = vst [vmem:[%s16153_s14 + $0x320] sm:$0xff] %v7405_v57  ;;  %v9087_v26 = vpop.f32.mrb[96].mxu1 }
 0x4e5   : > { %v7420_v41 = vadd.f32 %v17500_v29, %v9087_v26  ;;  %v7414_v40 = vpop.f32.mrb[97].mxu1 }
 0x4e6   : > { %v7415_v52 = vadd.f32 %v17500_v29, %v7414_v40 }
 0x4e7   : > { %7906 = vst [vmem:[%s16153_s14 + $0x338] sm:$0xff] %v7420_v41 }
 0x4e8   : > { %7905 = vst [vmem:[%s16153_s14 + $0x330] sm:$0xff] %v7415_v52 }
 0x4e9   : > { %v9090_v15 = vpop.f32.mrb[98].mxu1 }
 0x4ea   : > { %v7430_v21 = vadd.f32 %v17500_v29, %v9090_v15  ;;  %v7424_v35 = vpop.f32.mrb[99].mxu1 }
 0x4eb   : > { %v7425_v16 = vadd.f32 %v17500_v29, %v7424_v35 }
 0x4ec   : > { %7908 = vst [vmem:[%s16153_s14 + $0x348] sm:$0xff] %v7430_v21 }
 0x4ed   : > { %7907 = vst [vmem:[%s16153_s14 + $0x340] sm:$0xff] %v7425_v16 }
 0x4ee   : > { %v9093_v28 = vpop.f32.mrb[100].mxu1 }
 0x4ef   : > { %v7440_v1 = vadd.f32 %v17500_v29, %v9093_v28  ;;  %v7434_v32 = vpop.f32.mrb[101].mxu1 }
 0x4f0   : > { %v7435_v50 = vadd.f32 %v17500_v29, %v7434_v32 }
 0x4f1   : > { %7910 = vst [vmem:[%s16153_s14 + $0x358] sm:$0xff] %v7440_v1 }
 0x4f2   : > { %7909 = vst [vmem:[%s16153_s14 + $0x350] sm:$0xff] %v7435_v50 }
 0x4f3   : > { %v9096_v60 = vpop.f32.mrb[102].mxu1 }
 0x4f4   : > { %v7450_v30 = vadd.f32 %v17500_v29, %v9096_v60  ;;  %v7444_v8 = vpop.f32.mrb[103].mxu1 }
 0x4f5   : > { %v7445_v34 = vadd.f32 %v17500_v29, %v7444_v8 }
 0x4f6   : > { %7912 = vst [vmem:[%s16153_s14 + $0x368] sm:$0xff] %v7450_v30 }
 0x4f7   : > { %7911 = vst [vmem:[%s16153_s14 + $0x360] sm:$0xff] %v7445_v34 }
 0x4f8   : > { %v9099_v49 = vpop.f32.mrb[104].mxu1 }
 0x4f9   : > { %v7460_v36 = vadd.f32 %v17500_v29, %v9099_v49  ;;  %v7454_v45 = vpop.f32.mrb[105].mxu1 }
 0x4fa   : > { %v7455_v58 = vadd.f32 %v17500_v29, %v7454_v45 }
 0x4fb   : > { %7914 = vst [vmem:[%s16153_s14 + $0x378] sm:$0xff] %v7460_v36 }
 0x4fc   : > { %7913 = vst [vmem:[%s16153_s14 + $0x370] sm:$0xff] %v7455_v58 }
 0x4fe   : > { %v9102_v27 = vpop.f32.mrb[106].mxu1 }
 0x4ff   : > { %v7470_v54 = vadd.f32 %v17500_v29, %v9102_v27  ;;  %v7464_v48 = vpop.f32.mrb[107].mxu1 }
 0x500   : > { %v7465_v11 = vadd.f32 %v17500_v29, %v7464_v48 }
 0x501   : > { %7916 = vst [vmem:[%s16153_s14 + $0x388] sm:$0xff] %v7470_v54 }
 0x502   : > { %7915 = vst [vmem:[%s16153_s14 + $0x380] sm:$0xff] %v7465_v11 }
 0x504   : > { %v9105_v6 = vpop.f32.mrb[108].mxu1 }
 0x505   : > { %v7480_v20 = vadd.f32 %v17500_v29, %v9105_v6  ;;  %v7474_v46 = vpop.f32.mrb[109].mxu1 }
 0x506   : > { %v7475_v12 = vadd.f32 %v17500_v29, %v7474_v46 }
 0x507   : > { %7918 = vst [vmem:[%s16153_s14 + $0x398] sm:$0xff] %v7480_v20 }
 0x508   : > { %7917 = vst [vmem:[%s16153_s14 + $0x390] sm:$0xff] %v7475_v12 }
 0x50a   : > { %v9108_v7 = vpop.f32.mrb[110].mxu1 }
 0x50b   : > { %v7490_v19 = vadd.f32 %v17500_v29, %v9108_v7  ;;  %v7484_v31 = vpop.f32.mrb[111].mxu1 }
 0x50c   : > { %v7485_v61 = vadd.f32 %v17500_v29, %v7484_v31 }
 0x50d   : > { %7920 = vst [vmem:[%s16153_s14 + $0x3a8] sm:$0xff] %v7490_v19 }
 0x50e   : > { %7919 = vst [vmem:[%s16153_s14 + $0x3a0] sm:$0xff] %v7485_v61  ;;  %v9111_v43 = vpop.f32.mrb[112].mxu1 }
 0x50f   : > { %v7500_v10 = vadd.f32 %v17500_v29, %v9111_v43  ;;  %v7494_v3 = vpop.f32.mrb[113].mxu1 }
 0x510   : > { %v7495_v18 = vadd.f32 %v17500_v29, %v7494_v3 }
 0x511   : > { %7922 = vst [vmem:[%s16153_s14 + $0x3b8] sm:$0xff] %v7500_v10 }
 0x512   : > { %7921 = vst [vmem:[%s16153_s14 + $0x3b0] sm:$0xff] %v7495_v18 }
 0x514   : > { %v9114_v33 = vpop.f32.mrb[114].mxu1 }
 0x515   : > { %v7510_v23 = vadd.f32 %v17500_v29, %v9114_v33  ;;  %v7504_v24 = vpop.f32.mrb[115].mxu1 }
 0x516   : > { %v7505_v25 = vadd.f32 %v17500_v29, %v7504_v24 }
 0x517   : > { %7924 = vst [vmem:[%s16153_s14 + $0x3c8] sm:$0xff] %v7510_v23 }
 0x518   : > { %7923 = vst [vmem:[%s16153_s14 + $0x3c0] sm:$0xff] %v7505_v25 }
 0x51a   : > { %v9117_v14 = vpop.f32.mrb[116].mxu1 }
 0x51b   : > { %v7520_v5 = vadd.f32 %v17500_v29, %v9117_v14  ;;  %v7514_v55 = vpop.f32.mrb[117].mxu1 }
 0x51c   : > { %v7515_v39 = vadd.f32 %v17500_v29, %v7514_v55 }
 0x51d   : > { %7926 = vst [vmem:[%s16153_s14 + $0x3d8] sm:$0xff] %v7520_v5 }
 0x51e   : > { %7925 = vst [vmem:[%s16153_s14 + $0x3d0] sm:$0xff] %v7515_v39 }
 0x520   : > { %v9120_v56 = vpop.f32.mrb[118].mxu1 }
 0x521   : > { %v7530_v0 = vadd.f32 %v17500_v29, %v9120_v56  ;;  %v7524_v17 = vpop.f32.mrb[119].mxu1 }
 0x522   : > { %v7525_v37 = vadd.f32 %v17500_v29, %v7524_v17 }
 0x523   : > { %7928 = vst [vmem:[%s16153_s14 + $0x3e8] sm:$0xff] %v7530_v0 }
 0x524   : > { %7927 = vst [vmem:[%s16153_s14 + $0x3e0] sm:$0xff] %v7525_v37 }
 0x526   : > { %v9123_v9 = vpop.f32.mrb[120].mxu1 }
 0x527   : > { %v7540_v22 = vadd.f32 %v17500_v29, %v9123_v9  ;;  %v7534_v44 = vpop.f32.mrb[121].mxu1 }
 0x528   : > { %v7535_v51 = vadd.f32 %v17500_v29, %v7534_v44 }
 0x529   : > { %7930 = vst [vmem:[%s16153_s14 + $0x3f8] sm:$0xff] %v7540_v22 }
 0x52a   : > { %7929 = vst [vmem:[%s16153_s14 + $0x3f0] sm:$0xff] %v7535_v51 }
 0x52c   : > { %v9126_v42 = vpop.f32.mrb[122].mxu1 }
 0x52d   : > { %v7550_v53 = vadd.f32 %v17500_v29, %v9126_v42  ;;  %v7544_v63 = vpop.f32.mrb[123].mxu1 }
 0x52e   : > { %v7545_v4 = vadd.f32 %v17500_v29, %v7544_v63 }
 0x52f   : > { %7932 = vst [vmem:[%s16153_s14 + $0x408] sm:$0xff] %v7550_v53 }
 0x530   : > { %7931 = vst [vmem:[%s16153_s14 + $0x400] sm:$0xff] %v7545_v4  ;;  %v9129_v47 = vpop.f32.mrb[124].mxu1 }
 0x531   : > { %v7560_v13 = vadd.f32 %v17500_v29, %v9129_v47  ;;  %v7554_v38 = vpop.f32.mrb[125].mxu1 }
 0x532   : > { %v7555_v2 = vadd.f32 %v17500_v29, %v7554_v38 }
 0x533   : > { %7934 = vst [vmem:[%s16153_s14 + $0x418] sm:$0xff] %v7560_v13 }
 0x534   : > { %7933 = vst [vmem:[%s16153_s14 + $0x410] sm:$0xff] %v7555_v2 }
 0x537   : > { %v9132_v59 = vpop.f32.mrb[126].mxu1 }
 0x538   : > { %v7570_v62 = vadd.f32 %v17500_v29, %v9132_v59  ;;  %v7564_v57 = vpop.f32.mrb[127].mxu1 }
 0x539   : > { %v7565_v26 = vadd.f32 %v17500_v29, %v7564_v57 }
 0x53a   : > { %7936 = vst [vmem:[%s16153_s14 + $0x428] sm:$0xff] %v7570_v62 }
 0x53b   : > { %7935 = vst [vmem:[%s16153_s14 + $0x420] sm:$0xff] %v7565_v26 }
 0x53c   : > { %v9135_v41 = vpop.f32.mrb[128].mxu1 }
 0x53d   : > { %v7580_v40 = vadd.f32 %v17500_v29, %v9135_v41  ;;  %v7574_v52 = vpop.f32.mrb[129].mxu1 }
 0x53e   : > { %v7575_v15 = vadd.f32 %v17500_v29, %v7574_v52 }
 0x53f   : > { %7938 = vst [vmem:[%s16153_s14 + $0x438] sm:$0xff] %v7580_v40 }
 0x540   : > { %7937 = vst [vmem:[%s16153_s14 + $0x430] sm:$0xff] %v7575_v15 }
 0x542   : > { %v9138_v21 = vpop.f32.mrb[130].mxu1 }
 0x543   : > { %v7590_v35 = vadd.f32 %v17500_v29, %v9138_v21  ;;  %v7584_v16 = vpop.f32.mrb[131].mxu1 }
 0x544   : > { %v7585_v28 = vadd.f32 %v17500_v29, %v7584_v16 }
 0x545   : > { %7940 = vst [vmem:[%s16153_s14 + $0x448] sm:$0xff] %v7590_v35 }
 0x546   : > { %7939 = vst [vmem:[%s16153_s14 + $0x440] sm:$0xff] %v7585_v28 }
 0x547   : > { %v9141_v1 = vpop.f32.mrb[132].mxu1 }
 0x548   : > { %v7600_v32 = vadd.f32 %v17500_v29, %v9141_v1  ;;  %v7594_v50 = vpop.f32.mrb[133].mxu1 }
 0x549   : > { %v7595_v60 = vadd.f32 %v17500_v29, %v7594_v50 }
 0x54a   : > { %7942 = vst [vmem:[%s16153_s14 + $0x458] sm:$0xff] %v7600_v32 }
 0x54b   : > { %7941 = vst [vmem:[%s16153_s14 + $0x450] sm:$0xff] %v7595_v60 }
 0x54d   : > { %v9144_v30 = vpop.f32.mrb[134].mxu1 }
 0x54e   : > { %v7610_v8 = vadd.f32 %v17500_v29, %v9144_v30  ;;  %v7604_v34 = vpop.f32.mrb[135].mxu1 }
 0x54f   : > { %v7605_v49 = vadd.f32 %v17500_v29, %v7604_v34 }
 0x550   : > { %7944 = vst [vmem:[%s16153_s14 + $0x468] sm:$0xff] %v7610_v8 }
 0x551   : > { %7943 = vst [vmem:[%s16153_s14 + $0x460] sm:$0xff] %v7605_v49 }
 0x552   : > { %v9147_v36 = vpop.f32.mrb[136].mxu1 }
 0x553   : > { %v7620_v45 = vadd.f32 %v17500_v29, %v9147_v36  ;;  %v7614_v58 = vpop.f32.mrb[137].mxu1 }
 0x554   : > { %v7615_v27 = vadd.f32 %v17500_v29, %v7614_v58 }
 0x555   : > { %7946 = vst [vmem:[%s16153_s14 + $0x478] sm:$0xff] %v7620_v45 }
 0x556   : > { %7945 = vst [vmem:[%s16153_s14 + $0x470] sm:$0xff] %v7615_v27 }
 0x558   : > { %v9150_v54 = vpop.f32.mrb[138].mxu1 }
 0x559   : > { %v7630_v48 = vadd.f32 %v17500_v29, %v9150_v54  ;;  %v7624_v11 = vpop.f32.mrb[139].mxu1 }
 0x55a   : > { %v7625_v6 = vadd.f32 %v17500_v29, %v7624_v11 }
 0x55b   : > { %7948 = vst [vmem:[%s16153_s14 + $0x488] sm:$0xff] %v7630_v48 }
 0x55c   : > { %7947 = vst [vmem:[%s16153_s14 + $0x480] sm:$0xff] %v7625_v6 }
 0x55d   : > { %v9153_v20 = vpop.f32.mrb[140].mxu1 }
 0x55e   : > { %v7640_v46 = vadd.f32 %v17500_v29, %v9153_v20  ;;  %v7634_v12 = vpop.f32.mrb[141].mxu1 }
 0x55f   : > { %v7635_v7 = vadd.f32 %v17500_v29, %v7634_v12 }
 0x560   : > { %7950 = vst [vmem:[%s16153_s14 + $0x498] sm:$0xff] %v7640_v46 }
 0x561   : > { %7949 = vst [vmem:[%s16153_s14 + $0x490] sm:$0xff] %v7635_v7 }
 0x563   : > { %v9156_v19 = vpop.f32.mrb[142].mxu1 }
 0x564   : > { %v7650_v31 = vadd.f32 %v17500_v29, %v9156_v19  ;;  %v7644_v61 = vpop.f32.mrb[143].mxu1 }
 0x565   : > { %v7645_v43 = vadd.f32 %v17500_v29, %v7644_v61 }
 0x566   : > { %7952 = vst [vmem:[%s16153_s14 + $0x4a8] sm:$0xff] %v7650_v31 }
 0x567   : > { %7951 = vst [vmem:[%s16153_s14 + $0x4a0] sm:$0xff] %v7645_v43 }
 0x568   : > { %v9159_v10 = vpop.f32.mrb[144].mxu1 }
 0x569   : > { %v7660_v3 = vadd.f32 %v17500_v29, %v9159_v10  ;;  %v7654_v18 = vpop.f32.mrb[145].mxu1 }
 0x56a   : > { %v7655_v33 = vadd.f32 %v17500_v29, %v7654_v18 }
 0x56b   : > { %7954 = vst [vmem:[%s16153_s14 + $0x4b8] sm:$0xff] %v7660_v3 }
 0x56c   : > { %7953 = vst [vmem:[%s16153_s14 + $0x4b0] sm:$0xff] %v7655_v33 }
 0x56f   : > { %v9162_v23 = vpop.f32.mrb[146].mxu1 }
 0x570   : > { %v7670_v24 = vadd.f32 %v17500_v29, %v9162_v23  ;;  %v7664_v25 = vpop.f32.mrb[147].mxu1 }
 0x571   : > { %v7665_v14 = vadd.f32 %v17500_v29, %v7664_v25 }
 0x572   : > { %7956 = vst [vmem:[%s16153_s14 + $0x4c8] sm:$0xff] %v7670_v24 }
 0x573   : > { %7955 = vst [vmem:[%s16153_s14 + $0x4c0] sm:$0xff] %v7665_v14  ;;  %v9165_v5 = vpop.f32.mrb[148].mxu1 }
 0x574   : > { %v7680_v55 = vadd.f32 %v17500_v29, %v9165_v5  ;;  %v7674_v39 = vpop.f32.mrb[149].mxu1 }
 0x575   : > { %v7675_v56 = vadd.f32 %v17500_v29, %v7674_v39 }
 0x576   : > { %7958 = vst [vmem:[%s16153_s14 + $0x4d8] sm:$0xff] %v7680_v55 }
 0x577   : > { %7957 = vst [vmem:[%s16153_s14 + $0x4d0] sm:$0xff] %v7675_v56 }
 0x579   : > { %v9168_v0 = vpop.f32.mrb[150].mxu1 }
 0x57a   : > { %v7690_v17 = vadd.f32 %v17500_v29, %v9168_v0  ;;  %v7684_v37 = vpop.f32.mrb[151].mxu1 }
 0x57b   : > { %v7685_v9 = vadd.f32 %v17500_v29, %v7684_v37 }
 0x57c   : > { %7960 = vst [vmem:[%s16153_s14 + $0x4e8] sm:$0xff] %v7690_v17 }
 0x57d   : > { %7959 = vst [vmem:[%s16153_s14 + $0x4e0] sm:$0xff] %v7685_v9 }
 0x57e   : > { %v9171_v22 = vpop.f32.mrb[152].mxu1 }
 0x57f   : > { %v7700_v44 = vadd.f32 %v17500_v29, %v9171_v22  ;;  %v7694_v51 = vpop.f32.mrb[153].mxu1 }
 0x580   : > { %v7695_v42 = vadd.f32 %v17500_v29, %v7694_v51 }
 0x581   : > { %7962 = vst [vmem:[%s16153_s14 + $0x4f8] sm:$0xff] %v7700_v44 }
 0x582   : > { %7961 = vst [vmem:[%s16153_s14 + $0x4f0] sm:$0xff] %v7695_v42 }
 0x584   : > { %v9174_v53 = vpop.f32.mrb[154].mxu1 }
 0x585   : > { %v7710_v63 = vadd.f32 %v17500_v29, %v9174_v53  ;;  %v7704_v4 = vpop.f32.mrb[155].mxu1 }
 0x586   : > { %v7705_v47 = vadd.f32 %v17500_v29, %v7704_v4 }
 0x587   : > { %7964 = vst [vmem:[%s16153_s14 + $0x508] sm:$0xff] %v7710_v63 }
 0x588   : > { %7963 = vst [vmem:[%s16153_s14 + $0x500] sm:$0xff] %v7705_v47 }
 0x589   : > { %v9177_v13 = vpop.f32.mrb[156].mxu1 }
 0x58a   : > { %v7720_v38 = vadd.f32 %v17500_v29, %v9177_v13  ;;  %v7714_v2 = vpop.f32.mrb[157].mxu1 }
 0x58b   : > { %v7715_v59 = vadd.f32 %v17500_v29, %v7714_v2 }
 0x58c   : > { %7966 = vst [vmem:[%s16153_s14 + $0x518] sm:$0xff] %v7720_v38 }
 0x58d   : > { %7965 = vst [vmem:[%s16153_s14 + $0x510] sm:$0xff] %v7715_v59 }
 0x58f   : > { %v9180_v62 = vpop.f32.mrb[158].mxu1 }
 0x590   : > { %v7730_v57 = vadd.f32 %v17500_v29, %v9180_v62  ;;  %v7724_v26 = vpop.f32.mrb[159].mxu1 }
 0x591   : > { %v7725_v41 = vadd.f32 %v17500_v29, %v7724_v26 }
 0x592   : > { %7968 = vst [vmem:[%s16153_s14 + $0x528] sm:$0xff] %v7730_v57 }
 0x593   : > { %7967 = vst [vmem:[%s16153_s14 + $0x520] sm:$0xff] %v7725_v41 }
 0x594   : > { %v9183_v40 = vpop.f32.mrb[160].mxu1 }
 0x595   : > { %v7740_v52 = vadd.f32 %v17500_v29, %v9183_v40  ;;  %v7734_v15 = vpop.f32.mrb[161].mxu1 }
 0x596   : > { %v7735_v21 = vadd.f32 %v17500_v29, %v7734_v15 }
 0x597   : > { %7970 = vst [vmem:[%s16153_s14 + $0x538] sm:$0xff] %v7740_v52 }
 0x598   : > { %7969 = vst [vmem:[%s16153_s14 + $0x530] sm:$0xff] %v7735_v21 }
 0x59a   : > { %v9186_v35 = vpop.f32.mrb[162].mxu1 }
 0x59b   : > { %v7750_v16 = vadd.f32 %v17500_v29, %v9186_v35  ;;  %v7744_v28 = vpop.f32.mrb[163].mxu1 }
 0x59c   : > { %v7745_v1 = vadd.f32 %v17500_v29, %v7744_v28 }
 0x59d   : > { %7972 = vst [vmem:[%s16153_s14 + $0x548] sm:$0xff] %v7750_v16 }
 0x59e   : > { %7971 = vst [vmem:[%s16153_s14 + $0x540] sm:$0xff] %v7745_v1  ;;  %v9189_v32 = vpop.f32.mrb[164].mxu1 }
 0x59f   : > { %v7760_v50 = vadd.f32 %v17500_v29, %v9189_v32  ;;  %v7754_v60 = vpop.f32.mrb[165].mxu1 }
 0x5a0   : > { %v7755_v30 = vadd.f32 %v17500_v29, %v7754_v60 }
 0x5a1   : > { %7974 = vst [vmem:[%s16153_s14 + $0x558] sm:$0xff] %v7760_v50 }
 0x5a2   : > { %7973 = vst [vmem:[%s16153_s14 + $0x550] sm:$0xff] %v7755_v30 }
 0x5a3   : > { %v9192_v8 = vpop.f32.mrb[166].mxu1 }
 0x5a4   : > { %v7770_v34 = vadd.f32 %v17500_v29, %v9192_v8  ;;  %v7764_v49 = vpop.f32.mrb[167].mxu1 }
 0x5a5   : > { %v7765_v36 = vadd.f32 %v17500_v29, %v7764_v49 }
 0x5a6   : > { %7976 = vst [vmem:[%s16153_s14 + $0x568] sm:$0xff] %v7770_v34 }
 0x5a7   : > { %7975 = vst [vmem:[%s16153_s14 + $0x560] sm:$0xff] %v7765_v36 }
 0x5a9   : > { %v9195_v45 = vpop.f32.mrb[168].mxu1 }
 0x5aa   : > { %v7780_v58 = vadd.f32 %v17500_v29, %v9195_v45  ;;  %v7774_v27 = vpop.f32.mrb[169].mxu1 }
 0x5ab   : > { %v7775_v54 = vadd.f32 %v17500_v29, %v7774_v27 }
 0x5ac   : > { %7978 = vst [vmem:[%s16153_s14 + $0x578] sm:$0xff] %v7780_v58 }
 0x5ad   : > { %7977 = vst [vmem:[%s16153_s14 + $0x570] sm:$0xff] %v7775_v54 }
 0x5ae   : > { %v9198_v48 = vpop.f32.mrb[170].mxu1 }
 0x5af   : > { %v7790_v11 = vadd.f32 %v17500_v29, %v9198_v48  ;;  %v7784_v6 = vpop.f32.mrb[171].mxu1 }
 0x5b0   : > { %v7785_v20 = vadd.f32 %v17500_v29, %v7784_v6 }
 0x5b1   : > { %7980 = vst [vmem:[%s16153_s14 + $0x588] sm:$0xff] %v7790_v11 }
 0x5b2   : > { %7979 = vst [vmem:[%s16153_s14 + $0x580] sm:$0xff] %v7785_v20 }
 0x5b3   : > { %v9201_v46 = vpop.f32.mrb[172].mxu1 }
 0x5b4   : > { %v7800_v12 = vadd.f32 %v17500_v29, %v9201_v46  ;;  %v7794_v7 = vpop.f32.mrb[173].mxu1 }
 0x5b5   : > { %v7795_v19 = vadd.f32 %v17500_v29, %v7794_v7 }
 0x5b6   : > { %7982 = vst [vmem:[%s16153_s14 + $0x598] sm:$0xff] %v7800_v12 }
 0x5b7   : > { %7981 = vst [vmem:[%s16153_s14 + $0x590] sm:$0xff] %v7795_v19 }
 0x5b8   : > { %9315 = shalt.err (!%p9312_p3)
}
 0x5b9   : > { %s9316_s10 = scalar_lea.hbm %s17674_s28, 23040  ;;  %s9320_s15 = scalar_lea.hbm %s17730_s6, 46080 }
 0x5ba   : > { %p9317_p4 = scmp.ne.s32.totalorder %s17674_s28, %s9316_s10  ;;  %p9321_p9 = scmp.lt.u32.totalorder %s17674_s28, %s17730_s6 }
 0x5bb   : > { %p9322_p10 = scmp.lt.u32.totalorder %s9320_s15, %s9316_s10  ;;  %p9324_p12 = scmp.lt.u32.totalorder %s9316_s10, %s17674_s28 }
 0x5bc   : > { %p9318_p7 = pnand %p9317_p4, %p9443_p5 }
 0x5bd   : > { %p9323_p11 = por %p9322_p10, %p9321_p9 }
 0x5be   : > { %p9319_p8 = pneg %p9318_p7 }
 0x5bf   : > { %p9325_p13 = por %p9324_p12, %p9323_p11 }
 0x5c1   : > { %p9326_p0 = pnand %p9325_p13, %p9319_p8 }
 0x5c3   : > { %9329 = shalt.err (!%p9326_p0)
}
 0x5c4   : > { %s9368_s18 = smov 128   ;;  %s9369_s20 = smov 8  }
 0x5c5   : > { %9251 = dma.vmem_to_hbm [thread:$0]  (%p9443_p5), %s17677_s19, 23040, %s17674_s28, %s17683_s25, %s9368_s18, %s9368_s18, %s9369_s20  }
 0x5c6 PF: > { %p9257_p1 = scmp.ge.s32.totalorder %s9364_s24, 2  ;;  %s8012_s26 = sand.u32 1, %s9352_s21  }
 0x5c7   : > { %s8013_s9 = scalar_lea.sflag [#allocation3], %s8012_s26 }
 0x5c8   : > { %p9254_p2 = pnand %p9257_p1, %p9447_p6 }
 0x5ca   : > { %9347 = dma.done.wait (!%p9254_p2), %s8013_s9, 23040  }
 0x5cb   : > { %9349 = vsyncadd (!%p9254_p2), %s8013_s9, 4294944256  ;;  %p16_p3 = scmp.ge.s32.totalorder %s9430_s27, 4   ;;  %s19179_s21 = smov %s9356_s22 }
 0x5cc   : > { %s19180_s22 = smov %s9360_s23  ;;  %s19181_s23 = smov %s9441_s30 }
 0x5cd   : > { %s19182_s24 = smov %s9430_s27  ;;  %18 = sbr.rel (!%p16_p3) target bundleno = 3 (0x3), region = 79 }
 0x5d4   :  { %8018 = vsyncpa [#allocation3], 1 }
 0x5d5   :  { %8020 = vsyncpa [#allocation3 + $0x1], 1 }

</bundles_post_ra>
